<compile_context>
chip_gen: v7x
topology: tpu7x:2x2x1
jax: 0.10.0
libtpu: 0.0.40
codegen_flags: <defaults>
</compile_context>

<pallas_src>
import numpy as np
import jax
import jax.numpy as jnp
from jax.experimental import pallas as pl
from jax.experimental.pallas import tpu as pltpu

# ------------------------- config (consistent with the module) --------------
VOC = 50            # encoder_emb.num_embeddings == decoder_emb.num_embeddings
VOC_PAD = 128       # lane-dense padding of each decoder's vocab logits
EMB = 16            # embedding_dim
HID = 32            # hid_dim
ENC_LAYERS = 1
DEC_LAYERS = 1
LATENT = 8          # latent_dim
ENC_BI = True
N_DIR = 2 if ENC_BI else 1
HD = HID * N_DIR    # decoder hidden size (64)
B = 2               # n_batch
BP = 8              # batch rows padded to the 8-sublane granule
T_GO = 16           # go:   (n_batch, 16)
T_BARE = 15         # bare: (n_batch, 15)
GW = 128            # per-gate lane width (padded / 128-aligned)
HW_ENC = 128        # fused encoder hidden lanes: [fwd 32 | bwd 32 | pad 64]
HW_DEC = 2 * HD     # fused decoder hidden lanes: [dec 64 | dec_couple 64]

_VMEM = pltpu.MemorySpace.VMEM


# ------------------------------- Pallas kernels ------------------------------
def _encoder_vmf_kernel(x_ref, wihf_ref, wihb_ref, bih_ref, whh_ref, bhh_ref,
                        whead_ref, bhead_ref,
                        miu_ref, kap_ref, miu_c_ref,
                        gxf_scr, gxb_scr):
    """Fused bidirectional-GRU encoder + vMF posterior heads (one invocation).

    Both directions run as ONE block-diagonal recurrence; the backward
    direction reads its input projection at time (T-1-t).  Only the final
    states feed the heads (no hidden-sequence output)."""
    TB = x_ref.shape[0]
    T = TB // BP

    # Input projections for the whole sequence (off the serial chain).
    gxf_scr[...] = (jnp.dot(x_ref[...], wihf_ref[...],
                            preferred_element_type=jnp.float32) + bih_ref[...])
    gxb_scr[...] = jnp.dot(x_ref[...], wihb_ref[...],
                           preferred_element_type=jnp.float32)

    whh = whh_ref[...]
    bhh = bhh_ref[...]
    h = jnp.zeros((BP, HW_ENC), jnp.float32)          # h0 is always zeros
    for t in range(T):                                 # static unroll (T = 15)
        gx = (gxf_scr[pl.ds(t * BP, BP), :]
              + gxb_scr[pl.ds((T - 1 - t) * BP, BP), :])
        gh = jnp.dot(h, whh, preferred_element_type=jnp.float32) + bhh
        # PyTorch GRU gate order r, z, n; each gate in its own 128-lane block.
        r = jax.nn.sigmoid(gx[:, :GW] + gh[:, :GW])
        z = jax.nn.sigmoid(gx[:, GW:2 * GW] + gh[:, GW:2 * GW])
        n = jnp.tanh(gx[:, 2 * GW:] + r * gh[:, 2 * GW:])
        h = (1.0 - z) * n + z * h

    # PosteriorVMF + PosteriorVMFCouple epilogue: one (128, 2L+1) matmul.
    y = (jnp.dot(h, whead_ref[...], preferred_element_type=jnp.float32)
         + bhead_ref[...])
    mu = y[:B, :LATENT]
    mu_c = y[:B, LATENT:2 * LATENT]
    k = y[:B, 2 * LATENT:2 * LATENT + 1]
    miu_ref[...] = mu * jax.lax.rsqrt(
        jnp.sum(mu * mu, axis=-1, keepdims=True) + 1e-12)
    miu_c_ref[...] = mu_c * jax.lax.rsqrt(
        jnp.sum(mu_c * mu_c, axis=-1, keepdims=True) + 1e-12)
    # softplus(kappa) + 1
    kap_ref[...] = jnp.maximum(k, 0.0) + jnp.log1p(jnp.exp(-jnp.abs(k))) + 1.0


def encoder_vmf(x_flat, ep):
    """x_flat: (T_bare*BP, EMB) time-major, batch rows padded to BP."""
    TB = x_flat.shape[0]
    return pl.pallas_call(
        _encoder_vmf_kernel,
        out_shape=(jax.ShapeDtypeStruct((B, LATENT), jnp.float32),
                   jax.ShapeDtypeStruct((B, 1), jnp.float32),
                   jax.ShapeDtypeStruct((B, LATENT), jnp.float32)),
        in_specs=[pl.BlockSpec(memory_space=_VMEM)] * 8,
        out_specs=(pl.BlockSpec(memory_space=_VMEM),) * 3,
        scratch_shapes=[pltpu.VMEM((TB, 3 * GW), jnp.float32),
                        pltpu.VMEM((TB, 3 * GW), jnp.float32)],
    )(x_flat, ep["w_ih_f"], ep["w_ih_b"], ep["b_ih"], ep["w_hh"], ep["b_hh"],
      ep["w_heads"], ep["b_heads"])


def _dual_decoder_kernel(z_ref, w1_ref, b1_ref, w2_ref, b2_ref,
                         wih_init_ref, wih_go_ref, bih_ref, whh_ref, bhh_ref,
                         wout_ref, bout_ref, embgo_ref,
                         init0_ref, init1_ref, logits_ref,
                         gx_scr, hs_scr):
    """Fully fused dual decoder (Decoder + DecoderCouple), one invocation.

    toInit / toInitCouple run as one block-diagonal MLP; both decoders share
    ONE block-diagonal GRU recurrence; the vocab projection for both decoders
    is a single lane-dense (128, 256) matmul."""
    TB = logits_ref.shape[0]
    T = TB // BP

    # toInit / toInitCouple (block-diagonal): Linear -> ReLU -> Linear.
    h1 = jnp.maximum(
        jnp.dot(z_ref[...], w1_ref[...], preferred_element_type=jnp.float32)
        + b1_ref[...], 0.0)
    init = (jnp.dot(h1, w2_ref[...], preferred_element_type=jnp.float32)
            + b2_ref[...])                            # (BP, 2E) = [init0|init1]
    init0_ref[...] = init[:B, :EMB]
    init1_ref[...] = init[:B, EMB:2 * EMB]

    # Input projection for the whole sequence: t=0 uses the init inputs
    # (different per decoder), t>=1 uses the shared go-token embeddings.
    bih = bih_ref[...]
    gx_scr[pl.ds(0, BP), :] = (
        jnp.dot(init, wih_init_ref[...], preferred_element_type=jnp.float32)
        + bih)
    gx_scr[pl.ds(BP, TB - BP), :] = (
        jnp.dot(embgo_ref[...], wih_go_ref[...],
                preferred_element_type=jnp.float32) + bih)

    # GRU recurrence (init_states are zeros, as in the module).
    whh = whh_ref[...]
    bhh = bhh_ref[...]
    h = jnp.zeros((BP, HW_DEC), jnp.float32)
    for t in range(T):                                 # static unroll (T = 16)
        gx = gx_scr[pl.ds(t * BP, BP), :]
        gh = jnp.dot(h, whh, preferred_element_type=jnp.float32) + bhh
        r = jax.nn.sigmoid(gx[:, :GW] + gh[:, :GW])
        z = jax.nn.sigmoid(gx[:, GW:2 * GW] + gh[:, GW:2 * GW])
        n = jnp.tanh(gx[:, 2 * GW:] + r * gh[:, 2 * GW:])
        h = (1.0 - z) * n + z * h
        hs_scr[pl.ds(t * BP, BP), :] = h

    # Vocab projection for both decoders at once; lane-dense 256-wide output.
    logits_ref[...] = (jnp.dot(hs_scr[...], wout_ref[...],
                               preferred_element_type=jnp.float32)
                       + bout_ref[...])


def dual_decoder(z_comb, embgo_flat, dp, T):
    """z_comb: (BP, 2L) = [latent | latent_couple]; embgo_flat: ((T-1)*BP, E).

    Returns init_input (B,E), init_input_couple (B,E) and packed logits
    (T*BP, 2*VOC_PAD) with decoder 0 in lanes [0:128) and decoder 1 in
    lanes [128:256)."""
    TB = T * BP
    return pl.pallas_call(
        _dual_decoder_kernel,
        out_shape=(jax.ShapeDtypeStruct((B, EMB), jnp.float32),
                   jax.ShapeDtypeStruct((B, EMB), jnp.float32),
                   jax.ShapeDtypeStruct((TB, 2 * VOC_PAD), jnp.float32)),
        in_specs=[pl.BlockSpec(memory_space=_VMEM)] * 13,
        out_specs=(pl.BlockSpec(memory_space=_VMEM),) * 3,
        scratch_shapes=[pltpu.VMEM((TB, 3 * GW), jnp.float32),
                        pltpu.VMEM((TB, HW_DEC), jnp.float32)],
    )(z_comb, dp["w1"], dp["b1"], dp["w2"], dp["b2"],
      dp["w_ih_init"], dp["w_ih_go"], dp["b_ih"], dp["w_hh"], dp["b_hh"],
      dp["w_out"], dp["b_out"], embgo_flat)


# ------------------------------- parameters ---------------------------------
def _dense(key, shape, scale=0.1):
    return scale * jax.random.normal(key, shape, dtype=jnp.float32)


def init_params(key):
    ks = iter(jax.random.split(key, 64))
    p = {}
    p["enc_emb"] = _dense(next(ks), (VOC, EMB))
    p["dec_emb"] = _dense(next(ks), (VOC, EMB))

    layer = {}
    for d in ("fwd", "bwd"):                          # bidirectional GRU layer
        layer[d] = {"w_ih": _dense(next(ks), (EMB, 3 * HID)),
                    "b_ih": _dense(next(ks), (3 * HID,)),
                    "w_hh": _dense(next(ks), (HID, 3 * HID)),
                    "b_hh": _dense(next(ks), (3 * HID,))}
    p["encoder"] = [layer]

    D = HID * N_DIR * ENC_LAYERS
    for name in ("post", "post_couple"):              # PosteriorVMF / Couple
        p[name] = {"w_mu": _dense(next(ks), (D, LATENT)),
                   "b_mu": _dense(next(ks), (LATENT,)),
                   "w_k": _dense(next(ks), (D, 1)),
                   "b_k": _dense(next(ks), (1,))}
    for name in ("to_init", "to_init_couple"):        # toInit / toInitCouple
        p[name] = {"w1": _dense(next(ks), (LATENT, EMB)),
                   "b1": _dense(next(ks), (EMB,)),
                   "w2": _dense(next(ks), (EMB, EMB)),
                   "b2": _dense(next(ks), (EMB,))}
    for name in ("decoder", "decoder_couple"):        # Decoder / DecoderCouple
        p[name] = {"w_ih": _dense(next(ks), (EMB, 3 * HD)),
                   "b_ih": _dense(next(ks), (3 * HD,)),
                   "w_hh": _dense(next(ks), (HD, 3 * HD)),
                   "b_hh": _dense(next(ks), (3 * HD,)),
                   "w_out": _dense(next(ks), (HD, VOC)),
                   "b_out": _dense(next(ks), (VOC,))}
    return p


def pack_params(p):
    """Pack per-module weights into the block-diagonal, lane-aligned layouts
    the two fused kernels expect (done once at setup time, in numpy)."""
    assert ENC_LAYERS == 1 and DEC_LAYERS == 1  # TODO(synk): multi-layer not fused
    H = HID

    def npy(x):
        return np.asarray(x, dtype=np.float32)

    # ----- encoder (+ heads): block-diagonal direction fusion ---------------
    fw, bw = p["encoder"][0]["fwd"], p["encoder"][0]["bwd"]
    wih_f = np.zeros((EMB, 3 * GW), np.float32)
    wih_b = np.zeros((EMB, 3 * GW), np.float32)
    bih = np.zeros((1, 3 * GW), np.float32)
    whh = np.zeros((HW_ENC, 3 * GW), np.float32)
    bhh = np.zeros((1, 3 * GW), np.float32)
    for g in range(3):
        c0 = g * GW
        wih_f[:, c0:c0 + H] = npy(fw["w_ih"][:, g * H:(g + 1) * H])
        wih_b[:, c0 + H:c0 + 2 * H] = npy(bw["w_ih"][:, g * H:(g + 1) * H])
        bih[0, c0:c0 + H] = npy(fw["b_ih"][g * H:(g + 1) * H])
        bih[0, c0 + H:c0 + 2 * H] = npy(bw["b_ih"][g * H:(g + 1) * H])
        whh[0:H, c0:c0 + H] = npy(fw["w_hh"][:, g * H:(g + 1) * H])
        whh[H:2 * H, c0 + H:c0 + 2 * H] = npy(bw["w_hh"][:, g * H:(g + 1) * H])
        bhh[0, c0:c0 + H] = npy(fw["b_hh"][g * H:(g + 1) * H])
        bhh[0, c0 + H:c0 + 2 * H] = npy(bw["b_hh"][g * H:(g + 1) * H])
    # heads columns = [miu | miu_couple | kappa]; rows padded 64 -> 128.
    w_heads = np.zeros((HW_ENC, 2 * LATENT + 1), np.float32)
    w_heads[:2 * H, :LATENT] = npy(p["post"]["w_mu"])
    w_heads[:2 * H, LATENT:2 * LATENT] = npy(p["post_couple"]["w_mu"])
    w_heads[:2 * H, 2 * LATENT:] = npy(p["post"]["w_k"])
    b_heads = np.concatenate([npy(p["post"]["b_mu"]),
                              npy(p["post_couple"]["b_mu"]),
                              npy(p["post"]["b_k"])]).reshape(1, -1)
    enc_packed = {k: jnp.asarray(v) for k, v in dict(
        w_ih_f=wih_f, w_ih_b=wih_b, b_ih=bih, w_hh=whh, b_hh=bhh,
        w_heads=w_heads, b_heads=b_heads).items()}

    # ----- dual decoder: block-diagonal decoder fusion ----------------------
    d0, d1 = p["decoder"], p["decoder_couple"]
    i0, i1 = p["to_init"], p["to_init_couple"]
    w1 = np.zeros((2 * LATENT, 2 * EMB), np.float32)
    w1[:LATENT, :EMB] = npy(i0["w1"]); w1[LATENT:, EMB:] = npy(i1["w1"])
    b1 = np.concatenate([npy(i0["b1"]), npy(i1["b1"])]).reshape(1, -1)
    w2 = np.zeros((2 * EMB, 2 * EMB), np.float32)
    w2[:EMB, :EMB] = npy(i0["w2"]); w2[EMB:, EMB:] = npy(i1["w2"])
    b2 = np.concatenate([npy(i0["b2"]), npy(i1["b2"])]).reshape(1, -1)

    wih_init = np.zeros((2 * EMB, 3 * GW), np.float32)
    wih_go = np.zeros((EMB, 3 * GW), np.float32)
    bih_d = np.zeros((1, 3 * GW), np.float32)
    whh_d = np.zeros((HW_DEC, 3 * GW), np.float32)
    bhh_d = np.zeros((1, 3 * GW), np.float32)
    for g in range(3):
        c0 = g * GW
        wih_init[:EMB, c0:c0 + HD] = npy(d0["w_ih"][:, g * HD:(g + 1) * HD])
        wih_init[EMB:, c0 + HD:c0 + 2 * HD] = npy(d1["w_ih"][:, g * HD:(g + 1) * HD])
        wih_go[:, c0:c0 + HD] = npy(d0["w_ih"][:, g * HD:(g + 1) * HD])
        wih_go[:, c0 + HD:c0 + 2 * HD] = npy(d1["w_ih"][:, g * HD:(g + 1) * HD])
        bih_d[0, c0:c0 + HD] = npy(d0["b_ih"][g * HD:(g + 1) * HD])
        bih_d[0, c0 + HD:c0 + 2 * HD] = npy(d1["b_ih"][g * HD:(g + 1) * HD])
        whh_d[:HD, c0:c0 + HD] = npy(d0["w_hh"][:, g * HD:(g + 1) * HD])
        whh_d[HD:, c0 + HD:c0 + 2 * HD] = npy(d1["w_hh"][:, g * HD:(g + 1) * HD])
        bhh_d[0, c0:c0 + HD] = npy(d0["b_hh"][g * HD:(g + 1) * HD])
        bhh_d[0, c0 + HD:c0 + 2 * HD] = npy(d1["b_hh"][g * HD:(g + 1) * HD])
    wout = np.zeros((HW_DEC, 2 * VOC_PAD), np.float32)
    wout[:HD, :VOC] = npy(d0["w_out"])
    wout[HD:, VOC_PAD:VOC_PAD + VOC] = npy(d1["w_out"])
    bout = np.zeros((1, 2 * VOC_PAD), np.float32)
    bout[0, :VOC] = npy(d0["b_out"])
    bout[0, VOC_PAD:VOC_PAD + VOC] = npy(d1["b_out"])
    dec_packed = {k: jnp.asarray(v) for k, v in dict(
        w1=w1, b1=b1, w2=w2, b2=b2, w_ih_init=wih_init, w_ih_go=wih_go,
        b_ih=bih_d, w_hh=whh_d, b_hh=bhh_d, w_out=wout, b_out=bout).items()}

    return {"enc_emb": p["enc_emb"], "dec_emb": p["dec_emb"],
            "enc_packed": enc_packed, "dec_packed": dec_packed}


# ----------------------------- model components ------------------------------
def vmf_rsample(key, loc, scale, n_sample=1, n_rej=16):
    """VonMisesFisher.rsample, m != 3 rejection path, fully vectorized:
    all n_rej proposals are drawn in ONE batched RNG call and the first
    accepted proposal is selected per element."""
    Bb, m = loc.shape
    k_e, k_u, k_v = jax.random.split(key, 3)
    shape = (n_sample, Bb, 1)
    c = jnp.sqrt(4.0 * scale ** 2 + (m - 1) ** 2)
    b_true = (-2.0 * scale + c) / (m - 1)
    b_app = (m - 1) / (4.0 * scale)
    s = jnp.clip(scale - 10.0, 0.0, 1.0)
    b = b_app * s + b_true * (1.0 - s)
    a = (m - 1 + 2.0 * scale + c) / 4.0
    d = 4.0 * a * b / (1.0 + b) - (m - 1) * jnp.log(float(m - 1))
    b_r = jnp.broadcast_to(b, shape)
    a_r = jnp.broadcast_to(a, shape)
    d_r = jnp.broadcast_to(d, shape)

    e_ = jax.random.beta(k_e, (m - 1) / 2.0, (m - 1) / 2.0, (n_rej,) + shape)
    u = jax.random.uniform(k_u, (n_rej,) + shape)
    w_prop = (1.0 - (1.0 + b_r) * e_) / (1.0 - (1.0 - b_r) * e_)
    t = 2.0 * a_r * b_r / (1.0 - (1.0 - b_r) * e_)
    accept = ((m - 1) * jnp.log(t) - t + d_r) > jnp.log(u)
    first = jnp.argmax(accept, axis=0)                 # first accepted index
    # TODO(synk): torch loops until every element accepts; here we cap at
    # n_rej proposals and fall back to the last one (accept prob is O(1)).
    idx = jnp.where(jnp.any(accept, axis=0), first, n_rej - 1)
    w = jnp.take_along_axis(w_prop, idx[None, ...], axis=0)[0]

    v = jax.random.normal(k_v, (n_sample, Bb, m))[..., 1:]
    v = v / jnp.linalg.norm(v, axis=-1, keepdims=True)
    w_comp = jnp.sqrt(jnp.maximum(1.0 - w ** 2, 1e-10))
    x = jnp.concatenate([w, w_comp * v], axis=-1)
    # Householder rotation onto loc
    e1 = jnp.zeros((m,), jnp.float32).at[0].set(1.0)
    u_h = e1 - loc
    u_h = u_h / (jnp.linalg.norm(u_h, axis=-1, keepdims=True) + 1e-5)
    z = x - 2.0 * jnp.sum(x * u_h, axis=-1, keepdims=True) * u_h
    return z                                           # (n_sample, B, m)


def s_vae_couple_forward(params, go, bare, key):
    """Training-mode forward of S_VAE_COUPLE.

    Returns (logits, vmf_dist_params, prior_unif_params, logits_couple,
             init_input, init_input_couple); torch Distribution objects are
    represented by their parameter dicts."""
    Bb, T = go.shape
    Tb = bare.shape[1]
    assert Bb == B and Bb <= BP

    # ---- Encoder + fused posterior heads (one pallas_call) --------------
    # TODO(synk): pack_padded_sequence / variable sent_len not modeled; all
    # sequences are treated as full length.
    # TODO(synk): embedding gathers left to XLA (tiny); could be moved
    # in-kernel via a one-hot matmul if launch overhead dominates further.
    bare_p = jnp.pad(bare, ((0, BP - Bb), (0, 0)))             # (BP, Tb)
    emb = params["enc_emb"][bare_p]                            # (BP, Tb, E)
    x_flat = jnp.transpose(emb, (1, 0, 2)).reshape(Tb * BP, EMB)
    miu, kappa, miu_couple = encoder_vmf(x_flat, params["enc_packed"])

    latent_vector = vmf_rsample(key, miu, kappa, n_sample=1)[0]    # squeeze(0)
    latent_vector_couple = miu_couple          # no_instance=True -> return miu

    # ---- Fused dual decoder (toInit + GRU + vocab head, one pallas_call) ---
    # TODO(synk): Decoder class source not provided in the reference; inferred
    # as teacher-forcing GRU (zero initial hidden) whose first-step input is
    # init_input and later inputs are go-token embeddings, then a vocab head.
    z_comb = jnp.pad(
        jnp.concatenate([latent_vector, latent_vector_couple], axis=-1),
        ((0, BP - Bb), (0, 0)))                                # (BP, 2L)
    go_p = jnp.pad(go[:, :-1], ((0, BP - Bb), (0, 0)))         # (BP, T-1)
    emb_go = params["dec_emb"][go_p]                           # (BP, T-1, E)
    embgo_flat = jnp.transpose(emb_go, (1, 0, 2)).reshape((T - 1) * BP, EMB)
    init_input, init_input_couple, logits_pack = dual_decoder(
        z_comb, embgo_flat, params["dec_packed"], T)

    lg = logits_pack.reshape(T, BP, 2, VOC_PAD)
    logits = jnp.transpose(lg[:, :Bb, 0, :VOC], (1, 0, 2))        # (B, T, VOC)
    logits_couple = jnp.transpose(lg[:, :Bb, 1, :VOC], (1, 0, 2))

    vmf_dist = {"loc": miu, "scale": kappa}            # VonMisesFisher params
    prior_unif = {"dim": LATENT}                       # HypersphericalUniform
    # TODO(synk): eval-mode branch (generate_uniform + Decoder(latent_vector=..))
    # is not implemented (beam-search / latent_vector decode path undefined).
    return (logits, vmf_dist, prior_unif, logits_couple,
            init_input, init_input_couple)


# ----------------------------------- main ------------------------------------
if __name__ == "__main__":
    key = jax.random.PRNGKey(0)
    k_par, k_go, k_bare, k_samp = jax.random.split(key, 4)
    params = pack_params(init_params(k_par))
    go = jax.random.randint(k_go, (B, T_GO), 0, VOC)         # (n_batch, 16)
    bare = jax.random.randint(k_bare, (B, T_BARE), 0, VOC)   # (n_batch, 15)

    fwd = jax.jit(s_vae_couple_forward)
    out = jax.block_until_ready(fwd(params, go, bare, k_samp))

    logits, vmf_dist, prior_unif, logits_couple, init_input, init_input_c = out
    assert logits.shape == (B, T_GO, VOC)
    assert logits_couple.shape == (B, T_GO, VOC)
    assert vmf_dist["loc"].shape == (B, LATENT)
    assert vmf_dist["scale"].shape == (B, 1)
    assert init_input.shape == (B, EMB)
    assert init_input_c.shape == (B, EMB)
    assert bool(jnp.all(jnp.isfinite(logits)))
    assert bool(jnp.all(jnp.isfinite(logits_couple)))
    assert bool(jnp.all(jnp.isfinite(vmf_dist["loc"])))
    print("KERNEL_OK")
</pallas_src>

<mosaic_0001>
module attributes {stable_mosaic.version = 11 : i64} {
  func.func @_encoder_vmf_kernel(%arg0: memref<120x16xf32, #tpu.memory_space<vmem>>, %arg1: memref<16x384xf32, #tpu.memory_space<vmem>>, %arg2: memref<16x384xf32, #tpu.memory_space<vmem>>, %arg3: memref<1x384xf32, #tpu.memory_space<vmem>>, %arg4: memref<128x384xf32, #tpu.memory_space<vmem>>, %arg5: memref<1x384xf32, #tpu.memory_space<vmem>>, %arg6: memref<128x17xf32, #tpu.memory_space<vmem>>, %arg7: memref<1x17xf32, #tpu.memory_space<vmem>>, %arg8: memref<2x8xf32, #tpu.memory_space<vmem>>, %arg9: memref<2x1xf32, #tpu.memory_space<vmem>>, %arg10: memref<2x8xf32, #tpu.memory_space<vmem>>, %arg11: memref<120x384xf32, #tpu.memory_space<vmem>>, %arg12: memref<120x384xf32, #tpu.memory_space<vmem>>) attributes {dimension_semantics = [], scalar_prefetch = 0 : i64, scratch_operands = 2 : i64, tpu.core_type = #tpu.core_type<tc>} {
    %c0 = arith.constant 0 : index
    %c0_0 = arith.constant 0 : index
    %0 = vector.load %arg0[%c0, %c0_0] : memref<120x16xf32, #tpu.memory_space<vmem>>, vector<120x16xf32>
    %c0_1 = arith.constant 0 : index
    %c0_2 = arith.constant 0 : index
    %1 = vector.load %arg1[%c0_1, %c0_2] : memref<16x384xf32, #tpu.memory_space<vmem>>, vector<16x384xf32>
    %cst = arith.constant dense<0.000000e+00> : vector<120x384xf32>
    %2 = tpu.matmul %0, %1, %cst {dimension_numbers = #tpu.dot_dimension_numbers<[1], [0], [0], [1], [0, 0, 1, 1], [], []>} : vector<120x16xf32>, vector<16x384xf32>, vector<120x384xf32> -> vector<120x384xf32>
    %c0_3 = arith.constant 0 : index
    %c0_4 = arith.constant 0 : index
    %3 = vector.load %arg3[%c0_3, %c0_4] : memref<1x384xf32, #tpu.memory_space<vmem>>, vector<1x384xf32>
    %4 = vector.broadcast %3 : vector<1x384xf32> to vector<120x384xf32>
    %5 = arith.addf %2, %4 : vector<120x384xf32>
    %c0_5 = arith.constant 0 : index
    %c0_6 = arith.constant 0 : index
    %6 = vector.load %arg11[%c0_5, %c0_6] : memref<120x384xf32, #tpu.memory_space<vmem>>, vector<120x384xf32>
    tpu.vector_store %arg11[%c0_5, %c0_6], %5 {strides = array<i32>} : memref<120x384xf32, #tpu.memory_space<vmem>>, vector<120x384xf32>,
    %c0_7 = arith.constant 0 : index
    %c0_8 = arith.constant 0 : index
    %7 = vector.load %arg0[%c0_7, %c0_8] : memref<120x16xf32, #tpu.memory_space<vmem>>, vector<120x16xf32>
    %c0_9 = arith.constant 0 : index
    %c0_10 = arith.constant 0 : index
    %8 = vector.load %arg2[%c0_9, %c0_10] : memref<16x384xf32, #tpu.memory_space<vmem>>, vector<16x384xf32>
    %cst_11 = arith.constant dense<0.000000e+00> : vector<120x384xf32>
    %9 = tpu.matmul %7, %8, %cst_11 {dimension_numbers = #tpu.dot_dimension_numbers<[1], [0], [0], [1], [0, 0, 1, 1], [], []>} : vector<120x16xf32>, vector<16x384xf32>, vector<120x384xf32> -> vector<120x384xf32>
    %c0_12 = arith.constant 0 : index
    %c0_13 = arith.constant 0 : index
    %10 = vector.load %arg12[%c0_12, %c0_13] : memref<120x384xf32, #tpu.memory_space<vmem>>, vector<120x384xf32>
    tpu.vector_store %arg12[%c0_12, %c0_13], %9 {strides = array<i32>} : memref<120x384xf32, #tpu.memory_space<vmem>>, vector<120x384xf32>,
    %c0_14 = arith.constant 0 : index
    %c0_15 = arith.constant 0 : index
    %11 = vector.load %arg4[%c0_14, %c0_15] : memref<128x384xf32, #tpu.memory_space<vmem>>, vector<128x384xf32>
    %c0_16 = arith.constant 0 : index
    %c0_17 = arith.constant 0 : index
    %12 = vector.load %arg5[%c0_16, %c0_17] : memref<1x384xf32, #tpu.memory_space<vmem>>, vector<1x384xf32>
    %cst_18 = arith.constant 0.000000e+00 : f32
    %13 = vector.broadcast %cst_18 : f32 to vector<8x128xf32>
    %c0_19 = arith.constant 0 : index
    %c0_20 = arith.constant 0 : index
    %14 = vector.load %arg11[%c0_19, %c0_20] : memref<120x384xf32, #tpu.memory_space<vmem>>, vector<8x384xf32>
    %c112 = arith.constant 112 : index
    %c0_21 = arith.constant 0 : index
    %15 = vector.load %arg12[%c112, %c0_21] : memref<120x384xf32, #tpu.memory_space<vmem>>, vector<8x384xf32>
    %16 = arith.addf %14, %15 : vector<8x384xf32>
    %cst_22 = arith.constant dense<0.000000e+00> : vector<8x384xf32>
    %17 = tpu.matmul %13, %11, %cst_22 {dimension_numbers = #tpu.dot_dimension_numbers<[1], [0], [0], [1], [0, 0, 1, 1], [], []>} : vector<8x128xf32>, vector<128x384xf32>, vector<8x384xf32> -> vector<8x384xf32>
    %18 = vector.broadcast %12 : vector<1x384xf32> to vector<8x384xf32>
    %19 = arith.addf %17, %18 : vector<8x384xf32>
    %20 = vector.extract_strided_slice %16 {offsets = [0, 0], sizes = [8, 128], strides = [1, 1]} : vector<8x384xf32> to vector<8x128xf32>
    %21 = vector.extract_strided_slice %19 {offsets = [0, 0], sizes = [8, 128], strides = [1, 1]} : vector<8x384xf32> to vector<8x128xf32>
    %22 = arith.addf %20, %21 : vector<8x128xf32>
    %23 = arith.negf %22 : vector<8x128xf32>
    %24 = math.exp %23 : vector<8x128xf32>
    %cst_23 = arith.constant 1.000000e+00 : f32
    %25 = vector.broadcast %cst_23 : f32 to vector<8x128xf32>
    %26 = arith.addf %25, %24 : vector<8x128xf32>
    %27 = arith.divf %25, %26 : vector<8x128xf32>
    %28 = vector.extract_strided_slice %16 {offsets = [0, 128], sizes = [8, 128], strides = [1, 1]} : vector<8x384xf32> to vector<8x128xf32>
    %29 = vector.extract_strided_slice %19 {offsets = [0, 128], sizes = [8, 128], strides = [1, 1]} : vector<8x384xf32> to vector<8x128xf32>
    %30 = arith.addf %28, %29 : vector<8x128xf32>
    %31 = arith.negf %30 : vector<8x128xf32>
    %32 = math.exp %31 : vector<8x128xf32>
    %cst_24 = arith.constant 1.000000e+00 : f32
    %33 = vector.broadcast %cst_24 : f32 to vector<8x128xf32>
    %34 = arith.addf %33, %32 : vector<8x128xf32>
    %35 = arith.divf %33, %34 : vector<8x128xf32>
    %36 = vector.extract_strided_slice %16 {offsets = [0, 256], sizes = [8, 128], strides = [1, 1]} : vector<8x384xf32> to vector<8x128xf32>
    %37 = vector.extract_strided_slice %19 {offsets = [0, 256], sizes = [8, 128], strides = [1, 1]} : vector<8x384xf32> to vector<8x128xf32>
    %38 = arith.mulf %27, %37 : vector<8x128xf32>
    %39 = arith.addf %36, %38 : vector<8x128xf32>
    %40 = math.tanh %39 : vector<8x128xf32>
    %cst_25 = arith.constant 1.000000e+00 : f32
    %41 = vector.broadcast %cst_25 : f32 to vector<8x128xf32>
    %42 = arith.subf %41, %35 : vector<8x128xf32>
    %43 = arith.mulf %42, %40 : vector<8x128xf32>
    %44 = arith.mulf %35, %13 : vector<8x128xf32>
    %45 = arith.addf %43, %44 : vector<8x128xf32>
    %c8 = arith.constant 8 : index
    %c0_26 = arith.constant 0 : index
    %46 = vector.load %arg11[%c8, %c0_26] : memref<120x384xf32, #tpu.memory_space<vmem>>, vector<8x384xf32>
    %c104 = arith.constant 104 : index
    %c0_27 = arith.constant 0 : index
    %47 = vector.load %arg12[%c104, %c0_27] : memref<120x384xf32, #tpu.memory_space<vmem>>, vector<8x384xf32>
    %48 = arith.addf %46, %47 : vector<8x384xf32>
    %cst_28 = arith.constant dense<0.000000e+00> : vector<8x384xf32>
    %49 = tpu.matmul %45, %11, %cst_28 {dimension_numbers = #tpu.dot_dimension_numbers<[1], [0], [0], [1], [0, 0, 1, 1], [], []>} : vector<8x128xf32>, vector<128x384xf32>, vector<8x384xf32> -> vector<8x384xf32>
    %50 = vector.broadcast %12 : vector<1x384xf32> to vector<8x384xf32>
    %51 = arith.addf %49, %50 : vector<8x384xf32>
    %52 = vector.extract_strided_slice %48 {offsets = [0, 0], sizes = [8, 128], strides = [1, 1]} : vector<8x384xf32> to vector<8x128xf32>
    %53 = vector.extract_strided_slice %51 {offsets = [0, 0], sizes = [8, 128], strides = [1, 1]} : vector<8x384xf32> to vector<8x128xf32>
    %54 = arith.addf %52, %53 : vector<8x128xf32>
    %55 = arith.negf %54 : vector<8x128xf32>
    %56 = math.exp %55 : vector<8x128xf32>
    %cst_29 = arith.constant 1.000000e+00 : f32
    %57 = vector.broadcast %cst_29 : f32 to vector<8x128xf32>
    %58 = arith.addf %57, %56 : vector<8x128xf32>
    %59 = arith.divf %57, %58 : vector<8x128xf32>
    %60 = vector.extract_strided_slice %48 {offsets = [0, 128], sizes = [8, 128], strides = [1, 1]} : vector<8x384xf32> to vector<8x128xf32>
    %61 = vector.extract_strided_slice %51 {offsets = [0, 128], sizes = [8, 128], strides = [1, 1]} : vector<8x384xf32> to vector<8x128xf32>
    %62 = arith.addf %60, %61 : vector<8x128xf32>
    %63 = arith.negf %62 : vector<8x128xf32>
    %64 = math.exp %63 : vector<8x128xf32>
    %cst_30 = arith.constant 1.000000e+00 : f32
    %65 = vector.broadcast %cst_30 : f32 to vector<8x128xf32>
    %66 = arith.addf %65, %64 : vector<8x128xf32>
    %67 = arith.divf %65, %66 : vector<8x128xf32>
    %68 = vector.extract_strided_slice %48 {offsets = [0, 256], sizes = [8, 128], strides = [1, 1]} : vector<8x384xf32> to vector<8x128xf32>
    %69 = vector.extract_strided_slice %51 {offsets = [0, 256], sizes = [8, 128], strides = [1, 1]} : vector<8x384xf32> to vector<8x128xf32>
    %70 = arith.mulf %59, %69 : vector<8x128xf32>
    %71 = arith.addf %68, %70 : vector<8x128xf32>
    %72 = math.tanh %71 : vector<8x128xf32>
    %cst_31 = arith.constant 1.000000e+00 : f32
    %73 = vector.broadcast %cst_31 : f32 to vector<8x128xf32>
    %74 = arith.subf %73, %67 : vector<8x128xf32>
    %75 = arith.mulf %74, %72 : vector<8x128xf32>
    %76 = arith.mulf %67, %45 : vector<8x128xf32>
    %77 = arith.addf %75, %76 : vector<8x128xf32>
    %c16 = arith.constant 16 : index
    %c0_32 = arith.constant 0 : index
    %78 = vector.load %arg11[%c16, %c0_32] : memref<120x384xf32, #tpu.memory_space<vmem>>, vector<8x384xf32>
    %c96 = arith.constant 96 : index
    %c0_33 = arith.constant 0 : index
    %79 = vector.load %arg12[%c96, %c0_33] : memref<120x384xf32, #tpu.memory_space<vmem>>, vector<8x384xf32>
    %80 = arith.addf %78, %79 : vector<8x384xf32>
    %cst_34 = arith.constant dense<0.000000e+00> : vector<8x384xf32>
    %81 = tpu.matmul %77, %11, %cst_34 {dimension_numbers = #tpu.dot_dimension_numbers<[1], [0], [0], [1], [0, 0, 1, 1], [], []>} : vector<8x128xf32>, vector<128x384xf32>, vector<8x384xf32> -> vector<8x384xf32>
    %82 = vector.broadcast %12 : vector<1x384xf32> to vector<8x384xf32>
    %83 = arith.addf %81, %82 : vector<8x384xf32>
    %84 = vector.extract_strided_slice %80 {offsets = [0, 0], sizes = [8, 128], strides = [1, 1]} : vector<8x384xf32> to vector<8x128xf32>
    %85 = vector.extract_strided_slice %83 {offsets = [0, 0], sizes = [8, 128], strides = [1, 1]} : vector<8x384xf32> to vector<8x128xf32>
    %86 = arith.addf %84, %85 : vector<8x128xf32>
    %87 = arith.negf %86 : vector<8x128xf32>
    %88 = math.exp %87 : vector<8x128xf32>
    %cst_35 = arith.constant 1.000000e+00 : f32
    %89 = vector.broadcast %cst_35 : f32 to vector<8x128xf32>
    %90 = arith.addf %89, %88 : vector<8x128xf32>
    %91 = arith.divf %89, %90 : vector<8x128xf32>
    %92 = vector.extract_strided_slice %80 {offsets = [0, 128], sizes = [8, 128], strides = [1, 1]} : vector<8x384xf32> to vector<8x128xf32>
    %93 = vector.extract_strided_slice %83 {offsets = [0, 128], sizes = [8, 128], strides = [1, 1]} : vector<8x384xf32> to vector<8x128xf32>
    %94 = arith.addf %92, %93 : vector<8x128xf32>
    %95 = arith.negf %94 : vector<8x128xf32>
    %96 = math.exp %95 : vector<8x128xf32>
    %cst_36 = arith.constant 1.000000e+00 : f32
    %97 = vector.broadcast %cst_36 : f32 to vector<8x128xf32>
    %98 = arith.addf %97, %96 : vector<8x128xf32>
    %99 = arith.divf %97, %98 : vector<8x128xf32>
    %100 = vector.extract_strided_slice %80 {offsets = [0, 256], sizes = [8, 128], strides = [1, 1]} : vector<8x384xf32> to vector<8x128xf32>
    %101 = vector.extract_strided_slice %83 {offsets = [0, 256], sizes = [8, 128], strides = [1, 1]} : vector<8x384xf32> to vector<8x128xf32>
    %102 = arith.mulf %91, %101 : vector<8x128xf32>
    %103 = arith.addf %100, %102 : vector<8x128xf32>
    %104 = math.tanh %103 : vector<8x128xf32>
    %cst_37 = arith.constant 1.000000e+00 : f32
    %105 = vector.broadcast %cst_37 : f32 to vector<8x128xf32>
    %106 = arith.subf %105, %99 : vector<8x128xf32>
    %107 = arith.mulf %106, %104 : vector<8x128xf32>
    %108 = arith.mulf %99, %77 : vector<8x128xf32>
    %109 = arith.addf %107, %108 : vector<8x128xf32>
    %c24 = arith.constant 24 : index
    %c0_38 = arith.constant 0 : index
    %110 = vector.load %arg11[%c24, %c0_38] : memref<120x384xf32, #tpu.memory_space<vmem>>, vector<8x384xf32>
    %c88 = arith.constant 88 : index
    %c0_39 = arith.constant 0 : index
    %111 = vector.load %arg12[%c88, %c0_39] : memref<120x384xf32, #tpu.memory_space<vmem>>, vector<8x384xf32>
    %112 = arith.addf %110, %111 : vector<8x384xf32>
    %cst_40 = arith.constant dense<0.000000e+00> : vector<8x384xf32>
    %113 = tpu.matmul %109, %11, %cst_40 {dimension_numbers = #tpu.dot_dimension_numbers<[1], [0], [0], [1], [0, 0, 1, 1], [], []>} : vector<8x128xf32>, vector<128x384xf32>, vector<8x384xf32> -> vector<8x384xf32>
    %114 = vector.broadcast %12 : vector<1x384xf32> to vector<8x384xf32>
    %115 = arith.addf %113, %114 : vector<8x384xf32>
    %116 = vector.extract_strided_slice %112 {offsets = [0, 0], sizes = [8, 128], strides = [1, 1]} : vector<8x384xf32> to vector<8x128xf32>
    %117 = vector.extract_strided_slice %115 {offsets = [0, 0], sizes = [8, 128], strides = [1, 1]} : vector<8x384xf32> to vector<8x128xf32>
    %118 = arith.addf %116, %117 : vector<8x128xf32>
    %119 = arith.negf %118 : vector<8x128xf32>
    %120 = math.exp %119 : vector<8x128xf32>
    %cst_41 = arith.constant 1.000000e+00 : f32
    %121 = vector.broadcast %cst_41 : f32 to vector<8x128xf32>
    %122 = arith.addf %121, %120 : vector<8x128xf32>
    %123 = arith.divf %121, %122 : vector<8x128xf32>
    %124 = vector.extract_strided_slice %112 {offsets = [0, 128], sizes = [8, 128], strides = [1, 1]} : vector<8x384xf32> to vector<8x128xf32>
    %125 = vector.extract_strided_slice %115 {offsets = [0, 128], sizes = [8, 128], strides = [1, 1]} : vector<8x384xf32> to vector<8x128xf32>
    %126 = arith.addf %124, %125 : vector<8x128xf32>
    %127 = arith.negf %126 : vector<8x128xf32>
    %128 = math.exp %127 : vector<8x128xf32>
    %cst_42 = arith.constant 1.000000e+00 : f32
    %129 = vector.broadcast %cst_42 : f32 to vector<8x128xf32>
    %130 = arith.addf %129, %128 : vector<8x128xf32>
    %131 = arith.divf %129, %130 : vector<8x128xf32>
    %132 = vector.extract_strided_slice %112 {offsets = [0, 256], sizes = [8, 128], strides = [1, 1]} : vector<8x384xf32> to vector<8x128xf32>
    %133 = vector.extract_strided_slice %115 {offsets = [0, 256], sizes = [8, 128], strides = [1, 1]} : vector<8x384xf32> to vector<8x128xf32>
    %134 = arith.mulf %123, %133 : vector<8x128xf32>
    %135 = arith.addf %132, %134 : vector<8x128xf32>
    %136 = math.tanh %135 : vector<8x128xf32>
    %cst_43 = arith.constant 1.000000e+00 : f32
    %137 = vector.broadcast %cst_43 : f32 to vector<8x128xf32>
    %138 = arith.subf %137, %131 : vector<8x128xf32>
    %139 = arith.mulf %138, %136 : vector<8x128xf32>
    %140 = arith.mulf %131, %109 : vector<8x128xf32>
    %141 = arith.addf %139, %140 : vector<8x128xf32>
    %c32 = arith.constant 32 : index
    %c0_44 = arith.constant 0 : index
    %142 = vector.load %arg11[%c32, %c0_44] : memref<120x384xf32, #tpu.memory_space<vmem>>, vector<8x384xf32>
    %c80 = arith.constant 80 : index
    %c0_45 = arith.constant 0 : index
    %143 = vector.load %arg12[%c80, %c0_45] : memref<120x384xf32, #tpu.memory_space<vmem>>, vector<8x384xf32>
    %144 = arith.addf %142, %143 : vector<8x384xf32>
    %cst_46 = arith.constant dense<0.000000e+00> : vector<8x384xf32>
    %145 = tpu.matmul %141, %11, %cst_46 {dimension_numbers = #tpu.dot_dimension_numbers<[1], [0], [0], [1], [0, 0, 1, 1], [], []>} : vector<8x128xf32>, vector<128x384xf32>, vector<8x384xf32> -> vector<8x384xf32>
    %146 = vector.broadcast %12 : vector<1x384xf32> to vector<8x384xf32>
    %147 = arith.addf %145, %146 : vector<8x384xf32>
    %148 = vector.extract_strided_slice %144 {offsets = [0, 0], sizes = [8, 128], strides = [1, 1]} : vector<8x384xf32> to vector<8x128xf32>
    %149 = vector.extract_strided_slice %147 {offsets = [0, 0], sizes = [8, 128], strides = [1, 1]} : vector<8x384xf32> to vector<8x128xf32>
    %150 = arith.addf %148, %149 : vector<8x128xf32>
    %151 = arith.negf %150 : vector<8x128xf32>
    %152 = math.exp %151 : vector<8x128xf32>
    %cst_47 = arith.constant 1.000000e+00 : f32
    %153 = vector.broadcast %cst_47 : f32 to vector<8x128xf32>
    %154 = arith.addf %153, %152 : vector<8x128xf32>
    %155 = arith.divf %153, %154 : vector<8x128xf32>
    %156 = vector.extract_strided_slice %144 {offsets = [0, 128], sizes = [8, 128], strides = [1, 1]} : vector<8x384xf32> to vector<8x128xf32>
    %157 = vector.extract_strided_slice %147 {offsets = [0, 128], sizes = [8, 128], strides = [1, 1]} : vector<8x384xf32> to vector<8x128xf32>
    %158 = arith.addf %156, %157 : vector<8x128xf32>
    %159 = arith.negf %158 : vector<8x128xf32>
    %160 = math.exp %159 : vector<8x128xf32>
    %cst_48 = arith.constant 1.000000e+00 : f32
    %161 = vector.broadcast %cst_48 : f32 to vector<8x128xf32>
    %162 = arith.addf %161, %160 : vector<8x128xf32>
    %163 = arith.divf %161, %162 : vector<8x128xf32>
    %164 = vector.extract_strided_slice %144 {offsets = [0, 256], sizes = [8, 128], strides = [1, 1]} : vector<8x384xf32> to vector<8x128xf32>
    %165 = vector.extract_strided_slice %147 {offsets = [0, 256], sizes = [8, 128], strides = [1, 1]} : vector<8x384xf32> to vector<8x128xf32>
    %166 = arith.mulf %155, %165 : vector<8x128xf32>
    %167 = arith.addf %164, %166 : vector<8x128xf32>
    %168 = math.tanh %167 : vector<8x128xf32>
    %cst_49 = arith.constant 1.000000e+00 : f32
    %169 = vector.broadcast %cst_49 : f32 to vector<8x128xf32>
    %170 = arith.subf %169, %163 : vector<8x128xf32>
    %171 = arith.mulf %170, %168 : vector<8x128xf32>
    %172 = arith.mulf %163, %141 : vector<8x128xf32>
    %173 = arith.addf %171, %172 : vector<8x128xf32>
    %c40 = arith.constant 40 : index
    %c0_50 = arith.constant 0 : index
    %174 = vector.load %arg11[%c40, %c0_50] : memref<120x384xf32, #tpu.memory_space<vmem>>, vector<8x384xf32>
    %c72 = arith.constant 72 : index
    %c0_51 = arith.constant 0 : index
    %175 = vector.load %arg12[%c72, %c0_51] : memref<120x384xf32, #tpu.memory_space<vmem>>, vector<8x384xf32>
    %176 = arith.addf %174, %175 : vector<8x384xf32>
    %cst_52 = arith.constant dense<0.000000e+00> : vector<8x384xf32>
    %177 = tpu.matmul %173, %11, %cst_52 {dimension_numbers = #tpu.dot_dimension_numbers<[1], [0], [0], [1], [0, 0, 1, 1], [], []>} : vector<8x128xf32>, vector<128x384xf32>, vector<8x384xf32> -> vector<8x384xf32>
    %178 = vector.broadcast %12 : vector<1x384xf32> to vector<8x384xf32>
    %179 = arith.addf %177, %178 : vector<8x384xf32>
    %180 = vector.extract_strided_slice %176 {offsets = [0, 0], sizes = [8, 128], strides = [1, 1]} : vector<8x384xf32> to vector<8x128xf32>
    %181 = vector.extract_strided_slice %179 {offsets = [0, 0], sizes = [8, 128], strides = [1, 1]} : vector<8x384xf32> to vector<8x128xf32>
    %182 = arith.addf %180, %181 : vector<8x128xf32>
    %183 = arith.negf %182 : vector<8x128xf32>
    %184 = math.exp %183 : vector<8x128xf32>
    %cst_53 = arith.constant 1.000000e+00 : f32
    %185 = vector.broadcast %cst_53 : f32 to vector<8x128xf32>
    %186 = arith.addf %185, %184 : vector<8x128xf32>
    %187 = arith.divf %185, %186 : vector<8x128xf32>
    %188 = vector.extract_strided_slice %176 {offsets = [0, 128], sizes = [8, 128], strides = [1, 1]} : vector<8x384xf32> to vector<8x128xf32>
    %189 = vector.extract_strided_slice %179 {offsets = [0, 128], sizes = [8, 128], strides = [1, 1]} : vector<8x384xf32> to vector<8x128xf32>
    %190 = arith.addf %188, %189 : vector<8x128xf32>
    %191 = arith.negf %190 : vector<8x128xf32>
    %192 = math.exp %191 : vector<8x128xf32>
    %cst_54 = arith.constant 1.000000e+00 : f32
    %193 = vector.broadcast %cst_54 : f32 to vector<8x128xf32>
    %194 = arith.addf %193, %192 : vector<8x128xf32>
    %195 = arith.divf %193, %194 : vector<8x128xf32>
    %196 = vector.extract_strided_slice %176 {offsets = [0, 256], sizes = [8, 128], strides = [1, 1]} : vector<8x384xf32> to vector<8x128xf32>
    %197 = vector.extract_strided_slice %179 {offsets = [0, 256], sizes = [8, 128], strides = [1, 1]} : vector<8x384xf32> to vector<8x128xf32>
    %198 = arith.mulf %187, %197 : vector<8x128xf32>
    %199 = arith.addf %196, %198 : vector<8x128xf32>
    %200 = math.tanh %199 : vector<8x128xf32>
    %cst_55 = arith.constant 1.000000e+00 : f32
    %201 = vector.broadcast %cst_55 : f32 to vector<8x128xf32>
    %202 = arith.subf %201, %195 : vector<8x128xf32>
    %203 = arith.mulf %202, %200 : vector<8x128xf32>
    %204 = arith.mulf %195, %173 : vector<8x128xf32>
    %205 = arith.addf %203, %204 : vector<8x128xf32>
    %c48 = arith.constant 48 : index
    %c0_56 = arith.constant 0 : index
    %206 = vector.load %arg11[%c48, %c0_56] : memref<120x384xf32, #tpu.memory_space<vmem>>, vector<8x384xf32>
    %c64 = arith.constant 64 : index
    %c0_57 = arith.constant 0 : index
    %207 = vector.load %arg12[%c64, %c0_57] : memref<120x384xf32, #tpu.memory_space<vmem>>, vector<8x384xf32>
    %208 = arith.addf %206, %207 : vector<8x384xf32>
    %cst_58 = arith.constant dense<0.000000e+00> : vector<8x384xf32>
    %209 = tpu.matmul %205, %11, %cst_58 {dimension_numbers = #tpu.dot_dimension_numbers<[1], [0], [0], [1], [0, 0, 1, 1], [], []>} : vector<8x128xf32>, vector<128x384xf32>, vector<8x384xf32> -> vector<8x384xf32>
    %210 = vector.broadcast %12 : vector<1x384xf32> to vector<8x384xf32>
    %211 = arith.addf %209, %210 : vector<8x384xf32>
    %212 = vector.extract_strided_slice %208 {offsets = [0, 0], sizes = [8, 128], strides = [1, 1]} : vector<8x384xf32> to vector<8x128xf32>
    %213 = vector.extract_strided_slice %211 {offsets = [0, 0], sizes = [8, 128], strides = [1, 1]} : vector<8x384xf32> to vector<8x128xf32>
    %214 = arith.addf %212, %213 : vector<8x128xf32>
    %215 = arith.negf %214 : vector<8x128xf32>
    %216 = math.exp %215 : vector<8x128xf32>
    %cst_59 = arith.constant 1.000000e+00 : f32
    %217 = vector.broadcast %cst_59 : f32 to vector<8x128xf32>
    %218 = arith.addf %217, %216 : vector<8x128xf32>
    %219 = arith.divf %217, %218 : vector<8x128xf32>
    %220 = vector.extract_strided_slice %208 {offsets = [0, 128], sizes = [8, 128], strides = [1, 1]} : vector<8x384xf32> to vector<8x128xf32>
    %221 = vector.extract_strided_slice %211 {offsets = [0, 128], sizes = [8, 128], strides = [1, 1]} : vector<8x384xf32> to vector<8x128xf32>
    %222 = arith.addf %220, %221 : vector<8x128xf32>
    %223 = arith.negf %222 : vector<8x128xf32>
    %224 = math.exp %223 : vector<8x128xf32>
    %cst_60 = arith.constant 1.000000e+00 : f32
    %225 = vector.broadcast %cst_60 : f32 to vector<8x128xf32>
    %226 = arith.addf %225, %224 : vector<8x128xf32>
    %227 = arith.divf %225, %226 : vector<8x128xf32>
    %228 = vector.extract_strided_slice %208 {offsets = [0, 256], sizes = [8, 128], strides = [1, 1]} : vector<8x384xf32> to vector<8x128xf32>
    %229 = vector.extract_strided_slice %211 {offsets = [0, 256], sizes = [8, 128], strides = [1, 1]} : vector<8x384xf32> to vector<8x128xf32>
    %230 = arith.mulf %219, %229 : vector<8x128xf32>
    %231 = arith.addf %228, %230 : vector<8x128xf32>
    %232 = math.tanh %231 : vector<8x128xf32>
    %cst_61 = arith.constant 1.000000e+00 : f32
    %233 = vector.broadcast %cst_61 : f32 to vector<8x128xf32>
    %234 = arith.subf %233, %227 : vector<8x128xf32>
    %235 = arith.mulf %234, %232 : vector<8x128xf32>
    %236 = arith.mulf %227, %205 : vector<8x128xf32>
    %237 = arith.addf %235, %236 : vector<8x128xf32>
    %c56 = arith.constant 56 : index
    %c0_62 = arith.constant 0 : index
    %238 = vector.load %arg11[%c56, %c0_62] : memref<120x384xf32, #tpu.memory_space<vmem>>, vector<8x384xf32>
    %c56_63 = arith.constant 56 : index
    %c0_64 = arith.constant 0 : index
    %239 = vector.load %arg12[%c56_63, %c0_64] : memref<120x384xf32, #tpu.memory_space<vmem>>, vector<8x384xf32>
    %240 = arith.addf %238, %239 : vector<8x384xf32>
    %cst_65 = arith.constant dense<0.000000e+00> : vector<8x384xf32>
    %241 = tpu.matmul %237, %11, %cst_65 {dimension_numbers = #tpu.dot_dimension_numbers<[1], [0], [0], [1], [0, 0, 1, 1], [], []>} : vector<8x128xf32>, vector<128x384xf32>, vector<8x384xf32> -> vector<8x384xf32>
    %242 = vector.broadcast %12 : vector<1x384xf32> to vector<8x384xf32>
    %243 = arith.addf %241, %242 : vector<8x384xf32>
    %244 = vector.extract_strided_slice %240 {offsets = [0, 0], sizes = [8, 128], strides = [1, 1]} : vector<8x384xf32> to vector<8x128xf32>
    %245 = vector.extract_strided_slice %243 {offsets = [0, 0], sizes = [8, 128], strides = [1, 1]} : vector<8x384xf32> to vector<8x128xf32>
    %246 = arith.addf %244, %245 : vector<8x128xf32>
    %247 = arith.negf %246 : vector<8x128xf32>
    %248 = math.exp %247 : vector<8x128xf32>
    %cst_66 = arith.constant 1.000000e+00 : f32
    %249 = vector.broadcast %cst_66 : f32 to vector<8x128xf32>
    %250 = arith.addf %249, %248 : vector<8x128xf32>
    %251 = arith.divf %249, %250 : vector<8x128xf32>
    %252 = vector.extract_strided_slice %240 {offsets = [0, 128], sizes = [8, 128], strides = [1, 1]} : vector<8x384xf32> to vector<8x128xf32>
    %253 = vector.extract_strided_slice %243 {offsets = [0, 128], sizes = [8, 128], strides = [1, 1]} : vector<8x384xf32> to vector<8x128xf32>
    %254 = arith.addf %252, %253 : vector<8x128xf32>
    %255 = arith.negf %254 : vector<8x128xf32>
    %256 = math.exp %255 : vector<8x128xf32>
    %cst_67 = arith.constant 1.000000e+00 : f32
    %257 = vector.broadcast %cst_67 : f32 to vector<8x128xf32>
    %258 = arith.addf %257, %256 : vector<8x128xf32>
    %259 = arith.divf %257, %258 : vector<8x128xf32>
    %260 = vector.extract_strided_slice %240 {offsets = [0, 256], sizes = [8, 128], strides = [1, 1]} : vector<8x384xf32> to vector<8x128xf32>
    %261 = vector.extract_strided_slice %243 {offsets = [0, 256], sizes = [8, 128], strides = [1, 1]} : vector<8x384xf32> to vector<8x128xf32>
    %262 = arith.mulf %251, %261 : vector<8x128xf32>
    %263 = arith.addf %260, %262 : vector<8x128xf32>
    %264 = math.tanh %263 : vector<8x128xf32>
    %cst_68 = arith.constant 1.000000e+00 : f32
    %265 = vector.broadcast %cst_68 : f32 to vector<8x128xf32>
    %266 = arith.subf %265, %259 : vector<8x128xf32>
    %267 = arith.mulf %266, %264 : vector<8x128xf32>
    %268 = arith.mulf %259, %237 : vector<8x128xf32>
    %269 = arith.addf %267, %268 : vector<8x128xf32>
    %c64_69 = arith.constant 64 : index
    %c0_70 = arith.constant 0 : index
    %270 = vector.load %arg11[%c64_69, %c0_70] : memref<120x384xf32, #tpu.memory_space<vmem>>, vector<8x384xf32>
    %c48_71 = arith.constant 48 : index
    %c0_72 = arith.constant 0 : index
    %271 = vector.load %arg12[%c48_71, %c0_72] : memref<120x384xf32, #tpu.memory_space<vmem>>, vector<8x384xf32>
    %272 = arith.addf %270, %271 : vector<8x384xf32>
    %cst_73 = arith.constant dense<0.000000e+00> : vector<8x384xf32>
    %273 = tpu.matmul %269, %11, %cst_73 {dimension_numbers = #tpu.dot_dimension_numbers<[1], [0], [0], [1], [0, 0, 1, 1], [], []>} : vector<8x128xf32>, vector<128x384xf32>, vector<8x384xf32> -> vector<8x384xf32>
    %274 = vector.broadcast %12 : vector<1x384xf32> to vector<8x384xf32>
    %275 = arith.addf %273, %274 : vector<8x384xf32>
    %276 = vector.extract_strided_slice %272 {offsets = [0, 0], sizes = [8, 128], strides = [1, 1]} : vector<8x384xf32> to vector<8x128xf32>
    %277 = vector.extract_strided_slice %275 {offsets = [0, 0], sizes = [8, 128], strides = [1, 1]} : vector<8x384xf32> to vector<8x128xf32>
    %278 = arith.addf %276, %277 : vector<8x128xf32>
    %279 = arith.negf %278 : vector<8x128xf32>
    %280 = math.exp %279 : vector<8x128xf32>
    %cst_74 = arith.constant 1.000000e+00 : f32
    %281 = vector.broadcast %cst_74 : f32 to vector<8x128xf32>
    %282 = arith.addf %281, %280 : vector<8x128xf32>
    %283 = arith.divf %281, %282 : vector<8x128xf32>
    %284 = vector.extract_strided_slice %272 {offsets = [0, 128], sizes = [8, 128], strides = [1, 1]} : vector<8x384xf32> to vector<8x128xf32>
    %285 = vector.extract_strided_slice %275 {offsets = [0, 128], sizes = [8, 128], strides = [1, 1]} : vector<8x384xf32> to vector<8x128xf32>
    %286 = arith.addf %284, %285 : vector<8x128xf32>
    %287 = arith.negf %286 : vector<8x128xf32>
    %288 = math.exp %287 : vector<8x128xf32>
    %cst_75 = arith.constant 1.000000e+00 : f32
    %289 = vector.broadcast %cst_75 : f32 to vector<8x128xf32>
    %290 = arith.addf %289, %288 : vector<8x128xf32>
    %291 = arith.divf %289, %290 : vector<8x128xf32>
    %292 = vector.extract_strided_slice %272 {offsets = [0, 256], sizes = [8, 128], strides = [1, 1]} : vector<8x384xf32> to vector<8x128xf32>
    %293 = vector.extract_strided_slice %275 {offsets = [0, 256], sizes = [8, 128], strides = [1, 1]} : vector<8x384xf32> to vector<8x128xf32>
    %294 = arith.mulf %283, %293 : vector<8x128xf32>
    %295 = arith.addf %292, %294 : vector<8x128xf32>
    %296 = math.tanh %295 : vector<8x128xf32>
    %cst_76 = arith.constant 1.000000e+00 : f32
    %297 = vector.broadcast %cst_76 : f32 to vector<8x128xf32>
    %298 = arith.subf %297, %291 : vector<8x128xf32>
    %299 = arith.mulf %298, %296 : vector<8x128xf32>
    %300 = arith.mulf %291, %269 : vector<8x128xf32>
    %301 = arith.addf %299, %300 : vector<8x128xf32>
    %c72_77 = arith.constant 72 : index
    %c0_78 = arith.constant 0 : index
    %302 = vector.load %arg11[%c72_77, %c0_78] : memref<120x384xf32, #tpu.memory_space<vmem>>, vector<8x384xf32>
    %c40_79 = arith.constant 40 : index
    %c0_80 = arith.constant 0 : index
    %303 = vector.load %arg12[%c40_79, %c0_80] : memref<120x384xf32, #tpu.memory_space<vmem>>, vector<8x384xf32>
    %304 = arith.addf %302, %303 : vector<8x384xf32>
    %cst_81 = arith.constant dense<0.000000e+00> : vector<8x384xf32>
    %305 = tpu.matmul %301, %11, %cst_81 {dimension_numbers = #tpu.dot_dimension_numbers<[1], [0], [0], [1], [0, 0, 1, 1], [], []>} : vector<8x128xf32>, vector<128x384xf32>, vector<8x384xf32> -> vector<8x384xf32>
    %306 = vector.broadcast %12 : vector<1x384xf32> to vector<8x384xf32>
    %307 = arith.addf %305, %306 : vector<8x384xf32>
    %308 = vector.extract_strided_slice %304 {offsets = [0, 0], sizes = [8, 128], strides = [1, 1]} : vector<8x384xf32> to vector<8x128xf32>
    %309 = vector.extract_strided_slice %307 {offsets = [0, 0], sizes = [8, 128], strides = [1, 1]} : vector<8x384xf32> to vector<8x128xf32>
    %310 = arith.addf %308, %309 : vector<8x128xf32>
    %311 = arith.negf %310 : vector<8x128xf32>
    %312 = math.exp %311 : vector<8x128xf32>
    %cst_82 = arith.constant 1.000000e+00 : f32
    %313 = vector.broadcast %cst_82 : f32 to vector<8x128xf32>
    %314 = arith.addf %313, %312 : vector<8x128xf32>
    %315 = arith.divf %313, %314 : vector<8x128xf32>
    %316 = vector.extract_strided_slice %304 {offsets = [0, 128], sizes = [8, 128], strides = [1, 1]} : vector<8x384xf32> to vector<8x128xf32>
    %317 = vector.extract_strided_slice %307 {offsets = [0, 128], sizes = [8, 128], strides = [1, 1]} : vector<8x384xf32> to vector<8x128xf32>
    %318 = arith.addf %316, %317 : vector<8x128xf32>
    %319 = arith.negf %318 : vector<8x128xf32>
    %320 = math.exp %319 : vector<8x128xf32>
    %cst_83 = arith.constant 1.000000e+00 : f32
    %321 = vector.broadcast %cst_83 : f32 to vector<8x128xf32>
    %322 = arith.addf %321, %320 : vector<8x128xf32>
    %323 = arith.divf %321, %322 : vector<8x128xf32>
    %324 = vector.extract_strided_slice %304 {offsets = [0, 256], sizes = [8, 128], strides = [1, 1]} : vector<8x384xf32> to vector<8x128xf32>
    %325 = vector.extract_strided_slice %307 {offsets = [0, 256], sizes = [8, 128], strides = [1, 1]} : vector<8x384xf32> to vector<8x128xf32>
    %326 = arith.mulf %315, %325 : vector<8x128xf32>
    %327 = arith.addf %324, %326 : vector<8x128xf32>
    %328 = math.tanh %327 : vector<8x128xf32>
    %cst_84 = arith.constant 1.000000e+00 : f32
    %329 = vector.broadcast %cst_84 : f32 to vector<8x128xf32>
    %330 = arith.subf %329, %323 : vector<8x128xf32>
    %331 = arith.mulf %330, %328 : vector<8x128xf32>
    %332 = arith.mulf %323, %301 : vector<8x128xf32>
    %333 = arith.addf %331, %332 : vector<8x128xf32>
    %c80_85 = arith.constant 80 : index
    %c0_86 = arith.constant 0 : index
    %334 = vector.load %arg11[%c80_85, %c0_86] : memref<120x384xf32, #tpu.memory_space<vmem>>, vector<8x384xf32>
    %c32_87 = arith.constant 32 : index
    %c0_88 = arith.constant 0 : index
    %335 = vector.load %arg12[%c32_87, %c0_88] : memref<120x384xf32, #tpu.memory_space<vmem>>, vector<8x384xf32>
    %336 = arith.addf %334, %335 : vector<8x384xf32>
    %cst_89 = arith.constant dense<0.000000e+00> : vector<8x384xf32>
    %337 = tpu.matmul %333, %11, %cst_89 {dimension_numbers = #tpu.dot_dimension_numbers<[1], [0], [0], [1], [0, 0, 1, 1], [], []>} : vector<8x128xf32>, vector<128x384xf32>, vector<8x384xf32> -> vector<8x384xf32>
    %338 = vector.broadcast %12 : vector<1x384xf32> to vector<8x384xf32>
    %339 = arith.addf %337, %338 : vector<8x384xf32>
    %340 = vector.extract_strided_slice %336 {offsets = [0, 0], sizes = [8, 128], strides = [1, 1]} : vector<8x384xf32> to vector<8x128xf32>
    %341 = vector.extract_strided_slice %339 {offsets = [0, 0], sizes = [8, 128], strides = [1, 1]} : vector<8x384xf32> to vector<8x128xf32>
    %342 = arith.addf %340, %341 : vector<8x128xf32>
    %343 = arith.negf %342 : vector<8x128xf32>
    %344 = math.exp %343 : vector<8x128xf32>
    %cst_90 = arith.constant 1.000000e+00 : f32
    %345 = vector.broadcast %cst_90 : f32 to vector<8x128xf32>
    %346 = arith.addf %345, %344 : vector<8x128xf32>
    %347 = arith.divf %345, %346 : vector<8x128xf32>
    %348 = vector.extract_strided_slice %336 {offsets = [0, 128], sizes = [8, 128], strides = [1, 1]} : vector<8x384xf32> to vector<8x128xf32>
    %349 = vector.extract_strided_slice %339 {offsets = [0, 128], sizes = [8, 128], strides = [1, 1]} : vector<8x384xf32> to vector<8x128xf32>
    %350 = arith.addf %348, %349 : vector<8x128xf32>
    %351 = arith.negf %350 : vector<8x128xf32>
    %352 = math.exp %351 : vector<8x128xf32>
    %cst_91 = arith.constant 1.000000e+00 : f32
    %353 = vector.broadcast %cst_91 : f32 to vector<8x128xf32>
    %354 = arith.addf %353, %352 : vector<8x128xf32>
    %355 = arith.divf %353, %354 : vector<8x128xf32>
    %356 = vector.extract_strided_slice %336 {offsets = [0, 256], sizes = [8, 128], strides = [1, 1]} : vector<8x384xf32> to vector<8x128xf32>
    %357 = vector.extract_strided_slice %339 {offsets = [0, 256], sizes = [8, 128], strides = [1, 1]} : vector<8x384xf32> to vector<8x128xf32>
    %358 = arith.mulf %347, %357 : vector<8x128xf32>
    %359 = arith.addf %356, %358 : vector<8x128xf32>
    %360 = math.tanh %359 : vector<8x128xf32>
    %cst_92 = arith.constant 1.000000e+00 : f32
    %361 = vector.broadcast %cst_92 : f32 to vector<8x128xf32>
    %362 = arith.subf %361, %355 : vector<8x128xf32>
    %363 = arith.mulf %362, %360 : vector<8x128xf32>
    %364 = arith.mulf %355, %333 : vector<8x128xf32>
    %365 = arith.addf %363, %364 : vector<8x128xf32>
    %c88_93 = arith.constant 88 : index
    %c0_94 = arith.constant 0 : index
    %366 = vector.load %arg11[%c88_93, %c0_94] : memref<120x384xf32, #tpu.memory_space<vmem>>, vector<8x384xf32>
    %c24_95 = arith.constant 24 : index
    %c0_96 = arith.constant 0 : index
    %367 = vector.load %arg12[%c24_95, %c0_96] : memref<120x384xf32, #tpu.memory_space<vmem>>, vector<8x384xf32>
    %368 = arith.addf %366, %367 : vector<8x384xf32>
    %cst_97 = arith.constant dense<0.000000e+00> : vector<8x384xf32>
    %369 = tpu.matmul %365, %11, %cst_97 {dimension_numbers = #tpu.dot_dimension_numbers<[1], [0], [0], [1], [0, 0, 1, 1], [], []>} : vector<8x128xf32>, vector<128x384xf32>, vector<8x384xf32> -> vector<8x384xf32>
    %370 = vector.broadcast %12 : vector<1x384xf32> to vector<8x384xf32>
    %371 = arith.addf %369, %370 : vector<8x384xf32>
    %372 = vector.extract_strided_slice %368 {offsets = [0, 0], sizes = [8, 128], strides = [1, 1]} : vector<8x384xf32> to vector<8x128xf32>
    %373 = vector.extract_strided_slice %371 {offsets = [0, 0], sizes = [8, 128], strides = [1, 1]} : vector<8x384xf32> to vector<8x128xf32>
    %374 = arith.addf %372, %373 : vector<8x128xf32>
    %375 = arith.negf %374 : vector<8x128xf32>
    %376 = math.exp %375 : vector<8x128xf32>
    %cst_98 = arith.constant 1.000000e+00 : f32
    %377 = vector.broadcast %cst_98 : f32 to vector<8x128xf32>
    %378 = arith.addf %377, %376 : vector<8x128xf32>
    %379 = arith.divf %377, %378 : vector<8x128xf32>
    %380 = vector.extract_strided_slice %368 {offsets = [0, 128], sizes = [8, 128], strides = [1, 1]} : vector<8x384xf32> to vector<8x128xf32>
    %381 = vector.extract_strided_slice %371 {offsets = [0, 128], sizes = [8, 128], strides = [1, 1]} : vector<8x384xf32> to vector<8x128xf32>
    %382 = arith.addf %380, %381 : vector<8x128xf32>
    %383 = arith.negf %382 : vector<8x128xf32>
    %384 = math.exp %383 : vector<8x128xf32>
    %cst_99 = arith.constant 1.000000e+00 : f32
    %385 = vector.broadcast %cst_99 : f32 to vector<8x128xf32>
    %386 = arith.addf %385, %384 : vector<8x128xf32>
    %387 = arith.divf %385, %386 : vector<8x128xf32>
    %388 = vector.extract_strided_slice %368 {offsets = [0, 256], sizes = [8, 128], strides = [1, 1]} : vector<8x384xf32> to vector<8x128xf32>
    %389 = vector.extract_strided_slice %371 {offsets = [0, 256], sizes = [8, 128], strides = [1, 1]} : vector<8x384xf32> to vector<8x128xf32>
    %390 = arith.mulf %379, %389 : vector<8x128xf32>
    %391 = arith.addf %388, %390 : vector<8x128xf32>
    %392 = math.tanh %391 : vector<8x128xf32>
    %cst_100 = arith.constant 1.000000e+00 : f32
    %393 = vector.broadcast %cst_100 : f32 to vector<8x128xf32>
    %394 = arith.subf %393, %387 : vector<8x128xf32>
    %395 = arith.mulf %394, %392 : vector<8x128xf32>
    %396 = arith.mulf %387, %365 : vector<8x128xf32>
    %397 = arith.addf %395, %396 : vector<8x128xf32>
    %c96_101 = arith.constant 96 : index
    %c0_102 = arith.constant 0 : index
    %398 = vector.load %arg11[%c96_101, %c0_102] : memref<120x384xf32, #tpu.memory_space<vmem>>, vector<8x384xf32>
    %c16_103 = arith.constant 16 : index
    %c0_104 = arith.constant 0 : index
    %399 = vector.load %arg12[%c16_103, %c0_104] : memref<120x384xf32, #tpu.memory_space<vmem>>, vector<8x384xf32>
    %400 = arith.addf %398, %399 : vector<8x384xf32>
    %cst_105 = arith.constant dense<0.000000e+00> : vector<8x384xf32>
    %401 = tpu.matmul %397, %11, %cst_105 {dimension_numbers = #tpu.dot_dimension_numbers<[1], [0], [0], [1], [0, 0, 1, 1], [], []>} : vector<8x128xf32>, vector<128x384xf32>, vector<8x384xf32> -> vector<8x384xf32>
    %402 = vector.broadcast %12 : vector<1x384xf32> to vector<8x384xf32>
    %403 = arith.addf %401, %402 : vector<8x384xf32>
    %404 = vector.extract_strided_slice %400 {offsets = [0, 0], sizes = [8, 128], strides = [1, 1]} : vector<8x384xf32> to vector<8x128xf32>
    %405 = vector.extract_strided_slice %403 {offsets = [0, 0], sizes = [8, 128], strides = [1, 1]} : vector<8x384xf32> to vector<8x128xf32>
    %406 = arith.addf %404, %405 : vector<8x128xf32>
    %407 = arith.negf %406 : vector<8x128xf32>
    %408 = math.exp %407 : vector<8x128xf32>
    %cst_106 = arith.constant 1.000000e+00 : f32
    %409 = vector.broadcast %cst_106 : f32 to vector<8x128xf32>
    %410 = arith.addf %409, %408 : vector<8x128xf32>
    %411 = arith.divf %409, %410 : vector<8x128xf32>
    %412 = vector.extract_strided_slice %400 {offsets = [0, 128], sizes = [8, 128], strides = [1, 1]} : vector<8x384xf32> to vector<8x128xf32>
    %413 = vector.extract_strided_slice %403 {offsets = [0, 128], sizes = [8, 128], strides = [1, 1]} : vector<8x384xf32> to vector<8x128xf32>
    %414 = arith.addf %412, %413 : vector<8x128xf32>
    %415 = arith.negf %414 : vector<8x128xf32>
    %416 = math.exp %415 : vector<8x128xf32>
    %cst_107 = arith.constant 1.000000e+00 : f32
    %417 = vector.broadcast %cst_107 : f32 to vector<8x128xf32>
    %418 = arith.addf %417, %416 : vector<8x128xf32>
    %419 = arith.divf %417, %418 : vector<8x128xf32>
    %420 = vector.extract_strided_slice %400 {offsets = [0, 256], sizes = [8, 128], strides = [1, 1]} : vector<8x384xf32> to vector<8x128xf32>
    %421 = vector.extract_strided_slice %403 {offsets = [0, 256], sizes = [8, 128], strides = [1, 1]} : vector<8x384xf32> to vector<8x128xf32>
    %422 = arith.mulf %411, %421 : vector<8x128xf32>
    %423 = arith.addf %420, %422 : vector<8x128xf32>
    %424 = math.tanh %423 : vector<8x128xf32>
    %cst_108 = arith.constant 1.000000e+00 : f32
    %425 = vector.broadcast %cst_108 : f32 to vector<8x128xf32>
    %426 = arith.subf %425, %419 : vector<8x128xf32>
    %427 = arith.mulf %426, %424 : vector<8x128xf32>
    %428 = arith.mulf %419, %397 : vector<8x128xf32>
    %429 = arith.addf %427, %428 : vector<8x128xf32>
    %c104_109 = arith.constant 104 : index
    %c0_110 = arith.constant 0 : index
    %430 = vector.load %arg11[%c104_109, %c0_110] : memref<120x384xf32, #tpu.memory_space<vmem>>, vector<8x384xf32>
    %c8_111 = arith.constant 8 : index
    %c0_112 = arith.constant 0 : index
    %431 = vector.load %arg12[%c8_111, %c0_112] : memref<120x384xf32, #tpu.memory_space<vmem>>, vector<8x384xf32>
    %432 = arith.addf %430, %431 : vector<8x384xf32>
    %cst_113 = arith.constant dense<0.000000e+00> : vector<8x384xf32>
    %433 = tpu.matmul %429, %11, %cst_113 {dimension_numbers = #tpu.dot_dimension_numbers<[1], [0], [0], [1], [0, 0, 1, 1], [], []>} : vector<8x128xf32>, vector<128x384xf32>, vector<8x384xf32> -> vector<8x384xf32>
    %434 = vector.broadcast %12 : vector<1x384xf32> to vector<8x384xf32>
    %435 = arith.addf %433, %434 : vector<8x384xf32>
    %436 = vector.extract_strided_slice %432 {offsets = [0, 0], sizes = [8, 128], strides = [1, 1]} : vector<8x384xf32> to vector<8x128xf32>
    %437 = vector.extract_strided_slice %435 {offsets = [0, 0], sizes = [8, 128], strides = [1, 1]} : vector<8x384xf32> to vector<8x128xf32>
    %438 = arith.addf %436, %437 : vector<8x128xf32>
    %439 = arith.negf %438 : vector<8x128xf32>
    %440 = math.exp %439 : vector<8x128xf32>
    %cst_114 = arith.constant 1.000000e+00 : f32
    %441 = vector.broadcast %cst_114 : f32 to vector<8x128xf32>
    %442 = arith.addf %441, %440 : vector<8x128xf32>
    %443 = arith.divf %441, %442 : vector<8x128xf32>
    %444 = vector.extract_strided_slice %432 {offsets = [0, 128], sizes = [8, 128], strides = [1, 1]} : vector<8x384xf32> to vector<8x128xf32>
    %445 = vector.extract_strided_slice %435 {offsets = [0, 128], sizes = [8, 128], strides = [1, 1]} : vector<8x384xf32> to vector<8x128xf32>
    %446 = arith.addf %444, %445 : vector<8x128xf32>
    %447 = arith.negf %446 : vector<8x128xf32>
    %448 = math.exp %447 : vector<8x128xf32>
    %cst_115 = arith.constant 1.000000e+00 : f32
    %449 = vector.broadcast %cst_115 : f32 to vector<8x128xf32>
    %450 = arith.addf %449, %448 : vector<8x128xf32>
    %451 = arith.divf %449, %450 : vector<8x128xf32>
    %452 = vector.extract_strided_slice %432 {offsets = [0, 256], sizes = [8, 128], strides = [1, 1]} : vector<8x384xf32> to vector<8x128xf32>
    %453 = vector.extract_strided_slice %435 {offsets = [0, 256], sizes = [8, 128], strides = [1, 1]} : vector<8x384xf32> to vector<8x128xf32>
    %454 = arith.mulf %443, %453 : vector<8x128xf32>
    %455 = arith.addf %452, %454 : vector<8x128xf32>
    %456 = math.tanh %455 : vector<8x128xf32>
    %cst_116 = arith.constant 1.000000e+00 : f32
    %457 = vector.broadcast %cst_116 : f32 to vector<8x128xf32>
    %458 = arith.subf %457, %451 : vector<8x128xf32>
    %459 = arith.mulf %458, %456 : vector<8x128xf32>
    %460 = arith.mulf %451, %429 : vector<8x128xf32>
    %461 = arith.addf %459, %460 : vector<8x128xf32>
    %c112_117 = arith.constant 112 : index
    %c0_118 = arith.constant 0 : index
    %462 = vector.load %arg11[%c112_117, %c0_118] : memref<120x384xf32, #tpu.memory_space<vmem>>, vector<8x384xf32>
    %c0_119 = arith.constant 0 : index
    %c0_120 = arith.constant 0 : index
    %463 = vector.load %arg12[%c0_119, %c0_120] : memref<120x384xf32, #tpu.memory_space<vmem>>, vector<8x384xf32>
    %464 = arith.addf %462, %463 : vector<8x384xf32>
    %cst_121 = arith.constant dense<0.000000e+00> : vector<8x384xf32>
    %465 = tpu.matmul %461, %11, %cst_121 {dimension_numbers = #tpu.dot_dimension_numbers<[1], [0], [0], [1], [0, 0, 1, 1], [], []>} : vector<8x128xf32>, vector<128x384xf32>, vector<8x384xf32> -> vector<8x384xf32>
    %466 = vector.broadcast %12 : vector<1x384xf32> to vector<8x384xf32>
    %467 = arith.addf %465, %466 : vector<8x384xf32>
    %468 = vector.extract_strided_slice %464 {offsets = [0, 0], sizes = [8, 128], strides = [1, 1]} : vector<8x384xf32> to vector<8x128xf32>
    %469 = vector.extract_strided_slice %467 {offsets = [0, 0], sizes = [8, 128], strides = [1, 1]} : vector<8x384xf32> to vector<8x128xf32>
    %470 = arith.addf %468, %469 : vector<8x128xf32>
    %471 = arith.negf %470 : vector<8x128xf32>
    %472 = math.exp %471 : vector<8x128xf32>
    %cst_122 = arith.constant 1.000000e+00 : f32
    %473 = vector.broadcast %cst_122 : f32 to vector<8x128xf32>
    %474 = arith.addf %473, %472 : vector<8x128xf32>
    %475 = arith.divf %473, %474 : vector<8x128xf32>
    %476 = vector.extract_strided_slice %464 {offsets = [0, 128], sizes = [8, 128], strides = [1, 1]} : vector<8x384xf32> to vector<8x128xf32>
    %477 = vector.extract_strided_slice %467 {offsets = [0, 128], sizes = [8, 128], strides = [1, 1]} : vector<8x384xf32> to vector<8x128xf32>
    %478 = arith.addf %476, %477 : vector<8x128xf32>
    %479 = arith.negf %478 : vector<8x128xf32>
    %480 = math.exp %479 : vector<8x128xf32>
    %cst_123 = arith.constant 1.000000e+00 : f32
    %481 = vector.broadcast %cst_123 : f32 to vector<8x128xf32>
    %482 = arith.addf %481, %480 : vector<8x128xf32>
    %483 = arith.divf %481, %482 : vector<8x128xf32>
    %484 = vector.extract_strided_slice %464 {offsets = [0, 256], sizes = [8, 128], strides = [1, 1]} : vector<8x384xf32> to vector<8x128xf32>
    %485 = vector.extract_strided_slice %467 {offsets = [0, 256], sizes = [8, 128], strides = [1, 1]} : vector<8x384xf32> to vector<8x128xf32>
    %486 = arith.mulf %475, %485 : vector<8x128xf32>
    %487 = arith.addf %484, %486 : vector<8x128xf32>
    %488 = math.tanh %487 : vector<8x128xf32>
    %cst_124 = arith.constant 1.000000e+00 : f32
    %489 = vector.broadcast %cst_124 : f32 to vector<8x128xf32>
    %490 = arith.subf %489, %483 : vector<8x128xf32>
    %491 = arith.mulf %490, %488 : vector<8x128xf32>
    %492 = arith.mulf %483, %461 : vector<8x128xf32>
    %493 = arith.addf %491, %492 : vector<8x128xf32>
    %c0_125 = arith.constant 0 : index
    %c0_126 = arith.constant 0 : index
    %494 = vector.load %arg6[%c0_125, %c0_126] : memref<128x17xf32, #tpu.memory_space<vmem>>, vector<128x17xf32>
    %cst_127 = arith.constant dense<0.000000e+00> : vector<8x17xf32>
    %495 = tpu.matmul %493, %494, %cst_127 {dimension_numbers = #tpu.dot_dimension_numbers<[1], [0], [0], [1], [0, 0, 1, 1], [], []>} : vector<8x128xf32>, vector<128x17xf32>, vector<8x17xf32> -> vector<8x17xf32>
    %c0_128 = arith.constant 0 : index
    %c0_129 = arith.constant 0 : index
    %496 = vector.load %arg7[%c0_128, %c0_129] : memref<1x17xf32, #tpu.memory_space<vmem>>, vector<1x17xf32>
    %497 = vector.broadcast %496 : vector<1x17xf32> to vector<8x17xf32>
    %498 = arith.addf %495, %497 : vector<8x17xf32>
    %499 = vector.extract_strided_slice %498 {offsets = [0, 0], sizes = [2, 8], strides = [1, 1]} : vector<8x17xf32> to vector<2x8xf32>
    %500 = vector.extract_strided_slice %498 {offsets = [0, 8], sizes = [2, 8], strides = [1, 1]} : vector<8x17xf32> to vector<2x8xf32>
    %501 = vector.extract_strided_slice %498 {offsets = [0, 16], sizes = [2, 1], strides = [1, 1]} : vector<8x17xf32> to vector<2x1xf32>
    %502 = arith.mulf %499, %499 : vector<2x8xf32>
    %cst_130 = arith.constant dense<0.000000e+00> : vector<2xf32>
    %503 = vector.multi_reduction <add>, %502, %cst_130 [1] : vector<2x8xf32> to vector<2xf32>
    %504 = vector.shape_cast %503 : vector<2xf32> to vector<2x1xf32>
    %cst_131 = arith.constant 9.99999996E-13 : f32
    %505 = vector.broadcast %cst_131 : f32 to vector<2x1xf32>
    %506 = arith.addf %504, %505 : vector<2x1xf32>
    %507 = math.rsqrt %506 : vector<2x1xf32>
    %508 = vector.broadcast %507 : vector<2x1xf32> to vector<2x8xf32>
    %509 = arith.mulf %499, %508 : vector<2x8xf32>
    %c0_132 = arith.constant 0 : index
    %c0_133 = arith.constant 0 : index
    %510 = vector.load %arg8[%c0_132, %c0_133] : memref<2x8xf32, #tpu.memory_space<vmem>>, vector<2x8xf32>
    tpu.vector_store %arg8[%c0_132, %c0_133], %509 {strides = array<i32>} : memref<2x8xf32, #tpu.memory_space<vmem>>, vector<2x8xf32>,
    %511 = arith.mulf %500, %500 : vector<2x8xf32>
    %cst_134 = arith.constant dense<0.000000e+00> : vector<2xf32>
    %512 = vector.multi_reduction <add>, %511, %cst_134 [1] : vector<2x8xf32> to vector<2xf32>
    %513 = vector.shape_cast %512 : vector<2xf32> to vector<2x1xf32>
    %cst_135 = arith.constant 9.99999996E-13 : f32
    %514 = vector.broadcast %cst_135 : f32 to vector<2x1xf32>
    %515 = arith.addf %513, %514 : vector<2x1xf32>
    %516 = math.rsqrt %515 : vector<2x1xf32>
    %517 = vector.broadcast %516 : vector<2x1xf32> to vector<2x8xf32>
    %518 = arith.mulf %500, %517 : vector<2x8xf32>
    %c0_136 = arith.constant 0 : index
    %c0_137 = arith.constant 0 : index
    %519 = vector.load %arg10[%c0_136, %c0_137] : memref<2x8xf32, #tpu.memory_space<vmem>>, vector<2x8xf32>
    tpu.vector_store %arg10[%c0_136, %c0_137], %518 {strides = array<i32>} : memref<2x8xf32, #tpu.memory_space<vmem>>, vector<2x8xf32>,
    %cst_138 = arith.constant 0.000000e+00 : f32
    %520 = vector.broadcast %cst_138 : f32 to vector<2x1xf32>
    %521 = arith.maximumf %501, %520 : vector<2x1xf32>
    %522 = math.absf %501 : vector<2x1xf32>
    %cst_139 = arith.constant 0.000000e+00 : f32
    %523 = vector.broadcast %cst_139 : f32 to vector<2x1xf32>
    %524 = arith.subf %523, %522 : vector<2x1xf32>
    %525 = math.exp %524 : vector<2x1xf32>
    %526 = math.log1p %525 : vector<2x1xf32>
    %527 = arith.addf %521, %526 : vector<2x1xf32>
    %cst_140 = arith.constant 1.000000e+00 : f32
    %528 = vector.broadcast %cst_140 : f32 to vector<2x1xf32>
    %529 = arith.addf %527, %528 : vector<2x1xf32>
    %c0_141 = arith.constant 0 : index
    %c0_142 = arith.constant 0 : index
    %530 = vector.load %arg9[%c0_141, %c0_142] : memref<2x1xf32, #tpu.memory_space<vmem>>, vector<2x1xf32>
    tpu.vector_store %arg9[%c0_141, %c0_142], %529 {strides = array<i32>} : memref<2x1xf32, #tpu.memory_space<vmem>>, vector<2x1xf32>,
    return
  }
}

module attributes {stable_mosaic.version = 11 : i64} {
  func.func @_dual_decoder_kernel(%arg0: memref<8x16xf32, #tpu.memory_space<vmem>>, %arg1: memref<16x32xf32, #tpu.memory_space<vmem>>, %arg2: memref<1x32xf32, #tpu.memory_space<vmem>>, %arg3: memref<32x32xf32, #tpu.memory_space<vmem>>, %arg4: memref<1x32xf32, #tpu.memory_space<vmem>>, %arg5: memref<32x384xf32, #tpu.memory_space<vmem>>, %arg6: memref<16x384xf32, #tpu.memory_space<vmem>>, %arg7: memref<1x384xf32, #tpu.memory_space<vmem>>, %arg8: memref<128x384xf32, #tpu.memory_space<vmem>>, %arg9: memref<1x384xf32, #tpu.memory_space<vmem>>, %arg10: memref<128x256xf32, #tpu.memory_space<vmem>>, %arg11: memref<1x256xf32, #tpu.memory_space<vmem>>, %arg12: memref<120x16xf32, #tpu.memory_space<vmem>>, %arg13: memref<2x16xf32, #tpu.memory_space<vmem>>, %arg14: memref<2x16xf32, #tpu.memory_space<vmem>>, %arg15: memref<128x256xf32, #tpu.memory_space<vmem>>, %arg16: memref<128x384xf32, #tpu.memory_space<vmem>>, %arg17: memref<128x128xf32, #tpu.memory_space<vmem>>) attributes {dimension_semantics = [], scalar_prefetch = 0 : i64, scratch_operands = 2 : i64, tpu.core_type = #tpu.core_type<tc>} {
    %c0 = arith.constant 0 : index
    %c0_0 = arith.constant 0 : index
    %0 = vector.load %arg0[%c0, %c0_0] : memref<8x16xf32, #tpu.memory_space<vmem>>, vector<8x16xf32>
    %c0_1 = arith.constant 0 : index
    %c0_2 = arith.constant 0 : index
    %1 = vector.load %arg1[%c0_1, %c0_2] : memref<16x32xf32, #tpu.memory_space<vmem>>, vector<16x32xf32>
    %cst = arith.constant dense<0.000000e+00> : vector<8x32xf32>
    %2 = tpu.matmul %0, %1, %cst {dimension_numbers = #tpu.dot_dimension_numbers<[1], [0], [0], [1], [0, 0, 1, 1], [], []>} : vector<8x16xf32>, vector<16x32xf32>, vector<8x32xf32> -> vector<8x32xf32>
    %c0_3 = arith.constant 0 : index
    %c0_4 = arith.constant 0 : index
    %3 = vector.load %arg2[%c0_3, %c0_4] : memref<1x32xf32, #tpu.memory_space<vmem>>, vector<1x32xf32>
    %4 = vector.broadcast %3 : vector<1x32xf32> to vector<8x32xf32>
    %5 = arith.addf %2, %4 : vector<8x32xf32>
    %cst_5 = arith.constant 0.000000e+00 : f32
    %6 = vector.broadcast %cst_5 : f32 to vector<8x32xf32>
    %7 = arith.maximumf %5, %6 : vector<8x32xf32>
    %c0_6 = arith.constant 0 : index
    %c0_7 = arith.constant 0 : index
    %8 = vector.load %arg3[%c0_6, %c0_7] : memref<32x32xf32, #tpu.memory_space<vmem>>, vector<32x32xf32>
    %cst_8 = arith.constant dense<0.000000e+00> : vector<8x32xf32>
    %9 = tpu.matmul %7, %8, %cst_8 {dimension_numbers = #tpu.dot_dimension_numbers<[1], [0], [0], [1], [0, 0, 1, 1], [], []>} : vector<8x32xf32>, vector<32x32xf32>, vector<8x32xf32> -> vector<8x32xf32>
    %c0_9 = arith.constant 0 : index
    %c0_10 = arith.constant 0 : index
    %10 = vector.load %arg4[%c0_9, %c0_10] : memref<1x32xf32, #tpu.memory_space<vmem>>, vector<1x32xf32>
    %11 = vector.broadcast %10 : vector<1x32xf32> to vector<8x32xf32>
    %12 = arith.addf %9, %11 : vector<8x32xf32>
    %13 = vector.extract_strided_slice %12 {offsets = [0, 0], sizes = [2, 16], strides = [1, 1]} : vector<8x32xf32> to vector<2x16xf32>
    %c0_11 = arith.constant 0 : index
    %c0_12 = arith.constant 0 : index
    %14 = vector.load %arg13[%c0_11, %c0_12] : memref<2x16xf32, #tpu.memory_space<vmem>>, vector<2x16xf32>
    tpu.vector_store %arg13[%c0_11, %c0_12], %13 {strides = array<i32>} : memref<2x16xf32, #tpu.memory_space<vmem>>, vector<2x16xf32>,
    %15 = vector.extract_strided_slice %12 {offsets = [0, 16], sizes = [2, 16], strides = [1, 1]} : vector<8x32xf32> to vector<2x16xf32>
    %c0_13 = arith.constant 0 : index
    %c0_14 = arith.constant 0 : index
    %16 = vector.load %arg14[%c0_13, %c0_14] : memref<2x16xf32, #tpu.memory_space<vmem>>, vector<2x16xf32>
    tpu.vector_store %arg14[%c0_13, %c0_14], %15 {strides = array<i32>} : memref<2x16xf32, #tpu.memory_space<vmem>>, vector<2x16xf32>,
    %c0_15 = arith.constant 0 : index
    %c0_16 = arith.constant 0 : index
    %17 = vector.load %arg7[%c0_15, %c0_16] : memref<1x384xf32, #tpu.memory_space<vmem>>, vector<1x384xf32>
    %c0_17 = arith.constant 0 : index
    %c0_18 = arith.constant 0 : index
    %18 = vector.load %arg5[%c0_17, %c0_18] : memref<32x384xf32, #tpu.memory_space<vmem>>, vector<32x384xf32>
    %cst_19 = arith.constant dense<0.000000e+00> : vector<8x384xf32>
    %19 = tpu.matmul %12, %18, %cst_19 {dimension_numbers = #tpu.dot_dimension_numbers<[1], [0], [0], [1], [0, 0, 1, 1], [], []>} : vector<8x32xf32>, vector<32x384xf32>, vector<8x384xf32> -> vector<8x384xf32>
    %20 = vector.broadcast %17 : vector<1x384xf32> to vector<8x384xf32>
    %21 = arith.addf %19, %20 : vector<8x384xf32>
    %c0_20 = arith.constant 0 : index
    %c0_21 = arith.constant 0 : index
    %22 = vector.load %arg16[%c0_20, %c0_21] : memref<128x384xf32, #tpu.memory_space<vmem>>, vector<8x384xf32>
    tpu.vector_store %arg16[%c0_20, %c0_21], %21 {strides = array<i32>} : memref<128x384xf32, #tpu.memory_space<vmem>>, vector<8x384xf32>,
    %c0_22 = arith.constant 0 : index
    %c0_23 = arith.constant 0 : index
    %23 = vector.load %arg12[%c0_22, %c0_23] : memref<120x16xf32, #tpu.memory_space<vmem>>, vector<120x16xf32>
    %c0_24 = arith.constant 0 : index
    %c0_25 = arith.constant 0 : index
    %24 = vector.load %arg6[%c0_24, %c0_25] : memref<16x384xf32, #tpu.memory_space<vmem>>, vector<16x384xf32>
    %cst_26 = arith.constant dense<0.000000e+00> : vector<120x384xf32>
    %25 = tpu.matmul %23, %24, %cst_26 {dimension_numbers = #tpu.dot_dimension_numbers<[1], [0], [0], [1], [0, 0, 1, 1], [], []>} : vector<120x16xf32>, vector<16x384xf32>, vector<120x384xf32> -> vector<120x384xf32>
    %26 = vector.broadcast %17 : vector<1x384xf32> to vector<120x384xf32>
    %27 = arith.addf %25, %26 : vector<120x384xf32>
    %c8 = arith.constant 8 : index
    %c0_27 = arith.constant 0 : index
    %28 = vector.load %arg16[%c8, %c0_27] : memref<128x384xf32, #tpu.memory_space<vmem>>, vector<120x384xf32>
    tpu.vector_store %arg16[%c8, %c0_27], %27 {strides = array<i32>} : memref<128x384xf32, #tpu.memory_space<vmem>>, vector<120x384xf32>,
    %c0_28 = arith.constant 0 : index
    %c0_29 = arith.constant 0 : index
    %29 = vector.load %arg8[%c0_28, %c0_29] : memref<128x384xf32, #tpu.memory_space<vmem>>, vector<128x384xf32>
    %c0_30 = arith.constant 0 : index
    %c0_31 = arith.constant 0 : index
    %30 = vector.load %arg9[%c0_30, %c0_31] : memref<1x384xf32, #tpu.memory_space<vmem>>, vector<1x384xf32>
    %cst_32 = arith.constant 0.000000e+00 : f32
    %31 = vector.broadcast %cst_32 : f32 to vector<8x128xf32>
    %c0_33 = arith.constant 0 : index
    %c0_34 = arith.constant 0 : index
    %32 = vector.load %arg16[%c0_33, %c0_34] : memref<128x384xf32, #tpu.memory_space<vmem>>, vector<8x384xf32>
    %cst_35 = arith.constant dense<0.000000e+00> : vector<8x384xf32>
    %33 = tpu.matmul %31, %29, %cst_35 {dimension_numbers = #tpu.dot_dimension_numbers<[1], [0], [0], [1], [0, 0, 1, 1], [], []>} : vector<8x128xf32>, vector<128x384xf32>, vector<8x384xf32> -> vector<8x384xf32>
    %34 = vector.broadcast %30 : vector<1x384xf32> to vector<8x384xf32>
    %35 = arith.addf %33, %34 : vector<8x384xf32>
    %36 = vector.extract_strided_slice %32 {offsets = [0, 0], sizes = [8, 128], strides = [1, 1]} : vector<8x384xf32> to vector<8x128xf32>
    %37 = vector.extract_strided_slice %35 {offsets = [0, 0], sizes = [8, 128], strides = [1, 1]} : vector<8x384xf32> to vector<8x128xf32>
    %38 = arith.addf %36, %37 : vector<8x128xf32>
    %39 = arith.negf %38 : vector<8x128xf32>
    %40 = math.exp %39 : vector<8x128xf32>
    %cst_36 = arith.constant 1.000000e+00 : f32
    %41 = vector.broadcast %cst_36 : f32 to vector<8x128xf32>
    %42 = arith.addf %41, %40 : vector<8x128xf32>
    %43 = arith.divf %41, %42 : vector<8x128xf32>
    %44 = vector.extract_strided_slice %32 {offsets = [0, 128], sizes = [8, 128], strides = [1, 1]} : vector<8x384xf32> to vector<8x128xf32>
    %45 = vector.extract_strided_slice %35 {offsets = [0, 128], sizes = [8, 128], strides = [1, 1]} : vector<8x384xf32> to vector<8x128xf32>
    %46 = arith.addf %44, %45 : vector<8x128xf32>
    %47 = arith.negf %46 : vector<8x128xf32>
    %48 = math.exp %47 : vector<8x128xf32>
    %cst_37 = arith.constant 1.000000e+00 : f32
    %49 = vector.broadcast %cst_37 : f32 to vector<8x128xf32>
    %50 = arith.addf %49, %48 : vector<8x128xf32>
    %51 = arith.divf %49, %50 : vector<8x128xf32>
    %52 = vector.extract_strided_slice %32 {offsets = [0, 256], sizes = [8, 128], strides = [1, 1]} : vector<8x384xf32> to vector<8x128xf32>
    %53 = vector.extract_strided_slice %35 {offsets = [0, 256], sizes = [8, 128], strides = [1, 1]} : vector<8x384xf32> to vector<8x128xf32>
    %54 = arith.mulf %43, %53 : vector<8x128xf32>
    %55 = arith.addf %52, %54 : vector<8x128xf32>
    %56 = math.tanh %55 : vector<8x128xf32>
    %cst_38 = arith.constant 1.000000e+00 : f32
    %57 = vector.broadcast %cst_38 : f32 to vector<8x128xf32>
    %58 = arith.subf %57, %51 : vector<8x128xf32>
    %59 = arith.mulf %58, %56 : vector<8x128xf32>
    %60 = arith.mulf %51, %31 : vector<8x128xf32>
    %61 = arith.addf %59, %60 : vector<8x128xf32>
    %c0_39 = arith.constant 0 : index
    %c0_40 = arith.constant 0 : index
    %62 = vector.load %arg17[%c0_39, %c0_40] : memref<128x128xf32, #tpu.memory_space<vmem>>, vector<8x128xf32>
    tpu.vector_store %arg17[%c0_39, %c0_40], %61 {strides = array<i32>} : memref<128x128xf32, #tpu.memory_space<vmem>>, vector<8x128xf32>,
    %c8_41 = arith.constant 8 : index
    %c0_42 = arith.constant 0 : index
    %63 = vector.load %arg16[%c8_41, %c0_42] : memref<128x384xf32, #tpu.memory_space<vmem>>, vector<8x384xf32>
    %cst_43 = arith.constant dense<0.000000e+00> : vector<8x384xf32>
    %64 = tpu.matmul %61, %29, %cst_43 {dimension_numbers = #tpu.dot_dimension_numbers<[1], [0], [0], [1], [0, 0, 1, 1], [], []>} : vector<8x128xf32>, vector<128x384xf32>, vector<8x384xf32> -> vector<8x384xf32>
    %65 = vector.broadcast %30 : vector<1x384xf32> to vector<8x384xf32>
    %66 = arith.addf %64, %65 : vector<8x384xf32>
    %67 = vector.extract_strided_slice %63 {offsets = [0, 0], sizes = [8, 128], strides = [1, 1]} : vector<8x384xf32> to vector<8x128xf32>
    %68 = vector.extract_strided_slice %66 {offsets = [0, 0], sizes = [8, 128], strides = [1, 1]} : vector<8x384xf32> to vector<8x128xf32>
    %69 = arith.addf %67, %68 : vector<8x128xf32>
    %70 = arith.negf %69 : vector<8x128xf32>
    %71 = math.exp %70 : vector<8x128xf32>
    %cst_44 = arith.constant 1.000000e+00 : f32
    %72 = vector.broadcast %cst_44 : f32 to vector<8x128xf32>
    %73 = arith.addf %72, %71 : vector<8x128xf32>
    %74 = arith.divf %72, %73 : vector<8x128xf32>
    %75 = vector.extract_strided_slice %63 {offsets = [0, 128], sizes = [8, 128], strides = [1, 1]} : vector<8x384xf32> to vector<8x128xf32>
    %76 = vector.extract_strided_slice %66 {offsets = [0, 128], sizes = [8, 128], strides = [1, 1]} : vector<8x384xf32> to vector<8x128xf32>
    %77 = arith.addf %75, %76 : vector<8x128xf32>
    %78 = arith.negf %77 : vector<8x128xf32>
    %79 = math.exp %78 : vector<8x128xf32>
    %cst_45 = arith.constant 1.000000e+00 : f32
    %80 = vector.broadcast %cst_45 : f32 to vector<8x128xf32>
    %81 = arith.addf %80, %79 : vector<8x128xf32>
    %82 = arith.divf %80, %81 : vector<8x128xf32>
    %83 = vector.extract_strided_slice %63 {offsets = [0, 256], sizes = [8, 128], strides = [1, 1]} : vector<8x384xf32> to vector<8x128xf32>
    %84 = vector.extract_strided_slice %66 {offsets = [0, 256], sizes = [8, 128], strides = [1, 1]} : vector<8x384xf32> to vector<8x128xf32>
    %85 = arith.mulf %74, %84 : vector<8x128xf32>
    %86 = arith.addf %83, %85 : vector<8x128xf32>
    %87 = math.tanh %86 : vector<8x128xf32>
    %cst_46 = arith.constant 1.000000e+00 : f32
    %88 = vector.broadcast %cst_46 : f32 to vector<8x128xf32>
    %89 = arith.subf %88, %82 : vector<8x128xf32>
    %90 = arith.mulf %89, %87 : vector<8x128xf32>
    %91 = arith.mulf %82, %61 : vector<8x128xf32>
    %92 = arith.addf %90, %91 : vector<8x128xf32>
    %c8_47 = arith.constant 8 : index
    %c0_48 = arith.constant 0 : index
    %93 = vector.load %arg17[%c8_47, %c0_48] : memref<128x128xf32, #tpu.memory_space<vmem>>, vector<8x128xf32>
    tpu.vector_store %arg17[%c8_47, %c0_48], %92 {strides = array<i32>} : memref<128x128xf32, #tpu.memory_space<vmem>>, vector<8x128xf32>,
    %c16 = arith.constant 16 : index
    %c0_49 = arith.constant 0 : index
    %94 = vector.load %arg16[%c16, %c0_49] : memref<128x384xf32, #tpu.memory_space<vmem>>, vector<8x384xf32>
    %cst_50 = arith.constant dense<0.000000e+00> : vector<8x384xf32>
    %95 = tpu.matmul %92, %29, %cst_50 {dimension_numbers = #tpu.dot_dimension_numbers<[1], [0], [0], [1], [0, 0, 1, 1], [], []>} : vector<8x128xf32>, vector<128x384xf32>, vector<8x384xf32> -> vector<8x384xf32>
    %96 = vector.broadcast %30 : vector<1x384xf32> to vector<8x384xf32>
    %97 = arith.addf %95, %96 : vector<8x384xf32>
    %98 = vector.extract_strided_slice %94 {offsets = [0, 0], sizes = [8, 128], strides = [1, 1]} : vector<8x384xf32> to vector<8x128xf32>
    %99 = vector.extract_strided_slice %97 {offsets = [0, 0], sizes = [8, 128], strides = [1, 1]} : vector<8x384xf32> to vector<8x128xf32>
    %100 = arith.addf %98, %99 : vector<8x128xf32>
    %101 = arith.negf %100 : vector<8x128xf32>
    %102 = math.exp %101 : vector<8x128xf32>
    %cst_51 = arith.constant 1.000000e+00 : f32
    %103 = vector.broadcast %cst_51 : f32 to vector<8x128xf32>
    %104 = arith.addf %103, %102 : vector<8x128xf32>
    %105 = arith.divf %103, %104 : vector<8x128xf32>
    %106 = vector.extract_strided_slice %94 {offsets = [0, 128], sizes = [8, 128], strides = [1, 1]} : vector<8x384xf32> to vector<8x128xf32>
    %107 = vector.extract_strided_slice %97 {offsets = [0, 128], sizes = [8, 128], strides = [1, 1]} : vector<8x384xf32> to vector<8x128xf32>
    %108 = arith.addf %106, %107 : vector<8x128xf32>
    %109 = arith.negf %108 : vector<8x128xf32>
    %110 = math.exp %109 : vector<8x128xf32>
    %cst_52 = arith.constant 1.000000e+00 : f32
    %111 = vector.broadcast %cst_52 : f32 to vector<8x128xf32>
    %112 = arith.addf %111, %110 : vector<8x128xf32>
    %113 = arith.divf %111, %112 : vector<8x128xf32>
    %114 = vector.extract_strided_slice %94 {offsets = [0, 256], sizes = [8, 128], strides = [1, 1]} : vector<8x384xf32> to vector<8x128xf32>
    %115 = vector.extract_strided_slice %97 {offsets = [0, 256], sizes = [8, 128], strides = [1, 1]} : vector<8x384xf32> to vector<8x128xf32>
    %116 = arith.mulf %105, %115 : vector<8x128xf32>
    %117 = arith.addf %114, %116 : vector<8x128xf32>
    %118 = math.tanh %117 : vector<8x128xf32>
    %cst_53 = arith.constant 1.000000e+00 : f32
    %119 = vector.broadcast %cst_53 : f32 to vector<8x128xf32>
    %120 = arith.subf %119, %113 : vector<8x128xf32>
    %121 = arith.mulf %120, %118 : vector<8x128xf32>
    %122 = arith.mulf %113, %92 : vector<8x128xf32>
    %123 = arith.addf %121, %122 : vector<8x128xf32>
    %c16_54 = arith.constant 16 : index
    %c0_55 = arith.constant 0 : index
    %124 = vector.load %arg17[%c16_54, %c0_55] : memref<128x128xf32, #tpu.memory_space<vmem>>, vector<8x128xf32>
    tpu.vector_store %arg17[%c16_54, %c0_55], %123 {strides = array<i32>} : memref<128x128xf32, #tpu.memory_space<vmem>>, vector<8x128xf32>,
    %c24 = arith.constant 24 : index
    %c0_56 = arith.constant 0 : index
    %125 = vector.load %arg16[%c24, %c0_56] : memref<128x384xf32, #tpu.memory_space<vmem>>, vector<8x384xf32>
    %cst_57 = arith.constant dense<0.000000e+00> : vector<8x384xf32>
    %126 = tpu.matmul %123, %29, %cst_57 {dimension_numbers = #tpu.dot_dimension_numbers<[1], [0], [0], [1], [0, 0, 1, 1], [], []>} : vector<8x128xf32>, vector<128x384xf32>, vector<8x384xf32> -> vector<8x384xf32>
    %127 = vector.broadcast %30 : vector<1x384xf32> to vector<8x384xf32>
    %128 = arith.addf %126, %127 : vector<8x384xf32>
    %129 = vector.extract_strided_slice %125 {offsets = [0, 0], sizes = [8, 128], strides = [1, 1]} : vector<8x384xf32> to vector<8x128xf32>
    %130 = vector.extract_strided_slice %128 {offsets = [0, 0], sizes = [8, 128], strides = [1, 1]} : vector<8x384xf32> to vector<8x128xf32>
    %131 = arith.addf %129, %130 : vector<8x128xf32>
    %132 = arith.negf %131 : vector<8x128xf32>
    %133 = math.exp %132 : vector<8x128xf32>
    %cst_58 = arith.constant 1.000000e+00 : f32
    %134 = vector.broadcast %cst_58 : f32 to vector<8x128xf32>
    %135 = arith.addf %134, %133 : vector<8x128xf32>
    %136 = arith.divf %134, %135 : vector<8x128xf32>
    %137 = vector.extract_strided_slice %125 {offsets = [0, 128], sizes = [8, 128], strides = [1, 1]} : vector<8x384xf32> to vector<8x128xf32>
    %138 = vector.extract_strided_slice %128 {offsets = [0, 128], sizes = [8, 128], strides = [1, 1]} : vector<8x384xf32> to vector<8x128xf32>
    %139 = arith.addf %137, %138 : vector<8x128xf32>
    %140 = arith.negf %139 : vector<8x128xf32>
    %141 = math.exp %140 : vector<8x128xf32>
    %cst_59 = arith.constant 1.000000e+00 : f32
    %142 = vector.broadcast %cst_59 : f32 to vector<8x128xf32>
    %143 = arith.addf %142, %141 : vector<8x128xf32>
    %144 = arith.divf %142, %143 : vector<8x128xf32>
    %145 = vector.extract_strided_slice %125 {offsets = [0, 256], sizes = [8, 128], strides = [1, 1]} : vector<8x384xf32> to vector<8x128xf32>
    %146 = vector.extract_strided_slice %128 {offsets = [0, 256], sizes = [8, 128], strides = [1, 1]} : vector<8x384xf32> to vector<8x128xf32>
    %147 = arith.mulf %136, %146 : vector<8x128xf32>
    %148 = arith.addf %145, %147 : vector<8x128xf32>
    %149 = math.tanh %148 : vector<8x128xf32>
    %cst_60 = arith.constant 1.000000e+00 : f32
    %150 = vector.broadcast %cst_60 : f32 to vector<8x128xf32>
    %151 = arith.subf %150, %144 : vector<8x128xf32>
    %152 = arith.mulf %151, %149 : vector<8x128xf32>
    %153 = arith.mulf %144, %123 : vector<8x128xf32>
    %154 = arith.addf %152, %153 : vector<8x128xf32>
    %c24_61 = arith.constant 24 : index
    %c0_62 = arith.constant 0 : index
    %155 = vector.load %arg17[%c24_61, %c0_62] : memref<128x128xf32, #tpu.memory_space<vmem>>, vector<8x128xf32>
    tpu.vector_store %arg17[%c24_61, %c0_62], %154 {strides = array<i32>} : memref<128x128xf32, #tpu.memory_space<vmem>>, vector<8x128xf32>,
    %c32 = arith.constant 32 : index
    %c0_63 = arith.constant 0 : index
    %156 = vector.load %arg16[%c32, %c0_63] : memref<128x384xf32, #tpu.memory_space<vmem>>, vector<8x384xf32>
    %cst_64 = arith.constant dense<0.000000e+00> : vector<8x384xf32>
    %157 = tpu.matmul %154, %29, %cst_64 {dimension_numbers = #tpu.dot_dimension_numbers<[1], [0], [0], [1], [0, 0, 1, 1], [], []>} : vector<8x128xf32>, vector<128x384xf32>, vector<8x384xf32> -> vector<8x384xf32>
    %158 = vector.broadcast %30 : vector<1x384xf32> to vector<8x384xf32>
    %159 = arith.addf %157, %158 : vector<8x384xf32>
    %160 = vector.extract_strided_slice %156 {offsets = [0, 0], sizes = [8, 128], strides = [1, 1]} : vector<8x384xf32> to vector<8x128xf32>
    %161 = vector.extract_strided_slice %159 {offsets = [0, 0], sizes = [8, 128], strides = [1, 1]} : vector<8x384xf32> to vector<8x128xf32>
    %162 = arith.addf %160, %161 : vector<8x128xf32>
    %163 = arith.negf %162 : vector<8x128xf32>
    %164 = math.exp %163 : vector<8x128xf32>
    %cst_65 = arith.constant 1.000000e+00 : f32
    %165 = vector.broadcast %cst_65 : f32 to vector<8x128xf32>
    %166 = arith.addf %165, %164 : vector<8x128xf32>
    %167 = arith.divf %165, %166 : vector<8x128xf32>
    %168 = vector.extract_strided_slice %156 {offsets = [0, 128], sizes = [8, 128], strides = [1, 1]} : vector<8x384xf32> to vector<8x128xf32>
    %169 = vector.extract_strided_slice %159 {offsets = [0, 128], sizes = [8, 128], strides = [1, 1]} : vector<8x384xf32> to vector<8x128xf32>
    %170 = arith.addf %168, %169 : vector<8x128xf32>
    %171 = arith.negf %170 : vector<8x128xf32>
    %172 = math.exp %171 : vector<8x128xf32>
    %cst_66 = arith.constant 1.000000e+00 : f32
    %173 = vector.broadcast %cst_66 : f32 to vector<8x128xf32>
    %174 = arith.addf %173, %172 : vector<8x128xf32>
    %175 = arith.divf %173, %174 : vector<8x128xf32>
    %176 = vector.extract_strided_slice %156 {offsets = [0, 256], sizes = [8, 128], strides = [1, 1]} : vector<8x384xf32> to vector<8x128xf32>
    %177 = vector.extract_strided_slice %159 {offsets = [0, 256], sizes = [8, 128], strides = [1, 1]} : vector<8x384xf32> to vector<8x128xf32>
    %178 = arith.mulf %167, %177 : vector<8x128xf32>
    %179 = arith.addf %176, %178 : vector<8x128xf32>
    %180 = math.tanh %179 : vector<8x128xf32>
    %cst_67 = arith.constant 1.000000e+00 : f32
    %181 = vector.broadcast %cst_67 : f32 to vector<8x128xf32>
    %182 = arith.subf %181, %175 : vector<8x128xf32>
    %183 = arith.mulf %182, %180 : vector<8x128xf32>
    %184 = arith.mulf %175, %154 : vector<8x128xf32>
    %185 = arith.addf %183, %184 : vector<8x128xf32>
    %c32_68 = arith.constant 32 : index
    %c0_69 = arith.constant 0 : index
    %186 = vector.load %arg17[%c32_68, %c0_69] : memref<128x128xf32, #tpu.memory_space<vmem>>, vector<8x128xf32>
    tpu.vector_store %arg17[%c32_68, %c0_69], %185 {strides = array<i32>} : memref<128x128xf32, #tpu.memory_space<vmem>>, vector<8x128xf32>,
    %c40 = arith.constant 40 : index
    %c0_70 = arith.constant 0 : index
    %187 = vector.load %arg16[%c40, %c0_70] : memref<128x384xf32, #tpu.memory_space<vmem>>, vector<8x384xf32>
    %cst_71 = arith.constant dense<0.000000e+00> : vector<8x384xf32>
    %188 = tpu.matmul %185, %29, %cst_71 {dimension_numbers = #tpu.dot_dimension_numbers<[1], [0], [0], [1], [0, 0, 1, 1], [], []>} : vector<8x128xf32>, vector<128x384xf32>, vector<8x384xf32> -> vector<8x384xf32>
    %189 = vector.broadcast %30 : vector<1x384xf32> to vector<8x384xf32>
    %190 = arith.addf %188, %189 : vector<8x384xf32>
    %191 = vector.extract_strided_slice %187 {offsets = [0, 0], sizes = [8, 128], strides = [1, 1]} : vector<8x384xf32> to vector<8x128xf32>
    %192 = vector.extract_strided_slice %190 {offsets = [0, 0], sizes = [8, 128], strides = [1, 1]} : vector<8x384xf32> to vector<8x128xf32>
    %193 = arith.addf %191, %192 : vector<8x128xf32>
    %194 = arith.negf %193 : vector<8x128xf32>
    %195 = math.exp %194 : vector<8x128xf32>
    %cst_72 = arith.constant 1.000000e+00 : f32
    %196 = vector.broadcast %cst_72 : f32 to vector<8x128xf32>
    %197 = arith.addf %196, %195 : vector<8x128xf32>
    %198 = arith.divf %196, %197 : vector<8x128xf32>
    %199 = vector.extract_strided_slice %187 {offsets = [0, 128], sizes = [8, 128], strides = [1, 1]} : vector<8x384xf32> to vector<8x128xf32>
    %200 = vector.extract_strided_slice %190 {offsets = [0, 128], sizes = [8, 128], strides = [1, 1]} : vector<8x384xf32> to vector<8x128xf32>
    %201 = arith.addf %199, %200 : vector<8x128xf32>
    %202 = arith.negf %201 : vector<8x128xf32>
    %203 = math.exp %202 : vector<8x128xf32>
    %cst_73 = arith.constant 1.000000e+00 : f32
    %204 = vector.broadcast %cst_73 : f32 to vector<8x128xf32>
    %205 = arith.addf %204, %203 : vector<8x128xf32>
    %206 = arith.divf %204, %205 : vector<8x128xf32>
    %207 = vector.extract_strided_slice %187 {offsets = [0, 256], sizes = [8, 128], strides = [1, 1]} : vector<8x384xf32> to vector<8x128xf32>
    %208 = vector.extract_strided_slice %190 {offsets = [0, 256], sizes = [8, 128], strides = [1, 1]} : vector<8x384xf32> to vector<8x128xf32>
    %209 = arith.mulf %198, %208 : vector<8x128xf32>
    %210 = arith.addf %207, %209 : vector<8x128xf32>
    %211 = math.tanh %210 : vector<8x128xf32>
    %cst_74 = arith.constant 1.000000e+00 : f32
    %212 = vector.broadcast %cst_74 : f32 to vector<8x128xf32>
    %213 = arith.subf %212, %206 : vector<8x128xf32>
    %214 = arith.mulf %213, %211 : vector<8x128xf32>
    %215 = arith.mulf %206, %185 : vector<8x128xf32>
    %216 = arith.addf %214, %215 : vector<8x128xf32>
    %c40_75 = arith.constant 40 : index
    %c0_76 = arith.constant 0 : index
    %217 = vector.load %arg17[%c40_75, %c0_76] : memref<128x128xf32, #tpu.memory_space<vmem>>, vector<8x128xf32>
    tpu.vector_store %arg17[%c40_75, %c0_76], %216 {strides = array<i32>} : memref<128x128xf32, #tpu.memory_space<vmem>>, vector<8x128xf32>,
    %c48 = arith.constant 48 : index
    %c0_77 = arith.constant 0 : index
    %218 = vector.load %arg16[%c48, %c0_77] : memref<128x384xf32, #tpu.memory_space<vmem>>, vector<8x384xf32>
    %cst_78 = arith.constant dense<0.000000e+00> : vector<8x384xf32>
    %219 = tpu.matmul %216, %29, %cst_78 {dimension_numbers = #tpu.dot_dimension_numbers<[1], [0], [0], [1], [0, 0, 1, 1], [], []>} : vector<8x128xf32>, vector<128x384xf32>, vector<8x384xf32> -> vector<8x384xf32>
    %220 = vector.broadcast %30 : vector<1x384xf32> to vector<8x384xf32>
    %221 = arith.addf %219, %220 : vector<8x384xf32>
    %222 = vector.extract_strided_slice %218 {offsets = [0, 0], sizes = [8, 128], strides = [1, 1]} : vector<8x384xf32> to vector<8x128xf32>
    %223 = vector.extract_strided_slice %221 {offsets = [0, 0], sizes = [8, 128], strides = [1, 1]} : vector<8x384xf32> to vector<8x128xf32>
    %224 = arith.addf %222, %223 : vector<8x128xf32>
    %225 = arith.negf %224 : vector<8x128xf32>
    %226 = math.exp %225 : vector<8x128xf32>
    %cst_79 = arith.constant 1.000000e+00 : f32
    %227 = vector.broadcast %cst_79 : f32 to vector<8x128xf32>
    %228 = arith.addf %227, %226 : vector<8x128xf32>
    %229 = arith.divf %227, %228 : vector<8x128xf32>
    %230 = vector.extract_strided_slice %218 {offsets = [0, 128], sizes = [8, 128], strides = [1, 1]} : vector<8x384xf32> to vector<8x128xf32>
    %231 = vector.extract_strided_slice %221 {offsets = [0, 128], sizes = [8, 128], strides = [1, 1]} : vector<8x384xf32> to vector<8x128xf32>
    %232 = arith.addf %230, %231 : vector<8x128xf32>
    %233 = arith.negf %232 : vector<8x128xf32>
    %234 = math.exp %233 : vector<8x128xf32>
    %cst_80 = arith.constant 1.000000e+00 : f32
    %235 = vector.broadcast %cst_80 : f32 to vector<8x128xf32>
    %236 = arith.addf %235, %234 : vector<8x128xf32>
    %237 = arith.divf %235, %236 : vector<8x128xf32>
    %238 = vector.extract_strided_slice %218 {offsets = [0, 256], sizes = [8, 128], strides = [1, 1]} : vector<8x384xf32> to vector<8x128xf32>
    %239 = vector.extract_strided_slice %221 {offsets = [0, 256], sizes = [8, 128], strides = [1, 1]} : vector<8x384xf32> to vector<8x128xf32>
    %240 = arith.mulf %229, %239 : vector<8x128xf32>
    %241 = arith.addf %238, %240 : vector<8x128xf32>
    %242 = math.tanh %241 : vector<8x128xf32>
    %cst_81 = arith.constant 1.000000e+00 : f32
    %243 = vector.broadcast %cst_81 : f32 to vector<8x128xf32>
    %244 = arith.subf %243, %237 : vector<8x128xf32>
    %245 = arith.mulf %244, %242 : vector<8x128xf32>
    %246 = arith.mulf %237, %216 : vector<8x128xf32>
    %247 = arith.addf %245, %246 : vector<8x128xf32>
    %c48_82 = arith.constant 48 : index
    %c0_83 = arith.constant 0 : index
    %248 = vector.load %arg17[%c48_82, %c0_83] : memref<128x128xf32, #tpu.memory_space<vmem>>, vector<8x128xf32>
    tpu.vector_store %arg17[%c48_82, %c0_83], %247 {strides = array<i32>} : memref<128x128xf32, #tpu.memory_space<vmem>>, vector<8x128xf32>,
    %c56 = arith.constant 56 : index
    %c0_84 = arith.constant 0 : index
    %249 = vector.load %arg16[%c56, %c0_84] : memref<128x384xf32, #tpu.memory_space<vmem>>, vector<8x384xf32>
    %cst_85 = arith.constant dense<0.000000e+00> : vector<8x384xf32>
    %250 = tpu.matmul %247, %29, %cst_85 {dimension_numbers = #tpu.dot_dimension_numbers<[1], [0], [0], [1], [0, 0, 1, 1], [], []>} : vector<8x128xf32>, vector<128x384xf32>, vector<8x384xf32> -> vector<8x384xf32>
    %251 = vector.broadcast %30 : vector<1x384xf32> to vector<8x384xf32>
    %252 = arith.addf %250, %251 : vector<8x384xf32>
    %253 = vector.extract_strided_slice %249 {offsets = [0, 0], sizes = [8, 128], strides = [1, 1]} : vector<8x384xf32> to vector<8x128xf32>
    %254 = vector.extract_strided_slice %252 {offsets = [0, 0], sizes = [8, 128], strides = [1, 1]} : vector<8x384xf32> to vector<8x128xf32>
    %255 = arith.addf %253, %254 : vector<8x128xf32>
    %256 = arith.negf %255 : vector<8x128xf32>
    %257 = math.exp %256 : vector<8x128xf32>
    %cst_86 = arith.constant 1.000000e+00 : f32
    %258 = vector.broadcast %cst_86 : f32 to vector<8x128xf32>
    %259 = arith.addf %258, %257 : vector<8x128xf32>
    %260 = arith.divf %258, %259 : vector<8x128xf32>
    %261 = vector.extract_strided_slice %249 {offsets = [0, 128], sizes = [8, 128], strides = [1, 1]} : vector<8x384xf32> to vector<8x128xf32>
    %262 = vector.extract_strided_slice %252 {offsets = [0, 128], sizes = [8, 128], strides = [1, 1]} : vector<8x384xf32> to vector<8x128xf32>
    %263 = arith.addf %261, %262 : vector<8x128xf32>
    %264 = arith.negf %263 : vector<8x128xf32>
    %265 = math.exp %264 : vector<8x128xf32>
    %cst_87 = arith.constant 1.000000e+00 : f32
    %266 = vector.broadcast %cst_87 : f32 to vector<8x128xf32>
    %267 = arith.addf %266, %265 : vector<8x128xf32>
    %268 = arith.divf %266, %267 : vector<8x128xf32>
    %269 = vector.extract_strided_slice %249 {offsets = [0, 256], sizes = [8, 128], strides = [1, 1]} : vector<8x384xf32> to vector<8x128xf32>
    %270 = vector.extract_strided_slice %252 {offsets = [0, 256], sizes = [8, 128], strides = [1, 1]} : vector<8x384xf32> to vector<8x128xf32>
    %271 = arith.mulf %260, %270 : vector<8x128xf32>
    %272 = arith.addf %269, %271 : vector<8x128xf32>
    %273 = math.tanh %272 : vector<8x128xf32>
    %cst_88 = arith.constant 1.000000e+00 : f32
    %274 = vector.broadcast %cst_88 : f32 to vector<8x128xf32>
    %275 = arith.subf %274, %268 : vector<8x128xf32>
    %276 = arith.mulf %275, %273 : vector<8x128xf32>
    %277 = arith.mulf %268, %247 : vector<8x128xf32>
    %278 = arith.addf %276, %277 : vector<8x128xf32>
    %c56_89 = arith.constant 56 : index
    %c0_90 = arith.constant 0 : index
    %279 = vector.load %arg17[%c56_89, %c0_90] : memref<128x128xf32, #tpu.memory_space<vmem>>, vector<8x128xf32>
    tpu.vector_store %arg17[%c56_89, %c0_90], %278 {strides = array<i32>} : memref<128x128xf32, #tpu.memory_space<vmem>>, vector<8x128xf32>,
    %c64 = arith.constant 64 : index
    %c0_91 = arith.constant 0 : index
    %280 = vector.load %arg16[%c64, %c0_91] : memref<128x384xf32, #tpu.memory_space<vmem>>, vector<8x384xf32>
    %cst_92 = arith.constant dense<0.000000e+00> : vector<8x384xf32>
    %281 = tpu.matmul %278, %29, %cst_92 {dimension_numbers = #tpu.dot_dimension_numbers<[1], [0], [0], [1], [0, 0, 1, 1], [], []>} : vector<8x128xf32>, vector<128x384xf32>, vector<8x384xf32> -> vector<8x384xf32>
    %282 = vector.broadcast %30 : vector<1x384xf32> to vector<8x384xf32>
    %283 = arith.addf %281, %282 : vector<8x384xf32>
    %284 = vector.extract_strided_slice %280 {offsets = [0, 0], sizes = [8, 128], strides = [1, 1]} : vector<8x384xf32> to vector<8x128xf32>
    %285 = vector.extract_strided_slice %283 {offsets = [0, 0], sizes = [8, 128], strides = [1, 1]} : vector<8x384xf32> to vector<8x128xf32>
    %286 = arith.addf %284, %285 : vector<8x128xf32>
    %287 = arith.negf %286 : vector<8x128xf32>
    %288 = math.exp %287 : vector<8x128xf32>
    %cst_93 = arith.constant 1.000000e+00 : f32
    %289 = vector.broadcast %cst_93 : f32 to vector<8x128xf32>
    %290 = arith.addf %289, %288 : vector<8x128xf32>
    %291 = arith.divf %289, %290 : vector<8x128xf32>
    %292 = vector.extract_strided_slice %280 {offsets = [0, 128], sizes = [8, 128], strides = [1, 1]} : vector<8x384xf32> to vector<8x128xf32>
    %293 = vector.extract_strided_slice %283 {offsets = [0, 128], sizes = [8, 128], strides = [1, 1]} : vector<8x384xf32> to vector<8x128xf32>
    %294 = arith.addf %292, %293 : vector<8x128xf32>
    %295 = arith.negf %294 : vector<8x128xf32>
    %296 = math.exp %295 : vector<8x128xf32>
    %cst_94 = arith.constant 1.000000e+00 : f32
    %297 = vector.broadcast %cst_94 : f32 to vector<8x128xf32>
    %298 = arith.addf %297, %296 : vector<8x128xf32>
    %299 = arith.divf %297, %298 : vector<8x128xf32>
    %300 = vector.extract_strided_slice %280 {offsets = [0, 256], sizes = [8, 128], strides = [1, 1]} : vector<8x384xf32> to vector<8x128xf32>
    %301 = vector.extract_strided_slice %283 {offsets = [0, 256], sizes = [8, 128], strides = [1, 1]} : vector<8x384xf32> to vector<8x128xf32>
    %302 = arith.mulf %291, %301 : vector<8x128xf32>
    %303 = arith.addf %300, %302 : vector<8x128xf32>
    %304 = math.tanh %303 : vector<8x128xf32>
    %cst_95 = arith.constant 1.000000e+00 : f32
    %305 = vector.broadcast %cst_95 : f32 to vector<8x128xf32>
    %306 = arith.subf %305, %299 : vector<8x128xf32>
    %307 = arith.mulf %306, %304 : vector<8x128xf32>
    %308 = arith.mulf %299, %278 : vector<8x128xf32>
    %309 = arith.addf %307, %308 : vector<8x128xf32>
    %c64_96 = arith.constant 64 : index
    %c0_97 = arith.constant 0 : index
    %310 = vector.load %arg17[%c64_96, %c0_97] : memref<128x128xf32, #tpu.memory_space<vmem>>, vector<8x128xf32>
    tpu.vector_store %arg17[%c64_96, %c0_97], %309 {strides = array<i32>} : memref<128x128xf32, #tpu.memory_space<vmem>>, vector<8x128xf32>,
    %c72 = arith.constant 72 : index
    %c0_98 = arith.constant 0 : index
    %311 = vector.load %arg16[%c72, %c0_98] : memref<128x384xf32, #tpu.memory_space<vmem>>, vector<8x384xf32>
    %cst_99 = arith.constant dense<0.000000e+00> : vector<8x384xf32>
    %312 = tpu.matmul %309, %29, %cst_99 {dimension_numbers = #tpu.dot_dimension_numbers<[1], [0], [0], [1], [0, 0, 1, 1], [], []>} : vector<8x128xf32>, vector<128x384xf32>, vector<8x384xf32> -> vector<8x384xf32>
    %313 = vector.broadcast %30 : vector<1x384xf32> to vector<8x384xf32>
    %314 = arith.addf %312, %313 : vector<8x384xf32>
    %315 = vector.extract_strided_slice %311 {offsets = [0, 0], sizes = [8, 128], strides = [1, 1]} : vector<8x384xf32> to vector<8x128xf32>
    %316 = vector.extract_strided_slice %314 {offsets = [0, 0], sizes = [8, 128], strides = [1, 1]} : vector<8x384xf32> to vector<8x128xf32>
    %317 = arith.addf %315, %316 : vector<8x128xf32>
    %318 = arith.negf %317 : vector<8x128xf32>
    %319 = math.exp %318 : vector<8x128xf32>
    %cst_100 = arith.constant 1.000000e+00 : f32
    %320 = vector.broadcast %cst_100 : f32 to vector<8x128xf32>
    %321 = arith.addf %320, %319 : vector<8x128xf32>
    %322 = arith.divf %320, %321 : vector<8x128xf32>
    %323 = vector.extract_strided_slice %311 {offsets = [0, 128], sizes = [8, 128], strides = [1, 1]} : vector<8x384xf32> to vector<8x128xf32>
    %324 = vector.extract_strided_slice %314 {offsets = [0, 128], sizes = [8, 128], strides = [1, 1]} : vector<8x384xf32> to vector<8x128xf32>
    %325 = arith.addf %323, %324 : vector<8x128xf32>
    %326 = arith.negf %325 : vector<8x128xf32>
    %327 = math.exp %326 : vector<8x128xf32>
    %cst_101 = arith.constant 1.000000e+00 : f32
    %328 = vector.broadcast %cst_101 : f32 to vector<8x128xf32>
    %329 = arith.addf %328, %327 : vector<8x128xf32>
    %330 = arith.divf %328, %329 : vector<8x128xf32>
    %331 = vector.extract_strided_slice %311 {offsets = [0, 256], sizes = [8, 128], strides = [1, 1]} : vector<8x384xf32> to vector<8x128xf32>
    %332 = vector.extract_strided_slice %314 {offsets = [0, 256], sizes = [8, 128], strides = [1, 1]} : vector<8x384xf32> to vector<8x128xf32>
    %333 = arith.mulf %322, %332 : vector<8x128xf32>
    %334 = arith.addf %331, %333 : vector<8x128xf32>
    %335 = math.tanh %334 : vector<8x128xf32>
    %cst_102 = arith.constant 1.000000e+00 : f32
    %336 = vector.broadcast %cst_102 : f32 to vector<8x128xf32>
    %337 = arith.subf %336, %330 : vector<8x128xf32>
    %338 = arith.mulf %337, %335 : vector<8x128xf32>
    %339 = arith.mulf %330, %309 : vector<8x128xf32>
    %340 = arith.addf %338, %339 : vector<8x128xf32>
    %c72_103 = arith.constant 72 : index
    %c0_104 = arith.constant 0 : index
    %341 = vector.load %arg17[%c72_103, %c0_104] : memref<128x128xf32, #tpu.memory_space<vmem>>, vector<8x128xf32>
    tpu.vector_store %arg17[%c72_103, %c0_104], %340 {strides = array<i32>} : memref<128x128xf32, #tpu.memory_space<vmem>>, vector<8x128xf32>,
    %c80 = arith.constant 80 : index
    %c0_105 = arith.constant 0 : index
    %342 = vector.load %arg16[%c80, %c0_105] : memref<128x384xf32, #tpu.memory_space<vmem>>, vector<8x384xf32>
    %cst_106 = arith.constant dense<0.000000e+00> : vector<8x384xf32>
    %343 = tpu.matmul %340, %29, %cst_106 {dimension_numbers = #tpu.dot_dimension_numbers<[1], [0], [0], [1], [0, 0, 1, 1], [], []>} : vector<8x128xf32>, vector<128x384xf32>, vector<8x384xf32> -> vector<8x384xf32>
    %344 = vector.broadcast %30 : vector<1x384xf32> to vector<8x384xf32>
    %345 = arith.addf %343, %344 : vector<8x384xf32>
    %346 = vector.extract_strided_slice %342 {offsets = [0, 0], sizes = [8, 128], strides = [1, 1]} : vector<8x384xf32> to vector<8x128xf32>
    %347 = vector.extract_strided_slice %345 {offsets = [0, 0], sizes = [8, 128], strides = [1, 1]} : vector<8x384xf32> to vector<8x128xf32>
    %348 = arith.addf %346, %347 : vector<8x128xf32>
    %349 = arith.negf %348 : vector<8x128xf32>
    %350 = math.exp %349 : vector<8x128xf32>
    %cst_107 = arith.constant 1.000000e+00 : f32
    %351 = vector.broadcast %cst_107 : f32 to vector<8x128xf32>
    %352 = arith.addf %351, %350 : vector<8x128xf32>
    %353 = arith.divf %351, %352 : vector<8x128xf32>
    %354 = vector.extract_strided_slice %342 {offsets = [0, 128], sizes = [8, 128], strides = [1, 1]} : vector<8x384xf32> to vector<8x128xf32>
    %355 = vector.extract_strided_slice %345 {offsets = [0, 128], sizes = [8, 128], strides = [1, 1]} : vector<8x384xf32> to vector<8x128xf32>
    %356 = arith.addf %354, %355 : vector<8x128xf32>
    %357 = arith.negf %356 : vector<8x128xf32>
    %358 = math.exp %357 : vector<8x128xf32>
    %cst_108 = arith.constant 1.000000e+00 : f32
    %359 = vector.broadcast %cst_108 : f32 to vector<8x128xf32>
    %360 = arith.addf %359, %358 : vector<8x128xf32>
    %361 = arith.divf %359, %360 : vector<8x128xf32>
    %362 = vector.extract_strided_slice %342 {offsets = [0, 256], sizes = [8, 128], strides = [1, 1]} : vector<8x384xf32> to vector<8x128xf32>
    %363 = vector.extract_strided_slice %345 {offsets = [0, 256], sizes = [8, 128], strides = [1, 1]} : vector<8x384xf32> to vector<8x128xf32>
    %364 = arith.mulf %353, %363 : vector<8x128xf32>
    %365 = arith.addf %362, %364 : vector<8x128xf32>
    %366 = math.tanh %365 : vector<8x128xf32>
    %cst_109 = arith.constant 1.000000e+00 : f32
    %367 = vector.broadcast %cst_109 : f32 to vector<8x128xf32>
    %368 = arith.subf %367, %361 : vector<8x128xf32>
    %369 = arith.mulf %368, %366 : vector<8x128xf32>
    %370 = arith.mulf %361, %340 : vector<8x128xf32>
    %371 = arith.addf %369, %370 : vector<8x128xf32>
    %c80_110 = arith.constant 80 : index
    %c0_111 = arith.constant 0 : index
    %372 = vector.load %arg17[%c80_110, %c0_111] : memref<128x128xf32, #tpu.memory_space<vmem>>, vector<8x128xf32>
    tpu.vector_store %arg17[%c80_110, %c0_111], %371 {strides = array<i32>} : memref<128x128xf32, #tpu.memory_space<vmem>>, vector<8x128xf32>,
    %c88 = arith.constant 88 : index
    %c0_112 = arith.constant 0 : index
    %373 = vector.load %arg16[%c88, %c0_112] : memref<128x384xf32, #tpu.memory_space<vmem>>, vector<8x384xf32>
    %cst_113 = arith.constant dense<0.000000e+00> : vector<8x384xf32>
    %374 = tpu.matmul %371, %29, %cst_113 {dimension_numbers = #tpu.dot_dimension_numbers<[1], [0], [0], [1], [0, 0, 1, 1], [], []>} : vector<8x128xf32>, vector<128x384xf32>, vector<8x384xf32> -> vector<8x384xf32>
    %375 = vector.broadcast %30 : vector<1x384xf32> to vector<8x384xf32>
    %376 = arith.addf %374, %375 : vector<8x384xf32>
    %377 = vector.extract_strided_slice %373 {offsets = [0, 0], sizes = [8, 128], strides = [1, 1]} : vector<8x384xf32> to vector<8x128xf32>
    %378 = vector.extract_strided_slice %376 {offsets = [0, 0], sizes = [8, 128], strides = [1, 1]} : vector<8x384xf32> to vector<8x128xf32>
    %379 = arith.addf %377, %378 : vector<8x128xf32>
    %380 = arith.negf %379 : vector<8x128xf32>
    %381 = math.exp %380 : vector<8x128xf32>
    %cst_114 = arith.constant 1.000000e+00 : f32
    %382 = vector.broadcast %cst_114 : f32 to vector<8x128xf32>
    %383 = arith.addf %382, %381 : vector<8x128xf32>
    %384 = arith.divf %382, %383 : vector<8x128xf32>
    %385 = vector.extract_strided_slice %373 {offsets = [0, 128], sizes = [8, 128], strides = [1, 1]} : vector<8x384xf32> to vector<8x128xf32>
    %386 = vector.extract_strided_slice %376 {offsets = [0, 128], sizes = [8, 128], strides = [1, 1]} : vector<8x384xf32> to vector<8x128xf32>
    %387 = arith.addf %385, %386 : vector<8x128xf32>
    %388 = arith.negf %387 : vector<8x128xf32>
    %389 = math.exp %388 : vector<8x128xf32>
    %cst_115 = arith.constant 1.000000e+00 : f32
    %390 = vector.broadcast %cst_115 : f32 to vector<8x128xf32>
    %391 = arith.addf %390, %389 : vector<8x128xf32>
    %392 = arith.divf %390, %391 : vector<8x128xf32>
    %393 = vector.extract_strided_slice %373 {offsets = [0, 256], sizes = [8, 128], strides = [1, 1]} : vector<8x384xf32> to vector<8x128xf32>
    %394 = vector.extract_strided_slice %376 {offsets = [0, 256], sizes = [8, 128], strides = [1, 1]} : vector<8x384xf32> to vector<8x128xf32>
    %395 = arith.mulf %384, %394 : vector<8x128xf32>
    %396 = arith.addf %393, %395 : vector<8x128xf32>
    %397 = math.tanh %396 : vector<8x128xf32>
    %cst_116 = arith.constant 1.000000e+00 : f32
    %398 = vector.broadcast %cst_116 : f32 to vector<8x128xf32>
    %399 = arith.subf %398, %392 : vector<8x128xf32>
    %400 = arith.mulf %399, %397 : vector<8x128xf32>
    %401 = arith.mulf %392, %371 : vector<8x128xf32>
    %402 = arith.addf %400, %401 : vector<8x128xf32>
    %c88_117 = arith.constant 88 : index
    %c0_118 = arith.constant 0 : index
    %403 = vector.load %arg17[%c88_117, %c0_118] : memref<128x128xf32, #tpu.memory_space<vmem>>, vector<8x128xf32>
    tpu.vector_store %arg17[%c88_117, %c0_118], %402 {strides = array<i32>} : memref<128x128xf32, #tpu.memory_space<vmem>>, vector<8x128xf32>,
    %c96 = arith.constant 96 : index
    %c0_119 = arith.constant 0 : index
    %404 = vector.load %arg16[%c96, %c0_119] : memref<128x384xf32, #tpu.memory_space<vmem>>, vector<8x384xf32>
    %cst_120 = arith.constant dense<0.000000e+00> : vector<8x384xf32>
    %405 = tpu.matmul %402, %29, %cst_120 {dimension_numbers = #tpu.dot_dimension_numbers<[1], [0], [0], [1], [0, 0, 1, 1], [], []>} : vector<8x128xf32>, vector<128x384xf32>, vector<8x384xf32> -> vector<8x384xf32>
    %406 = vector.broadcast %30 : vector<1x384xf32> to vector<8x384xf32>
    %407 = arith.addf %405, %406 : vector<8x384xf32>
    %408 = vector.extract_strided_slice %404 {offsets = [0, 0], sizes = [8, 128], strides = [1, 1]} : vector<8x384xf32> to vector<8x128xf32>
    %409 = vector.extract_strided_slice %407 {offsets = [0, 0], sizes = [8, 128], strides = [1, 1]} : vector<8x384xf32> to vector<8x128xf32>
    %410 = arith.addf %408, %409 : vector<8x128xf32>
    %411 = arith.negf %410 : vector<8x128xf32>
    %412 = math.exp %411 : vector<8x128xf32>
    %cst_121 = arith.constant 1.000000e+00 : f32
    %413 = vector.broadcast %cst_121 : f32 to vector<8x128xf32>
    %414 = arith.addf %413, %412 : vector<8x128xf32>
    %415 = arith.divf %413, %414 : vector<8x128xf32>
    %416 = vector.extract_strided_slice %404 {offsets = [0, 128], sizes = [8, 128], strides = [1, 1]} : vector<8x384xf32> to vector<8x128xf32>
    %417 = vector.extract_strided_slice %407 {offsets = [0, 128], sizes = [8, 128], strides = [1, 1]} : vector<8x384xf32> to vector<8x128xf32>
    %418 = arith.addf %416, %417 : vector<8x128xf32>
    %419 = arith.negf %418 : vector<8x128xf32>
    %420 = math.exp %419 : vector<8x128xf32>
    %cst_122 = arith.constant 1.000000e+00 : f32
    %421 = vector.broadcast %cst_122 : f32 to vector<8x128xf32>
    %422 = arith.addf %421, %420 : vector<8x128xf32>
    %423 = arith.divf %421, %422 : vector<8x128xf32>
    %424 = vector.extract_strided_slice %404 {offsets = [0, 256], sizes = [8, 128], strides = [1, 1]} : vector<8x384xf32> to vector<8x128xf32>
    %425 = vector.extract_strided_slice %407 {offsets = [0, 256], sizes = [8, 128], strides = [1, 1]} : vector<8x384xf32> to vector<8x128xf32>
    %426 = arith.mulf %415, %425 : vector<8x128xf32>
    %427 = arith.addf %424, %426 : vector<8x128xf32>
    %428 = math.tanh %427 : vector<8x128xf32>
    %cst_123 = arith.constant 1.000000e+00 : f32
    %429 = vector.broadcast %cst_123 : f32 to vector<8x128xf32>
    %430 = arith.subf %429, %423 : vector<8x128xf32>
    %431 = arith.mulf %430, %428 : vector<8x128xf32>
    %432 = arith.mulf %423, %402 : vector<8x128xf32>
    %433 = arith.addf %431, %432 : vector<8x128xf32>
    %c96_124 = arith.constant 96 : index
    %c0_125 = arith.constant 0 : index
    %434 = vector.load %arg17[%c96_124, %c0_125] : memref<128x128xf32, #tpu.memory_space<vmem>>, vector<8x128xf32>
    tpu.vector_store %arg17[%c96_124, %c0_125], %433 {strides = array<i32>} : memref<128x128xf32, #tpu.memory_space<vmem>>, vector<8x128xf32>,
    %c104 = arith.constant 104 : index
    %c0_126 = arith.constant 0 : index
    %435 = vector.load %arg16[%c104, %c0_126] : memref<128x384xf32, #tpu.memory_space<vmem>>, vector<8x384xf32>
    %cst_127 = arith.constant dense<0.000000e+00> : vector<8x384xf32>
    %436 = tpu.matmul %433, %29, %cst_127 {dimension_numbers = #tpu.dot_dimension_numbers<[1], [0], [0], [1], [0, 0, 1, 1], [], []>} : vector<8x128xf32>, vector<128x384xf32>, vector<8x384xf32> -> vector<8x384xf32>
    %437 = vector.broadcast %30 : vector<1x384xf32> to vector<8x384xf32>
    %438 = arith.addf %436, %437 : vector<8x384xf32>
    %439 = vector.extract_strided_slice %435 {offsets = [0, 0], sizes = [8, 128], strides = [1, 1]} : vector<8x384xf32> to vector<8x128xf32>
    %440 = vector.extract_strided_slice %438 {offsets = [0, 0], sizes = [8, 128], strides = [1, 1]} : vector<8x384xf32> to vector<8x128xf32>
    %441 = arith.addf %439, %440 : vector<8x128xf32>
    %442 = arith.negf %441 : vector<8x128xf32>
    %443 = math.exp %442 : vector<8x128xf32>
    %cst_128 = arith.constant 1.000000e+00 : f32
    %444 = vector.broadcast %cst_128 : f32 to vector<8x128xf32>
    %445 = arith.addf %444, %443 : vector<8x128xf32>
    %446 = arith.divf %444, %445 : vector<8x128xf32>
    %447 = vector.extract_strided_slice %435 {offsets = [0, 128], sizes = [8, 128], strides = [1, 1]} : vector<8x384xf32> to vector<8x128xf32>
    %448 = vector.extract_strided_slice %438 {offsets = [0, 128], sizes = [8, 128], strides = [1, 1]} : vector<8x384xf32> to vector<8x128xf32>
    %449 = arith.addf %447, %448 : vector<8x128xf32>
    %450 = arith.negf %449 : vector<8x128xf32>
    %451 = math.exp %450 : vector<8x128xf32>
    %cst_129 = arith.constant 1.000000e+00 : f32
    %452 = vector.broadcast %cst_129 : f32 to vector<8x128xf32>
    %453 = arith.addf %452, %451 : vector<8x128xf32>
    %454 = arith.divf %452, %453 : vector<8x128xf32>
    %455 = vector.extract_strided_slice %435 {offsets = [0, 256], sizes = [8, 128], strides = [1, 1]} : vector<8x384xf32> to vector<8x128xf32>
    %456 = vector.extract_strided_slice %438 {offsets = [0, 256], sizes = [8, 128], strides = [1, 1]} : vector<8x384xf32> to vector<8x128xf32>
    %457 = arith.mulf %446, %456 : vector<8x128xf32>
    %458 = arith.addf %455, %457 : vector<8x128xf32>
    %459 = math.tanh %458 : vector<8x128xf32>
    %cst_130 = arith.constant 1.000000e+00 : f32
    %460 = vector.broadcast %cst_130 : f32 to vector<8x128xf32>
    %461 = arith.subf %460, %454 : vector<8x128xf32>
    %462 = arith.mulf %461, %459 : vector<8x128xf32>
    %463 = arith.mulf %454, %433 : vector<8x128xf32>
    %464 = arith.addf %462, %463 : vector<8x128xf32>
    %c104_131 = arith.constant 104 : index
    %c0_132 = arith.constant 0 : index
    %465 = vector.load %arg17[%c104_131, %c0_132] : memref<128x128xf32, #tpu.memory_space<vmem>>, vector<8x128xf32>
    tpu.vector_store %arg17[%c104_131, %c0_132], %464 {strides = array<i32>} : memref<128x128xf32, #tpu.memory_space<vmem>>, vector<8x128xf32>,
    %c112 = arith.constant 112 : index
    %c0_133 = arith.constant 0 : index
    %466 = vector.load %arg16[%c112, %c0_133] : memref<128x384xf32, #tpu.memory_space<vmem>>, vector<8x384xf32>
    %cst_134 = arith.constant dense<0.000000e+00> : vector<8x384xf32>
    %467 = tpu.matmul %464, %29, %cst_134 {dimension_numbers = #tpu.dot_dimension_numbers<[1], [0], [0], [1], [0, 0, 1, 1], [], []>} : vector<8x128xf32>, vector<128x384xf32>, vector<8x384xf32> -> vector<8x384xf32>
    %468 = vector.broadcast %30 : vector<1x384xf32> to vector<8x384xf32>
    %469 = arith.addf %467, %468 : vector<8x384xf32>
    %470 = vector.extract_strided_slice %466 {offsets = [0, 0], sizes = [8, 128], strides = [1, 1]} : vector<8x384xf32> to vector<8x128xf32>
    %471 = vector.extract_strided_slice %469 {offsets = [0, 0], sizes = [8, 128], strides = [1, 1]} : vector<8x384xf32> to vector<8x128xf32>
    %472 = arith.addf %470, %471 : vector<8x128xf32>
    %473 = arith.negf %472 : vector<8x128xf32>
    %474 = math.exp %473 : vector<8x128xf32>
    %cst_135 = arith.constant 1.000000e+00 : f32
    %475 = vector.broadcast %cst_135 : f32 to vector<8x128xf32>
    %476 = arith.addf %475, %474 : vector<8x128xf32>
    %477 = arith.divf %475, %476 : vector<8x128xf32>
    %478 = vector.extract_strided_slice %466 {offsets = [0, 128], sizes = [8, 128], strides = [1, 1]} : vector<8x384xf32> to vector<8x128xf32>
    %479 = vector.extract_strided_slice %469 {offsets = [0, 128], sizes = [8, 128], strides = [1, 1]} : vector<8x384xf32> to vector<8x128xf32>
    %480 = arith.addf %478, %479 : vector<8x128xf32>
    %481 = arith.negf %480 : vector<8x128xf32>
    %482 = math.exp %481 : vector<8x128xf32>
    %cst_136 = arith.constant 1.000000e+00 : f32
    %483 = vector.broadcast %cst_136 : f32 to vector<8x128xf32>
    %484 = arith.addf %483, %482 : vector<8x128xf32>
    %485 = arith.divf %483, %484 : vector<8x128xf32>
    %486 = vector.extract_strided_slice %466 {offsets = [0, 256], sizes = [8, 128], strides = [1, 1]} : vector<8x384xf32> to vector<8x128xf32>
    %487 = vector.extract_strided_slice %469 {offsets = [0, 256], sizes = [8, 128], strides = [1, 1]} : vector<8x384xf32> to vector<8x128xf32>
    %488 = arith.mulf %477, %487 : vector<8x128xf32>
    %489 = arith.addf %486, %488 : vector<8x128xf32>
    %490 = math.tanh %489 : vector<8x128xf32>
    %cst_137 = arith.constant 1.000000e+00 : f32
    %491 = vector.broadcast %cst_137 : f32 to vector<8x128xf32>
    %492 = arith.subf %491, %485 : vector<8x128xf32>
    %493 = arith.mulf %492, %490 : vector<8x128xf32>
    %494 = arith.mulf %485, %464 : vector<8x128xf32>
    %495 = arith.addf %493, %494 : vector<8x128xf32>
    %c112_138 = arith.constant 112 : index
    %c0_139 = arith.constant 0 : index
    %496 = vector.load %arg17[%c112_138, %c0_139] : memref<128x128xf32, #tpu.memory_space<vmem>>, vector<8x128xf32>
    tpu.vector_store %arg17[%c112_138, %c0_139], %495 {strides = array<i32>} : memref<128x128xf32, #tpu.memory_space<vmem>>, vector<8x128xf32>,
    %c120 = arith.constant 120 : index
    %c0_140 = arith.constant 0 : index
    %497 = vector.load %arg16[%c120, %c0_140] : memref<128x384xf32, #tpu.memory_space<vmem>>, vector<8x384xf32>
    %cst_141 = arith.constant dense<0.000000e+00> : vector<8x384xf32>
    %498 = tpu.matmul %495, %29, %cst_141 {dimension_numbers = #tpu.dot_dimension_numbers<[1], [0], [0], [1], [0, 0, 1, 1], [], []>} : vector<8x128xf32>, vector<128x384xf32>, vector<8x384xf32> -> vector<8x384xf32>
    %499 = vector.broadcast %30 : vector<1x384xf32> to vector<8x384xf32>
    %500 = arith.addf %498, %499 : vector<8x384xf32>
    %501 = vector.extract_strided_slice %497 {offsets = [0, 0], sizes = [8, 128], strides = [1, 1]} : vector<8x384xf32> to vector<8x128xf32>
    %502 = vector.extract_strided_slice %500 {offsets = [0, 0], sizes = [8, 128], strides = [1, 1]} : vector<8x384xf32> to vector<8x128xf32>
    %503 = arith.addf %501, %502 : vector<8x128xf32>
    %504 = arith.negf %503 : vector<8x128xf32>
    %505 = math.exp %504 : vector<8x128xf32>
    %cst_142 = arith.constant 1.000000e+00 : f32
    %506 = vector.broadcast %cst_142 : f32 to vector<8x128xf32>
    %507 = arith.addf %506, %505 : vector<8x128xf32>
    %508 = arith.divf %506, %507 : vector<8x128xf32>
    %509 = vector.extract_strided_slice %497 {offsets = [0, 128], sizes = [8, 128], strides = [1, 1]} : vector<8x384xf32> to vector<8x128xf32>
    %510 = vector.extract_strided_slice %500 {offsets = [0, 128], sizes = [8, 128], strides = [1, 1]} : vector<8x384xf32> to vector<8x128xf32>
    %511 = arith.addf %509, %510 : vector<8x128xf32>
    %512 = arith.negf %511 : vector<8x128xf32>
    %513 = math.exp %512 : vector<8x128xf32>
    %cst_143 = arith.constant 1.000000e+00 : f32
    %514 = vector.broadcast %cst_143 : f32 to vector<8x128xf32>
    %515 = arith.addf %514, %513 : vector<8x128xf32>
    %516 = arith.divf %514, %515 : vector<8x128xf32>
    %517 = vector.extract_strided_slice %497 {offsets = [0, 256], sizes = [8, 128], strides = [1, 1]} : vector<8x384xf32> to vector<8x128xf32>
    %518 = vector.extract_strided_slice %500 {offsets = [0, 256], sizes = [8, 128], strides = [1, 1]} : vector<8x384xf32> to vector<8x128xf32>
    %519 = arith.mulf %508, %518 : vector<8x128xf32>
    %520 = arith.addf %517, %519 : vector<8x128xf32>
    %521 = math.tanh %520 : vector<8x128xf32>
    %cst_144 = arith.constant 1.000000e+00 : f32
    %522 = vector.broadcast %cst_144 : f32 to vector<8x128xf32>
    %523 = arith.subf %522, %516 : vector<8x128xf32>
    %524 = arith.mulf %523, %521 : vector<8x128xf32>
    %525 = arith.mulf %516, %495 : vector<8x128xf32>
    %526 = arith.addf %524, %525 : vector<8x128xf32>
    %c120_145 = arith.constant 120 : index
    %c0_146 = arith.constant 0 : index
    %527 = vector.load %arg17[%c120_145, %c0_146] : memref<128x128xf32, #tpu.memory_space<vmem>>, vector<8x128xf32>
    tpu.vector_store %arg17[%c120_145, %c0_146], %526 {strides = array<i32>} : memref<128x128xf32, #tpu.memory_space<vmem>>, vector<8x128xf32>,
    %c0_147 = arith.constant 0 : index
    %c0_148 = arith.constant 0 : index
    %528 = vector.load %arg17[%c0_147, %c0_148] : memref<128x128xf32, #tpu.memory_space<vmem>>, vector<128x128xf32>
    %c0_149 = arith.constant 0 : index
    %c0_150 = arith.constant 0 : index
    %529 = vector.load %arg10[%c0_149, %c0_150] : memref<128x256xf32, #tpu.memory_space<vmem>>, vector<128x256xf32>
    %cst_151 = arith.constant dense<0.000000e+00> : vector<128x256xf32>
    %530 = tpu.matmul %528, %529, %cst_151 {dimension_numbers = #tpu.dot_dimension_numbers<[1], [0], [0], [1], [0, 0, 1, 1], [], []>} : vector<128x128xf32>, vector<128x256xf32>, vector<128x256xf32> -> vector<128x256xf32>
    %c0_152 = arith.constant 0 : index
    %c0_153 = arith.constant 0 : index
    %531 = vector.load %arg11[%c0_152, %c0_153] : memref<1x256xf32, #tpu.memory_space<vmem>>, vector<1x256xf32>
    %532 = vector.broadcast %531 : vector<1x256xf32> to vector<128x256xf32>
    %533 = arith.addf %530, %532 : vector<128x256xf32>
    %c0_154 = arith.constant 0 : index
    %c0_155 = arith.constant 0 : index
    %534 = vector.load %arg15[%c0_154, %c0_155] : memref<128x256xf32, #tpu.memory_space<vmem>>, vector<128x256xf32>
    tpu.vector_store %arg15[%c0_154, %c0_155], %533 {strides = array<i32>} : memref<128x256xf32, #tpu.memory_space<vmem>>, vector<128x256xf32>,
    return
  }
}

</mosaic_0001>

<bundles_post_ra>
// kernel: s_vae_couple_forward.2
= control target key start
LH: loop header
LB: loop body
LE: loop exit
PB: predicated region body
PF: predicated region fallthrough
CT: control target
= control target key end

     0   :  { %v7262_v3 = vmov 0.0   ;;  %vm70_vm0 = vcmask 130048   ;;  %v7264_v17 = vmov 0.0|0.0   ;;  %vm5863_vm1 = vmmov 0   ;;  %s5864_s14 = smov 120   ;;  %s7251_s1 = inlined_call_operand.vmem [shape: f32[16,384], index: 1, kind: input, shape index: {}]   ;;  %s7252_s2 = inlined_call_operand.vmem [shape: f32[16,384], index: 2, kind: input, shape index: {}]   ;;  %s7253_s0 = inlined_call_operand.vmem [shape: f32[120,16], index: 0, kind: input, shape index: {}]   ;;  %s7254_s4 = inlined_call_operand.vmem [shape: f32[128,384], index: 4, kind: input, shape index: {}]   ;;  %s7255_s3 = inlined_call_operand.vmem [shape: f32[1,384], index: 3, kind: input, shape index: {}]   ;;  %s7256_s5 = inlined_call_operand.vmem [shape: f32[1,384], index: 5, kind: input, shape index: {}]   ;;  %s7257_s6 = inlined_call_operand.vmem [shape: f32[128,17], index: 6, kind: input, shape index: {}]   ;;  %s7258_s7 = inlined_call_operand.vmem [shape: f32[1,17], index: 7, kind: input, shape index: {}]   ;;  %s7259_s8 = inlined_call_operand.vmem [shape: f32[2,8], index: 8, kind: output, shape index: {0}]   ;;  %s7260_s10 = inlined_call_operand.vmem [shape: f32[2,8], index: 10, kind: output, shape index: {2}]   ;;  %s7261_s9 = inlined_call_operand.vmem [shape: f32[2,1], index: 9, kind: output, shape index: {1}]  }
   0x1   :  { %v48_v0 = vld [vmem:[%s7251_s1 + $0x8] sm:$0xff]  ;;  %v51_v1 = vld [vmem:[%s7251_s1 + $0x20] sm:$0xff]  ;;  %180 = vmatprep.mubr.f32.mxu0 %v7262_v3  ;;  %246 = vmatprep.mubr.f32.mxu1 %v7262_v3  ;;  %v50_v5 = vld [vmem:[%s7251_s1 + $0x18] sm:$0xff]  ;;  %vm3586_vm2 = vcmask 58368   ;;  %vm3629_vm4 = vcmask 1024  }
   0x2   :  { %v47_v2 = vld [vmem:[%s7251_s1] sm:$0xff]  ;;  %v4698_v4 = vpack.c.bf16 %v51_v1, %v48_v0  ;;  %v49_v7 = vld [vmem:[%s7251_s1 + $0x10] sm:$0xff]  ;;  %v52_v8 = vld [vmem:[%s7251_s1 + $0x28] sm:$0xff] }
   0x3   :  { %v4700_v6 = vpack.c.bf16 %v50_v5, %v47_v2  ;;  %v472_v9 = vld [vmem:[%s7252_s2 + $0x8] sm:$0xff]  ;;  %v475_v10 = vld [vmem:[%s7252_s2 + $0x20] sm:$0xff]  ;;  %v474_v12 = vld [vmem:[%s7252_s2 + $0x18] sm:$0xff]  ;;  %v4703_v15 = vpack.c.bf16 %v52_v8, %v49_v7 }
   0x4   :  { %4699 = vmatprep.subr.bf16.mxu0 %v4698_v4  ;;  %5576 = vmatprep.subr.bf16.mxu1 %v4698_v4  ;;  %v471_v11 = vld [vmem:[%s7252_s2] sm:$0xff]  ;;  %v5961_v14 = vld [vmem:[%s7253_s0 + $0x58] sm:$0xff]  ;;  %v4705_v16 = vpack.c.bf16 %v475_v10, %v472_v9  ;;  %v5972_v19 = vld [vmem:[%s7253_s0 + $0x8] sm:$0xff] }
   0x5   :  { %4701 = vmatpush1.bf16.msra.mxu0 %v4700_v6  ;;  %5577 = vmatpush1.bf16.msra.mxu1 %v4700_v6  ;;  %v5956_v13 = vld [vmem:[%s7253_s0] sm:$0xff]  ;;  %v4707_v18 = vpack.c.bf16 %v474_v12, %v471_v11  ;;  %v863_v21 = vld [vmem:[%s7254_s4 + $0x8] sm:$0xff]  ;;  %v5998_v24 = vld [vmem:[%s7253_s0 + $0x10] sm:$0xff] }
   0x6   :  { %4702 = vmatprep.subr.bf16.mxu1 %v7264_v17  ;;  %4706 = vmatprep.subr.bf16.mxu0 %v4705_v16  ;;  %v5977_v20 = vld [vmem:[%s7253_s0 + $0x60] sm:$0xff]  ;;  %v6003_v25 = vld [vmem:[%s7253_s0 + $0x68] sm:$0xff]  ;;  %v6015_v26 = vld [vmem:[%s7253_s0 + $0x18] sm:$0xff] }
   0x7   :  { %v866_v22 = vld [vmem:[%s7254_s4 + $0x20] sm:$0xff]  ;;  %v6020_v27 = vld [vmem:[%s7253_s0 + $0x70] sm:$0xff]  ;;  %v476_v29 = vld [vmem:[%s7252_s2 + $0x28] sm:$0xff] }
   0x8   :  { %3643 = vmatmul.mubr.msk.f32.vlgmr.msra.gmra.mrb[0].mxu0 %vm70_vm0, %v5956_v13  ;;  %3654 = vmatmul.mubr.msk.f32.vlgmr.msra.gmra.mrb[0].mxu1 %vm70_vm0, %v5961_v14  ;;  %v5987_v23 = vpack.c.bf16 %v866_v22, %v863_v21  ;;  %v473_v28 = vld [vmem:[%s7252_s2 + $0x10] sm:$0xff]  ;;  %v6038_v30 = vld [vmem:[%s7253_s0 + $0x20] sm:$0xff]  ;;  %v6048_v32 = vld [vmem:[%s7253_s0 + $0x28] sm:$0xff] }
   0x9   :  { %4704 = vmatpush3.bf16.msra.mxu1 %v4703_v15  ;;  %186 = vmatprep.mubr.f32.mxu0 %v7262_v3  ;;  %v4710_v31 = vpack.c.bf16 %v476_v29, %v473_v28  ;;  %v6063_v33 = vld [vmem:[%s7253_s0 + $0x30] sm:$0xff]  ;;  %v6075_v34 = vld [vmem:[%s7253_s0 + $0x38] sm:$0xff]  ;;  %v6087_v35 = vld [vmem:[%s7253_s0 + $0x40] sm:$0xff] }
   0xa   :  { %252 = vmatprep.mubr.f32.mxu1 %v7262_v3  ;;  %4708 = vmatpush1.bf16.msra.mxu0 %v4707_v18  ;;  %v6099_v36 = vld [vmem:[%s7253_s0 + $0x48] sm:$0xff]  ;;  %v6111_v37 = vld [vmem:[%s7253_s0 + $0x50] sm:$0xff]  ;;  %v862_v38 = vld [vmem:[%s7254_s4] sm:$0xff] }
   0xb   :  { %4709 = vmatprep.subr.bf16.mxu1 %v7264_v17  ;;  %4713 = vmatprep.subr.bf16.mxu0 %v5987_v23  ;;  %v865_v39 = vld [vmem:[%s7254_s4 + $0x18] sm:$0xff]  ;;  %v872_v41 = vld [vmem:[%s7254_s4 + $0x50] sm:$0xff]  ;;  %v871_v45 = vld [vmem:[%s7254_s4 + $0x48] sm:$0xff] }
   0xc   :  { %3644 = vmatmul.mubr.msk.f32.gmra.mrb[2].mxu0 %vm70_vm0, %v5972_v19  ;;  %3655 = vmatmul.mubr.msk.f32.gmra.mrb[2].mxu1 %vm70_vm0, %v5977_v20  ;;  %v869_v40 = vld [vmem:[%s7254_s4 + $0x38] sm:$0xff]  ;;  %v6132_v42 = vpack.c.bf16 %v865_v39, %v862_v38  ;;  %v868_v44 = vld [vmem:[%s7254_s4 + $0x30] sm:$0xff]  ;;  %v875_v46 = vld [vmem:[%s7254_s4 + $0x68] sm:$0xff] }
   0xd   :  { %192 = vmatprep.mubr.f32.mxu0 %v7262_v3  ;;  %258 = vmatprep.mubr.f32.mxu1 %v7262_v3  ;;  %v6134_v43 = vpack.c.bf16 %v872_v41, %v869_v40  ;;  %v878_v47 = vld [vmem:[%s7254_s4 + $0x80] sm:$0xff]  ;;  %v6156_v48 = vpack.c.bf16 %v871_v45, %v868_v44  ;;  %v877_v51 = vld [vmem:[%s7254_s4 + $0x78] sm:$0xff]  ;;  %v884_v53 = vld [vmem:[%s7254_s4 + $0xb0] sm:$0xff] }
   0xe   :  { %v6159_v49 = vpack.c.bf16 %v878_v47, %v875_v46  ;;  %v874_v50 = vld [vmem:[%s7254_s4 + $0x60] sm:$0xff]  ;;  %v881_v52 = vld [vmem:[%s7254_s4 + $0x98] sm:$0xff]  ;;  %v880_v56 = vld [vmem:[%s7254_s4 + $0x90] sm:$0xff] }
   0xf   :  { %v6181_v54 = vpack.c.bf16 %v877_v51, %v874_v50  ;;  %v6184_v55 = vpack.c.bf16 %v884_v53, %v881_v52  ;;  %v883_v57 = vld [vmem:[%s7254_s4 + $0xa8] sm:$0xff]  ;;  %v890_v59 = vld [vmem:[%s7254_s4 + $0xe0] sm:$0xff]  ;;  %v889_v63 = vld [vmem:[%s7254_s4 + $0xd8] sm:$0xff] }
  0x10   :  { %3645 = vmatmul.mubr.msk.f32.gmra.mrb[4].mxu0 %vm70_vm0, %v5998_v24  ;;  %3656 = vmatmul.mubr.msk.f32.gmra.mrb[4].mxu1 %vm70_vm0, %v6003_v25  ;;  %v887_v58 = vld [vmem:[%s7254_s4 + $0xc8] sm:$0xff]  ;;  %v6206_v60 = vpack.c.bf16 %v883_v57, %v880_v56  ;;  %v886_v62 = vld [vmem:[%s7254_s4 + $0xc0] sm:$0xff]  ;;  %v893_v0 = vld [vmem:[%s7254_s4 + $0xf8] sm:$0xff] }
  0x11   :  { %198 = vmatprep.mubr.f32.mxu0 %v7262_v3  ;;  %264 = vmatprep.mubr.f32.mxu1 %v7262_v3  ;;  %v6209_v61 = vpack.c.bf16 %v890_v59, %v887_v58  ;;  %v896_v1 = vld [vmem:[%s7254_s4 + $0x110] sm:$0xff]  ;;  %v6231_v2 = vpack.c.bf16 %v889_v63, %v886_v62  ;;  %v895_v6 = vld [vmem:[%s7254_s4 + $0x108] sm:$0xff]  ;;  %v902_v8 = vld [vmem:[%s7254_s4 + $0x140] sm:$0xff] }
  0x12   :  { %v6234_v4 = vpack.c.bf16 %v896_v1, %v893_v0  ;;  %v892_v5 = vld [vmem:[%s7254_s4 + $0xf0] sm:$0xff]  ;;  %v899_v7 = vld [vmem:[%s7254_s4 + $0x128] sm:$0xff]  ;;  %v898_v11 = vld [vmem:[%s7254_s4 + $0x120] sm:$0xff] }
  0x13   :  { %v6256_v9 = vpack.c.bf16 %v895_v6, %v892_v5  ;;  %v6259_v10 = vpack.c.bf16 %v902_v8, %v899_v7  ;;  %v901_v12 = vld [vmem:[%s7254_s4 + $0x138] sm:$0xff]  ;;  %v908_v16 = vld [vmem:[%s7254_s4 + $0x170] sm:$0xff]  ;;  %v907_v28 = vld [vmem:[%s7254_s4 + $0x168] sm:$0xff] }
  0x14   :  { %3646 = vmatmul.mubr.msk.f32.gmra.mrb[6].mxu0 %vm70_vm0, %v6015_v26  ;;  %3657 = vmatmul.mubr.msk.f32.gmra.mrb[6].mxu1 %vm70_vm0, %v6020_v27  ;;  %v905_v15 = vld [vmem:[%s7254_s4 + $0x158] sm:$0xff]  ;;  %v6281_v18 = vpack.c.bf16 %v901_v12, %v898_v11  ;;  %v904_v22 = vld [vmem:[%s7254_s4 + $0x150] sm:$0xff]  ;;  %v870_v40 = vld [vmem:[%s7254_s4 + $0x40] sm:$0xff] }
  0x15   :  { %204 = vmatprep.mubr.f32.mxu0 %v7262_v3  ;;  %4044 = vmatprep.mubr.msk.f32.mxu1 %vm5863_vm1, %v7262_v3  ;;  %v6284_v21 = vpack.c.bf16 %v908_v16, %v905_v15  ;;  %v864_v29 = vld [vmem:[%s7254_s4 + $0x10] sm:$0xff]  ;;  %v6306_v38 = vpack.c.bf16 %v907_v28, %v904_v22  ;;  %v873_v41 = vld [vmem:[%s7254_s4 + $0x58] sm:$0xff]  ;;  %v879_v46 = vld [vmem:[%s7254_s4 + $0x88] sm:$0xff] }
  0x16   :  { %v6335_v44 = vpack.c.bf16 %v873_v41, %v870_v40  ;;  %v876_v45 = vld [vmem:[%s7254_s4 + $0x70] sm:$0xff]  ;;  %v882_v47 = vld [vmem:[%s7254_s4 + $0xa0] sm:$0xff]  ;;  %v885_v50 = vld [vmem:[%s7254_s4 + $0xb8] sm:$0xff] }
  0x17   :  { %v888_v51 = vld [vmem:[%s7254_s4 + $0xd0] sm:$0xff]  ;;  %v891_v52 = vld [vmem:[%s7254_s4 + $0xe8] sm:$0xff]  ;;  %v894_v53 = vld [vmem:[%s7254_s4 + $0x100] sm:$0xff] }
  0x18   :  { %3647 = vmatmul.mubr.msk.f32.gmra.mrb[8].mxu0 %vm70_vm0, %v6038_v30  ;;  %4045 = vmatmul.mubr.msk.f32.vlgmr.msra.gmra.mrb[8].mxu1 %vm70_vm0, %v5956_v13  ;;  %v897_v56 = vld [vmem:[%s7254_s4 + $0x118] sm:$0xff]  ;;  %v900_v57 = vld [vmem:[%s7254_s4 + $0x130] sm:$0xff]  ;;  %v903_v58 = vld [vmem:[%s7254_s4 + $0x148] sm:$0xff] }
  0x19   :  { %4711 = vmatpush3.bf16.msra.mxu1 %v4710_v31  ;;  %210 = vmatprep.mubr.f32.mxu0 %v7262_v3  ;;  %v867_v31 = vld [vmem:[%s7254_s4 + $0x28] sm:$0xff]  ;;  %v906_v59 = vld [vmem:[%s7254_s4 + $0x160] sm:$0xff]  ;;  %v909_v62 = vld [vmem:[%s7254_s4 + $0x178] sm:$0xff] }
  0x1a   :  { %4047 = vmatprep.mubr.msk.f32.mxu1 %vm5863_vm1, %v7262_v3  ;;  %4744 = vmatprep.subr.bf16.mxu1 %v7264_v17  ;;  %v6316_v39 = vpack.c.bf16 %v867_v31, %v864_v29  ;;  %v6534_v6 = vld [vmem:[%s7255_s3] sm:$0x7] }
  0x1c   :  { %3648 = vmatmul.mubr.msk.f32.gmra.mrb[10].mxu0 %vm70_vm0, %v6048_v32  ;;  %4048 = vmatmul.mubr.msk.f32.gmra.mrb[10].mxu1 %vm70_vm0, %v5972_v19 }
  0x1d   :  { %216 = vmatprep.mubr.f32.mxu0 %v7262_v3  ;;  %4050 = vmatprep.mubr.msk.f32.mxu1 %vm5863_vm1, %v7262_v3 }
  0x20   :  { %3649 = vmatmul.mubr.msk.f32.gmra.mrb[12].mxu0 %vm70_vm0, %v6063_v33  ;;  %4051 = vmatmul.mubr.msk.f32.gmra.mrb[12].mxu1 %vm70_vm0, %v5998_v24 }
  0x21   :  { %222 = vmatprep.mubr.f32.mxu0 %v7262_v3  ;;  %4053 = vmatprep.mubr.msk.f32.mxu1 %vm5863_vm1, %v7262_v3 }
  0x24   :  { %3650 = vmatmul.mubr.msk.f32.gmra.mrb[14].mxu0 %vm70_vm0, %v6075_v34  ;;  %4054 = vmatmul.mubr.msk.f32.gmra.mrb[14].mxu1 %vm70_vm0, %v6015_v26 }
  0x25   :  { %228 = vmatprep.mubr.f32.mxu0 %v7262_v3  ;;  %4056 = vmatprep.mubr.msk.f32.mxu1 %vm5863_vm1, %v7262_v3 }
  0x28   :  { %3651 = vmatmul.mubr.msk.f32.gmra.mrb[16].mxu0 %vm70_vm0, %v6087_v35  ;;  %4057 = vmatmul.mubr.msk.f32.gmra.mrb[16].mxu1 %vm70_vm0, %v6038_v30 }
  0x29   :  { %234 = vmatprep.mubr.f32.mxu0 %v7262_v3  ;;  %4059 = vmatprep.mubr.msk.f32.mxu1 %vm5863_vm1, %v7262_v3 }
  0x2c   :  { %3652 = vmatmul.mubr.msk.f32.gmra.mrb[18].mxu0 %vm70_vm0, %v6099_v36  ;;  %4060 = vmatmul.mubr.msk.f32.gmra.mrb[18].mxu1 %vm70_vm0, %v6048_v32 }
  0x2d   :  { %240 = vmatprep.mubr.f32.mxu0 %v7262_v3  ;;  %4062 = vmatprep.mubr.msk.f32.mxu1 %vm5863_vm1, %v7262_v3 }
  0x30   :  { %3653 = vmatmul.mubr.msk.f32.gmra.mrb[20].mxu0 %vm70_vm0, %v6111_v37  ;;  %4063 = vmatmul.mubr.msk.f32.gmra.mrb[20].mxu1 %vm70_vm0, %v6063_v33 }
  0x31   :  { %4065 = vmatprep.mubr.msk.f32.mxu1 %vm5863_vm1, %v7262_v3  ;;  %586 = vmatprep.mubr.f32.mxu0 %v7262_v3 }
  0x34   :  { %4066 = vmatmul.mubr.msk.f32.gmra.mrb[22].mxu1 %vm70_vm0, %v6075_v34  ;;  %3673 = vmatmul.mubr.msk.f32.vlgmr.msra.gmra.mrb[22].mxu0 %vm70_vm0, %v5956_v13 }
  0x35   :  { %4068 = vmatprep.mubr.msk.f32.mxu1 %vm5863_vm1, %v7262_v3  ;;  %592 = vmatprep.mubr.f32.mxu0 %v7262_v3 }
  0x36   :  { %4715 = vmatpush1.bf16.msra.mxu0 %v6132_v42 }
  0x37   :  { %4717 = vmatprep.subr.bf16.mxu0 %v6134_v43 }
  0x38   :  { %4069 = vmatmul.mubr.msk.f32.gmra.mrb[24].mxu1 %vm70_vm0, %v6087_v35  ;;  %3674 = vmatmul.mubr.msk.f32.gmra.mrb[24].mxu0 %vm70_vm0, %v5972_v19 }
  0x39   :  { %4071 = vmatprep.mubr.msk.f32.mxu1 %vm5863_vm1, %v7262_v3  ;;  %598 = vmatprep.mubr.f32.mxu0 %v7262_v3 }
  0x3a   :  { %4719 = vmatpush1.bf16.msra.mxu0 %v6156_v48 }
  0x3b   :  { %4721 = vmatprep.subr.bf16.mxu0 %v6159_v49 }
  0x3c   :  { %4072 = vmatmul.mubr.msk.f32.gmra.mrb[26].mxu1 %vm70_vm0, %v6099_v36  ;;  %3675 = vmatmul.mubr.msk.f32.gmra.mrb[26].mxu0 %vm70_vm0, %v5998_v24 }
  0x3d   :  { %4074 = vmatprep.mubr.msk.f32.mxu1 %vm5863_vm1, %v7262_v3  ;;  %604 = vmatprep.mubr.f32.mxu0 %v7262_v3 }
  0x3e   :  { %4723 = vmatpush1.bf16.msra.mxu0 %v6181_v54 }
  0x3f   :  { %4725 = vmatprep.subr.bf16.mxu0 %v6184_v55 }
  0x40   :  { %4075 = vmatmul.mubr.msk.f32.gmra.mrb[28].mxu1 %vm70_vm0, %v6111_v37  ;;  %3676 = vmatmul.mubr.msk.f32.gmra.mrb[28].mxu0 %vm70_vm0, %v6015_v26 }
  0x41   :  { %4077 = vmatprep.mubr.msk.f32.mxu1 %vm5863_vm1, %v7262_v3  ;;  %610 = vmatprep.mubr.f32.mxu0 %v7262_v3 }
  0x42   :  { %4727 = vmatpush1.bf16.msra.mxu0 %v6206_v60 }
  0x43   :  { %4729 = vmatprep.subr.bf16.mxu0 %v6209_v61 }
  0x44   :  { %4078 = vmatmul.mubr.msk.f32.gmra.mrb[30].mxu1 %vm70_vm0, %v5961_v14  ;;  %3677 = vmatmul.mubr.msk.f32.gmra.mrb[20].mxu0 %vm70_vm0, %v6038_v30 }
  0x45   :  { %4080 = vmatprep.mubr.msk.f32.mxu1 %vm5863_vm1, %v7262_v3  ;;  %616 = vmatprep.mubr.f32.mxu0 %v7262_v3 }
  0x46   :  { %4731 = vmatpush1.bf16.msra.mxu0 %v6231_v2 }
  0x47   :  { %4733 = vmatprep.subr.bf16.mxu0 %v6234_v4 }
  0x48   :  { %4081 = vmatmul.mubr.msk.f32.gmra.mrb[32].mxu1 %vm70_vm0, %v5977_v20  ;;  %3678 = vmatmul.mubr.msk.f32.gmra.mrb[18].mxu0 %vm70_vm0, %v6048_v32 }
  0x49   :  { %4083 = vmatprep.mubr.msk.f32.mxu1 %vm5863_vm1, %v7262_v3  ;;  %622 = vmatprep.mubr.f32.mxu0 %v7262_v3 }
  0x4a   :  { %4735 = vmatpush1.bf16.msra.mxu0 %v6256_v9 }
  0x4b   :  { %4737 = vmatprep.subr.bf16.mxu0 %v6259_v10 }
  0x4c   :  { %4084 = vmatmul.mubr.msk.f32.gmra.mrb[34].mxu1 %vm70_vm0, %v6003_v25  ;;  %3679 = vmatmul.mubr.msk.f32.gmra.mrb[16].mxu0 %vm70_vm0, %v6063_v33 }
  0x4d   :  { %4086 = vmatprep.mubr.msk.f32.mxu1 %vm5863_vm1, %v7262_v3  ;;  %628 = vmatprep.mubr.f32.mxu0 %v7262_v3 }
  0x4e   :  { %4739 = vmatpush1.bf16.msra.mxu0 %v6281_v18 }
  0x4f   :  { %4741 = vmatprep.subr.bf16.mxu0 %v6284_v21 }
  0x50   :  { %4087 = vmatmul.mubr.msk.f32.gmra.mrb[36].mxu1 %vm70_vm0, %v6020_v27  ;;  %3680 = vmatmul.mubr.msk.f32.gmra.mrb[14].mxu0 %vm70_vm0, %v6075_v34 }
  0x51   :  { %634 = vmatprep.mubr.f32.mxu0 %v7262_v3  ;;  %4093 = vmatprep.mubr.msk.f32.mxu1 %vm5863_vm1, %v7262_v3 }
  0x52   :  { %4743 = vmatpush1.bf16.msra.mxu0 %v6306_v38 }
  0x53   :  { %4769 = vmatprep.subr.bf16.mxu0 %v5987_v23 }
  0x54   :  { %3681 = vmatmul.mubr.msk.f32.gmra.mrb[12].mxu0 %vm70_vm0, %v6087_v35  ;;  %4094 = vmatmul.mubr.msk.f32.vlgmr.msra.gmra.mrb[38].mxu1 %vm70_vm0, %v5956_v13  ;;  %v6351_v13 = vpack.c.bf16 %v879_v46, %v876_v45 }
  0x55   :  { %4746 = vmatpush3.bf16.msra.mxu1 %v6316_v39  ;;  %640 = vmatprep.mubr.f32.mxu0 %v7262_v3 }
  0x56   :  { %4096 = vmatprep.mubr.msk.f32.mxu1 %vm5863_vm1, %v7262_v3  ;;  %4747 = vmatprep.subr.bf16.mxu1 %v7264_v17 }
  0x58   :  { %3682 = vmatmul.mubr.msk.f32.gmra.mrb[10].mxu0 %vm70_vm0, %v6099_v36  ;;  %4097 = vmatmul.mubr.msk.f32.gmra.mrb[40].mxu1 %vm70_vm0, %v5972_v19  ;;  %v6368_v19 = vpack.c.bf16 %v885_v50, %v882_v47 }
  0x59   :  { %646 = vmatprep.mubr.f32.mxu0 %v7262_v3  ;;  %4099 = vmatprep.mubr.msk.f32.mxu1 %vm5863_vm1, %v7262_v3 }
  0x5a   :  { %4749 = vmatpush3.bf16.msra.mxu1 %v6335_v44 }
  0x5b   :  { %4750 = vmatprep.subr.bf16.mxu1 %v7264_v17 }
  0x5c   :  { %3683 = vmatmul.mubr.msk.f32.gmra.mrb[8].mxu0 %vm70_vm0, %v6111_v37  ;;  %4100 = vmatmul.mubr.msk.f32.gmra.mrb[42].mxu1 %vm70_vm0, %v5998_v24  ;;  %v6385_v24 = vpack.c.bf16 %v891_v52, %v888_v51 }
  0x5d   :  { %652 = vmatprep.mubr.f32.mxu0 %v7262_v3  ;;  %4102 = vmatprep.mubr.msk.f32.mxu1 %vm5863_vm1, %v7262_v3 }
  0x5e   :  { %4752 = vmatpush3.bf16.msra.mxu1 %v6351_v13 }
  0x5f   :  { %4753 = vmatprep.subr.bf16.mxu1 %v7264_v17 }
  0x60   :  { %3684 = vmatmul.mubr.msk.f32.gmra.mrb[6].mxu0 %vm70_vm0, %v5961_v14  ;;  %4103 = vmatmul.mubr.msk.f32.gmra.mrb[44].mxu1 %vm70_vm0, %v6015_v26  ;;  %v6402_v26 = vpack.c.bf16 %v897_v56, %v894_v53 }
  0x61   :  { %658 = vmatprep.mubr.f32.mxu0 %v7262_v3  ;;  %4105 = vmatprep.mubr.msk.f32.mxu1 %vm5863_vm1, %v7262_v3 }
  0x62   :  { %4755 = vmatpush3.bf16.msra.mxu1 %v6368_v19 }
  0x63   :  { %4756 = vmatprep.subr.bf16.mxu1 %v7264_v17 }
  0x64   :  { %3685 = vmatmul.mubr.msk.f32.gmra.mrb[4].mxu0 %vm70_vm0, %v5977_v20  ;;  %4106 = vmatmul.mubr.msk.f32.gmra.mrb[46].mxu1 %vm70_vm0, %v6038_v30  ;;  %v6419_v30 = vpack.c.bf16 %v903_v58, %v900_v57 }
  0x65   :  { %664 = vmatprep.mubr.f32.mxu0 %v7262_v3  ;;  %4108 = vmatprep.mubr.msk.f32.mxu1 %vm5863_vm1, %v7262_v3 }
  0x66   :  { %4758 = vmatpush3.bf16.msra.mxu1 %v6385_v24 }
  0x67   :  { %4759 = vmatprep.subr.bf16.mxu1 %v7264_v17 }
  0x68   :  { %3686 = vmatmul.mubr.msk.f32.gmra.mrb[2].mxu0 %vm70_vm0, %v6003_v25  ;;  %4109 = vmatmul.mubr.msk.f32.gmra.mrb[48].mxu1 %vm70_vm0, %v6048_v32  ;;  %v6436_v32 = vpack.c.bf16 %v909_v62, %v906_v59 }
  0x69   :  { %670 = vmatprep.mubr.f32.mxu0 %v7262_v3  ;;  %4111 = vmatprep.mubr.msk.f32.mxu1 %vm5863_vm1, %v7262_v3 }
  0x6a   :  { %4761 = vmatpush3.bf16.msra.mxu1 %v6402_v26 }
  0x6b   :  { %4762 = vmatprep.subr.bf16.mxu1 %v7264_v17 }
  0x6c   :  { %3687 = vmatmul.mubr.msk.f32.gmra.mrb[0].mxu0 %vm70_vm0, %v6020_v27  ;;  %4112 = vmatmul.mubr.msk.f32.gmra.mrb[50].mxu1 %vm70_vm0, %v6063_v33 }
  0x6d   :  { %4114 = vmatprep.mubr.msk.f32.mxu1 %vm5863_vm1, %v7262_v3  ;;  %1000 = vmatprep.mubr.f32.mxu0 %v7262_v3 }
  0x6e   :  { %4764 = vmatpush3.bf16.msra.mxu1 %v6419_v30 }
  0x6f   :  { %4765 = vmatprep.subr.bf16.mxu1 %v7264_v17 }
  0x70   :  { %4115 = vmatmul.mubr.msk.f32.gmra.mrb[52].mxu1 %vm70_vm0, %v6075_v34  ;;  %v55_v34 = vlaneseq }
  0x71   :  { %4117 = vmatprep.mubr.msk.f32.mxu1 %vm5863_vm1, %v7262_v3 }
  0x72   :  { %4767 = vmatpush3.bf16.msra.mxu1 %v6436_v32 }
  0x73   :  { %4800 = vmatprep.subr.bf16.mxu1 %v7264_v17 }
  0x74   :  { %4118 = vmatmul.mubr.msk.f32.gmra.mrb[54].mxu1 %vm70_vm0, %v6087_v35  ;;  %1001 = vmatmul.mubr.f32.vlgmr.msra.gmra.mrb[0].mxu0 %v7262_v3 }
  0x75   :  { %4120 = vmatprep.mubr.msk.f32.mxu1 %vm5863_vm1, %v7262_v3  ;;  %4771 = vmatpush1.bf16.msra.mxu0 %v6132_v42 }
  0x76   :  { %4773 = vmatprep.subr.bf16.mxu0 %v6134_v43  ;;  %1171 = vmatprep.mubr.f32.mxu0 %v7262_v3 }
  0x78   :  { %4121 = vmatmul.mubr.msk.f32.gmra.mrb[56].mxu1 %vm70_vm0, %v6099_v36 }
  0x79   :  { %4123 = vmatprep.mubr.msk.f32.mxu1 %vm5863_vm1, %v7262_v3  ;;  %4775 = vmatpush1.bf16.msra.mxu0 %v6156_v48 }
  0x7a   :  { %4777 = vmatprep.subr.bf16.mxu0 %v6159_v49 }
  0x7c   :  { %4124 = vmatmul.mubr.msk.f32.gmra.mrb[58].mxu1 %vm70_vm0, %v6111_v37  ;;  %v6524_v37 = vshrl.u32 %v55_v34, 7 }
  0x7d   :  { %4126 = vmatprep.mubr.msk.f32.mxu1 %vm5863_vm1, %v7262_v3  ;;  %4779 = vmatpush1.bf16.msra.mxu0 %v6181_v54 }
  0x7e   :  { %4781 = vmatprep.subr.bf16.mxu0 %v6184_v55  ;;  %v7266_v0 = vsub.s32 2, %v6524_v37 }
  0x80   :  { %4127 = vmatmul.mubr.msk.f32.gmra.mrb[60].mxu1 %vm70_vm0, %v5961_v14  ;;  %v6539_v7 = vrot.slane %v6534_v6, %v7266_v0 }
  0x81   :  { %4129 = vmatprep.mubr.msk.f32.mxu1 %vm5863_vm1, %v7262_v3  ;;  %4783 = vmatpush1.bf16.msra.mxu0 %v6206_v60 }
  0x82   :  { %4785 = vmatprep.subr.bf16.mxu0 %v6209_v61 }
  0x84   :  { %4130 = vmatmul.mubr.msk.f32.gmra.mrb[62].mxu1 %vm70_vm0, %v5977_v20 }
  0x85   :  { %4132 = vmatprep.mubr.msk.f32.mxu1 %vm5863_vm1, %v7262_v3  ;;  %4787 = vmatpush1.bf16.msra.mxu0 %v6231_v2 }
  0x86   :  { %4789 = vmatprep.subr.bf16.mxu0 %v6234_v4 }
  0x88   :  { %4133 = vmatmul.mubr.msk.f32.gmra.mrb[64].mxu1 %vm70_vm0, %v6003_v25 }
  0x89   :  { %4135 = vmatprep.mubr.msk.f32.mxu1 %vm5863_vm1, %v7262_v3  ;;  %4791 = vmatpush1.bf16.msra.mxu0 %v6256_v9 }
  0x8a   :  { %4793 = vmatprep.subr.bf16.mxu0 %v6259_v10 }
  0x8c   :  { %4136 = vmatmul.mubr.msk.f32.gmra.mrb[66].mxu1 %vm70_vm0, %v6020_v27 }
  0x8d   :  { %4170 = vmatprep.mubr.msk.f32.mxu1 %vm5863_vm1, %v7262_v3  ;;  %4795 = vmatpush1.bf16.msra.mxu0 %v6281_v18 }
  0x8e   :  { %4797 = vmatprep.subr.bf16.mxu0 %v6284_v21 }
  0x90   :  { %4171 = vmatmul.mubr.f32.vlgmr.msra.gmra.mrb[68].mxu1 %v7262_v3 }
  0x91   :  { %4802 = vmatpush3.bf16.msra.mxu1 %v6316_v39  ;;  %4799 = vmatpush1.bf16.msra.mxu0 %v6306_v38 }
  0x92   :  { %4803 = vmatprep.subr.bf16.mxu1 %v7264_v17  ;;  %4205 = vmatprep.mubr.msk.f32.mxu1 %vm5863_vm1, %v7262_v3 }
  0x93   :  { %4825 = vmatprep.subr.bf16.mxu0 %v5987_v23 }
  0x95   :  { %4805 = vmatpush3.bf16.msra.mxu1 %v6335_v44 }
  0x96   :  { %4806 = vmatprep.subr.bf16.mxu1 %v7264_v17 }
  0x99   :  { %4808 = vmatpush3.bf16.msra.mxu1 %v6351_v13 }
  0x9a   :  { %4809 = vmatprep.subr.bf16.mxu1 %v7264_v17 }
  0x9d   :  { %4811 = vmatpush3.bf16.msra.mxu1 %v6368_v19 }
  0x9e   :  { %4812 = vmatprep.subr.bf16.mxu1 %v7264_v17 }
  0xa1   :  { %4814 = vmatpush3.bf16.msra.mxu1 %v6385_v24 }
  0xa2   :  { %4815 = vmatprep.subr.bf16.mxu1 %v7264_v17 }
  0xa5   :  { %4817 = vmatpush3.bf16.msra.mxu1 %v6402_v26 }
  0xa6   :  { %4818 = vmatprep.subr.bf16.mxu1 %v7264_v17 }
  0xa9   :  { %4820 = vmatpush3.bf16.msra.mxu1 %v6419_v30 }
  0xaa   :  { %4821 = vmatprep.subr.bf16.mxu1 %v7264_v17 }
  0xad   :  { %4823 = vmatpush3.bf16.msra.mxu1 %v6436_v32 }
  0xae   :  { %4856 = vmatprep.subr.bf16.mxu1 %v7264_v17 }
  0xdb   :  { %v6510_v14 = vpop.f32.mrb[0].mxu1 }
  0xdc   :  { %v6512_v20 = vpop.f32.mrb[1].mxu1 }
  0xdf   :  { %v6514_v25 = vpop.f32.mrb[2].mxu1 }
  0xe0   :  { %7267 = vst [vmem:[#allocation4_spill] sm:$0xff] %v6514_v25  ;;  %v6516_v27 = vpop.f32.mrb[3].mxu1 }
  0xe1   :  { %7268 = vst [vmem:[#allocation5_spill] sm:$0xff] %v6516_v27 }
  0xe3   :  { %v6518_v33 = vpop.f32.mrb[4].mxu1 }
  0xe4   :  { %7269 = vst [vmem:[#allocation6_spill] sm:$0xff] %v6518_v33  ;;  %v6520_v35 = vpop.f32.mrb[5].mxu1 }
  0xe5   :  { %7270 = vst [vmem:[#allocation7_spill] sm:$0xff] %v6520_v35 }
  0xe7   :  { %v6522_v36 = vpop.f32.mrb[6].mxu1 }
  0xe8   :  { %7271 = vst [vmem:[#allocation8_spill] sm:$0xff] %v6522_v36  ;;  %v6526_v63 = vpop.f32.mrb[7].mxu1 }
  0xe9   :  { %7272 = vst [vmem:[#allocation9_spill] sm:$0xff] %v6526_v63 }
  0xeb   :  { %v6529_v1 = vpop.f32.mrb[8].mxu1 }
  0xec   :  { %v4046_v5 = vpop.f32.mrb[9].mxu1 }
  0xef   :  { %v342_v8 = vpop.f32.mrb[10].mxu1 }
  0xf0   :  { %v6542_v11 = vadd.f32 %v342_v8, %v6539_v7  ;;  %v4049_v12 = vpop.f32.mrb[11].mxu1 }
  0xf3   :  { %v347_v15 = vpop.f32.mrb[12].mxu1 }
  0xf4   :  { %v6545_v16 = vadd.f32 %v347_v15, %v6539_v7  ;;  %v4052_v22 = vpop.f32.mrb[13].mxu1 }
  0xf7   :  { %v352_v28 = vpop.f32.mrb[14].mxu1 }
  0xf8   :  { %v6548_v29 = vadd.f32 %v352_v28, %v6539_v7  ;;  %v4055_v31 = vpop.f32.mrb[15].mxu1 }
  0xfb   :  { %v357_v40 = vpop.f32.mrb[16].mxu1 }
  0xfc   :  { %v6551_v41 = vadd.f32 %v357_v40, %v6539_v7  ;;  %v4058_v45 = vpop.f32.mrb[17].mxu1 }
  0xff   :  { %v362_v46 = vpop.f32.mrb[18].mxu1 }
 0x100   :  { %v6554_v47 = vadd.f32 %v362_v46, %v6539_v7  ;;  %v4061_v50 = vpop.f32.mrb[19].mxu1 }
 0x103   :  { %v367_v51 = vpop.f32.mrb[20].mxu1 }
 0x104   :  { %v368_v52 = vadd.f32 %v367_v51, %v6539_v7  ;;  %v4064_v53 = vpop.f32.mrb[21].mxu1 }
 0x107   :  { %v372_v56 = vpop.f32.mrb[22].mxu1 }
 0x108   :  { %v373_v57 = vadd.f32 %v372_v56, %v6539_v7  ;;  %v4067_v58 = vpop.f32.mrb[23].mxu1 }
 0x10b   :  { %v377_v59 = vpop.f32.mrb[24].mxu1 }
 0x10c   :  { %v378_v62 = vadd.f32 %v377_v59, %v6539_v7  ;;  %v4070_v34 = vpop.f32.mrb[25].mxu1 }
 0x10f   :  { %v382_v5 = vpop.f32.mrb[26].mxu1 }
 0x110   :  { %v383_v8 = vadd.f32 %v382_v5, %v6539_v7  ;;  %v4073_v12 = vpop.f32.mrb[27].mxu1 }
 0x113   :  { %v387_v15 = vpop.f32.mrb[28].mxu1 }
 0x114   :  { %v388_v22 = vadd.f32 %v387_v15, %v6539_v7  ;;  %v4076_v28 = vpop.f32.mrb[29].mxu1 }
 0x117   :  { %v392_v31 = vpop.f32.mrb[30].mxu1 }
 0x118   :  { %v393_v40 = vadd.f32 %v392_v31, %v6539_v7  ;;  %v4079_v45 = vpop.f32.mrb[31].mxu1 }
 0x11b   :  { %v397_v46 = vpop.f32.mrb[32].mxu1 }
 0x11c   :  { %v398_v50 = vadd.f32 %v397_v46, %v6539_v7  ;;  %v4082_v51 = vpop.f32.mrb[33].mxu1 }
 0x11f   :  { %v402_v53 = vpop.f32.mrb[34].mxu1 }
 0x120   :  { %v403_v56 = vadd.f32 %v402_v53, %v6539_v7  ;;  %v4085_v58 = vpop.f32.mrb[35].mxu1 }
 0x123   :  { %v407_v59 = vpop.f32.mrb[36].mxu1 }
 0x124   :  { %v408_v34 = vadd.f32 %v407_v59, %v6539_v7  ;;  %v4088_v5 = vpop.f32.mrb[37].mxu1 }
 0x127   :  { %v743_v12 = vpop.f32.mrb[38].mxu1 }
 0x128   :  { %v6565_v3 = vadd.f32 %v743_v12, %v408_v34  ;;  %v4095_v15 = vpop.f32.mrb[39].mxu1 }
 0x12a   :  { %7273 = vst [vmem:[#allocation10_spill] sm:$0xff] %v6565_v3 }
 0x12b   :  { %v748_v28 = vpop.f32.mrb[40].mxu1 }
 0x12c   :  { %v6567_v17 = vadd.f32 %v748_v28, %v403_v56  ;;  %v4098_v31 = vpop.f32.mrb[41].mxu1  ;;  %v57_v56 = vsub.s32 0, %v6524_v37 }
 0x12e   :  { %7274 = vst [vmem:[#allocation11_spill] sm:$0xff] %v6567_v17  ;;  %v6584_v31 = vrot.slane %v6534_v6, %v57_v56 }
 0x12f   :  { %v753_v45 = vpop.f32.mrb[42].mxu1 }
 0x130   :  { %v6569_v0 = vadd.f32 %v753_v45, %v398_v50  ;;  %v4101_v46 = vpop.f32.mrb[43].mxu1  ;;  %v910_v50 = vld [vmem:[%s7256_s5] sm:$0x7]  ;;  %v61_v45 = vsub.s32 1, %v6524_v37 }
 0x132   :  { %7275 = vst [vmem:[#allocation12_spill] sm:$0xff] %v6569_v0 }
 0x133   :  { %v758_v51 = vpop.f32.mrb[44].mxu1 }
 0x134   :  { %v6571_v63 = vadd.f32 %v758_v51, %v393_v40  ;;  %v4104_v53 = vpop.f32.mrb[45].mxu1 }
 0x137   :  { %v763_v58 = vpop.f32.mrb[46].mxu1 }
 0x138   :  { %v6573_v36 = vadd.f32 %v763_v58, %v388_v22  ;;  %v4107_v59 = vpop.f32.mrb[47].mxu1  ;;  %v6586_v22 = vrot.slane %v910_v50, %v57_v56  ;;  %v6596_v58 = vrot.slane %v6534_v6, %v61_v45 }
 0x13a   :  { %v6591_v46 = vadd.f32 %v6586_v22, %v6584_v31 }
 0x13b   :  { %v768_v5 = vpop.f32.mrb[48].mxu1 }
 0x13c   :  { %v6575_v34 = vadd.f32 %v768_v5, %v383_v8  ;;  %v4110_v12 = vpop.f32.mrb[49].mxu1 }
 0x13f   :  { %v773_v15 = vpop.f32.mrb[50].mxu1 }
 0x140   :  { %v6581_v28 = vadd.f32 %v773_v15, %v378_v62  ;;  %v4113_v40 = vpop.f32.mrb[51].mxu1  ;;  %v6598_v62 = vrot.slane %v910_v50, %v61_v45 }
 0x142   :  { %v6605_v3 = vadd.f32 %v6598_v62, %v6596_v58 }
 0x143   :  { %v778_v8 = vpop.f32.mrb[52].mxu1 }
 0x144   :  { %v6593_v51 = vadd.f32 %v778_v8, %v373_v57  ;;  %v4116_v53 = vpop.f32.mrb[53].mxu1 }
 0x147   :  { %v783_v59 = vpop.f32.mrb[54].mxu1  ;;  %v1002_v5 = vpop.f32.mrb[0].mxu0 }
 0x148   :  { %v6600_v12 = vadd.f32 %v783_v59, %v368_v52  ;;  %v5579_v56 = vadd.f32 %v6591_v46, %v1002_v5  ;;  %v4119_v15 = vpop.f32.mrb[55].mxu1  ;;  %v1004_v40 = vpop.f32.mrb[1].mxu0 }
 0x149   :  { %v5581_v53 = vadd.f32 %v6605_v3, %v1004_v40 }
 0x14a   :  { %v3703_v57 = vmul.f32 -1.442695, %v5579_v56 }
 0x14b   :  { %v788_v8 = vpop.f32.mrb[56].mxu1  ;;  %v3704_v5 = vmul.f32 -1.442695, %v5581_v53 }
 0x14c   :  { %5703 = vpow2.f32 %v3703_v57  ;;  %v6608_v6 = vadd.f32 %v788_v8, %v6554_v47  ;;  %v4122_v45 = vpop.f32.mrb[57].mxu1 }
 0x14d   :  { %5705 = vpow2.f32 %v3704_v5  ;;  %v338_v45 = vadd.f32 %v6529_v1, %v6539_v7 }
 0x14f   :  { %v793_v17 = vpop.f32.mrb[58].mxu1 }
 0x150   :  { %v6612_v52 = vadd.f32 %v793_v17, %v6551_v41  ;;  %v4125_v59 = vpop.f32.mrb[59].mxu1 }
 0x153   :  { %v798_v15 = vpop.f32.mrb[60].mxu1 }
 0x154   :  { %v6615_v35 = vadd.f32 %v798_v15, %v6548_v29  ;;  %v4128_v33 = vpop.f32.mrb[61].mxu1 }
 0x155   :  { %v7276_v33 = vsub.s32 2, %v6524_v37 }
 0x156   :  { %v5704_v56 = vpop.eup %5703 }
 0x157   :  { %v1081_v57 = vadd.f32 1.0, %v5704_v56  ;;  %v803_v0 = vpop.f32.mrb[62].mxu1  ;;  %v5706_v29 = vpop.eup %5705  ;;  %v6627_v59 = vrot.slane %v910_v50, %v7276_v33  ;;  %v7277_v50 = vmov 0.0|0.0  }
 0x158   :  { %v6618_v47 = vadd.f32 %v803_v0, %v6545_v16  ;;  %v4131_v8 = vpop.f32.mrb[63].mxu1  ;;  %v1088_v0 = vadd.f32 1.0, %v5706_v29 }
 0x159   :  { %5707 = vrcp.f32 %v1081_v57 }
 0x15a   :  { %5709 = vrcp.f32 %v1088_v0 }
 0x15b   :  { %v808_v40 = vpop.f32.mrb[64].mxu1 }
 0x15c   :  { %v6621_v17 = vadd.f32 %v808_v40, %v6542_v11  ;;  %v4134_v41 = vpop.f32.mrb[65].mxu1 }
 0x15f   :  { %v813_v53 = vpop.f32.mrb[66].mxu1 }
 0x160   :  { %v919_v5 = vadd.f32 %v813_v53, %v338_v45  ;;  %v4137_v15 = vpop.f32.mrb[67].mxu1  ;;  %v7278_v45 = vmov 0.0  }
 0x163   :  { %v1073_v16 = vpop.f32.mrb[68].mxu1  ;;  %v5708_v8 = vpop.eup %5707 }
 0x164   :  { %v1074_v56 = vadd.f32 %v1073_v16, %v6627_v59  ;;  %v4172_v57 = vpop.f32.mrb[69].mxu1  ;;  %v5710_v41 = vpop.eup %5709 }
 0x165   :  { %v1094_v1 = vsub.f32 1.0, %v5710_v41  ;;  %v1096_v25 = vmul.f32 0.0, %v5710_v41 }
 0x166   :  { %v1091_v11 = vmul.f32 %v5708_v8, %v1074_v56 }
 0x168   :  { %v1092_v40 = vadd.f32 %v1091_v11, %v919_v5 }
 0x16a   :  { %5711 = vtanh.f32 %v1092_v40 }
 0x174   :  { %v5712_v7 = vpop.eup %5711 }
 0x175   :  { %v1095_v27 = vmul.f32 %v5712_v7, %v1094_v1 }
 0x177   :  { %v1097_v37 = vadd.f32 %v1096_v25, %v1095_v27 }
 0x179   :  { %1172 = vmatmul.mubr.f32.vlgmr.msra.gmra.mrb[2].mxu0 %v1097_v37  ;;  %4206 = vmatmul.mubr.f32.vlgmr.msra.gmra.mrb[70].mxu1 %v1097_v37 }
 0x17a   :  { %4827 = vmatpush1.bf16.msra.mxu0 %v6132_v42  ;;  %4858 = vmatpush3.bf16.msra.mxu1 %v6316_v39 }
 0x17b   :  { %4829 = vmatprep.subr.bf16.mxu0 %v6134_v43  ;;  %4859 = vmatprep.subr.bf16.mxu1 %v7277_v50 }
 0x17c   :  { %1342 = vmatprep.mubr.f32.mxu0 %v7278_v45  ;;  %4240 = vmatprep.mubr.msk.f32.mxu1 %vm5863_vm1, %v7278_v45 }
 0x17e   :  { %4831 = vmatpush1.bf16.msra.mxu0 %v6156_v48  ;;  %4861 = vmatpush3.bf16.msra.mxu1 %v6335_v44 }
 0x17f   :  { %4833 = vmatprep.subr.bf16.mxu0 %v6159_v49  ;;  %4862 = vmatprep.subr.bf16.mxu1 %v7277_v50 }
 0x182   :  { %4835 = vmatpush1.bf16.msra.mxu0 %v6181_v54  ;;  %4864 = vmatpush3.bf16.msra.mxu1 %v6351_v13 }
 0x183   :  { %4837 = vmatprep.subr.bf16.mxu0 %v6184_v55  ;;  %4865 = vmatprep.subr.bf16.mxu1 %v7277_v50 }
 0x186   :  { %4839 = vmatpush1.bf16.msra.mxu0 %v6206_v60  ;;  %4867 = vmatpush3.bf16.msra.mxu1 %v6368_v19 }
 0x187   :  { %4841 = vmatprep.subr.bf16.mxu0 %v6209_v61  ;;  %4868 = vmatprep.subr.bf16.mxu1 %v7277_v50 }
 0x18a   :  { %4843 = vmatpush1.bf16.msra.mxu0 %v6231_v2  ;;  %4870 = vmatpush3.bf16.msra.mxu1 %v6385_v24 }
 0x18b   :  { %4845 = vmatprep.subr.bf16.mxu0 %v6234_v4  ;;  %4871 = vmatprep.subr.bf16.mxu1 %v7277_v50 }
 0x18e   :  { %4847 = vmatpush1.bf16.msra.mxu0 %v6256_v9  ;;  %4873 = vmatpush3.bf16.msra.mxu1 %v6402_v26 }
 0x18f   :  { %4849 = vmatprep.subr.bf16.mxu0 %v6259_v10  ;;  %4874 = vmatprep.subr.bf16.mxu1 %v7277_v50 }
 0x192   :  { %4851 = vmatpush1.bf16.msra.mxu0 %v6281_v18  ;;  %4876 = vmatpush3.bf16.msra.mxu1 %v6419_v30 }
 0x193   :  { %4853 = vmatprep.subr.bf16.mxu0 %v6284_v21  ;;  %4877 = vmatprep.subr.bf16.mxu1 %v7277_v50 }
 0x196   :  { %4855 = vmatpush1.bf16.msra.mxu0 %v6306_v38  ;;  %4879 = vmatpush3.bf16.msra.mxu1 %v6436_v32 }
 0x197   :  { %4881 = vmatprep.subr.bf16.mxu0 %v5987_v23  ;;  %4912 = vmatprep.subr.bf16.mxu1 %v7277_v50 }
 0x24c   :  { %v1173_v25 = vpop.f32.mrb[2].mxu0  ;;  %v1244_v27 = vpop.f32.mrb[70].mxu1 }
 0x24d   :  { %v5583_v29 = vadd.f32 %v6591_v46, %v1173_v25  ;;  %v1175_v53 = vpop.f32.mrb[3].mxu0  ;;  %v4207_v33 = vpop.f32.mrb[71].mxu1  ;;  %v1245_v11 = vadd.f32 %v1244_v27, %v6627_v59 }
 0x24e   :  { %v5585_v15 = vadd.f32 %v6605_v3, %v1175_v53 }
 0x24f   :  { %v3705_v5 = vmul.f32 -1.442695, %v5583_v29 }
 0x250   :  { %v3706_v0 = vmul.f32 -1.442695, %v5585_v15 }
 0x251   :  { %5713 = vpow2.f32 %v3705_v5 }
 0x252   :  { %5715 = vpow2.f32 %v3706_v0 }
 0x25b   :  { %v5714_v16 = vpop.eup %5713 }
 0x25c   :  { %v1252_v56 = vadd.f32 1.0, %v5714_v16  ;;  %v5716_v57 = vpop.eup %5715 }
 0x25d   :  { %v1259_v8 = vadd.f32 1.0, %v5716_v57 }
 0x25e   :  { %5717 = vrcp.f32 %v1252_v56 }
 0x25f   :  { %5719 = vrcp.f32 %v1259_v8 }
 0x268   :  { %v5718_v40 = vpop.eup %5717 }
 0x269   :  { %v1262_v41 = vmul.f32 %v5718_v40, %v1245_v11  ;;  %v5720_v7 = vpop.eup %5719 }
 0x26a   :  { %v1265_v25 = vsub.f32 1.0, %v5720_v7  ;;  %v1267_v33 = vmul.f32 %v5720_v7, %v1097_v37 }
 0x26b   :  { %v1263_v1 = vadd.f32 %v1262_v41, %v6621_v17 }
 0x26d   :  { %5721 = vtanh.f32 %v1263_v1 }
 0x277   :  { %v5722_v29 = vpop.eup %5721 }
 0x278   :  { %v1266_v53 = vmul.f32 %v5722_v29, %v1265_v25 }
 0x27a   :  { %v1268_v5 = vadd.f32 %v1267_v33, %v1266_v53 }
 0x27c   :  { %1343 = vmatmul.mubr.f32.vlgmr.msra.gmra.mrb[4].mxu0 %v1268_v5  ;;  %4241 = vmatmul.mubr.f32.vlgmr.msra.gmra.mrb[72].mxu1 %v1268_v5 }
 0x27d   :  { %4883 = vmatpush1.bf16.msra.mxu0 %v6132_v42  ;;  %4914 = vmatpush3.bf16.msra.mxu1 %v6316_v39 }
 0x27e   :  { %4885 = vmatprep.subr.bf16.mxu0 %v6134_v43  ;;  %4915 = vmatprep.subr.bf16.mxu1 %v7277_v50 }
 0x27f   :  { %1513 = vmatprep.mubr.f32.mxu0 %v7278_v45  ;;  %4275 = vmatprep.mubr.msk.f32.mxu1 %vm5863_vm1, %v7278_v45 }
 0x281   :  { %4887 = vmatpush1.bf16.msra.mxu0 %v6156_v48  ;;  %4917 = vmatpush3.bf16.msra.mxu1 %v6335_v44 }
 0x282   :  { %4889 = vmatprep.subr.bf16.mxu0 %v6159_v49  ;;  %4918 = vmatprep.subr.bf16.mxu1 %v7277_v50 }
 0x285   :  { %4891 = vmatpush1.bf16.msra.mxu0 %v6181_v54  ;;  %4920 = vmatpush3.bf16.msra.mxu1 %v6351_v13 }
 0x286   :  { %4893 = vmatprep.subr.bf16.mxu0 %v6184_v55  ;;  %4921 = vmatprep.subr.bf16.mxu1 %v7277_v50 }
 0x289   :  { %4895 = vmatpush1.bf16.msra.mxu0 %v6206_v60  ;;  %4923 = vmatpush3.bf16.msra.mxu1 %v6368_v19 }
 0x28a   :  { %4897 = vmatprep.subr.bf16.mxu0 %v6209_v61  ;;  %4924 = vmatprep.subr.bf16.mxu1 %v7277_v50 }
 0x28d   :  { %4899 = vmatpush1.bf16.msra.mxu0 %v6231_v2  ;;  %4926 = vmatpush3.bf16.msra.mxu1 %v6385_v24 }
 0x28e   :  { %4901 = vmatprep.subr.bf16.mxu0 %v6234_v4  ;;  %4927 = vmatprep.subr.bf16.mxu1 %v7277_v50 }
 0x291   :  { %4903 = vmatpush1.bf16.msra.mxu0 %v6256_v9  ;;  %4929 = vmatpush3.bf16.msra.mxu1 %v6402_v26 }
 0x292   :  { %4905 = vmatprep.subr.bf16.mxu0 %v6259_v10  ;;  %4930 = vmatprep.subr.bf16.mxu1 %v7277_v50 }
 0x295   :  { %4907 = vmatpush1.bf16.msra.mxu0 %v6281_v18  ;;  %4932 = vmatpush3.bf16.msra.mxu1 %v6419_v30 }
 0x296   :  { %4909 = vmatprep.subr.bf16.mxu0 %v6284_v21  ;;  %4933 = vmatprep.subr.bf16.mxu1 %v7277_v50 }
 0x299   :  { %4911 = vmatpush1.bf16.msra.mxu0 %v6306_v38  ;;  %4935 = vmatpush3.bf16.msra.mxu1 %v6436_v32 }
 0x29a   :  { %4937 = vmatprep.subr.bf16.mxu0 %v5987_v23  ;;  %4968 = vmatprep.subr.bf16.mxu1 %v7277_v50 }
 0x34f   :  { %v1344_v17 = vpop.f32.mrb[4].mxu0  ;;  %v1415_v37 = vpop.f32.mrb[72].mxu1 }
 0x350   :  { %v5587_v27 = vadd.f32 %v6591_v46, %v1344_v17  ;;  %v1346_v15 = vpop.f32.mrb[5].mxu0  ;;  %v4242_v0 = vpop.f32.mrb[73].mxu1  ;;  %v1416_v1 = vadd.f32 %v1415_v37, %v6627_v59 }
 0x351   :  { %v5589_v56 = vadd.f32 %v6605_v3, %v1346_v15 }
 0x352   :  { %v3707_v16 = vmul.f32 -1.442695, %v5587_v27 }
 0x353   :  { %v3708_v57 = vmul.f32 -1.442695, %v5589_v56 }
 0x354   :  { %5723 = vpow2.f32 %v3707_v16 }
 0x355   :  { %5725 = vpow2.f32 %v3708_v57 }
 0x35e   :  { %v5724_v8 = vpop.eup %5723 }
 0x35f   :  { %v1423_v11 = vadd.f32 1.0, %v5724_v8  ;;  %v5726_v40 = vpop.eup %5725 }
 0x360   :  { %v1430_v41 = vadd.f32 1.0, %v5726_v40 }
 0x361   :  { %5727 = vrcp.f32 %v1423_v11 }
 0x362   :  { %5729 = vrcp.f32 %v1430_v41 }
 0x36b   :  { %v5728_v7 = vpop.eup %5727 }
 0x36c   :  { %v1433_v25 = vmul.f32 %v5728_v7, %v1416_v1  ;;  %v5730_v53 = vpop.eup %5729 }
 0x36d   :  { %v1436_v33 = vsub.f32 1.0, %v5730_v53  ;;  %v1438_v15 = vmul.f32 %v5730_v53, %v1268_v5 }
 0x36e   :  { %v1434_v29 = vadd.f32 %v1433_v25, %v6618_v47 }
 0x370   :  { %5731 = vtanh.f32 %v1434_v29 }
 0x37a   :  { %v5732_v17 = vpop.eup %5731 }
 0x37b   :  { %v1437_v27 = vmul.f32 %v5732_v17, %v1436_v33 }
 0x37d   :  { %v1439_v0 = vadd.f32 %v1438_v15, %v1437_v27 }
 0x37f   :  { %1514 = vmatmul.mubr.f32.vlgmr.msra.gmra.mrb[6].mxu0 %v1439_v0  ;;  %4276 = vmatmul.mubr.f32.vlgmr.msra.gmra.mrb[74].mxu1 %v1439_v0 }
 0x380   :  { %4939 = vmatpush1.bf16.msra.mxu0 %v6132_v42  ;;  %4970 = vmatpush3.bf16.msra.mxu1 %v6316_v39 }
 0x381   :  { %4941 = vmatprep.subr.bf16.mxu0 %v6134_v43  ;;  %4971 = vmatprep.subr.bf16.mxu1 %v7277_v50 }
 0x382   :  { %1684 = vmatprep.mubr.f32.mxu0 %v7278_v45  ;;  %4310 = vmatprep.mubr.msk.f32.mxu1 %vm5863_vm1, %v7278_v45 }
 0x384   :  { %4943 = vmatpush1.bf16.msra.mxu0 %v6156_v48  ;;  %4973 = vmatpush3.bf16.msra.mxu1 %v6335_v44 }
 0x385   :  { %4945 = vmatprep.subr.bf16.mxu0 %v6159_v49  ;;  %4974 = vmatprep.subr.bf16.mxu1 %v7277_v50 }
 0x388   :  { %4947 = vmatpush1.bf16.msra.mxu0 %v6181_v54  ;;  %4976 = vmatpush3.bf16.msra.mxu1 %v6351_v13 }
 0x389   :  { %4949 = vmatprep.subr.bf16.mxu0 %v6184_v55  ;;  %4977 = vmatprep.subr.bf16.mxu1 %v7277_v50 }
 0x38c   :  { %4951 = vmatpush1.bf16.msra.mxu0 %v6206_v60  ;;  %4979 = vmatpush3.bf16.msra.mxu1 %v6368_v19 }
 0x38d   :  { %4953 = vmatprep.subr.bf16.mxu0 %v6209_v61  ;;  %4980 = vmatprep.subr.bf16.mxu1 %v7277_v50 }
 0x390   :  { %4955 = vmatpush1.bf16.msra.mxu0 %v6231_v2  ;;  %4982 = vmatpush3.bf16.msra.mxu1 %v6385_v24 }
 0x391   :  { %4957 = vmatprep.subr.bf16.mxu0 %v6234_v4  ;;  %4983 = vmatprep.subr.bf16.mxu1 %v7277_v50 }
 0x394   :  { %4959 = vmatpush1.bf16.msra.mxu0 %v6256_v9  ;;  %4985 = vmatpush3.bf16.msra.mxu1 %v6402_v26 }
 0x395   :  { %4961 = vmatprep.subr.bf16.mxu0 %v6259_v10  ;;  %4986 = vmatprep.subr.bf16.mxu1 %v7277_v50 }
 0x398   :  { %4963 = vmatpush1.bf16.msra.mxu0 %v6281_v18  ;;  %4988 = vmatpush3.bf16.msra.mxu1 %v6419_v30 }
 0x399   :  { %4965 = vmatprep.subr.bf16.mxu0 %v6284_v21  ;;  %4989 = vmatprep.subr.bf16.mxu1 %v7277_v50 }
 0x39c   :  { %4967 = vmatpush1.bf16.msra.mxu0 %v6306_v38  ;;  %4991 = vmatpush3.bf16.msra.mxu1 %v6436_v32 }
 0x39d   :  { %4993 = vmatprep.subr.bf16.mxu0 %v5987_v23  ;;  %5024 = vmatprep.subr.bf16.mxu1 %v7277_v50 }
 0x452   :  { %v1515_v47 = vpop.f32.mrb[6].mxu0  ;;  %v1586_v5 = vpop.f32.mrb[74].mxu1 }
 0x453   :  { %v5591_v37 = vadd.f32 %v6591_v46, %v1515_v47  ;;  %v1517_v16 = vpop.f32.mrb[7].mxu0  ;;  %v4277_v56 = vpop.f32.mrb[75].mxu1  ;;  %v1587_v25 = vadd.f32 %v1586_v5, %v6627_v59 }
 0x454   :  { %v5593_v8 = vadd.f32 %v6605_v3, %v1517_v16 }
 0x455   :  { %v3709_v57 = vmul.f32 -1.442695, %v5591_v37 }
 0x456   :  { %v3710_v11 = vmul.f32 -1.442695, %v5593_v8 }
 0x457   :  { %5733 = vpow2.f32 %v3709_v57 }
 0x458   :  { %5735 = vpow2.f32 %v3710_v11 }
 0x461   :  { %v5734_v40 = vpop.eup %5733 }
 0x462   :  { %v1594_v41 = vadd.f32 1.0, %v5734_v40  ;;  %v5736_v1 = vpop.eup %5735 }
 0x463   :  { %v1601_v7 = vadd.f32 1.0, %v5736_v1 }
 0x464   :  { %5737 = vrcp.f32 %v1594_v41 }
 0x465   :  { %5739 = vrcp.f32 %v1601_v7 }
 0x46e   :  { %v5738_v29 = vpop.eup %5737 }
 0x46f   :  { %v1604_v53 = vmul.f32 %v5738_v29, %v1587_v25  ;;  %v5740_v17 = vpop.eup %5739 }
 0x470   :  { %v1607_v27 = vsub.f32 1.0, %v5740_v17  ;;  %v1609_v37 = vmul.f32 %v5740_v17, %v1439_v0 }
 0x471   :  { %v1605_v33 = vadd.f32 %v1604_v53, %v6615_v35 }
 0x473   :  { %5741 = vtanh.f32 %v1605_v33 }
 0x47d   :  { %v5742_v15 = vpop.eup %5741 }
 0x47e   :  { %v1608_v47 = vmul.f32 %v5742_v15, %v1607_v27 }
 0x480   :  { %v1610_v16 = vadd.f32 %v1609_v37, %v1608_v47 }
 0x482   :  { %1685 = vmatmul.mubr.f32.vlgmr.msra.gmra.mrb[8].mxu0 %v1610_v16  ;;  %4311 = vmatmul.mubr.f32.vlgmr.msra.gmra.mrb[76].mxu1 %v1610_v16 }
 0x483   :  { %4995 = vmatpush1.bf16.msra.mxu0 %v6132_v42  ;;  %5026 = vmatpush3.bf16.msra.mxu1 %v6316_v39 }
 0x484   :  { %4997 = vmatprep.subr.bf16.mxu0 %v6134_v43  ;;  %5027 = vmatprep.subr.bf16.mxu1 %v7277_v50 }
 0x485   :  { %1855 = vmatprep.mubr.f32.mxu0 %v7278_v45  ;;  %4345 = vmatprep.mubr.msk.f32.mxu1 %vm5863_vm1, %v7278_v45 }
 0x487   :  { %4999 = vmatpush1.bf16.msra.mxu0 %v6156_v48  ;;  %5029 = vmatpush3.bf16.msra.mxu1 %v6335_v44 }
 0x488   :  { %5001 = vmatprep.subr.bf16.mxu0 %v6159_v49  ;;  %5030 = vmatprep.subr.bf16.mxu1 %v7277_v50 }
 0x48b   :  { %5003 = vmatpush1.bf16.msra.mxu0 %v6181_v54  ;;  %5032 = vmatpush3.bf16.msra.mxu1 %v6351_v13 }
 0x48c   :  { %5005 = vmatprep.subr.bf16.mxu0 %v6184_v55  ;;  %5033 = vmatprep.subr.bf16.mxu1 %v7277_v50 }
 0x48f   :  { %5007 = vmatpush1.bf16.msra.mxu0 %v6206_v60  ;;  %5035 = vmatpush3.bf16.msra.mxu1 %v6368_v19 }
 0x490   :  { %5009 = vmatprep.subr.bf16.mxu0 %v6209_v61  ;;  %5036 = vmatprep.subr.bf16.mxu1 %v7277_v50 }
 0x493   :  { %5011 = vmatpush1.bf16.msra.mxu0 %v6231_v2  ;;  %5038 = vmatpush3.bf16.msra.mxu1 %v6385_v24 }
 0x494   :  { %5013 = vmatprep.subr.bf16.mxu0 %v6234_v4  ;;  %5039 = vmatprep.subr.bf16.mxu1 %v7277_v50 }
 0x497   :  { %5015 = vmatpush1.bf16.msra.mxu0 %v6256_v9  ;;  %5041 = vmatpush3.bf16.msra.mxu1 %v6402_v26 }
 0x498   :  { %5017 = vmatprep.subr.bf16.mxu0 %v6259_v10  ;;  %5042 = vmatprep.subr.bf16.mxu1 %v7277_v50 }
 0x49b   :  { %5019 = vmatpush1.bf16.msra.mxu0 %v6281_v18  ;;  %5044 = vmatpush3.bf16.msra.mxu1 %v6419_v30 }
 0x49c   :  { %5021 = vmatprep.subr.bf16.mxu0 %v6284_v21  ;;  %5045 = vmatprep.subr.bf16.mxu1 %v7277_v50 }
 0x49f   :  { %5023 = vmatpush1.bf16.msra.mxu0 %v6306_v38  ;;  %5047 = vmatpush3.bf16.msra.mxu1 %v6436_v32 }
 0x4a0   :  { %5049 = vmatprep.subr.bf16.mxu0 %v5987_v23  ;;  %5080 = vmatprep.subr.bf16.mxu1 %v7277_v50 }
 0x555   :  { %v1686_v35 = vpop.f32.mrb[8].mxu0  ;;  %v1757_v0 = vpop.f32.mrb[76].mxu1 }
 0x556   :  { %v5595_v5 = vadd.f32 %v6591_v46, %v1686_v35  ;;  %v1688_v56 = vpop.f32.mrb[9].mxu0  ;;  %v4312_v57 = vpop.f32.mrb[77].mxu1  ;;  %v1758_v29 = vadd.f32 %v1757_v0, %v6627_v59 }
 0x557   :  { %v5597_v11 = vadd.f32 %v6605_v3, %v1688_v56 }
 0x558   :  { %v3711_v8 = vmul.f32 -1.442695, %v5595_v5 }
 0x559   :  { %v3712_v40 = vmul.f32 -1.442695, %v5597_v11 }
 0x55a   :  { %5743 = vpow2.f32 %v3711_v8 }
 0x55b   :  { %5745 = vpow2.f32 %v3712_v40 }
 0x564   :  { %v5744_v41 = vpop.eup %5743 }
 0x565   :  { %v1765_v1 = vadd.f32 1.0, %v5744_v41  ;;  %v5746_v7 = vpop.eup %5745 }
 0x566   :  { %v1772_v25 = vadd.f32 1.0, %v5746_v7 }
 0x567   :  { %5747 = vrcp.f32 %v1765_v1 }
 0x568   :  { %5749 = vrcp.f32 %v1772_v25 }
 0x571   :  { %v5748_v53 = vpop.eup %5747 }
 0x572   :  { %v1775_v33 = vmul.f32 %v5748_v53, %v1758_v29  ;;  %v5750_v27 = vpop.eup %5749 }
 0x573   :  { %v1778_v15 = vsub.f32 1.0, %v5750_v27  ;;  %v1780_v35 = vmul.f32 %v5750_v27, %v1610_v16 }
 0x574   :  { %v1776_v17 = vadd.f32 %v1775_v33, %v6612_v52 }
 0x576   :  { %5751 = vtanh.f32 %v1776_v17 }
 0x580   :  { %v5752_v47 = vpop.eup %5751 }
 0x581   :  { %v1779_v37 = vmul.f32 %v5752_v47, %v1778_v15 }
 0x583   :  { %v1781_v5 = vadd.f32 %v1780_v35, %v1779_v37 }
 0x585   :  { %1856 = vmatmul.mubr.f32.vlgmr.msra.gmra.mrb[10].mxu0 %v1781_v5  ;;  %4346 = vmatmul.mubr.f32.vlgmr.msra.gmra.mrb[78].mxu1 %v1781_v5 }
 0x586   :  { %5051 = vmatpush1.bf16.msra.mxu0 %v6132_v42  ;;  %5082 = vmatpush3.bf16.msra.mxu1 %v6316_v39 }
 0x587   :  { %5053 = vmatprep.subr.bf16.mxu0 %v6134_v43  ;;  %5083 = vmatprep.subr.bf16.mxu1 %v7277_v50 }
 0x588   :  { %2026 = vmatprep.mubr.f32.mxu0 %v7278_v45  ;;  %4380 = vmatprep.mubr.msk.f32.mxu1 %vm5863_vm1, %v7278_v45 }
 0x58a   :  { %5055 = vmatpush1.bf16.msra.mxu0 %v6156_v48  ;;  %5085 = vmatpush3.bf16.msra.mxu1 %v6335_v44 }
 0x58b   :  { %5057 = vmatprep.subr.bf16.mxu0 %v6159_v49  ;;  %5086 = vmatprep.subr.bf16.mxu1 %v7277_v50 }
 0x58e   :  { %5059 = vmatpush1.bf16.msra.mxu0 %v6181_v54  ;;  %5088 = vmatpush3.bf16.msra.mxu1 %v6351_v13 }
 0x58f   :  { %5061 = vmatprep.subr.bf16.mxu0 %v6184_v55  ;;  %5089 = vmatprep.subr.bf16.mxu1 %v7277_v50 }
 0x592   :  { %5063 = vmatpush1.bf16.msra.mxu0 %v6206_v60  ;;  %5091 = vmatpush3.bf16.msra.mxu1 %v6368_v19 }
 0x593   :  { %5065 = vmatprep.subr.bf16.mxu0 %v6209_v61  ;;  %5092 = vmatprep.subr.bf16.mxu1 %v7277_v50 }
 0x596   :  { %5067 = vmatpush1.bf16.msra.mxu0 %v6231_v2  ;;  %5094 = vmatpush3.bf16.msra.mxu1 %v6385_v24 }
 0x597   :  { %5069 = vmatprep.subr.bf16.mxu0 %v6234_v4  ;;  %5095 = vmatprep.subr.bf16.mxu1 %v7277_v50 }
 0x59a   :  { %5071 = vmatpush1.bf16.msra.mxu0 %v6256_v9  ;;  %5097 = vmatpush3.bf16.msra.mxu1 %v6402_v26 }
 0x59b   :  { %5073 = vmatprep.subr.bf16.mxu0 %v6259_v10  ;;  %5098 = vmatprep.subr.bf16.mxu1 %v7277_v50 }
 0x59e   :  { %5075 = vmatpush1.bf16.msra.mxu0 %v6281_v18  ;;  %5100 = vmatpush3.bf16.msra.mxu1 %v6419_v30 }
 0x59f   :  { %5077 = vmatprep.subr.bf16.mxu0 %v6284_v21  ;;  %5101 = vmatprep.subr.bf16.mxu1 %v7277_v50 }
 0x5a2   :  { %5079 = vmatpush1.bf16.msra.mxu0 %v6306_v38  ;;  %5103 = vmatpush3.bf16.msra.mxu1 %v6436_v32 }
 0x5a3   :  { %5105 = vmatprep.subr.bf16.mxu0 %v5987_v23  ;;  %5136 = vmatprep.subr.bf16.mxu1 %v7277_v50 }
 0x658   :  { %v1857_v52 = vpop.f32.mrb[10].mxu0  ;;  %v1928_v16 = vpop.f32.mrb[78].mxu1 }
 0x659   :  { %v5599_v0 = vadd.f32 %v6591_v46, %v1857_v52  ;;  %v1859_v56 = vpop.f32.mrb[11].mxu0  ;;  %v4347_v57 = vpop.f32.mrb[79].mxu1  ;;  %v1929_v29 = vadd.f32 %v1928_v16, %v6627_v59 }
 0x65a   :  { %v5601_v11 = vadd.f32 %v6605_v3, %v1859_v56 }
 0x65b   :  { %v3713_v8 = vmul.f32 -1.442695, %v5599_v0 }
 0x65c   :  { %v3714_v40 = vmul.f32 -1.442695, %v5601_v11 }
 0x65d   :  { %5753 = vpow2.f32 %v3713_v8 }
 0x65e   :  { %5755 = vpow2.f32 %v3714_v40 }
 0x667   :  { %v5754_v41 = vpop.eup %5753 }
 0x668   :  { %v1936_v1 = vadd.f32 1.0, %v5754_v41  ;;  %v5756_v7 = vpop.eup %5755 }
 0x669   :  { %v1943_v25 = vadd.f32 1.0, %v5756_v7 }
 0x66a   :  { %5757 = vrcp.f32 %v1936_v1 }
 0x66b   :  { %5759 = vrcp.f32 %v1943_v25 }
 0x674   :  { %v5758_v53 = vpop.eup %5757 }
 0x675   :  { %v1946_v33 = vmul.f32 %v5758_v53, %v1929_v29  ;;  %v5760_v27 = vpop.eup %5759 }
 0x676   :  { %v1949_v15 = vsub.f32 1.0, %v5760_v27  ;;  %v1951_v35 = vmul.f32 %v5760_v27, %v1781_v5 }
 0x677   :  { %v1947_v17 = vadd.f32 %v1946_v33, %v6608_v6 }
 0x679   :  { %5761 = vtanh.f32 %v1947_v17 }
 0x683   :  { %v5762_v47 = vpop.eup %5761 }
 0x684   :  { %v1950_v37 = vmul.f32 %v5762_v47, %v1949_v15 }
 0x686   :  { %v1952_v52 = vadd.f32 %v1951_v35, %v1950_v37 }
 0x688   :  { %2027 = vmatmul.mubr.f32.vlgmr.msra.gmra.mrb[12].mxu0 %v1952_v52  ;;  %4381 = vmatmul.mubr.f32.vlgmr.msra.gmra.mrb[80].mxu1 %v1952_v52 }
 0x689   :  { %5107 = vmatpush1.bf16.msra.mxu0 %v6132_v42  ;;  %5138 = vmatpush3.bf16.msra.mxu1 %v6316_v39 }
 0x68a   :  { %5109 = vmatprep.subr.bf16.mxu0 %v6134_v43  ;;  %5139 = vmatprep.subr.bf16.mxu1 %v7277_v50 }
 0x68b   :  { %2197 = vmatprep.mubr.f32.mxu0 %v7278_v45  ;;  %4415 = vmatprep.mubr.msk.f32.mxu1 %vm5863_vm1, %v7278_v45 }
 0x68d   :  { %5111 = vmatpush1.bf16.msra.mxu0 %v6156_v48  ;;  %5141 = vmatpush3.bf16.msra.mxu1 %v6335_v44 }
 0x68e   :  { %5113 = vmatprep.subr.bf16.mxu0 %v6159_v49  ;;  %5142 = vmatprep.subr.bf16.mxu1 %v7277_v50 }
 0x691   :  { %5115 = vmatpush1.bf16.msra.mxu0 %v6181_v54  ;;  %5144 = vmatpush3.bf16.msra.mxu1 %v6351_v13 }
 0x692   :  { %5117 = vmatprep.subr.bf16.mxu0 %v6184_v55  ;;  %5145 = vmatprep.subr.bf16.mxu1 %v7277_v50 }
 0x695   :  { %5119 = vmatpush1.bf16.msra.mxu0 %v6206_v60  ;;  %5147 = vmatpush3.bf16.msra.mxu1 %v6368_v19 }
 0x696   :  { %5121 = vmatprep.subr.bf16.mxu0 %v6209_v61  ;;  %5148 = vmatprep.subr.bf16.mxu1 %v7277_v50 }
 0x699   :  { %5123 = vmatpush1.bf16.msra.mxu0 %v6231_v2  ;;  %5150 = vmatpush3.bf16.msra.mxu1 %v6385_v24 }
 0x69a   :  { %5125 = vmatprep.subr.bf16.mxu0 %v6234_v4  ;;  %5151 = vmatprep.subr.bf16.mxu1 %v7277_v50 }
 0x69d   :  { %5127 = vmatpush1.bf16.msra.mxu0 %v6256_v9  ;;  %5153 = vmatpush3.bf16.msra.mxu1 %v6402_v26 }
 0x69e   :  { %5129 = vmatprep.subr.bf16.mxu0 %v6259_v10  ;;  %5154 = vmatprep.subr.bf16.mxu1 %v7277_v50 }
 0x6a1   :  { %5131 = vmatpush1.bf16.msra.mxu0 %v6281_v18  ;;  %5156 = vmatpush3.bf16.msra.mxu1 %v6419_v30 }
 0x6a2   :  { %5133 = vmatprep.subr.bf16.mxu0 %v6284_v21  ;;  %5157 = vmatprep.subr.bf16.mxu1 %v7277_v50 }
 0x6a5   :  { %5135 = vmatpush1.bf16.msra.mxu0 %v6306_v38  ;;  %5159 = vmatpush3.bf16.msra.mxu1 %v6436_v32 }
 0x6a6   :  { %5161 = vmatprep.subr.bf16.mxu0 %v5987_v23  ;;  %5192 = vmatprep.subr.bf16.mxu1 %v7277_v50 }
 0x75b   :  { %v2028_v6 = vpop.f32.mrb[12].mxu0  ;;  %v2099_v5 = vpop.f32.mrb[80].mxu1 }
 0x75c   :  { %v5603_v16 = vadd.f32 %v6591_v46, %v2028_v6  ;;  %v2030_v0 = vpop.f32.mrb[13].mxu0  ;;  %v4382_v56 = vpop.f32.mrb[81].mxu1  ;;  %v2100_v25 = vadd.f32 %v2099_v5, %v6627_v59 }
 0x75d   :  { %v5605_v8 = vadd.f32 %v6605_v3, %v2030_v0 }
 0x75e   :  { %v3715_v57 = vmul.f32 -1.442695, %v5603_v16 }
 0x75f   :  { %v3716_v11 = vmul.f32 -1.442695, %v5605_v8 }
 0x760   :  { %5763 = vpow2.f32 %v3715_v57 }
 0x761   :  { %5765 = vpow2.f32 %v3716_v11 }
 0x76a   :  { %v5764_v40 = vpop.eup %5763 }
 0x76b   :  { %v2107_v41 = vadd.f32 1.0, %v5764_v40  ;;  %v5766_v1 = vpop.eup %5765 }
 0x76c   :  { %v2114_v7 = vadd.f32 1.0, %v5766_v1 }
 0x76d   :  { %5767 = vrcp.f32 %v2107_v41 }
 0x76e   :  { %5769 = vrcp.f32 %v2114_v7 }
 0x777   :  { %v5768_v29 = vpop.eup %5767 }
 0x778   :  { %v2117_v53 = vmul.f32 %v5768_v29, %v2100_v25  ;;  %v5770_v17 = vpop.eup %5769 }
 0x779   :  { %v2120_v27 = vsub.f32 1.0, %v5770_v17  ;;  %v2122_v37 = vmul.f32 %v5770_v17, %v1952_v52 }
 0x77a   :  { %v2118_v33 = vadd.f32 %v2117_v53, %v6600_v12 }
 0x77c   :  { %5771 = vtanh.f32 %v2118_v33 }
 0x786   :  { %v5772_v15 = vpop.eup %5771 }
 0x787   :  { %v2121_v47 = vmul.f32 %v5772_v15, %v2120_v27 }
 0x789   :  { %v2123_v35 = vadd.f32 %v2122_v37, %v2121_v47 }
 0x78b   :  { %2198 = vmatmul.mubr.f32.vlgmr.msra.gmra.mrb[14].mxu0 %v2123_v35  ;;  %4416 = vmatmul.mubr.f32.vlgmr.msra.gmra.mrb[82].mxu1 %v2123_v35 }
 0x78c   :  { %5163 = vmatpush1.bf16.msra.mxu0 %v6132_v42  ;;  %5194 = vmatpush3.bf16.msra.mxu1 %v6316_v39 }
 0x78d   :  { %5165 = vmatprep.subr.bf16.mxu0 %v6134_v43  ;;  %5195 = vmatprep.subr.bf16.mxu1 %v7277_v50 }
 0x78e   :  { %2368 = vmatprep.mubr.f32.mxu0 %v7278_v45  ;;  %4450 = vmatprep.mubr.msk.f32.mxu1 %vm5863_vm1, %v7278_v45 }
 0x790   :  { %5167 = vmatpush1.bf16.msra.mxu0 %v6156_v48  ;;  %5197 = vmatpush3.bf16.msra.mxu1 %v6335_v44 }
 0x791   :  { %5169 = vmatprep.subr.bf16.mxu0 %v6159_v49  ;;  %5198 = vmatprep.subr.bf16.mxu1 %v7277_v50 }
 0x794   :  { %5171 = vmatpush1.bf16.msra.mxu0 %v6181_v54  ;;  %5200 = vmatpush3.bf16.msra.mxu1 %v6351_v13 }
 0x795   :  { %5173 = vmatprep.subr.bf16.mxu0 %v6184_v55  ;;  %5201 = vmatprep.subr.bf16.mxu1 %v7277_v50 }
 0x798   :  { %5175 = vmatpush1.bf16.msra.mxu0 %v6206_v60  ;;  %5203 = vmatpush3.bf16.msra.mxu1 %v6368_v19 }
 0x799   :  { %5177 = vmatprep.subr.bf16.mxu0 %v6209_v61  ;;  %5204 = vmatprep.subr.bf16.mxu1 %v7277_v50 }
 0x79c   :  { %5179 = vmatpush1.bf16.msra.mxu0 %v6231_v2  ;;  %5206 = vmatpush3.bf16.msra.mxu1 %v6385_v24 }
 0x79d   :  { %5181 = vmatprep.subr.bf16.mxu0 %v6234_v4  ;;  %5207 = vmatprep.subr.bf16.mxu1 %v7277_v50 }
 0x7a0   :  { %5183 = vmatpush1.bf16.msra.mxu0 %v6256_v9  ;;  %5209 = vmatpush3.bf16.msra.mxu1 %v6402_v26 }
 0x7a1   :  { %5185 = vmatprep.subr.bf16.mxu0 %v6259_v10  ;;  %5210 = vmatprep.subr.bf16.mxu1 %v7277_v50 }
 0x7a4   :  { %5187 = vmatpush1.bf16.msra.mxu0 %v6281_v18  ;;  %5212 = vmatpush3.bf16.msra.mxu1 %v6419_v30 }
 0x7a5   :  { %5189 = vmatprep.subr.bf16.mxu0 %v6284_v21  ;;  %5213 = vmatprep.subr.bf16.mxu1 %v7277_v50 }
 0x7a8   :  { %5191 = vmatpush1.bf16.msra.mxu0 %v6306_v38  ;;  %5215 = vmatpush3.bf16.msra.mxu1 %v6436_v32 }
 0x7a9   :  { %5217 = vmatprep.subr.bf16.mxu0 %v5987_v23  ;;  %5248 = vmatprep.subr.bf16.mxu1 %v7277_v50 }
 0x85e   :  { %v2199_v12 = vpop.f32.mrb[14].mxu0  ;;  %v2270_v52 = vpop.f32.mrb[82].mxu1 }
 0x85f   :  { %v5607_v6 = vadd.f32 %v6591_v46, %v2199_v12  ;;  %v2201_v5 = vpop.f32.mrb[15].mxu0  ;;  %v4417_v16 = vpop.f32.mrb[83].mxu1  ;;  %v2271_v1 = vadd.f32 %v2270_v52, %v6627_v59 }
 0x860   :  { %v5609_v56 = vadd.f32 %v6605_v3, %v2201_v5 }
 0x861   :  { %v3717_v0 = vmul.f32 -1.442695, %v5607_v6 }
 0x862   :  { %v3718_v57 = vmul.f32 -1.442695, %v5609_v56 }
 0x863   :  { %5773 = vpow2.f32 %v3717_v0 }
 0x864   :  { %5775 = vpow2.f32 %v3718_v57 }
 0x86d   :  { %v5774_v8 = vpop.eup %5773 }
 0x86e   :  { %v2278_v11 = vadd.f32 1.0, %v5774_v8  ;;  %v5776_v40 = vpop.eup %5775 }
 0x86f   :  { %v2285_v41 = vadd.f32 1.0, %v5776_v40 }
 0x870   :  { %5777 = vrcp.f32 %v2278_v11 }
 0x871   :  { %5779 = vrcp.f32 %v2285_v41 }
 0x87a   :  { %v5778_v7 = vpop.eup %5777 }
 0x87b   :  { %v2288_v25 = vmul.f32 %v5778_v7, %v2271_v1  ;;  %v5780_v53 = vpop.eup %5779 }
 0x87c   :  { %v2291_v33 = vsub.f32 1.0, %v5780_v53  ;;  %v2293_v15 = vmul.f32 %v5780_v53, %v2123_v35 }
 0x87d   :  { %v2289_v29 = vadd.f32 %v2288_v25, %v6593_v51 }
 0x87f   :  { %5781 = vtanh.f32 %v2289_v29 }
 0x889   :  { %v5782_v17 = vpop.eup %5781 }
 0x88a   :  { %v2292_v27 = vmul.f32 %v5782_v17, %v2291_v33 }
 0x88c   :  { %v2294_v47 = vadd.f32 %v2293_v15, %v2292_v27 }
 0x88e   :  { %2369 = vmatmul.mubr.f32.vlgmr.msra.gmra.mrb[16].mxu0 %v2294_v47  ;;  %4451 = vmatmul.mubr.f32.vlgmr.msra.gmra.mrb[84].mxu1 %v2294_v47 }
 0x88f   :  { %5219 = vmatpush1.bf16.msra.mxu0 %v6132_v42  ;;  %5250 = vmatpush3.bf16.msra.mxu1 %v6316_v39 }
 0x890   :  { %5221 = vmatprep.subr.bf16.mxu0 %v6134_v43  ;;  %5251 = vmatprep.subr.bf16.mxu1 %v7277_v50 }
 0x891   :  { %2539 = vmatprep.mubr.f32.mxu0 %v7278_v45  ;;  %4485 = vmatprep.mubr.msk.f32.mxu1 %vm5863_vm1, %v7278_v45 }
 0x893   :  { %5223 = vmatpush1.bf16.msra.mxu0 %v6156_v48  ;;  %5253 = vmatpush3.bf16.msra.mxu1 %v6335_v44 }
 0x894   :  { %5225 = vmatprep.subr.bf16.mxu0 %v6159_v49  ;;  %5254 = vmatprep.subr.bf16.mxu1 %v7277_v50 }
 0x897   :  { %5227 = vmatpush1.bf16.msra.mxu0 %v6181_v54  ;;  %5256 = vmatpush3.bf16.msra.mxu1 %v6351_v13 }
 0x898   :  { %5229 = vmatprep.subr.bf16.mxu0 %v6184_v55  ;;  %5257 = vmatprep.subr.bf16.mxu1 %v7277_v50 }
 0x89b   :  { %5231 = vmatpush1.bf16.msra.mxu0 %v6206_v60  ;;  %5259 = vmatpush3.bf16.msra.mxu1 %v6368_v19 }
 0x89c   :  { %5233 = vmatprep.subr.bf16.mxu0 %v6209_v61  ;;  %5260 = vmatprep.subr.bf16.mxu1 %v7277_v50 }
 0x89f   :  { %5235 = vmatpush1.bf16.msra.mxu0 %v6231_v2  ;;  %5262 = vmatpush3.bf16.msra.mxu1 %v6385_v24 }
 0x8a0   :  { %5237 = vmatprep.subr.bf16.mxu0 %v6234_v4  ;;  %5263 = vmatprep.subr.bf16.mxu1 %v7277_v50 }
 0x8a3   :  { %5239 = vmatpush1.bf16.msra.mxu0 %v6256_v9  ;;  %5265 = vmatpush3.bf16.msra.mxu1 %v6402_v26 }
 0x8a4   :  { %5241 = vmatprep.subr.bf16.mxu0 %v6259_v10  ;;  %5266 = vmatprep.subr.bf16.mxu1 %v7277_v50 }
 0x8a7   :  { %5243 = vmatpush1.bf16.msra.mxu0 %v6281_v18  ;;  %5268 = vmatpush3.bf16.msra.mxu1 %v6419_v30 }
 0x8a8   :  { %5245 = vmatprep.subr.bf16.mxu0 %v6284_v21  ;;  %5269 = vmatprep.subr.bf16.mxu1 %v7277_v50 }
 0x8ab   :  { %5247 = vmatpush1.bf16.msra.mxu0 %v6306_v38  ;;  %5271 = vmatpush3.bf16.msra.mxu1 %v6436_v32 }
 0x8ac   :  { %5273 = vmatprep.subr.bf16.mxu0 %v5987_v23  ;;  %5304 = vmatprep.subr.bf16.mxu1 %v7277_v50 }
 0x961   :  { %v2370_v51 = vpop.f32.mrb[16].mxu0  ;;  %v2441_v37 = vpop.f32.mrb[84].mxu1 }
 0x962   :  { %v5611_v35 = vadd.f32 %v6591_v46, %v2370_v51  ;;  %v2372_v12 = vpop.f32.mrb[17].mxu0  ;;  %v4452_v52 = vpop.f32.mrb[85].mxu1  ;;  %v2442_v11 = vadd.f32 %v2441_v37, %v6627_v59 }
 0x963   :  { %v5613_v5 = vadd.f32 %v6605_v3, %v2372_v12 }
 0x964   :  { %v3719_v6 = vmul.f32 -1.442695, %v5611_v35 }
 0x965   :  { %v3720_v16 = vmul.f32 -1.442695, %v5613_v5 }
 0x966   :  { %5783 = vpow2.f32 %v3719_v6 }
 0x967   :  { %5785 = vpow2.f32 %v3720_v16 }
 0x970   :  { %v5784_v0 = vpop.eup %5783 }
 0x971   :  { %v2449_v56 = vadd.f32 1.0, %v5784_v0  ;;  %v5786_v57 = vpop.eup %5785 }
 0x972   :  { %v2456_v8 = vadd.f32 1.0, %v5786_v57 }
 0x973   :  { %5787 = vrcp.f32 %v2449_v56 }
 0x974   :  { %5789 = vrcp.f32 %v2456_v8 }
 0x97d   :  { %v5788_v40 = vpop.eup %5787 }
 0x97e   :  { %v2459_v41 = vmul.f32 %v5788_v40, %v2442_v11  ;;  %v5790_v7 = vpop.eup %5789 }
 0x97f   :  { %v2462_v25 = vsub.f32 1.0, %v5790_v7  ;;  %v2464_v33 = vmul.f32 %v5790_v7, %v2294_v47 }
 0x980   :  { %v2460_v1 = vadd.f32 %v2459_v41, %v6581_v28 }
 0x982   :  { %5791 = vtanh.f32 %v2460_v1 }
 0x98c   :  { %v5792_v29 = vpop.eup %5791 }
 0x98d   :  { %v2463_v53 = vmul.f32 %v5792_v29, %v2462_v25 }
 0x98f   :  { %v2465_v17 = vadd.f32 %v2464_v33, %v2463_v53 }
 0x991   :  { %2540 = vmatmul.mubr.f32.vlgmr.msra.gmra.mrb[18].mxu0 %v2465_v17  ;;  %4486 = vmatmul.mubr.f32.vlgmr.msra.gmra.mrb[86].mxu1 %v2465_v17 }
 0x992   :  { %5275 = vmatpush1.bf16.msra.mxu0 %v6132_v42  ;;  %5306 = vmatpush3.bf16.msra.mxu1 %v6316_v39 }
 0x993   :  { %5277 = vmatprep.subr.bf16.mxu0 %v6134_v43  ;;  %5307 = vmatprep.subr.bf16.mxu1 %v7277_v50 }
 0x994   :  { %2710 = vmatprep.mubr.f32.mxu0 %v7278_v45  ;;  %4520 = vmatprep.mubr.msk.f32.mxu1 %vm5863_vm1, %v7278_v45 }
 0x996   :  { %5279 = vmatpush1.bf16.msra.mxu0 %v6156_v48  ;;  %5309 = vmatpush3.bf16.msra.mxu1 %v6335_v44 }
 0x997   :  { %5281 = vmatprep.subr.bf16.mxu0 %v6159_v49  ;;  %5310 = vmatprep.subr.bf16.mxu1 %v7277_v50 }
 0x99a   :  { %5283 = vmatpush1.bf16.msra.mxu0 %v6181_v54  ;;  %5312 = vmatpush3.bf16.msra.mxu1 %v6351_v13 }
 0x99b   :  { %5285 = vmatprep.subr.bf16.mxu0 %v6184_v55  ;;  %5313 = vmatprep.subr.bf16.mxu1 %v7277_v50 }
 0x99e   :  { %5287 = vmatpush1.bf16.msra.mxu0 %v6206_v60  ;;  %5315 = vmatpush3.bf16.msra.mxu1 %v6368_v19 }
 0x99f   :  { %5289 = vmatprep.subr.bf16.mxu0 %v6209_v61  ;;  %5316 = vmatprep.subr.bf16.mxu1 %v7277_v50 }
 0x9a2   :  { %5291 = vmatpush1.bf16.msra.mxu0 %v6231_v2  ;;  %5318 = vmatpush3.bf16.msra.mxu1 %v6385_v24 }
 0x9a3   :  { %5293 = vmatprep.subr.bf16.mxu0 %v6234_v4  ;;  %5319 = vmatprep.subr.bf16.mxu1 %v7277_v50 }
 0x9a6   :  { %5295 = vmatpush1.bf16.msra.mxu0 %v6256_v9  ;;  %5321 = vmatpush3.bf16.msra.mxu1 %v6402_v26 }
 0x9a7   :  { %5297 = vmatprep.subr.bf16.mxu0 %v6259_v10  ;;  %5322 = vmatprep.subr.bf16.mxu1 %v7277_v50 }
 0x9aa   :  { %5299 = vmatpush1.bf16.msra.mxu0 %v6281_v18  ;;  %5324 = vmatpush3.bf16.msra.mxu1 %v6419_v30 }
 0x9ab   :  { %5301 = vmatprep.subr.bf16.mxu0 %v6284_v21  ;;  %5325 = vmatprep.subr.bf16.mxu1 %v7277_v50 }
 0x9ae   :  { %5303 = vmatpush1.bf16.msra.mxu0 %v6306_v38  ;;  %5327 = vmatpush3.bf16.msra.mxu1 %v6436_v32 }
 0x9af   :  { %5329 = vmatprep.subr.bf16.mxu0 %v5987_v23  ;;  %5360 = vmatprep.subr.bf16.mxu1 %v7277_v50 }
 0xa64   :  { %v2541_v28 = vpop.f32.mrb[18].mxu0  ;;  %v2612_v27 = vpop.f32.mrb[86].mxu1 }
 0xa65   :  { %v5615_v15 = vadd.f32 %v6591_v46, %v2541_v28  ;;  %v2543_v47 = vpop.f32.mrb[19].mxu0  ;;  %v4487_v51 = vpop.f32.mrb[87].mxu1  ;;  %v2613_v0 = vadd.f32 %v2612_v27, %v6627_v59 }
 0xa66   :  { %v5617_v35 = vadd.f32 %v6605_v3, %v2543_v47 }
 0xa67   :  { %v3721_v37 = vmul.f32 -1.442695, %v5615_v15 }
 0xa68   :  { %v3722_v12 = vmul.f32 -1.442695, %v5617_v35 }
 0xa69   :  { %5793 = vpow2.f32 %v3721_v37 }
 0xa6a   :  { %5795 = vpow2.f32 %v3722_v12 }
 0xa73   :  { %v5794_v52 = vpop.eup %5793 }
 0xa74   :  { %v2620_v6 = vadd.f32 1.0, %v5794_v52  ;;  %v5796_v5 = vpop.eup %5795 }
 0xa75   :  { %v2627_v16 = vadd.f32 1.0, %v5796_v5 }
 0xa76   :  { %5797 = vrcp.f32 %v2620_v6 }
 0xa77   :  { %5799 = vrcp.f32 %v2627_v16 }
 0xa80   :  { %v5798_v56 = vpop.eup %5797 }
 0xa81   :  { %v2630_v57 = vmul.f32 %v5798_v56, %v2613_v0  ;;  %v5800_v11 = vpop.eup %5799 }
 0xa82   :  { %v2633_v40 = vsub.f32 1.0, %v5800_v11  ;;  %v2635_v7 = vmul.f32 %v5800_v11, %v2465_v17 }
 0xa83   :  { %v2631_v8 = vadd.f32 %v2630_v57, %v6575_v34 }
 0xa85   :  { %5801 = vtanh.f32 %v2631_v8  ;;  %v251_v8 = vadd.f32 %v6512_v20, %v6596_v58 }
 0xa8f   :  { %v5802_v41 = vpop.eup %5801 }
 0xa90   :  { %v2634_v1 = vmul.f32 %v5802_v41, %v2633_v40 }
 0xa92   :  { %v2636_v25 = vadd.f32 %v2635_v7, %v2634_v1  ;;  %v5626_v1 = vadd.f32 %v6598_v62, %v251_v8 }
 0xa94   :  { %2711 = vmatmul.mubr.f32.vlgmr.msra.gmra.mrb[20].mxu0 %v2636_v25  ;;  %4521 = vmatmul.mubr.f32.vlgmr.msra.gmra.mrb[88].mxu1 %v2636_v25 }
 0xa95   :  { %5331 = vmatpush1.bf16.msra.mxu0 %v6132_v42  ;;  %5362 = vmatpush3.bf16.msra.mxu1 %v6316_v39 }
 0xa96   :  { %5333 = vmatprep.subr.bf16.mxu0 %v6134_v43  ;;  %5363 = vmatprep.subr.bf16.mxu1 %v7277_v50 }
 0xa97   :  { %2881 = vmatprep.mubr.f32.mxu0 %v7278_v45  ;;  %4555 = vmatprep.mubr.msk.f32.mxu1 %vm5863_vm1, %v7278_v45 }
 0xa99   :  { %5335 = vmatpush1.bf16.msra.mxu0 %v6156_v48  ;;  %5365 = vmatpush3.bf16.msra.mxu1 %v6335_v44 }
 0xa9a   :  { %5337 = vmatprep.subr.bf16.mxu0 %v6159_v49  ;;  %5366 = vmatprep.subr.bf16.mxu1 %v7277_v50 }
 0xa9d   :  { %5339 = vmatpush1.bf16.msra.mxu0 %v6181_v54  ;;  %5368 = vmatpush3.bf16.msra.mxu1 %v6351_v13 }
 0xa9e   :  { %5341 = vmatprep.subr.bf16.mxu0 %v6184_v55  ;;  %5369 = vmatprep.subr.bf16.mxu1 %v7277_v50 }
 0xaa1   :  { %5343 = vmatpush1.bf16.msra.mxu0 %v6206_v60  ;;  %5371 = vmatpush3.bf16.msra.mxu1 %v6368_v19 }
 0xaa2   :  { %5345 = vmatprep.subr.bf16.mxu0 %v6209_v61  ;;  %5372 = vmatprep.subr.bf16.mxu1 %v7277_v50 }
 0xaa5   :  { %5347 = vmatpush1.bf16.msra.mxu0 %v6231_v2  ;;  %5374 = vmatpush3.bf16.msra.mxu1 %v6385_v24 }
 0xaa6   :  { %5349 = vmatprep.subr.bf16.mxu0 %v6234_v4  ;;  %5375 = vmatprep.subr.bf16.mxu1 %v7277_v50 }
 0xaa9   :  { %5351 = vmatpush1.bf16.msra.mxu0 %v6256_v9  ;;  %5377 = vmatpush3.bf16.msra.mxu1 %v6402_v26 }
 0xaaa   :  { %5353 = vmatprep.subr.bf16.mxu0 %v6259_v10  ;;  %5378 = vmatprep.subr.bf16.mxu1 %v7277_v50 }
 0xaad   :  { %5355 = vmatpush1.bf16.msra.mxu0 %v6281_v18  ;;  %5380 = vmatpush3.bf16.msra.mxu1 %v6419_v30 }
 0xaae   :  { %5357 = vmatprep.subr.bf16.mxu0 %v6284_v21  ;;  %5381 = vmatprep.subr.bf16.mxu1 %v7277_v50 }
 0xab1   :  { %5359 = vmatpush1.bf16.msra.mxu0 %v6306_v38  ;;  %5383 = vmatpush3.bf16.msra.mxu1 %v6436_v32 }
 0xab2   :  { %5385 = vmatprep.subr.bf16.mxu0 %v5987_v23  ;;  %5416 = vmatprep.subr.bf16.mxu1 %v7277_v50 }
 0xb67   :  { %v2712_v34 = vpop.f32.mrb[20].mxu0  ;;  %v2783_v29 = vpop.f32.mrb[88].mxu1 }
 0xb68   :  { %v5619_v53 = vadd.f32 %v6591_v46, %v2712_v34  ;;  %v2714_v33 = vpop.f32.mrb[21].mxu0  ;;  %v4522_v17 = vpop.f32.mrb[89].mxu1  ;;  %v2784_v12 = vadd.f32 %v2783_v29, %v6627_v59 }
 0xb69   :  { %v5621_v27 = vadd.f32 %v6605_v3, %v2714_v33 }
 0xb6a   :  { %v3723_v28 = vmul.f32 -1.442695, %v5619_v53 }
 0xb6b   :  { %v3724_v15 = vmul.f32 -1.442695, %v5621_v27 }
 0xb6c   :  { %5803 = vpow2.f32 %v3723_v28 }
 0xb6d   :  { %5805 = vpow2.f32 %v3724_v15 }
 0xb76   :  { %v5804_v47 = vpop.eup %5803 }
 0xb77   :  { %v2791_v51 = vadd.f32 1.0, %v5804_v47  ;;  %v5806_v37 = vpop.eup %5805 }
 0xb78   :  { %v2798_v35 = vadd.f32 1.0, %v5806_v37 }
 0xb79   :  { %5807 = vrcp.f32 %v2791_v51 }
 0xb7a   :  { %5809 = vrcp.f32 %v2798_v35 }
 0xb83   :  { %v5808_v52 = vpop.eup %5807 }
 0xb84   :  { %v2801_v6 = vmul.f32 %v5808_v52, %v2784_v12  ;;  %v5810_v5 = vpop.eup %5809 }
 0xb85   :  { %v2804_v16 = vsub.f32 1.0, %v5810_v5  ;;  %v2806_v56 = vmul.f32 %v5810_v5, %v2636_v25 }
 0xb86   :  { %v2802_v46 = vadd.f32 %v2801_v6, %v6573_v36  ;;  %v249_v36 = vadd.f32 %v6510_v14, %v6584_v31 }
 0xb88   :  { %5811 = vtanh.f32 %v2802_v46  ;;  %v5623_v11 = vadd.f32 %v6586_v22, %v249_v36 }
 0xb92   :  { %v5812_v0 = vpop.eup %5811 }
 0xb93   :  { %v2805_v3 = vmul.f32 %v5812_v0, %v2804_v16  ;;  %v7280_v16 = vld [vmem:[#allocation5_spill] sm:$0xff] }
 0xb94   :  { %v257_v0 = vadd.f32 %v7280_v16, %v6596_v58  ;;  %v3493_v16 = vld [vmem:[%s7257_s6 + $0x8] sm:$0xff] }
 0xb95   :  { %v7020_v57 = vadd.f32 %v2806_v56, %v2805_v3 }
 0xb96   :  { %v5632_v36 = vadd.f32 %v6598_v62, %v257_v0 }
 0xb97   :  { %2882 = vmatmul.mubr.f32.vlgmr.msra.gmra.mrb[28].mxu0 %v7020_v57  ;;  %4556 = vmatmul.mubr.f32.vlgmr.msra.gmra.mrb[90].mxu1 %v7020_v57 }
 0xb98   :  { %5387 = vmatpush1.bf16.msra.mxu0 %v6132_v42  ;;  %5418 = vmatpush3.bf16.msra.mxu1 %v6316_v39 }
 0xb99   :  { %5389 = vmatprep.subr.bf16.mxu0 %v6134_v43  ;;  %5419 = vmatprep.subr.bf16.mxu1 %v7277_v50 }
 0xb9a   :  { %3052 = vmatprep.mubr.f32.mxu0 %v7278_v45  ;;  %4590 = vmatprep.mubr.msk.f32.mxu1 %vm5863_vm1, %v7278_v45 }
 0xb9c   :  { %5391 = vmatpush1.bf16.msra.mxu0 %v6156_v48  ;;  %5421 = vmatpush3.bf16.msra.mxu1 %v6335_v44 }
 0xb9d   :  { %5393 = vmatprep.subr.bf16.mxu0 %v6159_v49  ;;  %5422 = vmatprep.subr.bf16.mxu1 %v7277_v50 }
 0xba0   :  { %5395 = vmatpush1.bf16.msra.mxu0 %v6181_v54  ;;  %5424 = vmatpush3.bf16.msra.mxu1 %v6351_v13 }
 0xba1   :  { %5397 = vmatprep.subr.bf16.mxu0 %v6184_v55  ;;  %5425 = vmatprep.subr.bf16.mxu1 %v7277_v50 }
 0xba4   :  { %5399 = vmatpush1.bf16.msra.mxu0 %v6206_v60  ;;  %5427 = vmatpush3.bf16.msra.mxu1 %v6368_v19 }
 0xba5   :  { %5401 = vmatprep.subr.bf16.mxu0 %v6209_v61  ;;  %5428 = vmatprep.subr.bf16.mxu1 %v7277_v50 }
 0xba8   :  { %5403 = vmatpush1.bf16.msra.mxu0 %v6231_v2  ;;  %5430 = vmatpush3.bf16.msra.mxu1 %v6385_v24 }
 0xba9   :  { %5405 = vmatprep.subr.bf16.mxu0 %v6234_v4  ;;  %5431 = vmatprep.subr.bf16.mxu1 %v7277_v50 }
 0xbac   :  { %5407 = vmatpush1.bf16.msra.mxu0 %v6256_v9  ;;  %5433 = vmatpush3.bf16.msra.mxu1 %v6402_v26 }
 0xbad   :  { %5409 = vmatprep.subr.bf16.mxu0 %v6259_v10  ;;  %5434 = vmatprep.subr.bf16.mxu1 %v7277_v50 }
 0xbb0   :  { %5411 = vmatpush1.bf16.msra.mxu0 %v6281_v18  ;;  %5436 = vmatpush3.bf16.msra.mxu1 %v6419_v30 }
 0xbb1   :  { %5413 = vmatprep.subr.bf16.mxu0 %v6284_v21  ;;  %5437 = vmatprep.subr.bf16.mxu1 %v7277_v50 }
 0xbb4   :  { %5415 = vmatpush1.bf16.msra.mxu0 %v6306_v38  ;;  %5439 = vmatpush3.bf16.msra.mxu1 %v6436_v32 }
 0xbb5   :  { %5441 = vmatprep.subr.bf16.mxu0 %v5987_v23  ;;  %5472 = vmatprep.subr.bf16.mxu1 %v7277_v50 }
 0xc6a   :  { %v2883_v40 = vpop.f32.mrb[28].mxu0  ;;  %v2954_v41 = vpop.f32.mrb[90].mxu1 }
 0xc6b   :  { %v5624_v7 = vadd.f32 %v5623_v11, %v2883_v40  ;;  %v2885_v25 = vpop.f32.mrb[29].mxu0  ;;  %v4557_v34 = vpop.f32.mrb[91].mxu1  ;;  %v2955_v20 = vadd.f32 %v2954_v41, %v6627_v59 }
 0xc6c   :  { %v5627_v29 = vadd.f32 %v5626_v1, %v2885_v25 }
 0xc6d   :  { %v3725_v53 = vmul.f32 -1.442695, %v5624_v7 }
 0xc6e   :  { %v3726_v33 = vmul.f32 -1.442695, %v5627_v29 }
 0xc6f   :  { %5813 = vpow2.f32 %v3725_v53 }
 0xc70   :  { %5815 = vpow2.f32 %v3726_v33 }
 0xc79   :  { %v5814_v17 = vpop.eup %5813 }
 0xc7a   :  { %v2962_v28 = vadd.f32 1.0, %v5814_v17  ;;  %v5816_v14 = vpop.eup %5815 }
 0xc7b   :  { %v2969_v27 = vadd.f32 1.0, %v5816_v14 }
 0xc7c   :  { %5817 = vrcp.f32 %v2962_v28  ;;  %v7281_v28 = vld [vmem:[#allocation12_spill] sm:$0xff] }
 0xc7d   :  { %5819 = vrcp.f32 %v2969_v27 }
 0xc86   :  { %v5818_v15 = vpop.eup %5817 }
 0xc87   :  { %v2972_v47 = vmul.f32 %v5818_v15, %v2955_v20  ;;  %v5820_v37 = vpop.eup %5819 }
 0xc88   :  { %v2975_v35 = vsub.f32 1.0, %v5820_v37  ;;  %v2977_v6 = vmul.f32 %v5820_v37, %v7020_v57 }
 0xc89   :  { %v2973_v51 = vadd.f32 %v2972_v47, %v6571_v63  ;;  %v7279_v63 = vld [vmem:[#allocation4_spill] sm:$0xff] }
 0xc8a   :  { %v255_v5 = vadd.f32 %v7279_v63, %v6584_v31 }
 0xc8b   :  { %5821 = vtanh.f32 %v2973_v51 }
 0xc8c   :  { %v5629_v3 = vadd.f32 %v6586_v22, %v255_v5  ;;  %v3492_v5 = vld [vmem:[%s7257_s6] sm:$0xff] }
 0xc8d   :  { %v5553_v0 = vpack.c.bf16 %v3493_v16, %v3492_v5 }
 0xc95   :  { %v5822_v12 = vpop.eup %5821 }
 0xc96   :  { %v2976_v52 = vmul.f32 %v5822_v12, %v2975_v35 }
 0xc98   :  { %v7068_v46 = vadd.f32 %v2977_v6, %v2976_v52 }
 0xc9a   :  { %3053 = vmatmul.mubr.f32.vlgmr.msra.gmra.mrb[26].mxu0 %v7068_v46  ;;  %4591 = vmatmul.mubr.f32.vlgmr.msra.gmra.mrb[92].mxu1 %v7068_v46 }
 0xc9b   :  { %5443 = vmatpush1.bf16.msra.mxu0 %v6132_v42  ;;  %5474 = vmatpush3.bf16.msra.mxu1 %v6316_v39 }
 0xc9c   :  { %5445 = vmatprep.subr.bf16.mxu0 %v6134_v43  ;;  %5475 = vmatprep.subr.bf16.mxu1 %v7277_v50 }
 0xc9d   :  { %3223 = vmatprep.mubr.f32.mxu0 %v7278_v45  ;;  %4625 = vmatprep.mubr.msk.f32.mxu1 %vm5863_vm1, %v7278_v45 }
 0xc9f   :  { %5447 = vmatpush1.bf16.msra.mxu0 %v6156_v48  ;;  %5477 = vmatpush3.bf16.msra.mxu1 %v6335_v44 }
 0xca0   :  { %5449 = vmatprep.subr.bf16.mxu0 %v6159_v49  ;;  %5478 = vmatprep.subr.bf16.mxu1 %v7277_v50 }
 0xca3   :  { %5451 = vmatpush1.bf16.msra.mxu0 %v6181_v54  ;;  %5480 = vmatpush3.bf16.msra.mxu1 %v6351_v13 }
 0xca4   :  { %5453 = vmatprep.subr.bf16.mxu0 %v6184_v55  ;;  %5481 = vmatprep.subr.bf16.mxu1 %v7277_v50 }
 0xca7   :  { %5455 = vmatpush1.bf16.msra.mxu0 %v6206_v60  ;;  %5483 = vmatpush3.bf16.msra.mxu1 %v6368_v19 }
 0xca8   :  { %5457 = vmatprep.subr.bf16.mxu0 %v6209_v61  ;;  %5484 = vmatprep.subr.bf16.mxu1 %v7277_v50 }
 0xcab   :  { %5459 = vmatpush1.bf16.msra.mxu0 %v6231_v2  ;;  %5486 = vmatpush3.bf16.msra.mxu1 %v6385_v24 }
 0xcac   :  { %5461 = vmatprep.subr.bf16.mxu0 %v6234_v4  ;;  %5487 = vmatprep.subr.bf16.mxu1 %v7277_v50 }
 0xcaf   :  { %5463 = vmatpush1.bf16.msra.mxu0 %v6256_v9  ;;  %5489 = vmatpush3.bf16.msra.mxu1 %v6402_v26 }
 0xcb0   :  { %5465 = vmatprep.subr.bf16.mxu0 %v6259_v10  ;;  %5490 = vmatprep.subr.bf16.mxu1 %v7277_v50 }
 0xcb3   :  { %5467 = vmatpush1.bf16.msra.mxu0 %v6281_v18  ;;  %5492 = vmatpush3.bf16.msra.mxu1 %v6419_v30 }
 0xcb4   :  { %5469 = vmatprep.subr.bf16.mxu0 %v6284_v21  ;;  %5493 = vmatprep.subr.bf16.mxu1 %v7277_v50 }
 0xcb7   :  { %5471 = vmatpush1.bf16.msra.mxu0 %v6306_v38  ;;  %5495 = vmatpush3.bf16.msra.mxu1 %v6436_v32 }
 0xcb8   :  { %5497 = vmatprep.subr.bf16.mxu0 %v5987_v23  ;;  %5528 = vmatprep.subr.bf16.mxu1 %v7277_v50 }
 0xd6d   :  { %v3054_v56 = vpop.f32.mrb[26].mxu0  ;;  %v3125_v57 = vpop.f32.mrb[92].mxu1 }
 0xd6e   :  { %v5630_v8 = vadd.f32 %v5629_v3, %v3054_v56  ;;  %v3056_v11 = vpop.f32.mrb[27].mxu0  ;;  %v4592_v40 = vpop.f32.mrb[93].mxu1  ;;  %v3126_v53 = vadd.f32 %v3125_v57, %v6627_v59  ;;  %v3494_v3 = vld [vmem:[%s7257_s6 + $0x10] sm:$0xff]  ;;  %v3496_v57 = vld [vmem:[%s7257_s6 + $0x20] sm:$0xff] }
 0xd6f   :  { %v5633_v41 = vadd.f32 %v5632_v36, %v3056_v11  ;;  %v3497_v36 = vld [vmem:[%s7257_s6 + $0x28] sm:$0xff]  ;;  %v3498_v11 = vld [vmem:[%s7257_s6 + $0x30] sm:$0xff]  ;;  %v3499_v40 = vld [vmem:[%s7257_s6 + $0x38] sm:$0xff] }
 0xd70   :  { %v3727_v1 = vmul.f32 -1.442695, %v5630_v8  ;;  %v5559_v8 = vpack.c.bf16 %v3497_v36, %v3496_v57 }
 0xd71   :  { %v3728_v23 = vmul.f32 -1.442695, %v5633_v41  ;;  %v5562_v41 = vpack.c.bf16 %v3499_v40, %v3498_v11 }
 0xd72   :  { %5823 = vpow2.f32 %v3727_v1  ;;  %v3500_v1 = vld [vmem:[%s7257_s6 + $0x40] sm:$0xff] }
 0xd73   :  { %5825 = vpow2.f32 %v3728_v23  ;;  %v3501_v23 = vld [vmem:[%s7257_s6 + $0x48] sm:$0xff] }
 0xd7c   :  { %v5824_v7 = vpop.eup %5823 }
 0xd7d   :  { %v3133_v25 = vadd.f32 1.0, %v5824_v7  ;;  %v5826_v34 = vpop.eup %5825  ;;  %v5565_v7 = vpack.c.bf16 %v3501_v23, %v3500_v1 }
 0xd7e   :  { %v3140_v29 = vadd.f32 1.0, %v5826_v34  ;;  %v3503_v34 = vld [vmem:[%s7257_s6 + $0x58] sm:$0xff] }
 0xd7f   :  { %5827 = vrcp.f32 %v3133_v25  ;;  %v3502_v25 = vld [vmem:[%s7257_s6 + $0x50] sm:$0xff] }
 0xd80   :  { %5829 = vrcp.f32 %v3140_v29  ;;  %v5568_v29 = vpack.c.bf16 %v3503_v34, %v3502_v25 }
 0xd89   :  { %v5828_v33 = vpop.eup %5827 }
 0xd8a   :  { %v3143_v17 = vmul.f32 %v5828_v33, %v3126_v53  ;;  %v5830_v27 = vpop.eup %5829  ;;  %v3504_v53 = vld [vmem:[%s7257_s6 + $0x60] sm:$0xff]  ;;  %v3505_v33 = vld [vmem:[%s7257_s6 + $0x68] sm:$0xff] }
 0xd8b   :  { %v3146_v20 = vsub.f32 1.0, %v5830_v27  ;;  %v3148_v51 = vmul.f32 %v5830_v27, %v7068_v46 }
 0xd8c   :  { %v3144_v14 = vadd.f32 %v3143_v17, %v7281_v28  ;;  %v5571_v17 = vpack.c.bf16 %v3505_v33, %v3504_v53  ;;  %v3506_v28 = vld [vmem:[%s7257_s6 + $0x70] sm:$0xff] }
 0xd8e   :  { %5831 = vtanh.f32 %v3144_v14  ;;  %v3507_v14 = vld [vmem:[%s7257_s6 + $0x78] sm:$0xff] }
 0xd8f   :  { %v5574_v27 = vpack.c.bf16 %v3507_v14, %v3506_v28 }
 0xd98   :  { %v5832_v15 = vpop.eup %5831 }
 0xd99   :  { %v3147_v47 = vmul.f32 %v5832_v15, %v3146_v20  ;;  %v7285_v20 = vld [vmem:[#allocation8_spill] sm:$0xff] }
 0xd9a   :  { %v267_v15 = vadd.f32 %v7285_v20, %v6584_v31 }
 0xd9b   :  { %v7116_v37 = vadd.f32 %v3148_v51, %v3147_v47  ;;  %v7286_v47 = vld [vmem:[#allocation9_spill] sm:$0xff] }
 0xd9c   :  { %v269_v51 = vadd.f32 %v7286_v47, %v6596_v58 }
 0xd9d   :  { %3224 = vmatmul.mubr.f32.vlgmr.msra.gmra.mrb[24].mxu0 %v7116_v37  ;;  %4626 = vmatmul.mubr.f32.vlgmr.msra.gmra.mrb[94].mxu1 %v7116_v37 }
 0xd9e   :  { %5499 = vmatpush1.bf16.msra.mxu0 %v6132_v42  ;;  %5530 = vmatpush3.bf16.msra.mxu1 %v6316_v39  ;;  %v7282_v42 = vld [vmem:[#allocation6_spill] sm:$0xff] }
 0xd9f   :  { %5501 = vmatprep.subr.bf16.mxu0 %v6134_v43  ;;  %5531 = vmatprep.subr.bf16.mxu1 %v7277_v50  ;;  %v261_v43 = vadd.f32 %v7282_v42, %v6584_v31 }
 0xda0   :  { %3394 = vmatprep.mubr.f32.mxu0 %v7278_v45  ;;  %4660 = vmatprep.mubr.msk.f32.mxu1 %vm5863_vm1, %v7278_v45 }
 0xda2   :  { %5503 = vmatpush1.bf16.msra.mxu0 %v6156_v48  ;;  %5533 = vmatpush3.bf16.msra.mxu1 %v6335_v44  ;;  %v7283_v48 = vld [vmem:[#allocation7_spill] sm:$0xff] }
 0xda3   :  { %5505 = vmatprep.subr.bf16.mxu0 %v6159_v49  ;;  %5534 = vmatprep.subr.bf16.mxu1 %v7277_v50  ;;  %v263_v49 = vadd.f32 %v7283_v48, %v6596_v58  ;;  %v5644_v48 = vadd.f32 %v6598_v62, %v269_v51 }
 0xda6   :  { %5507 = vmatpush1.bf16.msra.mxu0 %v6181_v54  ;;  %5536 = vmatpush3.bf16.msra.mxu1 %v6351_v13  ;;  %v5635_v54 = vadd.f32 %v6586_v22, %v261_v43 }
 0xda7   :  { %5509 = vmatprep.subr.bf16.mxu0 %v6184_v55  ;;  %5537 = vmatprep.subr.bf16.mxu1 %v7277_v50 }
 0xdaa   :  { %5511 = vmatpush1.bf16.msra.mxu0 %v6206_v60  ;;  %5539 = vmatpush3.bf16.msra.mxu1 %v6368_v19 }
 0xdab   :  { %5513 = vmatprep.subr.bf16.mxu0 %v6209_v61  ;;  %5540 = vmatprep.subr.bf16.mxu1 %v7277_v50  ;;  %v5638_v61 = vadd.f32 %v6598_v62, %v263_v49 }
 0xdae   :  { %5515 = vmatpush1.bf16.msra.mxu0 %v6231_v2  ;;  %5542 = vmatpush3.bf16.msra.mxu1 %v6385_v24 }
 0xdaf   :  { %5517 = vmatprep.subr.bf16.mxu0 %v6234_v4  ;;  %5543 = vmatprep.subr.bf16.mxu1 %v7277_v50 }
 0xdb2   :  { %5519 = vmatpush1.bf16.msra.mxu0 %v6256_v9  ;;  %5545 = vmatpush3.bf16.msra.mxu1 %v6402_v26 }
 0xdb3   :  { %5521 = vmatprep.subr.bf16.mxu0 %v6259_v10  ;;  %5546 = vmatprep.subr.bf16.mxu1 %v7277_v50 }
 0xdb6   :  { %5523 = vmatpush1.bf16.msra.mxu0 %v6281_v18  ;;  %5548 = vmatpush3.bf16.msra.mxu1 %v6419_v30  ;;  %v7284_v30 = vld [vmem:[#allocation11_spill] sm:$0xff] }
 0xdb7   :  { %5525 = vmatprep.subr.bf16.mxu0 %v6284_v21  ;;  %5549 = vmatprep.subr.bf16.mxu1 %v7277_v50 }
 0xdba   :  { %5527 = vmatpush1.bf16.msra.mxu0 %v6306_v38  ;;  %5551 = vmatpush3.bf16.msra.mxu1 %v6436_v32 }
 0xdbb   :  { %5552 = vmatprep.subr.bf16.mxu0 %v7277_v50 }
 0xe70   :  { %v3225_v55 = vpop.f32.mrb[24].mxu0  ;;  %v3296_v60 = vpop.f32.mrb[94].mxu1 }
 0xe71   :  { %v5636_v2 = vadd.f32 %v5635_v54, %v3225_v55  ;;  %v3227_v4 = vpop.f32.mrb[25].mxu0  ;;  %v4627_v9 = vpop.f32.mrb[95].mxu1  ;;  %v3297_v19 = vadd.f32 %v3296_v60, %v6627_v59 }
 0xe72   :  { %v5639_v10 = vadd.f32 %v5638_v61, %v3227_v4 }
 0xe73   :  { %v3729_v18 = vmul.f32 -1.442695, %v5636_v2 }
 0xe74   :  { %v3730_v21 = vmul.f32 -1.442695, %v5639_v10 }
 0xe75   :  { %5833 = vpow2.f32 %v3729_v18  ;;  %v7287_v18 = vld [vmem:[#allocation10_spill] sm:$0xff] }
 0xe76   :  { %5835 = vpow2.f32 %v3730_v21 }
 0xe7f   :  { %v5834_v38 = vpop.eup %5833 }
 0xe80   :  { %v3304_v39 = vadd.f32 1.0, %v5834_v38  ;;  %v5836_v44 = vpop.eup %5835 }
 0xe81   :  { %v3311_v13 = vadd.f32 1.0, %v5836_v44 }
 0xe82   :  { %5837 = vrcp.f32 %v3304_v39 }
 0xe83   :  { %5839 = vrcp.f32 %v3311_v13 }
 0xe8c   :  { %v5838_v24 = vpop.eup %5837 }
 0xe8d   :  { %v3314_v26 = vmul.f32 %v5838_v24, %v3297_v19  ;;  %v5840_v35 = vpop.eup %5839  ;;  %v3733_v24 = vld [vmem:[%s7258_s7] ss:$0 sm:$0xff] }
 0xe8e   :  { %v3317_v12 = vsub.f32 1.0, %v5840_v35  ;;  %v3319_v46 = vmul.f32 %v5840_v35, %v7116_v37  ;;  %v5641_v37 = vadd.f32 %v6586_v22, %v267_v15 }
 0xe8f   :  { %v3315_v32 = vadd.f32 %v3314_v26, %v7284_v30 }
 0xe91   :  { %5841 = vtanh.f32 %v3315_v32 }
 0xe9b   :  { %v5842_v52 = vpop.eup %5841 }
 0xe9c   :  { %v3318_v6 = vmul.f32 %v5842_v52, %v3317_v12 }
 0xe9e   :  { %v7163_v63 = vadd.f32 %v3319_v46, %v3318_v6 }
 0xea0   :  { %3395 = vmatmul.mubr.f32.vlgmr.msra.gmra.mrb[22].mxu0 %v7163_v63  ;;  %4661 = vmatmul.mubr.f32.vlgmr.msra.gmra.mrb[96].mxu1 %v7163_v63 }
 0xea1   :  { %4695 = vmatprep.mubr.msk.f32.mxu0 %vm5863_vm1, %v7278_v45  ;;  %5554 = vmatpush3.bf16.msra.mxu0 %v5553_v0  ;;  %v3495_v45 = vld [vmem:[%s7257_s6 + $0x18] sm:$0xff] }
 0xea2   :  { %5555 = vmatprep.subr.bf16.mxu0 %v7277_v50  ;;  %v5556_v56 = vpack.c.bf16 %v3495_v45, %v3494_v3 }
 0xea5   :  { %5557 = vmatpush3.bf16.msra.mxu0 %v5556_v56 }
 0xea6   :  { %5558 = vmatprep.subr.bf16.mxu0 %v7277_v50 }
 0xea9   :  { %5560 = vmatpush3.bf16.msra.mxu0 %v5559_v8 }
 0xeaa   :  { %5561 = vmatprep.subr.bf16.mxu0 %v7277_v50 }
 0xead   :  { %5563 = vmatpush3.bf16.msra.mxu0 %v5562_v41 }
 0xeae   :  { %5564 = vmatprep.subr.bf16.mxu0 %v7277_v50 }
 0xeb1   :  { %5566 = vmatpush3.bf16.msra.mxu0 %v5565_v7 }
 0xeb2   :  { %5567 = vmatprep.subr.bf16.mxu0 %v7277_v50 }
 0xeb5   :  { %5569 = vmatpush3.bf16.msra.mxu0 %v5568_v29 }
 0xeb6   :  { %5570 = vmatprep.subr.bf16.mxu0 %v7277_v50 }
 0xeb9   :  { %5572 = vmatpush3.bf16.msra.mxu0 %v5571_v17 }
 0xeba   :  { %5573 = vmatprep.subr.bf16.mxu0 %v7277_v50 }
 0xebd   :  { %5575 = vmatpush3.bf16.msra.mxu0 %v5574_v27 }
 0xf73   :  { %v3396_v42 = vpop.f32.mrb[22].mxu0  ;;  %v3467_v43 = vpop.f32.mrb[96].mxu1 }
 0xf74   :  { %v5642_v49 = vadd.f32 %v5641_v37, %v3396_v42  ;;  %v3398_v54 = vpop.f32.mrb[23].mxu0  ;;  %v4662_v55 = vpop.f32.mrb[97].mxu1  ;;  %v3468_v58 = vadd.f32 %v3467_v43, %v6627_v59 }
 0xf75   :  { %v5645_v60 = vadd.f32 %v5644_v48, %v3398_v54 }
 0xf76   :  { %v3731_v61 = vmul.f32 -1.442695, %v5642_v49 }
 0xf77   :  { %v3732_v50 = vmul.f32 -1.442695, %v5645_v60 }
 0xf78   :  { %5843 = vpow2.f32 %v3731_v61 }
 0xf79   :  { %5845 = vpow2.f32 %v3732_v50 }
 0xf82   :  { %v5844_v2 = vpop.eup %5843 }
 0xf83   :  { %v3475_v4 = vadd.f32 1.0, %v5844_v2  ;;  %v5846_v31 = vpop.eup %5845 }
 0xf84   :  { %v3482_v9 = vadd.f32 1.0, %v5846_v31 }
 0xf85   :  { %5847 = vrcp.f32 %v3475_v4 }
 0xf86   :  { %5849 = vrcp.f32 %v3482_v9 }
 0xf8f   :  { %v5848_v22 = vpop.eup %5847 }
 0xf90   :  { %v3485_v10 = vmul.f32 %v5848_v22, %v3468_v58  ;;  %v5850_v21 = vpop.eup %5849 }
 0xf91   :  { %v3488_v38 = vsub.f32 1.0, %v5850_v21  ;;  %v3490_v13 = vmul.f32 %v5850_v21, %v7163_v63 }
 0xf92   :  { %v3486_v62 = vadd.f32 %v3485_v10, %v7287_v18 }
 0xf94   :  { %5851 = vtanh.f32 %v3486_v62 }
 0xf9e   :  { %v5852_v39 = vpop.eup %5851 }
 0xf9f   :  { %v3489_v44 = vmul.f32 %v5852_v39, %v3488_v38 }
 0xfa1   :  { %v3491_v19 = vadd.f32 %v3490_v13, %v3489_v44 }
 0xfa3   :  { %4696 = vmatmul.mubr.f32.vlgmr.msra.gmra.mrb[30].mxu0 %v3491_v19 }
0x1076   :  { %v3581_v26 = vpop.f32.mrb[30].mxu0 }
0x1077   :  { %v3582_v59 = vadd.f32 %v3733_v24, %v3581_v26  ;;  %v4697_v30 = vpop.f32.mrb[31].mxu0 }
0x1079   :  { %v3585_v32 = vmul.f32 %v3582_v59, %v3582_v59  ;;  %v3610_v16 = vand.u32 2147483647, %v3582_v59  ;;  %v3609_v25 = vmax.f32 %v3582_v59, 0.0 }
0x107b   :  { %3595 = vrot.lane.b32.xlu0 %v3585_v32, %s5864_s14  ;;  %v3587_v35 = vsel %vm3586_vm2, %v3585_v32, 0.0  ;;  %v3611_v0 = vsub.f32 0.0, %v3610_v16 }
0x107c   :  { %3588 = vadd.xlane.f32.xlu1 %v3587_v35 }
0x107d   :  { %v3612_v3 = vmul.f32 1.442695, %v3611_v0 }
0x10ed   :  { %v3596_v12 = vpop.permute.xlu0 %3595 }
0x10ee   :  { %v3598_v52 = vsel %vm3586_vm2, %v3596_v12, 0.0 }
0x10ef   :  { %3599 = vadd.xlane.f32.xlu0 %v3598_v52 }
0x1109   :  { %v3589_v6 = vpop.xlane.xlu1 %3588 }
0x110a   :  { %v3590_v46 = vadd.f32 1e-12, %v3589_v6 }
0x110c   :  { %5853 = vrsqrt.f32 %v3590_v46 }
0x110d   :  { %5855 = vpow2.f32 %v3612_v3 }
0x1116   :  { %v5854_v63 = vpop.eup %5853 }
0x1117   :  { %v3592_v5 = vmul.f32 %v5854_v63, %v3582_v59  ;;  %v5856_v45 = vpop.eup %5855 }
0x1118   :  { %v3614_v56 = vadd.f32 1.0, %v5856_v45  ;;  %v3617_v8 = vmul.f32 -0.5, %v5856_v45  ;;  %v3620_v41 = vand.u32 2147483647, %v5856_v45 }
0x1119   :  { %3593 = vst.msk [vmem:[%s7259_s8] sm:$0x3] %vm3586_vm2, %v3592_v5  ;;  %s5865_s8 = smov 112  }
0x111a   :  { %5857 = vlog2.f32 %v3614_v56  ;;  %v3618_v40 = vadd.f32 1.0, %v3617_v8  ;;  %vm3621_vm3 = vcmp.lt.f32.partialorder %v3620_v41, 0.0004427343 }
0x111c   :  { %v3619_v23 = vmul.f32 %v5856_v45, %v3618_v40 }
0x1124   :  { %v5858_v11 = vpop.eup %5857 }
0x1125   :  { %v3616_v1 = vmul.f32 0.6931472, %v5858_v11 }
0x1127   :  { %v3622_v7 = vsel %vm3621_vm3, %v3619_v23, %v3616_v1 }
0x1128   :  { %v3623_v53 = vadd.f32 %v3622_v7, %v3609_v25 }
0x112a   :  { %v3624_v33 = vadd.f32 1.0, %v3623_v53 }
0x117c   :  { %v3600_v57 = vpop.xlane.xlu0 %3599 }
0x117d   :  { %v3601_v36 = vadd.f32 1e-12, %v3600_v57 }
0x117f   :  { %5859 = vrsqrt.f32 %v3601_v36 }
0x1189   :  { %v5860_v34 = vpop.eup %5859 }
0x118a   :  { %v3603_v29 = vmul.f32 %v5860_v34, %v3582_v59 }
0x118c   :  { %3605 = vrot.lane.b32.xlu1 %v3603_v29, %s5864_s14 }
0x1190   :  { %3626 = vrot.lane.b32.xlu1 %v3624_v33, %s5865_s8 }
0x11fe   :  { %v3606_v17 = vpop.permute.xlu1 %3605 }
0x11ff   :  { %3608 = vst.msk [vmem:[%s7260_s10] sm:$0x3] %vm3586_vm2, %v3606_v17 }
0x1202   :  { %v3627_v28 = vpop.permute.xlu1 %3626 }
0x1203   :  { %3630 = vst.msk [vmem:[%s7261_s9] sm:$0x3] %vm3629_vm4, %v3627_v28 }

// kernel: s_vae_couple_forward.3
= control target key start
LH: loop header
LB: loop body
LE: loop exit
PB: predicated region body
PF: predicated region fallthrough
CT: control target
= control target key end

     0   :  { %21 = vsyncpa [#allocation5], 0  ;;  %v7703_v2 = vmov 0.0|0.0   ;;  %vm6092_vm0 = vmmov 0   ;;  %v7701_v4 = vmov 0.0   ;;  %s7685_s0 = inlined_call_operand.vmem [shape: f32[8,16], index: 0, kind: input, shape index: {}]   ;;  %s7686_s1 = inlined_call_operand.vmem [shape: f32[16,32], index: 1, kind: input, shape index: {}]   ;;  %s7687_s2 = inlined_call_operand.vmem [shape: f32[1,32], index: 2, kind: input, shape index: {}]   ;;  %s7688_s3 = inlined_call_operand.vmem [shape: f32[32,32], index: 3, kind: input, shape index: {}]   ;;  %s7689_s4 = inlined_call_operand.vmem [shape: f32[1,32], index: 4, kind: input, shape index: {}]   ;;  %s7690_s5 = inlined_call_operand.vmem [shape: f32[32,384], index: 5, kind: input, shape index: {}]   ;;  %s7691_s6 = inlined_call_operand.vmem [shape: f32[16,384], index: 6, kind: input, shape index: {}]   ;;  %s7692_s7 = inlined_call_operand.vmem [shape: f32[1,384], index: 7, kind: input, shape index: {}]   ;;  %s7693_s8 = inlined_call_operand.vmem [shape: f32[128,384], index: 8, kind: input, shape index: {}]   ;;  %s7694_s9 = inlined_call_operand.vmem [shape: f32[1,384], index: 9, kind: input, shape index: {}]   ;;  %s7695_s10 = inlined_call_operand.vmem [shape: f32[128,256], index: 10, kind: input, shape index: {}]   ;;  %s7696_s11 = inlined_call_operand.vmem [shape: f32[1,256], index: 11, kind: input, shape index: {}]   ;;  %s7697_s12 = inlined_call_operand.vmem [shape: f32[120,16], index: 12, kind: input, shape index: {}]   ;;  %s7698_s13 = inlined_call_operand.hbm [shape: f32[2,16], index: 13, kind: output, shape index: {0}]   ;;  %s7699_s14 = inlined_call_operand.hbm [shape: f32[2,16], index: 14, kind: output, shape index: {1}]   ;;  %s7700_s15 = inlined_call_operand.vmem [shape: f32[128,256], index: 15, kind: output, shape index: {2}]  }
   0x1   :  { %v50_v0 = vld [vmem:[%s7686_s1] sm:$0xff]  ;;  %v51_v1 = vld [vmem:[%s7686_s1 + $0x8] sm:$0xff]  ;;  %4821 = vmatprep.subr.bf16.mxu0 %v7703_v2  ;;  %4187 = vmatprep.mubr.msk.f32.mxu0 %vm6092_vm0, %v7701_v4 }
   0x2   :  { %v4822_v3 = vpack.c.bf16 %v51_v1, %v50_v0  ;;  %v134_v5 = vld [vmem:[%s7688_s3] sm:$0xff]  ;;  %v135_v6 = vld [vmem:[%s7688_s3 + $0x8] sm:$0xff]  ;;  %4824 = vmatprep.subr.bf16.mxu1 %v7703_v2  ;;  %4198 = vmatprep.mubr.msk.f32.mxu1 %vm6092_vm0, %v7701_v4 }
   0x3   :  { %v4825_v7 = vpack.c.bf16 %v135_v6, %v134_v5 }
   0x4   :  { %22 = vsyncpa [#allocation7], 0  ;;  %4823 = vmatpush3.bf16.msra.mxu0 %v4822_v3  ;;  %v49_v8 = vld [vmem:[%s7685_s0] sm:$0xff]  ;;  %vm59_vm1 = vcmask 130048   ;;  %v136_v9 = vld [vmem:[%s7688_s3 + $0x10] sm:$0xff]  ;;  %vm145_vm2 = vcmask 261120  }
   0x5   :  { %4826 = vmatpush3.bf16.msra.mxu1 %v4825_v7  ;;  %v137_v10 = vld [vmem:[%s7688_s3 + $0x18] sm:$0xff]  ;;  %v228_v12 = vld [vmem:[%s7690_s5 + $0x8] sm:$0xff]  ;;  %v231_v13 = vld [vmem:[%s7690_s5 + $0x20] sm:$0xff]  ;;  %vm219_vm3 = vcmask 123904   ;;  %s6094_s19 = smov 112   ;;  %s6096_s24 = smov [#allocation6]  }
   0x6   :  { %4827 = vmatprep.subr.bf16.mxu1 %v7703_v2  ;;  %v4828_v11 = vpack.c.bf16 %v137_v10, %v136_v9  ;;  %v4830_v14 = vpack.c.bf16 %v231_v13, %v228_v12  ;;  %v227_v15 = vld [vmem:[%s7690_s5] sm:$0xff]  ;;  %v230_v16 = vld [vmem:[%s7690_s5 + $0x18] sm:$0xff]  ;;  %v237_v19 = vld [vmem:[%s7690_s5 + $0x50] sm:$0xff]  ;;  %s3797_s25 = sshll.u32 %s6096_s24, 4  ;;  %s3798_s25 = int_to_ptr.vmem [resolvable:$true] %s3797_s25 }
   0x7   :  { %4188 = vmatmul.mubr.msk.f32.vlgmr.msra.gmra.mrb[0].mxu0 %vm59_vm1, %v49_v8  ;;  %v4832_v17 = vpack.c.bf16 %v230_v16, %v227_v15  ;;  %v234_v18 = vld [vmem:[%s7690_s5 + $0x38] sm:$0xff]  ;;  %v3813_v21 = vld [vmem:[%s7687_s2] ss:$0 sm:$0xff]  ;;  %v229_v22 = vld [vmem:[%s7690_s5 + $0x10] sm:$0xff] }
   0x8   :  { %321 = vmatprep.mubr.f32.mxu0 %v7701_v4  ;;  %4831 = vmatprep.subr.bf16.mxu0 %v4830_v14  ;;  %v4834_v20 = vpack.c.bf16 %v237_v19, %v234_v18  ;;  %v232_v23 = vld [vmem:[%s7690_s5 + $0x28] sm:$0xff]  ;;  %v235_v29 = vld [vmem:[%s7690_s5 + $0x40] sm:$0xff]  ;;  %v238_v30 = vld [vmem:[%s7690_s5 + $0x58] sm:$0xff] }
   0x9   :  { %4829 = vmatpush3.bf16.msra.mxu1 %v4828_v11  ;;  %4833 = vmatpush1.bf16.msra.mxu0 %v4832_v17  ;;  %v4839_v27 = vpack.c.bf16 %v232_v23, %v229_v22  ;;  %v4842_v31 = vpack.c.bf16 %v238_v30, %v235_v29  ;;  %v233_v32 = vld [vmem:[%s7690_s5 + $0x30] sm:$0xff]  ;;  %v236_v33 = vld [vmem:[%s7690_s5 + $0x48] sm:$0xff]  ;;  %v420_v36 = vld [vmem:[%s7691_s6 + $0x20] sm:$0xff] }
   0xa   :  { %4838 = vmatprep.subr.bf16.mxu1 %v7703_v2  ;;  %4835 = vmatprep.subr.bf16.mxu0 %v4834_v20  ;;  %v4836_v34 = vpack.c.bf16 %v236_v33, %v233_v32  ;;  %v417_v35 = vld [vmem:[%s7691_s6 + $0x8] sm:$0xff]  ;;  %v3815_v38 = vld [vmem:[%s7689_s4] ss:$0 sm:$0xff]  ;;  %v419_v40 = vld [vmem:[%s7691_s6 + $0x18] sm:$0xff] }
   0xb   :  { %v4844_v37 = vpack.c.bf16 %v420_v36, %v417_v35  ;;  %v416_v39 = vld [vmem:[%s7691_s6] sm:$0xff]  ;;  %v418_v45 = vld [vmem:[%s7691_s6 + $0x10] sm:$0xff]  ;;  %v421_v46 = vld [vmem:[%s7691_s6 + $0x28] sm:$0xff]  ;;  %s6095_s6 = smov [#allocation4]  }
   0xc   :  { %v4846_v44 = vpack.c.bf16 %v419_v40, %v416_v39  ;;  %v808_v47 = vld [vmem:[%s7693_s8 + $0x8] sm:$0xff]  ;;  %v811_v48 = vld [vmem:[%s7693_s8 + $0x20] sm:$0xff]  ;;  %v810_v50 = vld [vmem:[%s7693_s8 + $0x18] sm:$0xff]  ;;  %v4849_v52 = vpack.c.bf16 %v421_v46, %v418_v45  ;;  %s3787_s23 = sshll.u32 %s6095_s6, 4  ;;  %s3788_s23 = int_to_ptr.vmem [resolvable:$true] %s3787_s23 }
   0xd   :  { %4837 = vmatpush1.bf16.msra.mxu0 %v4836_v34  ;;  %v807_v49 = vld [vmem:[%s7693_s8] sm:$0xff]  ;;  %v6293_v53 = vpack.c.bf16 %v811_v48, %v808_v47  ;;  %v814_v56 = vld [vmem:[%s7693_s8 + $0x38] sm:$0xff]  ;;  %v817_v57 = vld [vmem:[%s7693_s8 + $0x50] sm:$0xff]  ;;  %s6043_s1 = scalar_lea.vmem %s3788_s23, 32  ;;  %p6048_p1 = scmp.lt.s32.totalorder %s3788_s23, %s3788_s23 }
   0xe   :  { %4845 = vmatprep.subr.bf16.mxu0 %v4844_v37  ;;  %v6291_v51 = vld [vmem:[%s7697_s12 + $0x60] sm:$0xff]  ;;  %v6299_v55 = vpack.c.bf16 %v810_v50, %v807_v49  ;;  %v813_v58 = vld [vmem:[%s7693_s8 + $0x30] sm:$0xff]  ;;  %v816_v59 = vld [vmem:[%s7693_s8 + $0x48] sm:$0xff]  ;;  %v6325_v61 = vpack.c.bf16 %v817_v57, %v814_v56  ;;  %p6044_p0 = scmp.ne.s32.totalorder %s3788_s23, %s6043_s1  ;;  %p6049_p2 = scmp.lt.s32.totalorder %s6043_s1, %s6043_s1 }
   0xf   :  { %v401_v54 = vld [vmem:[%s7697_s12] sm:$0xff]  ;;  %v6323_v60 = vld [vmem:[%s7697_s12 + $0x68] sm:$0xff]  ;;  %v6337_v1 = vpack.c.bf16 %v816_v59, %v813_v58  ;;  %v822_v6 = vld [vmem:[%s7693_s8 + $0x78] sm:$0xff] }
  0x10   :  { %v820_v62 = vld [vmem:[%s7693_s8 + $0x68] sm:$0xff]  ;;  %v823_v63 = vld [vmem:[%s7693_s8 + $0x80] sm:$0xff]  ;;  %v6357_v7 = vld [vmem:[%s7697_s12 + $0x70] sm:$0xff]  ;;  %p6050_p3 = por %p6049_p2, %p6048_p1 }
  0x11   :  { %v402_v0 = vld [vmem:[%s7697_s12 + $0x8] sm:$0xff]  ;;  %v6344_v3 = vpack.c.bf16 %v823_v63, %v820_v62  ;;  %v819_v5 = vld [vmem:[%s7693_s8 + $0x60] sm:$0xff]  ;;  %v826_v8 = vld [vmem:[%s7693_s8 + $0x98] sm:$0xff] }
  0x12   :  { %v829_v9 = vld [vmem:[%s7693_s8 + $0xb0] sm:$0xff]  ;;  %v6370_v11 = vpack.c.bf16 %v822_v6, %v819_v5  ;;  %v828_v14 = vld [vmem:[%s7693_s8 + $0xa8] sm:$0xff]  ;;  %v404_v15 = vld [vmem:[%s7697_s12 + $0x18] sm:$0xff]  ;;  %p6051_p4 = pnand %p6050_p3, %p6044_p0 }
  0x13   :  { %v403_v10 = vld [vmem:[%s7697_s12 + $0x10] sm:$0xff]  ;;  %v6375_v12 = vpack.c.bf16 %v829_v9, %v826_v8  ;;  %v832_v16 = vld [vmem:[%s7693_s8 + $0xc8] sm:$0xff]  ;;  %v835_v17 = vld [vmem:[%s7693_s8 + $0xe0] sm:$0xff] }
  0x14   :  { %v825_v13 = vld [vmem:[%s7693_s8 + $0x90] sm:$0xff]  ;;  %v6405_v19 = vpack.c.bf16 %v835_v17, %v832_v16  ;;  %v831_v20 = vld [vmem:[%s7693_s8 + $0xc0] sm:$0xff]  ;;  %v838_v23 = vld [vmem:[%s7693_s8 + $0xf8] sm:$0xff] }
  0x15   :  { %v6399_v18 = vpack.c.bf16 %v828_v14, %v825_v13  ;;  %v405_v22 = vld [vmem:[%s7697_s12 + $0x20] sm:$0xff]  ;;  %v406_v29 = vld [vmem:[%s7697_s12 + $0x28] sm:$0xff]  ;;  %v846_v35 = vld [vmem:[%s7693_s8 + $0x138] sm:$0xff] }
  0x16   :  { %v844_v30 = vld [vmem:[%s7693_s8 + $0x128] sm:$0xff]  ;;  %v843_v34 = vld [vmem:[%s7693_s8 + $0x120] sm:$0xff]  ;;  %v407_v36 = vld [vmem:[%s7697_s12 + $0x30] sm:$0xff] }
  0x17   :  { %v6483_v39 = vpack.c.bf16 %v846_v35, %v843_v34  ;;  %v409_v45 = vld [vmem:[%s7697_s12 + $0x40] sm:$0xff]  ;;  %v410_v46 = vld [vmem:[%s7697_s12 + $0x48] sm:$0xff]  ;;  %v411_v47 = vld [vmem:[%s7697_s12 + $0x50] sm:$0xff] }
  0x18   :  { %v412_v48 = vld [vmem:[%s7697_s12 + $0x58] sm:$0xff]  ;;  %v809_v49 = vld [vmem:[%s7693_s8 + $0x10] sm:$0xff]  ;;  %v812_v50 = vld [vmem:[%s7693_s8 + $0x28] sm:$0xff] }
  0x19   :  { %v821_v57 = vld [vmem:[%s7693_s8 + $0x70] sm:$0xff]  ;;  %v824_v58 = vld [vmem:[%s7693_s8 + $0x88] sm:$0xff]  ;;  %v830_v62 = vld [vmem:[%s7693_s8 + $0xb8] sm:$0xff] }
  0x1a   :  { %v6600_v59 = vpack.c.bf16 %v824_v58, %v821_v57  ;;  %v836_v5 = vld [vmem:[%s7693_s8 + $0xe8] sm:$0xff]  ;;  %v842_v8 = vld [vmem:[%s7693_s8 + $0x118] sm:$0xff] }
  0x1b   :  { %v848_v13 = vld [vmem:[%s7693_s8 + $0x148] sm:$0xff]  ;;  %v854_v16 = vld [vmem:[%s7693_s8 + $0x178] sm:$0xff] }
  0xda   :  { %v129_v24 = vpop.f32.mrb[0].mxu0 }
  0xdb   :  { %v130_v25 = vadd.f32 %v3813_v21, %v129_v24  ;;  %v4189_v26 = vpop.f32.mrb[1].mxu0  ;;  %v834_v21 = vld [vmem:[%s7693_s8 + $0xd8] sm:$0xff]  ;;  %v841_v24 = vld [vmem:[%s7693_s8 + $0x110] sm:$0xff] }
  0xdc   :  { %v6433_v26 = vpack.c.bf16 %v841_v24, %v838_v23  ;;  %v6683_v24 = vld [vmem:[%s7692_s7] sm:$0x7] }
  0xdd   :  { %v133_v28 = vmax.f32 %v130_v25, 0.0  ;;  %v6427_v25 = vpack.c.bf16 %v834_v21, %v831_v20  ;;  %v240_v21 = vlaneseq }
  0xdf   :  { %4199 = vmatmul.mubr.msk.f32.vlgmr.msra.gmra.mrb[0].mxu1 %vm145_vm2, %v133_v28  ;;  %v840_v28 = vld [vmem:[%s7693_s8 + $0x108] sm:$0xff] }
  0xe0   :  { %4840 = vmatpush3.bf16.msra.mxu1 %v4839_v27  ;;  %4209 = vmatprep.mubr.msk.f32.mxu1 %vm6092_vm0, %v7701_v4  ;;  %v837_v27 = vld [vmem:[%s7693_s8 + $0xf0] sm:$0xff] }
  0xe1   :  { %4841 = vmatprep.subr.bf16.mxu1 %v7703_v2  ;;  %v6455_v32 = vpack.c.bf16 %v840_v28, %v837_v27  ;;  %v6688_v27 = vld [vmem:[%s7694_s9] sm:$0x7] }
  0xe4   :  { %4843 = vmatpush3.bf16.msra.mxu1 %v4842_v31  ;;  %v847_v31 = vld [vmem:[%s7693_s8 + $0x140] sm:$0xff] }
  0xe5   :  { %5779 = vmatprep.subr.bf16.mxu1 %v4844_v37  ;;  %v6461_v33 = vpack.c.bf16 %v847_v31, %v844_v30  ;;  %v850_v37 = vld [vmem:[%s7693_s8 + $0x158] sm:$0xff] }
 0x1b2   :  { %v215_v41 = vpop.f32.mrb[0].mxu1 }
 0x1b3   :  { %v216_v42 = vadd.f32 %v3815_v38, %v215_v41  ;;  %v4200_v43 = vpop.f32.mrb[1].mxu1  ;;  %v853_v38 = vld [vmem:[%s7693_s8 + $0x170] sm:$0xff] }
 0x1b4   :  { %v6489_v40 = vpack.c.bf16 %v853_v38, %v850_v37  ;;  %v849_v41 = vld [vmem:[%s7693_s8 + $0x150] sm:$0xff]  ;;  %v408_v43 = vld [vmem:[%s7697_s12 + $0x38] sm:$0xff] }
 0x1b5   :  { %222 = vrot.lane.b32.xlu0 %v216_v42, %s6094_s19  ;;  %3817 = vmatmul.mubr.msk.f32.vlgmr.msra.gmra.mrb[2].mxu0 %vm145_vm2, %v216_v42  ;;  %220 = vst.msk [vmem:[#allocation4] sm:$0x3] %vm219_vm3, %v216_v42 }
 0x1b6   :  { %4210 = vmatmul.mubr.msk.f32.vlgmr.msra.gmra.mrb[2].mxu1 %vm145_vm2, %v216_v42  ;;  %4847 = vmatpush1.bf16.msra.mxu0 %v4846_v44  ;;  %v852_v42 = vld [vmem:[%s7693_s8 + $0x168] sm:$0xff] }
 0x1b7   :  { %5780 = vmatpush1.bf16.msra.mxu1 %v4846_v44  ;;  %603 = vmatprep.mubr.f32.mxu1 %v7701_v4  ;;  %v6505_v44 = vpack.c.bf16 %v852_v42, %v849_v41 }
 0x1b8   :  { %4848 = vmatprep.subr.bf16.mxu1 %v7703_v2  ;;  %531 = vmatprep.mubr.f32.mxu0 %v7701_v4 }
 0x1b9   :  { %4908 = vmatprep.subr.bf16.mxu0 %v6293_v53  ;;  %3819 = vmatmul.mubr.msk.f32.vlgmr.msra.gmra.mrb[4].mxu0 %vm59_vm1, %v401_v54 }
 0x1ba   :  { %3831 = vmatmul.mubr.msk.f32.vlgmr.msra.gmra.mrb[4].mxu1 %vm59_vm1, %v6291_v51  ;;  %4910 = vmatpush1.bf16.msra.mxu0 %v6299_v55 }
 0x1bb   :  { %4850 = vmatpush3.bf16.msra.mxu1 %v4849_v52  ;;  %609 = vmatprep.mubr.f32.mxu1 %v7701_v4  ;;  %v815_v52 = vld [vmem:[%s7693_s8 + $0x40] sm:$0xff] }
 0x1bc   :  { %4852 = vmatprep.subr.bf16.mxu1 %v6293_v53  ;;  %537 = vmatprep.mubr.f32.mxu0 %v7701_v4 }
 0x1bd   :  { %3820 = vmatmul.mubr.msk.f32.gmra.mrb[6].mxu0 %vm59_vm1, %v402_v0  ;;  %4912 = vmatprep.subr.bf16.mxu0 %v6325_v61 }
 0x1be   :  { %3832 = vmatmul.mubr.msk.f32.gmra.mrb[6].mxu1 %vm59_vm1, %v6323_v60  ;;  %4914 = vmatpush1.bf16.msra.mxu0 %v6337_v1 }
 0x1bf   :  { %615 = vmatprep.mubr.f32.mxu1 %v7701_v4  ;;  %543 = vmatprep.mubr.f32.mxu0 %v7701_v4 }
 0x1c0   :  { %4916 = vmatprep.subr.bf16.mxu0 %v6344_v3 }
 0x1c1   :  { %3821 = vmatmul.mubr.msk.f32.gmra.mrb[8].mxu0 %vm59_vm1, %v403_v10 }
 0x1c2   :  { %3833 = vmatmul.mubr.msk.f32.gmra.mrb[8].mxu1 %vm59_vm1, %v6357_v7  ;;  %549 = vmatprep.mubr.f32.mxu0 %v7701_v4 }
 0x1c3   :  { %4216 = vmatprep.mubr.msk.f32.mxu1 %vm6092_vm0, %v7701_v4  ;;  %4918 = vmatpush1.bf16.msra.mxu0 %v6370_v11 }
 0x1c4   :  { %4920 = vmatprep.subr.bf16.mxu0 %v6375_v12 }
 0x1c5   :  { %3822 = vmatmul.mubr.msk.f32.gmra.mrb[10].mxu0 %vm59_vm1, %v404_v15 }
 0x1c6   :  { %4217 = vmatmul.mubr.msk.f32.vlgmr.msra.gmra.mrb[10].mxu1 %vm59_vm1, %v401_v54  ;;  %555 = vmatprep.mubr.f32.mxu0 %v7701_v4  ;;  %v818_v54 = vld [vmem:[%s7693_s8 + $0x58] sm:$0xff] }
 0x1c7   :  { %4854 = vmatpush1.bf16.msra.mxu1 %v6299_v55  ;;  %4219 = vmatprep.mubr.msk.f32.mxu1 %vm6092_vm0, %v7701_v4  ;;  %v6588_v56 = vpack.c.bf16 %v818_v54, %v815_v52 }
 0x1c8   :  { %4856 = vmatprep.subr.bf16.mxu1 %v6325_v61  ;;  %4922 = vmatpush1.bf16.msra.mxu0 %v6399_v18 }
 0x1c9   :  { %3823 = vmatmul.mubr.msk.f32.gmra.mrb[12].mxu0 %vm59_vm1, %v405_v22  ;;  %4924 = vmatprep.subr.bf16.mxu0 %v6405_v19 }
 0x1ca   :  { %4220 = vmatmul.mubr.msk.f32.gmra.mrb[12].mxu1 %vm59_vm1, %v402_v0  ;;  %561 = vmatprep.mubr.f32.mxu0 %v7701_v4  ;;  %v833_v0 = vld [vmem:[%s7693_s8 + $0xd0] sm:$0xff] }
 0x1cb   :  { %4222 = vmatprep.mubr.msk.f32.mxu1 %vm6092_vm0, %v7701_v4  ;;  %4858 = vmatpush1.bf16.msra.mxu1 %v6337_v1  ;;  %v6620_v6 = vpack.c.bf16 %v836_v5, %v833_v0 }
 0x1cc   :  { %4860 = vmatprep.subr.bf16.mxu1 %v6344_v3  ;;  %4926 = vmatpush1.bf16.msra.mxu0 %v6427_v25 }
 0x1cd   :  { %3824 = vmatmul.mubr.msk.f32.gmra.mrb[14].mxu0 %vm59_vm1, %v406_v29  ;;  %4928 = vmatprep.subr.bf16.mxu0 %v6433_v26 }
 0x1ce   :  { %4223 = vmatmul.mubr.msk.f32.gmra.mrb[14].mxu1 %vm59_vm1, %v403_v10  ;;  %567 = vmatprep.mubr.f32.mxu0 %v7701_v4  ;;  %v845_v10 = vld [vmem:[%s7693_s8 + $0x130] sm:$0xff] }
 0x1cf   :  { %4225 = vmatprep.mubr.msk.f32.mxu1 %vm6092_vm0, %v7701_v4  ;;  %4862 = vmatpush1.bf16.msra.mxu1 %v6370_v11  ;;  %v6640_v14 = vpack.c.bf16 %v848_v13, %v845_v10 }
 0x1d0   :  { %4864 = vmatprep.subr.bf16.mxu1 %v6375_v12  ;;  %4930 = vmatpush1.bf16.msra.mxu0 %v6455_v32 }
 0x1d1   :  { %3825 = vmatmul.mubr.msk.f32.gmra.mrb[16].mxu0 %vm59_vm1, %v407_v36  ;;  %4932 = vmatprep.subr.bf16.mxu0 %v6461_v33 }
 0x1d2   :  { %4226 = vmatmul.mubr.msk.f32.gmra.mrb[16].mxu1 %vm59_vm1, %v404_v15  ;;  %573 = vmatprep.mubr.f32.mxu0 %v7701_v4  ;;  %v851_v15 = vld [vmem:[%s7693_s8 + $0x160] sm:$0xff] }
 0x1d3   :  { %4228 = vmatprep.mubr.msk.f32.mxu1 %vm6092_vm0, %v7701_v4  ;;  %4866 = vmatpush1.bf16.msra.mxu1 %v6399_v18  ;;  %v6650_v17 = vpack.c.bf16 %v854_v16, %v851_v15 }
 0x1d4   :  { %4868 = vmatprep.subr.bf16.mxu1 %v6405_v19  ;;  %4934 = vmatpush1.bf16.msra.mxu0 %v6483_v39 }
 0x1d5   :  { %3826 = vmatmul.mubr.msk.f32.gmra.mrb[18].mxu0 %vm59_vm1, %v408_v43  ;;  %4936 = vmatprep.subr.bf16.mxu0 %v6489_v40 }
 0x1d6   :  { %4229 = vmatmul.mubr.msk.f32.gmra.mrb[18].mxu1 %vm59_vm1, %v405_v22  ;;  %579 = vmatprep.mubr.f32.mxu0 %v7701_v4  ;;  %v6675_v22 = vshrl.u32 %v240_v21, 7 }
 0x1d7   :  { %4231 = vmatprep.mubr.msk.f32.mxu1 %vm6092_vm0, %v7701_v4  ;;  %4870 = vmatpush1.bf16.msra.mxu1 %v6427_v25 }
 0x1d8   :  { %4872 = vmatprep.subr.bf16.mxu1 %v6433_v26  ;;  %4938 = vmatpush1.bf16.msra.mxu0 %v6505_v44  ;;  %v6678_v23 = vsub.s32 0, %v6675_v22  ;;  %v6697_v31 = vsub.s32 1, %v6675_v22 }
 0x1d9   :  { %3827 = vmatmul.mubr.msk.f32.gmra.mrb[20].mxu0 %vm59_vm1, %v409_v45  ;;  %4964 = vmatprep.subr.bf16.mxu0 %v6293_v53 }
 0x1da   :  { %4232 = vmatmul.mubr.msk.f32.gmra.mrb[20].mxu1 %vm59_vm1, %v406_v29  ;;  %585 = vmatprep.mubr.f32.mxu0 %v7701_v4  ;;  %7707 = vst [vmem:[#allocation10_spill] sm:$0xff] %v6678_v23  ;;  %v243_v28 = vrot.slane %v6683_v24, %v6678_v23  ;;  %v863_v29 = vrot.slane %v6688_v27, %v6678_v23  ;;  %7708 = vst [vmem:[#allocation11_spill] sm:$0xff] %v6697_v31 }
 0x1db   :  { %4234 = vmatprep.mubr.msk.f32.mxu1 %vm6092_vm0, %v7701_v4  ;;  %4874 = vmatpush1.bf16.msra.mxu1 %v6455_v32  ;;  %v247_v34 = vrot.slane %v6683_v24, %v6697_v31  ;;  %v867_v35 = vrot.slane %v6688_v27, %v6697_v31 }
 0x1dc   :  { %4876 = vmatprep.subr.bf16.mxu1 %v6461_v33  ;;  %v6694_v30 = vadd.f32 %v863_v29, %v243_v28 }
 0x1dd   :  { %3828 = vmatmul.mubr.msk.f32.gmra.mrb[22].mxu0 %vm59_vm1, %v410_v46 }
 0x1de   :  { %4235 = vmatmul.mubr.msk.f32.gmra.mrb[22].mxu1 %vm59_vm1, %v407_v36  ;;  %591 = vmatprep.mubr.f32.mxu0 %v7701_v4  ;;  %v6703_v36 = vadd.f32 %v867_v35, %v247_v34 }
 0x1df   :  { %4237 = vmatprep.mubr.msk.f32.mxu1 %vm6092_vm0, %v7701_v4  ;;  %4878 = vmatpush1.bf16.msra.mxu1 %v6483_v39 }
 0x1e0   :  { %4880 = vmatprep.subr.bf16.mxu1 %v6489_v40 }
 0x1e1   :  { %3829 = vmatmul.mubr.msk.f32.gmra.mrb[24].mxu0 %vm59_vm1, %v411_v47 }
 0x1e2   :  { %4238 = vmatmul.mubr.msk.f32.gmra.mrb[24].mxu1 %vm59_vm1, %v408_v43  ;;  %597 = vmatprep.mubr.f32.mxu0 %v7701_v4 }
 0x1e3   :  { %4240 = vmatprep.mubr.msk.f32.mxu1 %vm6092_vm0, %v7701_v4  ;;  %4882 = vmatpush1.bf16.msra.mxu1 %v6505_v44 }
 0x1e4   :  { %4883 = vmatprep.subr.bf16.mxu1 %v7703_v2 }
 0x1e5   :  { %3830 = vmatmul.mubr.msk.f32.gmra.mrb[26].mxu0 %vm59_vm1, %v412_v48 }
 0x1e6   :  { %4241 = vmatmul.mubr.msk.f32.gmra.mrb[26].mxu1 %vm59_vm1, %v409_v45  ;;  %1105 = vmatprep.mubr.f32.mxu0 %v7701_v4 }
 0x1e7   :  { %4243 = vmatprep.mubr.msk.f32.mxu1 %vm6092_vm0, %v7701_v4 }
 0x1ea   :  { %4244 = vmatmul.mubr.msk.f32.gmra.mrb[28].mxu1 %vm59_vm1, %v410_v46 }
 0x1eb   :  { %4246 = vmatprep.mubr.msk.f32.mxu1 %vm6092_vm0, %v7701_v4 }
 0x1ee   :  { %4247 = vmatmul.mubr.msk.f32.gmra.mrb[30].mxu1 %vm59_vm1, %v411_v47 }
 0x1ef   :  { %4249 = vmatprep.mubr.msk.f32.mxu1 %vm6092_vm0, %v7701_v4 }
 0x1f2   :  { %4250 = vmatmul.mubr.msk.f32.gmra.mrb[32].mxu1 %vm59_vm1, %v412_v48 }
 0x1f3   :  { %4252 = vmatprep.mubr.msk.f32.mxu1 %vm6092_vm0, %v7701_v4 }
 0x1f6   :  { %4253 = vmatmul.mubr.msk.f32.gmra.mrb[34].mxu1 %vm59_vm1, %v6291_v51  ;;  %v6578_v51 = vpack.c.bf16 %v812_v50, %v809_v49 }
 0x1f7   :  { %4255 = vmatprep.mubr.msk.f32.mxu1 %vm6092_vm0, %v7701_v4 }
 0x1fa   :  { %4256 = vmatmul.mubr.msk.f32.gmra.mrb[36].mxu1 %vm59_vm1, %v6323_v60  ;;  %v827_v60 = vld [vmem:[%s7693_s8 + $0xa0] sm:$0xff] }
 0x1fb   :  { %4258 = vmatprep.mubr.msk.f32.mxu1 %vm6092_vm0, %v7701_v4  ;;  %v6610_v63 = vpack.c.bf16 %v830_v62, %v827_v60 }
 0x1fe   :  { %4259 = vmatmul.mubr.msk.f32.gmra.mrb[38].mxu1 %vm59_vm1, %v6357_v7  ;;  %v839_v7 = vld [vmem:[%s7693_s8 + $0x100] sm:$0xff] }
 0x1ff   :  { %939 = vmatprep.mubr.f32.mxu1 %v7701_v4  ;;  %v6630_v9 = vpack.c.bf16 %v842_v8, %v839_v7 }
 0x202   :  { %940 = vmatmul.mubr.f32.vlgmr.msra.gmra.mrb[40].mxu1 %v7701_v4 }
 0x203   :  { %4885 = vmatpush3.bf16.msra.mxu1 %v6578_v51  ;;  %4293 = vmatprep.mubr.msk.f32.mxu1 %vm6092_vm0, %v7701_v4 }
 0x204   :  { %4886 = vmatprep.subr.bf16.mxu1 %v7703_v2 }
 0x207   :  { %4888 = vmatpush3.bf16.msra.mxu1 %v6588_v56 }
 0x208   :  { %4889 = vmatprep.subr.bf16.mxu1 %v7703_v2 }
 0x20b   :  { %4891 = vmatpush3.bf16.msra.mxu1 %v6600_v59 }
 0x20c   :  { %4892 = vmatprep.subr.bf16.mxu1 %v7703_v2 }
 0x20f   :  { %4894 = vmatpush3.bf16.msra.mxu1 %v6610_v63 }
 0x210   :  { %4895 = vmatprep.subr.bf16.mxu1 %v7703_v2 }
 0x213   :  { %4897 = vmatpush3.bf16.msra.mxu1 %v6620_v6 }
 0x214   :  { %4898 = vmatprep.subr.bf16.mxu1 %v7703_v2 }
 0x217   :  { %4900 = vmatpush3.bf16.msra.mxu1 %v6630_v9 }
 0x218   :  { %4901 = vmatprep.subr.bf16.mxu1 %v7703_v2 }
 0x21b   :  { %4903 = vmatpush3.bf16.msra.mxu1 %v6640_v14 }
 0x21c   :  { %4904 = vmatprep.subr.bf16.mxu1 %v7703_v2 }
 0x21f   :  { %4906 = vmatpush3.bf16.msra.mxu1 %v6650_v17 }
 0x220   :  { %4939 = vmatprep.subr.bf16.mxu1 %v7703_v2 }
 0x222   :  { %4294 = vmatmul.mubr.f32.vlgmr.msra.gmra.mrb[42].mxu1 %v7701_v4 }
 0x223   :  { %4941 = vmatpush3.bf16.msra.mxu1 %v6578_v51  ;;  %4328 = vmatprep.mubr.msk.f32.mxu1 %vm6092_vm0, %v7701_v4 }
 0x224   :  { %4942 = vmatprep.subr.bf16.mxu1 %v7703_v2 }
 0x227   :  { %v223_v20 = vpop.permute.xlu0 %222  ;;  %4944 = vmatpush3.bf16.msra.mxu1 %v6588_v56 }
 0x228   :  { %225 = vst.msk [vmem:[#allocation6] sm:$0x3] %vm219_vm3, %v223_v20  ;;  %4945 = vmatprep.subr.bf16.mxu1 %v7703_v2 }
 0x22b   :  { %4947 = vmatpush3.bf16.msra.mxu1 %v6600_v59 }
 0x22c   :  { %4948 = vmatprep.subr.bf16.mxu1 %v7703_v2 }
 0x22f   :  { %4950 = vmatpush3.bf16.msra.mxu1 %v6610_v63 }
 0x230   :  { %4951 = vmatprep.subr.bf16.mxu1 %v7703_v2 }
 0x233   :  { %4953 = vmatpush3.bf16.msra.mxu1 %v6620_v6 }
 0x234   :  { %4954 = vmatprep.subr.bf16.mxu1 %v7703_v2 }
 0x237   :  { %4956 = vmatpush3.bf16.msra.mxu1 %v6630_v9 }
 0x238   :  { %4957 = vmatprep.subr.bf16.mxu1 %v7703_v2 }
 0x23b   :  { %4959 = vmatpush3.bf16.msra.mxu1 %v6640_v14 }
 0x23c   :  { %4960 = vmatprep.subr.bf16.mxu1 %v7703_v2 }
 0x23f   :  { %4962 = vmatpush3.bf16.msra.mxu1 %v6650_v17 }
 0x240   :  { %4995 = vmatprep.subr.bf16.mxu1 %v7703_v2 }
 0x288   :  { %v323_v37 = vpop.f32.mrb[2].mxu0 }
 0x289   :  { %v6705_v38 = vpop.f32.mrb[2].mxu1  ;;  %v325_v41 = vpop.f32.mrb[3].mxu0  ;;  %v324_v23 = vadd.f32 %v323_v37, %v243_v28 }
 0x28a   :  { %v4211_v42 = vpop.f32.mrb[3].mxu1 }
 0x28d   :  { %v605_v43 = vpop.f32.mrb[4].mxu1 }
 0x28e   :  { %v606_v45 = vadd.f32 %v605_v43, %v243_v28  ;;  %v607_v46 = vpop.f32.mrb[5].mxu1 }
 0x28f   :  { %v608_v47 = vadd.f32 %v607_v46, %v247_v34 }
 0x290   :  { %v6707_v48 = vadd.f32 %v863_v29, %v606_v45 }
 0x291   :  { %v611_v49 = vpop.f32.mrb[6].mxu1  ;;  %v6709_v50 = vadd.f32 %v867_v35, %v608_v47 }
 0x292   :  { %7709 = vst [vmem:[#allocation12_spill] sm:$0xff] %v6707_v48  ;;  %v612_v52 = vadd.f32 %v611_v49, %v243_v28  ;;  %v613_v54 = vpop.f32.mrb[7].mxu1 }
 0x293   :  { %7710 = vst [vmem:[#allocation13_spill] sm:$0xff] %v6709_v50  ;;  %v614_v57 = vadd.f32 %v613_v54, %v247_v34 }
 0x294   :  { %v6711_v58 = vadd.f32 %v863_v29, %v612_v52 }
 0x295   :  { %v617_v60 = vpop.f32.mrb[8].mxu1  ;;  %v6713_v62 = vadd.f32 %v867_v35, %v614_v57 }
 0x296   :  { %7711 = vst [vmem:[#allocation14_spill] sm:$0xff] %v6711_v58  ;;  %v618_v0 = vadd.f32 %v617_v60, %v243_v28  ;;  %v619_v5 = vpop.f32.mrb[9].mxu1 }
 0x297   :  { %7712 = vst [vmem:[#allocation15_spill] sm:$0xff] %v6713_v62  ;;  %v620_v7 = vadd.f32 %v619_v5, %v247_v34 }
 0x298   :  { %v6715_v8 = vadd.f32 %v863_v29, %v618_v0 }
 0x299   :  { %v6717_v10 = vpop.f32.mrb[10].mxu1  ;;  %v6719_v13 = vadd.f32 %v867_v35, %v620_v7 }
 0x29a   :  { %7713 = vst [vmem:[#allocation16_spill] sm:$0xff] %v6715_v8  ;;  %v4218_v15 = vpop.f32.mrb[11].mxu1  ;;  %v5782_v8 = vadd.f32 %v863_v29, %v324_v23 }
 0x29b   :  { %7714 = vst [vmem:[#allocation17_spill] sm:$0xff] %v6719_v13 }
 0x29d   :  { %v6721_v16 = vpop.f32.mrb[12].mxu1 }
 0x29e   :  { %v4221_v20 = vpop.f32.mrb[13].mxu1 }
 0x2a1   :  { %v6723_v21 = vpop.f32.mrb[14].mxu1 }
 0x2a2   :  { %v4224_v42 = vpop.f32.mrb[15].mxu1 }
 0x2a5   :  { %v6725_v43 = vpop.f32.mrb[16].mxu1 }
 0x2a6   :  { %v4227_v45 = vpop.f32.mrb[17].mxu1 }
 0x2a9   :  { %v6727_v46 = vpop.f32.mrb[18].mxu1 }
 0x2aa   :  { %v4230_v47 = vpop.f32.mrb[19].mxu1 }
 0x2ad   :  { %v6729_v49 = vpop.f32.mrb[20].mxu1 }
 0x2ae   :  { %v4233_v52 = vpop.f32.mrb[21].mxu1 }
 0x2b1   :  { %v6731_v54 = vpop.f32.mrb[22].mxu1 }
 0x2b2   :  { %v4236_v57 = vpop.f32.mrb[23].mxu1 }
 0x2b5   :  { %v6733_v60 = vpop.f32.mrb[24].mxu1 }
 0x2b6   :  { %v4239_v0 = vpop.f32.mrb[25].mxu1 }
 0x2b7   :  { %v326_v0 = vadd.f32 %v325_v41, %v247_v34 }
 0x2b9   :  { %v6735_v5 = vpop.f32.mrb[26].mxu1 }
 0x2ba   :  { %v4242_v7 = vpop.f32.mrb[27].mxu1 }
 0x2bd   :  { %v6737_v15 = vpop.f32.mrb[28].mxu1 }
 0x2be   :  { %v4245_v20 = vpop.f32.mrb[29].mxu1 }
 0x2bf   :  { %v5785_v20 = vadd.f32 %v867_v35, %v326_v0 }
 0x2c1   :  { %v6739_v42 = vpop.f32.mrb[30].mxu1 }
 0x2c2   :  { %v4248_v45 = vpop.f32.mrb[31].mxu1 }
 0x2c5   :  { %v6741_v4 = vpop.f32.mrb[32].mxu1 }
 0x2c6   :  { %7715 = vst [vmem:[#allocation18_spill] sm:$0xff] %v6741_v4  ;;  %v4251_v47 = vpop.f32.mrb[33].mxu1 }
 0x2c9   :  { %v6743_v2 = vpop.f32.mrb[34].mxu1 }
 0x2ca   :  { %v4254_v52 = vpop.f32.mrb[35].mxu1 }
 0x2cd   :  { %v6745_v31 = vpop.f32.mrb[36].mxu1 }
 0x2ce   :  { %v4257_v57 = vpop.f32.mrb[37].mxu1 }
 0x2cf   :  { %v250_v57 = vsub.s32 2, %v6675_v22 }
 0x2d1   :  { %v6747_v13 = vpop.f32.mrb[38].mxu1  ;;  %v6751_v34 = vrot.slane %v6688_v27, %v250_v57  ;;  %v6754_v23 = vrot.slane %v6683_v24, %v250_v57 }
 0x2d2   :  { %v4260_v7 = vpop.f32.mrb[39].mxu1 }
 0x2d3   :  { %v7717_v7 = vmov 0.0  }
 0x2d5   :  { %v941_v62 = vpop.f32.mrb[40].mxu1 }
 0x2d6   :  { %v5783_v58 = vadd.f32 %v5782_v8, %v941_v62  ;;  %v943_v50 = vpop.f32.mrb[41].mxu1 }
 0x2d7   :  { %v5786_v45 = vadd.f32 %v5785_v20, %v943_v50  ;;  %v395_v50 = vadd.f32 %v6705_v38, %v6754_v23  ;;  %v7716_v38 = vmov 0.0|0.0  }
 0x2d8   :  { %v3849_v48 = vmul.f32 -1.442695, %v5783_v58 }
 0x2d9   :  { %v3850_v47 = vmul.f32 -1.442695, %v5786_v45 }
 0x2da   :  { %5883 = vpow2.f32 %v3849_v48 }
 0x2db   :  { %5885 = vpow2.f32 %v3850_v47 }
 0x2e4   :  { %v5884_v4 = vpop.eup %5883 }
 0x2e5   :  { %v1020_v52 = vadd.f32 1.0, %v5884_v4  ;;  %v5886_v28 = vpop.eup %5885 }
 0x2e6   :  { %v1027_v29 = vadd.f32 1.0, %v5886_v28 }
 0x2e7   :  { %5887 = vrcp.f32 %v1020_v52 }
 0x2e8   :  { %5889 = vrcp.f32 %v1027_v29 }
 0x2f1   :  { %v5888_v48 = vpop.eup %5887 }
 0x2f2   :  { %v5890_v22 = vpop.eup %5889 }
 0x2f3   :  { %v1033_v62 = vsub.f32 1.0, %v5890_v22  ;;  %v1035_v0 = vmul.f32 0.0, %v5890_v22  ;;  %v689_v22 = vadd.f32 %v6717_v10, %v6754_v23 }
 0x2f5   :  { %v1012_v35 = vpop.f32.mrb[42].mxu1 }
 0x2f6   :  { %v1013_v37 = vadd.f32 %v1012_v35, %v6751_v34  ;;  %v4295_v41 = vpop.f32.mrb[43].mxu1 }
 0x2f8   :  { %v1030_v4 = vmul.f32 %v5888_v48, %v1013_v37 }
 0x2fa   :  { %v1031_v58 = vadd.f32 %v1030_v4, %v395_v50 }
 0x2fc   :  { %5891 = vtanh.f32 %v1031_v58 }
 0x306   :  { %v5892_v27 = vpop.eup %5891 }
 0x307   :  { %v1034_v8 = vmul.f32 %v5892_v27, %v1033_v62 }
 0x309   :  { %v6759_v24 = vadd.f32 %v1035_v0, %v1034_v8 }
 0x30b   :  { %1106 = vmatmul.mubr.f32.vlgmr.msra.gmra.mrb[4].mxu0 %v6759_v24  ;;  %4329 = vmatmul.mubr.f32.vlgmr.msra.gmra.mrb[44].mxu1 %v6759_v24 }
 0x30c   :  { %4966 = vmatpush1.bf16.msra.mxu0 %v6299_v55  ;;  %4997 = vmatpush3.bf16.msra.mxu1 %v6578_v51 }
 0x30d   :  { %4968 = vmatprep.subr.bf16.mxu0 %v6325_v61  ;;  %4998 = vmatprep.subr.bf16.mxu1 %v7716_v38 }
 0x30e   :  { %1271 = vmatprep.mubr.f32.mxu0 %v7717_v7  ;;  %4363 = vmatprep.mubr.msk.f32.mxu1 %vm6092_vm0, %v7717_v7 }
 0x310   :  { %4970 = vmatpush1.bf16.msra.mxu0 %v6337_v1  ;;  %5000 = vmatpush3.bf16.msra.mxu1 %v6588_v56 }
 0x311   :  { %4972 = vmatprep.subr.bf16.mxu0 %v6344_v3  ;;  %5001 = vmatprep.subr.bf16.mxu1 %v7716_v38 }
 0x314   :  { %4974 = vmatpush1.bf16.msra.mxu0 %v6370_v11  ;;  %5003 = vmatpush3.bf16.msra.mxu1 %v6600_v59 }
 0x315   :  { %4976 = vmatprep.subr.bf16.mxu0 %v6375_v12  ;;  %5004 = vmatprep.subr.bf16.mxu1 %v7716_v38 }
 0x318   :  { %4978 = vmatpush1.bf16.msra.mxu0 %v6399_v18  ;;  %5006 = vmatpush3.bf16.msra.mxu1 %v6610_v63 }
 0x319   :  { %4980 = vmatprep.subr.bf16.mxu0 %v6405_v19  ;;  %5007 = vmatprep.subr.bf16.mxu1 %v7716_v38 }
 0x31c   :  { %4982 = vmatpush1.bf16.msra.mxu0 %v6427_v25  ;;  %5009 = vmatpush3.bf16.msra.mxu1 %v6620_v6 }
 0x31d   :  { %4984 = vmatprep.subr.bf16.mxu0 %v6433_v26  ;;  %5010 = vmatprep.subr.bf16.mxu1 %v7716_v38 }
 0x320   :  { %4986 = vmatpush1.bf16.msra.mxu0 %v6455_v32  ;;  %5012 = vmatpush3.bf16.msra.mxu1 %v6630_v9 }
 0x321   :  { %4988 = vmatprep.subr.bf16.mxu0 %v6461_v33  ;;  %5013 = vmatprep.subr.bf16.mxu1 %v7716_v38 }
 0x324   :  { %4990 = vmatpush1.bf16.msra.mxu0 %v6483_v39  ;;  %5015 = vmatpush3.bf16.msra.mxu1 %v6640_v14 }
 0x325   :  { %4992 = vmatprep.subr.bf16.mxu0 %v6489_v40  ;;  %5016 = vmatprep.subr.bf16.mxu1 %v7716_v38 }
 0x328   :  { %4994 = vmatpush1.bf16.msra.mxu0 %v6505_v44  ;;  %5018 = vmatpush3.bf16.msra.mxu1 %v6650_v17 }
 0x329   :  { %5020 = vmatprep.subr.bf16.mxu0 %v6293_v53  ;;  %5051 = vmatprep.subr.bf16.mxu1 %v7716_v38 }
 0x3de   :  { %v1107_v20 = vpop.f32.mrb[4].mxu0  ;;  %v1178_v45 = vpop.f32.mrb[44].mxu1 }
 0x3df   :  { %v5788_v47 = vadd.f32 %v6694_v30, %v1107_v20  ;;  %v1109_v52 = vpop.f32.mrb[5].mxu0  ;;  %v4330_v57 = vpop.f32.mrb[45].mxu1  ;;  %v1179_v4 = vadd.f32 %v1178_v45, %v6751_v34 }
 0x3e0   :  { %v5790_v29 = vadd.f32 %v6703_v36, %v1109_v52 }
 0x3e1   :  { %v3851_v28 = vmul.f32 -1.442695, %v5788_v47 }
 0x3e2   :  { %v3852_v35 = vmul.f32 -1.442695, %v5790_v29 }
 0x3e3   :  { %5893 = vpow2.f32 %v3851_v28 }
 0x3e4   :  { %5895 = vpow2.f32 %v3852_v35 }
 0x3ed   :  { %v5894_v37 = vpop.eup %5893 }
 0x3ee   :  { %v1186_v41 = vadd.f32 1.0, %v5894_v37  ;;  %v5896_v48 = vpop.eup %5895 }
 0x3ef   :  { %v1193_v50 = vadd.f32 1.0, %v5896_v48 }
 0x3f0   :  { %5897 = vrcp.f32 %v1186_v41 }
 0x3f1   :  { %5899 = vrcp.f32 %v1193_v50 }
 0x3fa   :  { %v5898_v58 = vpop.eup %5897 }
 0x3fb   :  { %v1196_v62 = vmul.f32 %v5898_v58, %v1179_v4  ;;  %v5900_v8 = vpop.eup %5899 }
 0x3fc   :  { %v1199_v0 = vsub.f32 1.0, %v5900_v8  ;;  %v1201_v52 = vmul.f32 %v5900_v8, %v6759_v24  ;;  %v694_v8 = vadd.f32 %v6721_v16, %v6754_v23 }
 0x3fd   :  { %v1197_v27 = vadd.f32 %v1196_v62, %v689_v22 }
 0x3ff   :  { %5901 = vtanh.f32 %v1197_v27 }
 0x409   :  { %v5902_v20 = vpop.eup %5901 }
 0x40a   :  { %v1200_v47 = vmul.f32 %v5902_v20, %v1199_v0 }
 0x40c   :  { %v6804_v57 = vadd.f32 %v1201_v52, %v1200_v47 }
 0x40e   :  { %1272 = vmatmul.mubr.f32.vlgmr.msra.gmra.mrb[6].mxu0 %v6804_v57  ;;  %4364 = vmatmul.mubr.f32.vlgmr.msra.gmra.mrb[46].mxu1 %v6804_v57 }
 0x40f   :  { %5022 = vmatpush1.bf16.msra.mxu0 %v6299_v55  ;;  %5053 = vmatpush3.bf16.msra.mxu1 %v6578_v51 }
 0x410   :  { %5024 = vmatprep.subr.bf16.mxu0 %v6325_v61  ;;  %5054 = vmatprep.subr.bf16.mxu1 %v7716_v38 }
 0x411   :  { %1437 = vmatprep.mubr.f32.mxu0 %v7717_v7  ;;  %4398 = vmatprep.mubr.msk.f32.mxu1 %vm6092_vm0, %v7717_v7 }
 0x413   :  { %5026 = vmatpush1.bf16.msra.mxu0 %v6337_v1  ;;  %5056 = vmatpush3.bf16.msra.mxu1 %v6588_v56 }
 0x414   :  { %5028 = vmatprep.subr.bf16.mxu0 %v6344_v3  ;;  %5057 = vmatprep.subr.bf16.mxu1 %v7716_v38 }
 0x417   :  { %5030 = vmatpush1.bf16.msra.mxu0 %v6370_v11  ;;  %5059 = vmatpush3.bf16.msra.mxu1 %v6600_v59 }
 0x418   :  { %5032 = vmatprep.subr.bf16.mxu0 %v6375_v12  ;;  %5060 = vmatprep.subr.bf16.mxu1 %v7716_v38 }
 0x41b   :  { %5034 = vmatpush1.bf16.msra.mxu0 %v6399_v18  ;;  %5062 = vmatpush3.bf16.msra.mxu1 %v6610_v63 }
 0x41c   :  { %5036 = vmatprep.subr.bf16.mxu0 %v6405_v19  ;;  %5063 = vmatprep.subr.bf16.mxu1 %v7716_v38 }
 0x41f   :  { %5038 = vmatpush1.bf16.msra.mxu0 %v6427_v25  ;;  %5065 = vmatpush3.bf16.msra.mxu1 %v6620_v6 }
 0x420   :  { %5040 = vmatprep.subr.bf16.mxu0 %v6433_v26  ;;  %5066 = vmatprep.subr.bf16.mxu1 %v7716_v38 }
 0x423   :  { %5042 = vmatpush1.bf16.msra.mxu0 %v6455_v32  ;;  %5068 = vmatpush3.bf16.msra.mxu1 %v6630_v9 }
 0x424   :  { %5044 = vmatprep.subr.bf16.mxu0 %v6461_v33  ;;  %5069 = vmatprep.subr.bf16.mxu1 %v7716_v38 }
 0x427   :  { %5046 = vmatpush1.bf16.msra.mxu0 %v6483_v39  ;;  %5071 = vmatpush3.bf16.msra.mxu1 %v6640_v14 }
 0x428   :  { %5048 = vmatprep.subr.bf16.mxu0 %v6489_v40  ;;  %5072 = vmatprep.subr.bf16.mxu1 %v7716_v38 }
 0x42b   :  { %5050 = vmatpush1.bf16.msra.mxu0 %v6505_v44  ;;  %5074 = vmatpush3.bf16.msra.mxu1 %v6650_v17 }
 0x42c   :  { %5076 = vmatprep.subr.bf16.mxu0 %v6293_v53  ;;  %5107 = vmatprep.subr.bf16.mxu1 %v7716_v38 }
 0x4e1   :  { %v1273_v10 = vpop.f32.mrb[6].mxu0  ;;  %v1344_v45 = vpop.f32.mrb[46].mxu1 }
 0x4e2   :  { %v5792_v28 = vadd.f32 %v6694_v30, %v1273_v10  ;;  %v1275_v29 = vpop.f32.mrb[7].mxu0  ;;  %v4365_v35 = vpop.f32.mrb[47].mxu1  ;;  %v1345_v62 = vadd.f32 %v1344_v45, %v6751_v34 }
 0x4e3   :  { %v5794_v41 = vadd.f32 %v6703_v36, %v1275_v29 }
 0x4e4   :  { %v3853_v37 = vmul.f32 -1.442695, %v5792_v28 }
 0x4e5   :  { %v3854_v48 = vmul.f32 -1.442695, %v5794_v41 }
 0x4e6   :  { %5903 = vpow2.f32 %v3853_v37 }
 0x4e7   :  { %5905 = vpow2.f32 %v3854_v48 }
 0x4f0   :  { %v5904_v50 = vpop.eup %5903 }
 0x4f1   :  { %v1352_v4 = vadd.f32 1.0, %v5904_v50  ;;  %v5906_v58 = vpop.eup %5905 }
 0x4f2   :  { %v1359_v22 = vadd.f32 1.0, %v5906_v58 }
 0x4f3   :  { %5907 = vrcp.f32 %v1352_v4 }
 0x4f4   :  { %5909 = vrcp.f32 %v1359_v22 }
 0x4fd   :  { %v5908_v27 = vpop.eup %5907 }
 0x4fe   :  { %v1362_v0 = vmul.f32 %v5908_v27, %v1345_v62  ;;  %v5910_v47 = vpop.eup %5909 }
 0x4ff   :  { %v1365_v52 = vsub.f32 1.0, %v5910_v47  ;;  %v1367_v29 = vmul.f32 %v5910_v47, %v6804_v57  ;;  %v699_v47 = vadd.f32 %v6723_v21, %v6754_v23 }
 0x500   :  { %v1363_v20 = vadd.f32 %v1362_v0, %v694_v8 }
 0x502   :  { %5911 = vtanh.f32 %v1363_v20 }
 0x50c   :  { %v5912_v10 = vpop.eup %5911 }
 0x50d   :  { %v1366_v28 = vmul.f32 %v5912_v10, %v1365_v52 }
 0x50f   :  { %v6849_v35 = vadd.f32 %v1367_v29, %v1366_v28 }
 0x511   :  { %1438 = vmatmul.mubr.f32.vlgmr.msra.gmra.mrb[8].mxu0 %v6849_v35  ;;  %4399 = vmatmul.mubr.f32.vlgmr.msra.gmra.mrb[48].mxu1 %v6849_v35 }
 0x512   :  { %5078 = vmatpush1.bf16.msra.mxu0 %v6299_v55  ;;  %5109 = vmatpush3.bf16.msra.mxu1 %v6578_v51 }
 0x513   :  { %5080 = vmatprep.subr.bf16.mxu0 %v6325_v61  ;;  %5110 = vmatprep.subr.bf16.mxu1 %v7716_v38 }
 0x514   :  { %1603 = vmatprep.mubr.f32.mxu0 %v7717_v7  ;;  %4433 = vmatprep.mubr.msk.f32.mxu1 %vm6092_vm0, %v7717_v7 }
 0x516   :  { %5082 = vmatpush1.bf16.msra.mxu0 %v6337_v1  ;;  %5112 = vmatpush3.bf16.msra.mxu1 %v6588_v56 }
 0x517   :  { %5084 = vmatprep.subr.bf16.mxu0 %v6344_v3  ;;  %5113 = vmatprep.subr.bf16.mxu1 %v7716_v38 }
 0x51a   :  { %5086 = vmatpush1.bf16.msra.mxu0 %v6370_v11  ;;  %5115 = vmatpush3.bf16.msra.mxu1 %v6600_v59 }
 0x51b   :  { %5088 = vmatprep.subr.bf16.mxu0 %v6375_v12  ;;  %5116 = vmatprep.subr.bf16.mxu1 %v7716_v38 }
 0x51e   :  { %5090 = vmatpush1.bf16.msra.mxu0 %v6399_v18  ;;  %5118 = vmatpush3.bf16.msra.mxu1 %v6610_v63 }
 0x51f   :  { %5092 = vmatprep.subr.bf16.mxu0 %v6405_v19  ;;  %5119 = vmatprep.subr.bf16.mxu1 %v7716_v38 }
 0x522   :  { %5094 = vmatpush1.bf16.msra.mxu0 %v6427_v25  ;;  %5121 = vmatpush3.bf16.msra.mxu1 %v6620_v6 }
 0x523   :  { %5096 = vmatprep.subr.bf16.mxu0 %v6433_v26  ;;  %5122 = vmatprep.subr.bf16.mxu1 %v7716_v38 }
 0x526   :  { %5098 = vmatpush1.bf16.msra.mxu0 %v6455_v32  ;;  %5124 = vmatpush3.bf16.msra.mxu1 %v6630_v9 }
 0x527   :  { %5100 = vmatprep.subr.bf16.mxu0 %v6461_v33  ;;  %5125 = vmatprep.subr.bf16.mxu1 %v7716_v38 }
 0x52a   :  { %5102 = vmatpush1.bf16.msra.mxu0 %v6483_v39  ;;  %5127 = vmatpush3.bf16.msra.mxu1 %v6640_v14 }
 0x52b   :  { %5104 = vmatprep.subr.bf16.mxu0 %v6489_v40  ;;  %5128 = vmatprep.subr.bf16.mxu1 %v7716_v38 }
 0x52e   :  { %5106 = vmatpush1.bf16.msra.mxu0 %v6505_v44  ;;  %5130 = vmatpush3.bf16.msra.mxu1 %v6650_v17 }
 0x52f   :  { %5132 = vmatprep.subr.bf16.mxu0 %v6293_v53  ;;  %5163 = vmatprep.subr.bf16.mxu1 %v7716_v38 }
 0x5e4   :  { %v1439_v16 = vpop.f32.mrb[8].mxu0  ;;  %v1510_v45 = vpop.f32.mrb[48].mxu1 }
 0x5e5   :  { %v5796_v37 = vadd.f32 %v6694_v30, %v1439_v16  ;;  %v1441_v41 = vpop.f32.mrb[9].mxu0  ;;  %v4400_v48 = vpop.f32.mrb[49].mxu1  ;;  %v1511_v0 = vadd.f32 %v1510_v45, %v6751_v34 }
 0x5e6   :  { %v5798_v4 = vadd.f32 %v6703_v36, %v1441_v41 }
 0x5e7   :  { %v3855_v50 = vmul.f32 -1.442695, %v5796_v37 }
 0x5e8   :  { %v3856_v58 = vmul.f32 -1.442695, %v5798_v4 }
 0x5e9   :  { %5913 = vpow2.f32 %v3855_v50 }
 0x5ea   :  { %5915 = vpow2.f32 %v3856_v58 }
 0x5f3   :  { %v5914_v22 = vpop.eup %5913 }
 0x5f4   :  { %v1518_v62 = vadd.f32 1.0, %v5914_v22  ;;  %v5916_v27 = vpop.eup %5915 }
 0x5f5   :  { %v1525_v8 = vadd.f32 1.0, %v5916_v27 }
 0x5f6   :  { %5917 = vrcp.f32 %v1518_v62 }
 0x5f7   :  { %5919 = vrcp.f32 %v1525_v8 }
 0x600   :  { %v5918_v20 = vpop.eup %5917 }
 0x601   :  { %v1528_v52 = vmul.f32 %v5918_v20, %v1511_v0  ;;  %v5920_v28 = vpop.eup %5919 }
 0x602   :  { %v1531_v29 = vsub.f32 1.0, %v5920_v28  ;;  %v1533_v41 = vmul.f32 %v5920_v28, %v6849_v35  ;;  %v704_v28 = vadd.f32 %v6725_v43, %v6754_v23 }
 0x603   :  { %v1529_v10 = vadd.f32 %v1528_v52, %v699_v47 }
 0x605   :  { %5921 = vtanh.f32 %v1529_v10 }
 0x60f   :  { %v5922_v16 = vpop.eup %5921 }
 0x610   :  { %v1532_v37 = vmul.f32 %v5922_v16, %v1531_v29 }
 0x612   :  { %v6894_v48 = vadd.f32 %v1533_v41, %v1532_v37 }
 0x614   :  { %1604 = vmatmul.mubr.f32.vlgmr.msra.gmra.mrb[10].mxu0 %v6894_v48  ;;  %4434 = vmatmul.mubr.f32.vlgmr.msra.gmra.mrb[50].mxu1 %v6894_v48 }
 0x615   :  { %5134 = vmatpush1.bf16.msra.mxu0 %v6299_v55  ;;  %5165 = vmatpush3.bf16.msra.mxu1 %v6578_v51 }
 0x616   :  { %5136 = vmatprep.subr.bf16.mxu0 %v6325_v61  ;;  %5166 = vmatprep.subr.bf16.mxu1 %v7716_v38 }
 0x617   :  { %1769 = vmatprep.mubr.f32.mxu0 %v7717_v7  ;;  %4468 = vmatprep.mubr.msk.f32.mxu1 %vm6092_vm0, %v7717_v7 }
 0x619   :  { %5138 = vmatpush1.bf16.msra.mxu0 %v6337_v1  ;;  %5168 = vmatpush3.bf16.msra.mxu1 %v6588_v56 }
 0x61a   :  { %5140 = vmatprep.subr.bf16.mxu0 %v6344_v3  ;;  %5169 = vmatprep.subr.bf16.mxu1 %v7716_v38 }
 0x61d   :  { %5142 = vmatpush1.bf16.msra.mxu0 %v6370_v11  ;;  %5171 = vmatpush3.bf16.msra.mxu1 %v6600_v59 }
 0x61e   :  { %5144 = vmatprep.subr.bf16.mxu0 %v6375_v12  ;;  %5172 = vmatprep.subr.bf16.mxu1 %v7716_v38 }
 0x621   :  { %5146 = vmatpush1.bf16.msra.mxu0 %v6399_v18  ;;  %5174 = vmatpush3.bf16.msra.mxu1 %v6610_v63 }
 0x622   :  { %5148 = vmatprep.subr.bf16.mxu0 %v6405_v19  ;;  %5175 = vmatprep.subr.bf16.mxu1 %v7716_v38 }
 0x625   :  { %5150 = vmatpush1.bf16.msra.mxu0 %v6427_v25  ;;  %5177 = vmatpush3.bf16.msra.mxu1 %v6620_v6 }
 0x626   :  { %5152 = vmatprep.subr.bf16.mxu0 %v6433_v26  ;;  %5178 = vmatprep.subr.bf16.mxu1 %v7716_v38 }
 0x629   :  { %5154 = vmatpush1.bf16.msra.mxu0 %v6455_v32  ;;  %5180 = vmatpush3.bf16.msra.mxu1 %v6630_v9 }
 0x62a   :  { %5156 = vmatprep.subr.bf16.mxu0 %v6461_v33  ;;  %5181 = vmatprep.subr.bf16.mxu1 %v7716_v38 }
 0x62d   :  { %5158 = vmatpush1.bf16.msra.mxu0 %v6483_v39  ;;  %5183 = vmatpush3.bf16.msra.mxu1 %v6640_v14 }
 0x62e   :  { %5160 = vmatprep.subr.bf16.mxu0 %v6489_v40  ;;  %5184 = vmatprep.subr.bf16.mxu1 %v7716_v38 }
 0x631   :  { %5162 = vmatpush1.bf16.msra.mxu0 %v6505_v44  ;;  %5186 = vmatpush3.bf16.msra.mxu1 %v6650_v17 }
 0x632   :  { %5188 = vmatprep.subr.bf16.mxu0 %v6293_v53  ;;  %5219 = vmatprep.subr.bf16.mxu1 %v7716_v38 }
 0x6e7   :  { %v1605_v21 = vpop.f32.mrb[10].mxu0  ;;  %v1676_v45 = vpop.f32.mrb[50].mxu1 }
 0x6e8   :  { %v5800_v50 = vadd.f32 %v6694_v30, %v1605_v21  ;;  %v1607_v4 = vpop.f32.mrb[11].mxu0  ;;  %v4435_v58 = vpop.f32.mrb[51].mxu1  ;;  %v1677_v52 = vadd.f32 %v1676_v45, %v6751_v34 }
 0x6e9   :  { %v5802_v62 = vadd.f32 %v6703_v36, %v1607_v4 }
 0x6ea   :  { %v3857_v22 = vmul.f32 -1.442695, %v5800_v50 }
 0x6eb   :  { %v3858_v27 = vmul.f32 -1.442695, %v5802_v62 }
 0x6ec   :  { %5923 = vpow2.f32 %v3857_v22 }
 0x6ed   :  { %5925 = vpow2.f32 %v3858_v27 }
 0x6f6   :  { %v5924_v8 = vpop.eup %5923 }
 0x6f7   :  { %v1684_v0 = vadd.f32 1.0, %v5924_v8  ;;  %v5926_v20 = vpop.eup %5925 }
 0x6f8   :  { %v1691_v47 = vadd.f32 1.0, %v5926_v20 }
 0x6f9   :  { %5927 = vrcp.f32 %v1684_v0 }
 0x6fa   :  { %5929 = vrcp.f32 %v1691_v47 }
 0x703   :  { %v5928_v10 = vpop.eup %5927 }
 0x704   :  { %v1694_v29 = vmul.f32 %v5928_v10, %v1677_v52  ;;  %v5930_v37 = vpop.eup %5929 }
 0x705   :  { %v1697_v41 = vsub.f32 1.0, %v5930_v37  ;;  %v1699_v4 = vmul.f32 %v5930_v37, %v6894_v48  ;;  %v709_v37 = vadd.f32 %v6727_v46, %v6754_v23 }
 0x706   :  { %v1695_v16 = vadd.f32 %v1694_v29, %v704_v28 }
 0x708   :  { %5931 = vtanh.f32 %v1695_v16 }
 0x712   :  { %v5932_v21 = vpop.eup %5931 }
 0x713   :  { %v1698_v50 = vmul.f32 %v5932_v21, %v1697_v41 }
 0x715   :  { %v6939_v58 = vadd.f32 %v1699_v4, %v1698_v50 }
 0x717   :  { %1770 = vmatmul.mubr.f32.vlgmr.msra.gmra.mrb[12].mxu0 %v6939_v58  ;;  %4469 = vmatmul.mubr.f32.vlgmr.msra.gmra.mrb[52].mxu1 %v6939_v58 }
 0x718   :  { %5190 = vmatpush1.bf16.msra.mxu0 %v6299_v55  ;;  %5221 = vmatpush3.bf16.msra.mxu1 %v6578_v51 }
 0x719   :  { %5192 = vmatprep.subr.bf16.mxu0 %v6325_v61  ;;  %5222 = vmatprep.subr.bf16.mxu1 %v7716_v38 }
 0x71a   :  { %1935 = vmatprep.mubr.f32.mxu0 %v7717_v7  ;;  %4503 = vmatprep.mubr.msk.f32.mxu1 %vm6092_vm0, %v7717_v7 }
 0x71c   :  { %5194 = vmatpush1.bf16.msra.mxu0 %v6337_v1  ;;  %5224 = vmatpush3.bf16.msra.mxu1 %v6588_v56 }
 0x71d   :  { %5196 = vmatprep.subr.bf16.mxu0 %v6344_v3  ;;  %5225 = vmatprep.subr.bf16.mxu1 %v7716_v38 }
 0x720   :  { %5198 = vmatpush1.bf16.msra.mxu0 %v6370_v11  ;;  %5227 = vmatpush3.bf16.msra.mxu1 %v6600_v59 }
 0x721   :  { %5200 = vmatprep.subr.bf16.mxu0 %v6375_v12  ;;  %5228 = vmatprep.subr.bf16.mxu1 %v7716_v38 }
 0x724   :  { %5202 = vmatpush1.bf16.msra.mxu0 %v6399_v18  ;;  %5230 = vmatpush3.bf16.msra.mxu1 %v6610_v63 }
 0x725   :  { %5204 = vmatprep.subr.bf16.mxu0 %v6405_v19  ;;  %5231 = vmatprep.subr.bf16.mxu1 %v7716_v38 }
 0x728   :  { %5206 = vmatpush1.bf16.msra.mxu0 %v6427_v25  ;;  %5233 = vmatpush3.bf16.msra.mxu1 %v6620_v6 }
 0x729   :  { %5208 = vmatprep.subr.bf16.mxu0 %v6433_v26  ;;  %5234 = vmatprep.subr.bf16.mxu1 %v7716_v38 }
 0x72c   :  { %5210 = vmatpush1.bf16.msra.mxu0 %v6455_v32  ;;  %5236 = vmatpush3.bf16.msra.mxu1 %v6630_v9 }
 0x72d   :  { %5212 = vmatprep.subr.bf16.mxu0 %v6461_v33  ;;  %5237 = vmatprep.subr.bf16.mxu1 %v7716_v38 }
 0x730   :  { %5214 = vmatpush1.bf16.msra.mxu0 %v6483_v39  ;;  %5239 = vmatpush3.bf16.msra.mxu1 %v6640_v14 }
 0x731   :  { %5216 = vmatprep.subr.bf16.mxu0 %v6489_v40  ;;  %5240 = vmatprep.subr.bf16.mxu1 %v7716_v38 }
 0x734   :  { %5218 = vmatpush1.bf16.msra.mxu0 %v6505_v44  ;;  %5242 = vmatpush3.bf16.msra.mxu1 %v6650_v17 }
 0x735   :  { %5244 = vmatprep.subr.bf16.mxu0 %v6293_v53  ;;  %5275 = vmatprep.subr.bf16.mxu1 %v7716_v38 }
 0x7ea   :  { %v1771_v43 = vpop.f32.mrb[12].mxu0  ;;  %v1842_v45 = vpop.f32.mrb[52].mxu1 }
 0x7eb   :  { %v5804_v22 = vadd.f32 %v6694_v30, %v1771_v43  ;;  %v1773_v62 = vpop.f32.mrb[13].mxu0  ;;  %v4470_v27 = vpop.f32.mrb[53].mxu1  ;;  %v1843_v29 = vadd.f32 %v1842_v45, %v6751_v34 }
 0x7ec   :  { %v5806_v0 = vadd.f32 %v6703_v36, %v1773_v62 }
 0x7ed   :  { %v3859_v8 = vmul.f32 -1.442695, %v5804_v22 }
 0x7ee   :  { %v3860_v20 = vmul.f32 -1.442695, %v5806_v0 }
 0x7ef   :  { %5933 = vpow2.f32 %v3859_v8 }
 0x7f0   :  { %5935 = vpow2.f32 %v3860_v20 }
 0x7f9   :  { %v5934_v47 = vpop.eup %5933 }
 0x7fa   :  { %v1850_v52 = vadd.f32 1.0, %v5934_v47  ;;  %v5936_v10 = vpop.eup %5935 }
 0x7fb   :  { %v1857_v28 = vadd.f32 1.0, %v5936_v10 }
 0x7fc   :  { %5937 = vrcp.f32 %v1850_v52 }
 0x7fd   :  { %5939 = vrcp.f32 %v1857_v28 }
 0x806   :  { %v5938_v16 = vpop.eup %5937 }
 0x807   :  { %v1860_v41 = vmul.f32 %v5938_v16, %v1843_v29  ;;  %v5940_v50 = vpop.eup %5939 }
 0x808   :  { %v1863_v4 = vsub.f32 1.0, %v5940_v50  ;;  %v1865_v62 = vmul.f32 %v5940_v50, %v6939_v58  ;;  %v714_v50 = vadd.f32 %v6729_v49, %v6754_v23 }
 0x809   :  { %v1861_v21 = vadd.f32 %v1860_v41, %v709_v37 }
 0x80b   :  { %5941 = vtanh.f32 %v1861_v21 }
 0x815   :  { %v5942_v43 = vpop.eup %5941 }
 0x816   :  { %v1864_v22 = vmul.f32 %v5942_v43, %v1863_v4 }
 0x818   :  { %v6984_v27 = vadd.f32 %v1865_v62, %v1864_v22 }
 0x81a   :  { %1936 = vmatmul.mubr.f32.vlgmr.msra.gmra.mrb[14].mxu0 %v6984_v27  ;;  %4504 = vmatmul.mubr.f32.vlgmr.msra.gmra.mrb[54].mxu1 %v6984_v27 }
 0x81b   :  { %5246 = vmatpush1.bf16.msra.mxu0 %v6299_v55  ;;  %5277 = vmatpush3.bf16.msra.mxu1 %v6578_v51 }
 0x81c   :  { %5248 = vmatprep.subr.bf16.mxu0 %v6325_v61  ;;  %5278 = vmatprep.subr.bf16.mxu1 %v7716_v38 }
 0x81d   :  { %2101 = vmatprep.mubr.f32.mxu0 %v7717_v7  ;;  %4538 = vmatprep.mubr.msk.f32.mxu1 %vm6092_vm0, %v7717_v7 }
 0x81f   :  { %5250 = vmatpush1.bf16.msra.mxu0 %v6337_v1  ;;  %5280 = vmatpush3.bf16.msra.mxu1 %v6588_v56 }
 0x820   :  { %5252 = vmatprep.subr.bf16.mxu0 %v6344_v3  ;;  %5281 = vmatprep.subr.bf16.mxu1 %v7716_v38 }
 0x823   :  { %5254 = vmatpush1.bf16.msra.mxu0 %v6370_v11  ;;  %5283 = vmatpush3.bf16.msra.mxu1 %v6600_v59 }
 0x824   :  { %5256 = vmatprep.subr.bf16.mxu0 %v6375_v12  ;;  %5284 = vmatprep.subr.bf16.mxu1 %v7716_v38 }
 0x827   :  { %5258 = vmatpush1.bf16.msra.mxu0 %v6399_v18  ;;  %5286 = vmatpush3.bf16.msra.mxu1 %v6610_v63 }
 0x828   :  { %5260 = vmatprep.subr.bf16.mxu0 %v6405_v19  ;;  %5287 = vmatprep.subr.bf16.mxu1 %v7716_v38 }
 0x82b   :  { %5262 = vmatpush1.bf16.msra.mxu0 %v6427_v25  ;;  %5289 = vmatpush3.bf16.msra.mxu1 %v6620_v6 }
 0x82c   :  { %5264 = vmatprep.subr.bf16.mxu0 %v6433_v26  ;;  %5290 = vmatprep.subr.bf16.mxu1 %v7716_v38 }
 0x82f   :  { %5266 = vmatpush1.bf16.msra.mxu0 %v6455_v32  ;;  %5292 = vmatpush3.bf16.msra.mxu1 %v6630_v9 }
 0x830   :  { %5268 = vmatprep.subr.bf16.mxu0 %v6461_v33  ;;  %5293 = vmatprep.subr.bf16.mxu1 %v7716_v38 }
 0x833   :  { %5270 = vmatpush1.bf16.msra.mxu0 %v6483_v39  ;;  %5295 = vmatpush3.bf16.msra.mxu1 %v6640_v14 }
 0x834   :  { %5272 = vmatprep.subr.bf16.mxu0 %v6489_v40  ;;  %5296 = vmatprep.subr.bf16.mxu1 %v7716_v38 }
 0x837   :  { %5274 = vmatpush1.bf16.msra.mxu0 %v6505_v44  ;;  %5298 = vmatpush3.bf16.msra.mxu1 %v6650_v17 }
 0x838   :  { %5300 = vmatprep.subr.bf16.mxu0 %v6293_v53  ;;  %5331 = vmatprep.subr.bf16.mxu1 %v7716_v38 }
 0x8ed   :  { %v1937_v46 = vpop.f32.mrb[14].mxu0  ;;  %v2008_v45 = vpop.f32.mrb[54].mxu1 }
 0x8ee   :  { %v5808_v8 = vadd.f32 %v6694_v30, %v1937_v46  ;;  %v1939_v0 = vpop.f32.mrb[15].mxu0  ;;  %v4505_v20 = vpop.f32.mrb[55].mxu1  ;;  %v2009_v41 = vadd.f32 %v2008_v45, %v6751_v34 }
 0x8ef   :  { %v5810_v52 = vadd.f32 %v6703_v36, %v1939_v0 }
 0x8f0   :  { %v3861_v47 = vmul.f32 -1.442695, %v5808_v8 }
 0x8f1   :  { %v3862_v10 = vmul.f32 -1.442695, %v5810_v52 }
 0x8f2   :  { %5943 = vpow2.f32 %v3861_v47 }
 0x8f3   :  { %5945 = vpow2.f32 %v3862_v10 }
 0x8fc   :  { %v5944_v28 = vpop.eup %5943 }
 0x8fd   :  { %v2016_v29 = vadd.f32 1.0, %v5944_v28  ;;  %v5946_v16 = vpop.eup %5945 }
 0x8fe   :  { %v2023_v37 = vadd.f32 1.0, %v5946_v16 }
 0x8ff   :  { %5947 = vrcp.f32 %v2016_v29 }
 0x900   :  { %5949 = vrcp.f32 %v2023_v37 }
 0x909   :  { %v5948_v21 = vpop.eup %5947 }
 0x90a   :  { %v2026_v4 = vmul.f32 %v5948_v21, %v2009_v41  ;;  %v5950_v22 = vpop.eup %5949 }
 0x90b   :  { %v2029_v62 = vsub.f32 1.0, %v5950_v22  ;;  %v2031_v0 = vmul.f32 %v5950_v22, %v6984_v27  ;;  %v719_v22 = vadd.f32 %v6731_v54, %v6754_v23 }
 0x90c   :  { %v2027_v43 = vadd.f32 %v2026_v4, %v714_v50 }
 0x90e   :  { %5951 = vtanh.f32 %v2027_v43 }
 0x918   :  { %v5952_v46 = vpop.eup %5951 }
 0x919   :  { %v2030_v8 = vmul.f32 %v5952_v46, %v2029_v62 }
 0x91b   :  { %v7029_v20 = vadd.f32 %v2031_v0, %v2030_v8 }
 0x91d   :  { %2102 = vmatmul.mubr.f32.vlgmr.msra.gmra.mrb[16].mxu0 %v7029_v20  ;;  %4539 = vmatmul.mubr.f32.vlgmr.msra.gmra.mrb[56].mxu1 %v7029_v20 }
 0x91e   :  { %5302 = vmatpush1.bf16.msra.mxu0 %v6299_v55  ;;  %5333 = vmatpush3.bf16.msra.mxu1 %v6578_v51 }
 0x91f   :  { %5304 = vmatprep.subr.bf16.mxu0 %v6325_v61  ;;  %5334 = vmatprep.subr.bf16.mxu1 %v7716_v38 }
 0x920   :  { %2267 = vmatprep.mubr.f32.mxu0 %v7717_v7  ;;  %4573 = vmatprep.mubr.msk.f32.mxu1 %vm6092_vm0, %v7717_v7 }
 0x922   :  { %5306 = vmatpush1.bf16.msra.mxu0 %v6337_v1  ;;  %5336 = vmatpush3.bf16.msra.mxu1 %v6588_v56 }
 0x923   :  { %5308 = vmatprep.subr.bf16.mxu0 %v6344_v3  ;;  %5337 = vmatprep.subr.bf16.mxu1 %v7716_v38 }
 0x926   :  { %5310 = vmatpush1.bf16.msra.mxu0 %v6370_v11  ;;  %5339 = vmatpush3.bf16.msra.mxu1 %v6600_v59 }
 0x927   :  { %5312 = vmatprep.subr.bf16.mxu0 %v6375_v12  ;;  %5340 = vmatprep.subr.bf16.mxu1 %v7716_v38 }
 0x92a   :  { %5314 = vmatpush1.bf16.msra.mxu0 %v6399_v18  ;;  %5342 = vmatpush3.bf16.msra.mxu1 %v6610_v63 }
 0x92b   :  { %5316 = vmatprep.subr.bf16.mxu0 %v6405_v19  ;;  %5343 = vmatprep.subr.bf16.mxu1 %v7716_v38 }
 0x92e   :  { %5318 = vmatpush1.bf16.msra.mxu0 %v6427_v25  ;;  %5345 = vmatpush3.bf16.msra.mxu1 %v6620_v6 }
 0x92f   :  { %5320 = vmatprep.subr.bf16.mxu0 %v6433_v26  ;;  %5346 = vmatprep.subr.bf16.mxu1 %v7716_v38 }
 0x932   :  { %5322 = vmatpush1.bf16.msra.mxu0 %v6455_v32  ;;  %5348 = vmatpush3.bf16.msra.mxu1 %v6630_v9 }
 0x933   :  { %5324 = vmatprep.subr.bf16.mxu0 %v6461_v33  ;;  %5349 = vmatprep.subr.bf16.mxu1 %v7716_v38 }
 0x936   :  { %5326 = vmatpush1.bf16.msra.mxu0 %v6483_v39  ;;  %5351 = vmatpush3.bf16.msra.mxu1 %v6640_v14 }
 0x937   :  { %5328 = vmatprep.subr.bf16.mxu0 %v6489_v40  ;;  %5352 = vmatprep.subr.bf16.mxu1 %v7716_v38 }
 0x93a   :  { %5330 = vmatpush1.bf16.msra.mxu0 %v6505_v44  ;;  %5354 = vmatpush3.bf16.msra.mxu1 %v6650_v17 }
 0x93b   :  { %5356 = vmatprep.subr.bf16.mxu0 %v6293_v53  ;;  %5387 = vmatprep.subr.bf16.mxu1 %v7716_v38 }
 0x9f0   :  { %v2103_v49 = vpop.f32.mrb[16].mxu0  ;;  %v2174_v45 = vpop.f32.mrb[56].mxu1 }
 0x9f1   :  { %v5812_v47 = vadd.f32 %v6694_v30, %v2103_v49  ;;  %v2105_v52 = vpop.f32.mrb[17].mxu0  ;;  %v4540_v10 = vpop.f32.mrb[57].mxu1  ;;  %v2175_v4 = vadd.f32 %v2174_v45, %v6751_v34 }
 0x9f2   :  { %v5814_v29 = vadd.f32 %v6703_v36, %v2105_v52 }
 0x9f3   :  { %v3863_v28 = vmul.f32 -1.442695, %v5812_v47 }
 0x9f4   :  { %v3864_v16 = vmul.f32 -1.442695, %v5814_v29 }
 0x9f5   :  { %5953 = vpow2.f32 %v3863_v28 }
 0x9f6   :  { %5955 = vpow2.f32 %v3864_v16 }
 0x9ff   :  { %v5954_v37 = vpop.eup %5953 }
 0xa00   :  { %v2182_v41 = vadd.f32 1.0, %v5954_v37  ;;  %v5956_v21 = vpop.eup %5955 }
 0xa01   :  { %v2189_v50 = vadd.f32 1.0, %v5956_v21 }
 0xa02   :  { %5957 = vrcp.f32 %v2182_v41 }
 0xa03   :  { %5959 = vrcp.f32 %v2189_v50 }
 0xa0c   :  { %v5958_v43 = vpop.eup %5957 }
 0xa0d   :  { %v2192_v62 = vmul.f32 %v5958_v43, %v2175_v4  ;;  %v5960_v8 = vpop.eup %5959 }
 0xa0e   :  { %v2195_v0 = vsub.f32 1.0, %v5960_v8  ;;  %v2197_v52 = vmul.f32 %v5960_v8, %v7029_v20  ;;  %v724_v8 = vadd.f32 %v6733_v60, %v6754_v23 }
 0xa0f   :  { %v2193_v46 = vadd.f32 %v2192_v62, %v719_v22 }
 0xa11   :  { %5961 = vtanh.f32 %v2193_v46 }
 0xa1b   :  { %v5962_v49 = vpop.eup %5961 }
 0xa1c   :  { %v2196_v47 = vmul.f32 %v5962_v49, %v2195_v0 }
 0xa1e   :  { %v7074_v10 = vadd.f32 %v2197_v52, %v2196_v47 }
 0xa20   :  { %2268 = vmatmul.mubr.f32.vlgmr.msra.gmra.mrb[18].mxu0 %v7074_v10  ;;  %4574 = vmatmul.mubr.f32.vlgmr.msra.gmra.mrb[58].mxu1 %v7074_v10 }
 0xa21   :  { %5358 = vmatpush1.bf16.msra.mxu0 %v6299_v55  ;;  %5389 = vmatpush3.bf16.msra.mxu1 %v6578_v51 }
 0xa22   :  { %5360 = vmatprep.subr.bf16.mxu0 %v6325_v61  ;;  %5390 = vmatprep.subr.bf16.mxu1 %v7716_v38 }
 0xa23   :  { %2433 = vmatprep.mubr.f32.mxu0 %v7717_v7  ;;  %4608 = vmatprep.mubr.msk.f32.mxu1 %vm6092_vm0, %v7717_v7 }
 0xa25   :  { %5362 = vmatpush1.bf16.msra.mxu0 %v6337_v1  ;;  %5392 = vmatpush3.bf16.msra.mxu1 %v6588_v56 }
 0xa26   :  { %5364 = vmatprep.subr.bf16.mxu0 %v6344_v3  ;;  %5393 = vmatprep.subr.bf16.mxu1 %v7716_v38 }
 0xa29   :  { %5366 = vmatpush1.bf16.msra.mxu0 %v6370_v11  ;;  %5395 = vmatpush3.bf16.msra.mxu1 %v6600_v59 }
 0xa2a   :  { %5368 = vmatprep.subr.bf16.mxu0 %v6375_v12  ;;  %5396 = vmatprep.subr.bf16.mxu1 %v7716_v38 }
 0xa2d   :  { %5370 = vmatpush1.bf16.msra.mxu0 %v6399_v18  ;;  %5398 = vmatpush3.bf16.msra.mxu1 %v6610_v63 }
 0xa2e   :  { %5372 = vmatprep.subr.bf16.mxu0 %v6405_v19  ;;  %5399 = vmatprep.subr.bf16.mxu1 %v7716_v38 }
 0xa31   :  { %5374 = vmatpush1.bf16.msra.mxu0 %v6427_v25  ;;  %5401 = vmatpush3.bf16.msra.mxu1 %v6620_v6 }
 0xa32   :  { %5376 = vmatprep.subr.bf16.mxu0 %v6433_v26  ;;  %5402 = vmatprep.subr.bf16.mxu1 %v7716_v38 }
 0xa35   :  { %5378 = vmatpush1.bf16.msra.mxu0 %v6455_v32  ;;  %5404 = vmatpush3.bf16.msra.mxu1 %v6630_v9 }
 0xa36   :  { %5380 = vmatprep.subr.bf16.mxu0 %v6461_v33  ;;  %5405 = vmatprep.subr.bf16.mxu1 %v7716_v38 }
 0xa39   :  { %5382 = vmatpush1.bf16.msra.mxu0 %v6483_v39  ;;  %5407 = vmatpush3.bf16.msra.mxu1 %v6640_v14 }
 0xa3a   :  { %5384 = vmatprep.subr.bf16.mxu0 %v6489_v40  ;;  %5408 = vmatprep.subr.bf16.mxu1 %v7716_v38 }
 0xa3d   :  { %5386 = vmatpush1.bf16.msra.mxu0 %v6505_v44  ;;  %5410 = vmatpush3.bf16.msra.mxu1 %v6650_v17 }
 0xa3e   :  { %5412 = vmatprep.subr.bf16.mxu0 %v6293_v53  ;;  %5443 = vmatprep.subr.bf16.mxu1 %v7716_v38 }
 0xaf3   :  { %v2269_v54 = vpop.f32.mrb[18].mxu0  ;;  %v2340_v45 = vpop.f32.mrb[58].mxu1 }
 0xaf4   :  { %v5816_v28 = vadd.f32 %v6694_v30, %v2269_v54  ;;  %v2271_v29 = vpop.f32.mrb[19].mxu0  ;;  %v4575_v16 = vpop.f32.mrb[59].mxu1  ;;  %v2341_v62 = vadd.f32 %v2340_v45, %v6751_v34 }
 0xaf5   :  { %v5818_v41 = vadd.f32 %v6703_v36, %v2271_v29 }
 0xaf6   :  { %v3865_v37 = vmul.f32 -1.442695, %v5816_v28 }
 0xaf7   :  { %v3866_v21 = vmul.f32 -1.442695, %v5818_v41 }
 0xaf8   :  { %5963 = vpow2.f32 %v3865_v37 }
 0xaf9   :  { %5965 = vpow2.f32 %v3866_v21 }
 0xb02   :  { %v5964_v50 = vpop.eup %5963 }
 0xb03   :  { %v2348_v4 = vadd.f32 1.0, %v5964_v50  ;;  %v5966_v43 = vpop.eup %5965 }
 0xb04   :  { %v2355_v22 = vadd.f32 1.0, %v5966_v43 }
 0xb05   :  { %5967 = vrcp.f32 %v2348_v4 }
 0xb06   :  { %5969 = vrcp.f32 %v2355_v22 }
 0xb0f   :  { %v5968_v46 = vpop.eup %5967 }
 0xb10   :  { %v2358_v0 = vmul.f32 %v5968_v46, %v2341_v62  ;;  %v5970_v47 = vpop.eup %5969 }
 0xb11   :  { %v2361_v52 = vsub.f32 1.0, %v5970_v47  ;;  %v2363_v29 = vmul.f32 %v5970_v47, %v7074_v10  ;;  %v729_v47 = vadd.f32 %v6735_v5, %v6754_v23 }
 0xb12   :  { %v2359_v49 = vadd.f32 %v2358_v0, %v724_v8 }
 0xb14   :  { %5971 = vtanh.f32 %v2359_v49 }
 0xb1e   :  { %v5972_v54 = vpop.eup %5971 }
 0xb1f   :  { %v2362_v28 = vmul.f32 %v5972_v54, %v2361_v52 }
 0xb21   :  { %v7119_v16 = vadd.f32 %v2363_v29, %v2362_v28 }
 0xb23   :  { %2434 = vmatmul.mubr.f32.vlgmr.msra.gmra.mrb[20].mxu0 %v7119_v16  ;;  %4609 = vmatmul.mubr.f32.vlgmr.msra.gmra.mrb[60].mxu1 %v7119_v16 }
 0xb24   :  { %5414 = vmatpush1.bf16.msra.mxu0 %v6299_v55  ;;  %5445 = vmatpush3.bf16.msra.mxu1 %v6578_v51 }
 0xb25   :  { %5416 = vmatprep.subr.bf16.mxu0 %v6325_v61  ;;  %5446 = vmatprep.subr.bf16.mxu1 %v7716_v38 }
 0xb26   :  { %2599 = vmatprep.mubr.f32.mxu0 %v7717_v7  ;;  %4643 = vmatprep.mubr.msk.f32.mxu1 %vm6092_vm0, %v7717_v7 }
 0xb28   :  { %5418 = vmatpush1.bf16.msra.mxu0 %v6337_v1  ;;  %5448 = vmatpush3.bf16.msra.mxu1 %v6588_v56 }
 0xb29   :  { %5420 = vmatprep.subr.bf16.mxu0 %v6344_v3  ;;  %5449 = vmatprep.subr.bf16.mxu1 %v7716_v38 }
 0xb2c   :  { %5422 = vmatpush1.bf16.msra.mxu0 %v6370_v11  ;;  %5451 = vmatpush3.bf16.msra.mxu1 %v6600_v59 }
 0xb2d   :  { %5424 = vmatprep.subr.bf16.mxu0 %v6375_v12  ;;  %5452 = vmatprep.subr.bf16.mxu1 %v7716_v38 }
 0xb30   :  { %5426 = vmatpush1.bf16.msra.mxu0 %v6399_v18  ;;  %5454 = vmatpush3.bf16.msra.mxu1 %v6610_v63 }
 0xb31   :  { %5428 = vmatprep.subr.bf16.mxu0 %v6405_v19  ;;  %5455 = vmatprep.subr.bf16.mxu1 %v7716_v38 }
 0xb34   :  { %5430 = vmatpush1.bf16.msra.mxu0 %v6427_v25  ;;  %5457 = vmatpush3.bf16.msra.mxu1 %v6620_v6 }
 0xb35   :  { %5432 = vmatprep.subr.bf16.mxu0 %v6433_v26  ;;  %5458 = vmatprep.subr.bf16.mxu1 %v7716_v38 }
 0xb38   :  { %5434 = vmatpush1.bf16.msra.mxu0 %v6455_v32  ;;  %5460 = vmatpush3.bf16.msra.mxu1 %v6630_v9 }
 0xb39   :  { %5436 = vmatprep.subr.bf16.mxu0 %v6461_v33  ;;  %5461 = vmatprep.subr.bf16.mxu1 %v7716_v38 }
 0xb3c   :  { %5438 = vmatpush1.bf16.msra.mxu0 %v6483_v39  ;;  %5463 = vmatpush3.bf16.msra.mxu1 %v6640_v14 }
 0xb3d   :  { %5440 = vmatprep.subr.bf16.mxu0 %v6489_v40  ;;  %5464 = vmatprep.subr.bf16.mxu1 %v7716_v38 }
 0xb40   :  { %5442 = vmatpush1.bf16.msra.mxu0 %v6505_v44  ;;  %5466 = vmatpush3.bf16.msra.mxu1 %v6650_v17 }
 0xb41   :  { %5468 = vmatprep.subr.bf16.mxu0 %v6293_v53  ;;  %5499 = vmatprep.subr.bf16.mxu1 %v7716_v38 }
 0xbf6   :  { %v2435_v60 = vpop.f32.mrb[20].mxu0  ;;  %v2506_v45 = vpop.f32.mrb[60].mxu1 }
 0xbf7   :  { %v5820_v37 = vadd.f32 %v6694_v30, %v2435_v60  ;;  %v2437_v41 = vpop.f32.mrb[21].mxu0  ;;  %v4610_v21 = vpop.f32.mrb[61].mxu1  ;;  %v2507_v0 = vadd.f32 %v2506_v45, %v6751_v34 }
 0xbf8   :  { %v5822_v4 = vadd.f32 %v6703_v36, %v2437_v41 }
 0xbf9   :  { %v3867_v50 = vmul.f32 -1.442695, %v5820_v37 }
 0xbfa   :  { %v3868_v43 = vmul.f32 -1.442695, %v5822_v4 }
 0xbfb   :  { %5973 = vpow2.f32 %v3867_v50 }
 0xbfc   :  { %5975 = vpow2.f32 %v3868_v43 }
 0xc05   :  { %v5974_v22 = vpop.eup %5973 }
 0xc06   :  { %v2514_v62 = vadd.f32 1.0, %v5974_v22  ;;  %v5976_v46 = vpop.eup %5975 }
 0xc07   :  { %v2521_v8 = vadd.f32 1.0, %v5976_v46 }
 0xc08   :  { %5977 = vrcp.f32 %v2514_v62 }
 0xc09   :  { %5979 = vrcp.f32 %v2521_v8 }
 0xc12   :  { %v5978_v49 = vpop.eup %5977 }
 0xc13   :  { %v2524_v52 = vmul.f32 %v5978_v49, %v2507_v0  ;;  %v5980_v28 = vpop.eup %5979 }
 0xc14   :  { %v2527_v29 = vsub.f32 1.0, %v5980_v28  ;;  %v2529_v41 = vmul.f32 %v5980_v28, %v7119_v16  ;;  %v734_v28 = vadd.f32 %v6737_v15, %v6754_v23 }
 0xc15   :  { %v2525_v54 = vadd.f32 %v2524_v52, %v729_v47 }
 0xc17   :  { %5981 = vtanh.f32 %v2525_v54 }
 0xc21   :  { %v5982_v60 = vpop.eup %5981 }
 0xc22   :  { %v2528_v37 = vmul.f32 %v5982_v60, %v2527_v29 }
 0xc24   :  { %v7164_v21 = vadd.f32 %v2529_v41, %v2528_v37 }
 0xc26   :  { %2600 = vmatmul.mubr.f32.vlgmr.msra.gmra.mrb[22].mxu0 %v7164_v21  ;;  %4644 = vmatmul.mubr.f32.vlgmr.msra.gmra.mrb[62].mxu1 %v7164_v21 }
 0xc27   :  { %5470 = vmatpush1.bf16.msra.mxu0 %v6299_v55  ;;  %5501 = vmatpush3.bf16.msra.mxu1 %v6578_v51 }
 0xc28   :  { %5472 = vmatprep.subr.bf16.mxu0 %v6325_v61  ;;  %5502 = vmatprep.subr.bf16.mxu1 %v7716_v38 }
 0xc29   :  { %2765 = vmatprep.mubr.f32.mxu0 %v7717_v7  ;;  %4678 = vmatprep.mubr.msk.f32.mxu1 %vm6092_vm0, %v7717_v7 }
 0xc2b   :  { %5474 = vmatpush1.bf16.msra.mxu0 %v6337_v1  ;;  %5504 = vmatpush3.bf16.msra.mxu1 %v6588_v56 }
 0xc2c   :  { %5476 = vmatprep.subr.bf16.mxu0 %v6344_v3  ;;  %5505 = vmatprep.subr.bf16.mxu1 %v7716_v38 }
 0xc2f   :  { %5478 = vmatpush1.bf16.msra.mxu0 %v6370_v11  ;;  %5507 = vmatpush3.bf16.msra.mxu1 %v6600_v59 }
 0xc30   :  { %5480 = vmatprep.subr.bf16.mxu0 %v6375_v12  ;;  %5508 = vmatprep.subr.bf16.mxu1 %v7716_v38 }
 0xc33   :  { %5482 = vmatpush1.bf16.msra.mxu0 %v6399_v18  ;;  %5510 = vmatpush3.bf16.msra.mxu1 %v6610_v63 }
 0xc34   :  { %5484 = vmatprep.subr.bf16.mxu0 %v6405_v19  ;;  %5511 = vmatprep.subr.bf16.mxu1 %v7716_v38 }
 0xc37   :  { %5486 = vmatpush1.bf16.msra.mxu0 %v6427_v25  ;;  %5513 = vmatpush3.bf16.msra.mxu1 %v6620_v6 }
 0xc38   :  { %5488 = vmatprep.subr.bf16.mxu0 %v6433_v26  ;;  %5514 = vmatprep.subr.bf16.mxu1 %v7716_v38 }
 0xc3b   :  { %5490 = vmatpush1.bf16.msra.mxu0 %v6455_v32  ;;  %5516 = vmatpush3.bf16.msra.mxu1 %v6630_v9 }
 0xc3c   :  { %5492 = vmatprep.subr.bf16.mxu0 %v6461_v33  ;;  %5517 = vmatprep.subr.bf16.mxu1 %v7716_v38 }
 0xc3f   :  { %5494 = vmatpush1.bf16.msra.mxu0 %v6483_v39  ;;  %5519 = vmatpush3.bf16.msra.mxu1 %v6640_v14 }
 0xc40   :  { %5496 = vmatprep.subr.bf16.mxu0 %v6489_v40  ;;  %5520 = vmatprep.subr.bf16.mxu1 %v7716_v38 }
 0xc43   :  { %5498 = vmatpush1.bf16.msra.mxu0 %v6505_v44  ;;  %5522 = vmatpush3.bf16.msra.mxu1 %v6650_v17 }
 0xc44   :  { %5524 = vmatprep.subr.bf16.mxu0 %v6293_v53  ;;  %5555 = vmatprep.subr.bf16.mxu1 %v7716_v38 }
 0xcf9   :  { %v2601_v5 = vpop.f32.mrb[22].mxu0  ;;  %v2672_v45 = vpop.f32.mrb[62].mxu1 }
 0xcfa   :  { %v5824_v50 = vadd.f32 %v6694_v30, %v2601_v5  ;;  %v2603_v4 = vpop.f32.mrb[23].mxu0  ;;  %v4645_v43 = vpop.f32.mrb[63].mxu1  ;;  %v2673_v52 = vadd.f32 %v2672_v45, %v6751_v34 }
 0xcfb   :  { %v5826_v62 = vadd.f32 %v6703_v36, %v2603_v4 }
 0xcfc   :  { %v3869_v22 = vmul.f32 -1.442695, %v5824_v50 }
 0xcfd   :  { %v3870_v46 = vmul.f32 -1.442695, %v5826_v62 }
 0xcfe   :  { %5983 = vpow2.f32 %v3869_v22 }
 0xcff   :  { %5985 = vpow2.f32 %v3870_v46 }
 0xd08   :  { %v5984_v8 = vpop.eup %5983 }
 0xd09   :  { %v2680_v0 = vadd.f32 1.0, %v5984_v8  ;;  %v5986_v49 = vpop.eup %5985 }
 0xd0a   :  { %v2687_v47 = vadd.f32 1.0, %v5986_v49 }
 0xd0b   :  { %5987 = vrcp.f32 %v2680_v0 }
 0xd0c   :  { %5989 = vrcp.f32 %v2687_v47 }
 0xd15   :  { %v5988_v54 = vpop.eup %5987 }
 0xd16   :  { %v2690_v29 = vmul.f32 %v5988_v54, %v2673_v52  ;;  %v5990_v37 = vpop.eup %5989 }
 0xd17   :  { %v2693_v41 = vsub.f32 1.0, %v5990_v37  ;;  %v2695_v4 = vmul.f32 %v5990_v37, %v7164_v21  ;;  %v739_v37 = vadd.f32 %v6739_v42, %v6754_v23 }
 0xd18   :  { %v2691_v60 = vadd.f32 %v2690_v29, %v734_v28 }
 0xd1a   :  { %5991 = vtanh.f32 %v2691_v60 }
 0xd24   :  { %v5992_v5 = vpop.eup %5991 }
 0xd25   :  { %v2694_v50 = vmul.f32 %v5992_v5, %v2693_v41 }
 0xd27   :  { %v7209_v43 = vadd.f32 %v2695_v4, %v2694_v50 }
 0xd29   :  { %2766 = vmatmul.mubr.f32.vlgmr.msra.gmra.mrb[24].mxu0 %v7209_v43  ;;  %4679 = vmatmul.mubr.f32.vlgmr.msra.gmra.mrb[64].mxu1 %v7209_v43 }
 0xd2a   :  { %5526 = vmatpush1.bf16.msra.mxu0 %v6299_v55  ;;  %5557 = vmatpush3.bf16.msra.mxu1 %v6578_v51 }
 0xd2b   :  { %5528 = vmatprep.subr.bf16.mxu0 %v6325_v61  ;;  %5558 = vmatprep.subr.bf16.mxu1 %v7716_v38 }
 0xd2c   :  { %2931 = vmatprep.mubr.f32.mxu0 %v7717_v7  ;;  %4713 = vmatprep.mubr.msk.f32.mxu1 %vm6092_vm0, %v7717_v7 }
 0xd2e   :  { %5530 = vmatpush1.bf16.msra.mxu0 %v6337_v1  ;;  %5560 = vmatpush3.bf16.msra.mxu1 %v6588_v56 }
 0xd2f   :  { %5532 = vmatprep.subr.bf16.mxu0 %v6344_v3  ;;  %5561 = vmatprep.subr.bf16.mxu1 %v7716_v38 }
 0xd32   :  { %5534 = vmatpush1.bf16.msra.mxu0 %v6370_v11  ;;  %5563 = vmatpush3.bf16.msra.mxu1 %v6600_v59 }
 0xd33   :  { %5536 = vmatprep.subr.bf16.mxu0 %v6375_v12  ;;  %5564 = vmatprep.subr.bf16.mxu1 %v7716_v38 }
 0xd36   :  { %5538 = vmatpush1.bf16.msra.mxu0 %v6399_v18  ;;  %5566 = vmatpush3.bf16.msra.mxu1 %v6610_v63 }
 0xd37   :  { %5540 = vmatprep.subr.bf16.mxu0 %v6405_v19  ;;  %5567 = vmatprep.subr.bf16.mxu1 %v7716_v38 }
 0xd3a   :  { %5542 = vmatpush1.bf16.msra.mxu0 %v6427_v25  ;;  %5569 = vmatpush3.bf16.msra.mxu1 %v6620_v6 }
 0xd3b   :  { %5544 = vmatprep.subr.bf16.mxu0 %v6433_v26  ;;  %5570 = vmatprep.subr.bf16.mxu1 %v7716_v38 }
 0xd3e   :  { %5546 = vmatpush1.bf16.msra.mxu0 %v6455_v32  ;;  %5572 = vmatpush3.bf16.msra.mxu1 %v6630_v9 }
 0xd3f   :  { %5548 = vmatprep.subr.bf16.mxu0 %v6461_v33  ;;  %5573 = vmatprep.subr.bf16.mxu1 %v7716_v38 }
 0xd42   :  { %5550 = vmatpush1.bf16.msra.mxu0 %v6483_v39  ;;  %5575 = vmatpush3.bf16.msra.mxu1 %v6640_v14 }
 0xd43   :  { %5552 = vmatprep.subr.bf16.mxu0 %v6489_v40  ;;  %5576 = vmatprep.subr.bf16.mxu1 %v7716_v38 }
 0xd46   :  { %5554 = vmatpush1.bf16.msra.mxu0 %v6505_v44  ;;  %5578 = vmatpush3.bf16.msra.mxu1 %v6650_v17 }
 0xd47   :  { %5580 = vmatprep.subr.bf16.mxu0 %v6293_v53  ;;  %5611 = vmatprep.subr.bf16.mxu1 %v7716_v38 }
 0xdfc   :  { %v2767_v15 = vpop.f32.mrb[24].mxu0  ;;  %v2838_v45 = vpop.f32.mrb[64].mxu1 }
 0xdfd   :  { %v5828_v22 = vadd.f32 %v6694_v30, %v2767_v15  ;;  %v2769_v62 = vpop.f32.mrb[25].mxu0  ;;  %v4680_v46 = vpop.f32.mrb[65].mxu1  ;;  %v2839_v29 = vadd.f32 %v2838_v45, %v6751_v34 }
 0xdfe   :  { %v5830_v0 = vadd.f32 %v6703_v36, %v2769_v62 }
 0xdff   :  { %v3871_v8 = vmul.f32 -1.442695, %v5828_v22 }
 0xe00   :  { %v3872_v49 = vmul.f32 -1.442695, %v5830_v0 }
 0xe01   :  { %5993 = vpow2.f32 %v3871_v8 }
 0xe02   :  { %5995 = vpow2.f32 %v3872_v49 }
 0xe0b   :  { %v5994_v47 = vpop.eup %5993 }
 0xe0c   :  { %v2846_v52 = vadd.f32 1.0, %v5994_v47  ;;  %v5996_v54 = vpop.eup %5995 }
 0xe0d   :  { %v2853_v28 = vadd.f32 1.0, %v5996_v54 }
 0xe0e   :  { %5997 = vrcp.f32 %v2846_v52 }
 0xe0f   :  { %5999 = vrcp.f32 %v2853_v28 }
 0xe18   :  { %v5998_v60 = vpop.eup %5997 }
 0xe19   :  { %v2856_v41 = vmul.f32 %v5998_v60, %v2839_v29  ;;  %v6000_v50 = vpop.eup %5999 }
 0xe1a   :  { %v2859_v4 = vsub.f32 1.0, %v6000_v50  ;;  %v2861_v62 = vmul.f32 %v6000_v50, %v7209_v43  ;;  %v7718_v50 = vld [vmem:[#allocation18_spill] sm:$0xff] }
 0xe1b   :  { %v2857_v5 = vadd.f32 %v2856_v41, %v739_v37 }
 0xe1d   :  { %6001 = vtanh.f32 %v2857_v5 }
 0xe27   :  { %v6002_v15 = vpop.eup %6001 }
 0xe28   :  { %v2860_v22 = vmul.f32 %v6002_v15, %v2859_v4  ;;  %v744_v4 = vadd.f32 %v7718_v50, %v6754_v23 }
 0xe2a   :  { %v7254_v46 = vadd.f32 %v2861_v62, %v2860_v22 }
 0xe2c   :  { %2932 = vmatmul.mubr.f32.vlgmr.msra.gmra.mrb[26].mxu0 %v7254_v46  ;;  %4714 = vmatmul.mubr.f32.vlgmr.msra.gmra.mrb[66].mxu1 %v7254_v46 }
 0xe2d   :  { %5582 = vmatpush1.bf16.msra.mxu0 %v6299_v55  ;;  %5613 = vmatpush3.bf16.msra.mxu1 %v6578_v51 }
 0xe2e   :  { %5584 = vmatprep.subr.bf16.mxu0 %v6325_v61  ;;  %5614 = vmatprep.subr.bf16.mxu1 %v7716_v38 }
 0xe2f   :  { %3097 = vmatprep.mubr.f32.mxu0 %v7717_v7  ;;  %4748 = vmatprep.mubr.msk.f32.mxu1 %vm6092_vm0, %v7717_v7 }
 0xe31   :  { %5586 = vmatpush1.bf16.msra.mxu0 %v6337_v1  ;;  %5616 = vmatpush3.bf16.msra.mxu1 %v6588_v56 }
 0xe32   :  { %5588 = vmatprep.subr.bf16.mxu0 %v6344_v3  ;;  %5617 = vmatprep.subr.bf16.mxu1 %v7716_v38 }
 0xe35   :  { %5590 = vmatpush1.bf16.msra.mxu0 %v6370_v11  ;;  %5619 = vmatpush3.bf16.msra.mxu1 %v6600_v59 }
 0xe36   :  { %5592 = vmatprep.subr.bf16.mxu0 %v6375_v12  ;;  %5620 = vmatprep.subr.bf16.mxu1 %v7716_v38 }
 0xe39   :  { %5594 = vmatpush1.bf16.msra.mxu0 %v6399_v18  ;;  %5622 = vmatpush3.bf16.msra.mxu1 %v6610_v63 }
 0xe3a   :  { %5596 = vmatprep.subr.bf16.mxu0 %v6405_v19  ;;  %5623 = vmatprep.subr.bf16.mxu1 %v7716_v38 }
 0xe3d   :  { %5598 = vmatpush1.bf16.msra.mxu0 %v6427_v25  ;;  %5625 = vmatpush3.bf16.msra.mxu1 %v6620_v6 }
 0xe3e   :  { %5600 = vmatprep.subr.bf16.mxu0 %v6433_v26  ;;  %5626 = vmatprep.subr.bf16.mxu1 %v7716_v38 }
 0xe41   :  { %5602 = vmatpush1.bf16.msra.mxu0 %v6455_v32  ;;  %5628 = vmatpush3.bf16.msra.mxu1 %v6630_v9 }
 0xe42   :  { %5604 = vmatprep.subr.bf16.mxu0 %v6461_v33  ;;  %5629 = vmatprep.subr.bf16.mxu1 %v7716_v38 }
 0xe45   :  { %5606 = vmatpush1.bf16.msra.mxu0 %v6483_v39  ;;  %5631 = vmatpush3.bf16.msra.mxu1 %v6640_v14 }
 0xe46   :  { %5608 = vmatprep.subr.bf16.mxu0 %v6489_v40  ;;  %5632 = vmatprep.subr.bf16.mxu1 %v7716_v38 }
 0xe49   :  { %5610 = vmatpush1.bf16.msra.mxu0 %v6505_v44  ;;  %5634 = vmatpush3.bf16.msra.mxu1 %v6650_v17 }
 0xe4a   :  { %5636 = vmatprep.subr.bf16.mxu0 %v6293_v53  ;;  %5667 = vmatprep.subr.bf16.mxu1 %v7716_v38 }
 0xeff   :  { %v2933_v42 = vpop.f32.mrb[26].mxu0  ;;  %v3004_v45 = vpop.f32.mrb[66].mxu1 }
 0xf00   :  { %v5832_v8 = vadd.f32 %v6694_v30, %v2933_v42  ;;  %v2935_v0 = vpop.f32.mrb[27].mxu0  ;;  %v4715_v49 = vpop.f32.mrb[67].mxu1  ;;  %v3005_v41 = vadd.f32 %v3004_v45, %v6751_v34 }
 0xf01   :  { %v5834_v52 = vadd.f32 %v6703_v36, %v2935_v0 }
 0xf02   :  { %v3873_v47 = vmul.f32 -1.442695, %v5832_v8 }
 0xf03   :  { %v3874_v54 = vmul.f32 -1.442695, %v5834_v52 }
 0xf04   :  { %6003 = vpow2.f32 %v3873_v47  ;;  %v7719_v47 = vld [vmem:[#allocation12_spill] sm:$0xff] }
 0xf05   :  { %6005 = vpow2.f32 %v3874_v54 }
 0xf0e   :  { %v6004_v28 = vpop.eup %6003 }
 0xf0f   :  { %v3012_v29 = vadd.f32 1.0, %v6004_v28  ;;  %v6006_v60 = vpop.eup %6005 }
 0xf10   :  { %v3019_v37 = vadd.f32 1.0, %v6006_v60 }
 0xf11   :  { %6007 = vrcp.f32 %v3012_v29  ;;  %v7720_v29 = vld [vmem:[#allocation13_spill] sm:$0xff] }
 0xf12   :  { %6009 = vrcp.f32 %v3019_v37 }
 0xf1b   :  { %v6008_v5 = vpop.eup %6007 }
 0xf1c   :  { %v3022_v30 = vmul.f32 %v6008_v5, %v3005_v41  ;;  %v6010_v22 = vpop.eup %6009 }
 0xf1d   :  { %v3025_v36 = vsub.f32 1.0, %v6010_v22  ;;  %v3027_v8 = vmul.f32 %v6010_v22, %v7254_v46  ;;  %v749_v22 = vadd.f32 %v6743_v2, %v6754_v23  ;;  %v3545_v2 = vld [vmem:[%s7695_s10 + $0x8] sm:$0xff] }
 0xf1e   :  { %v3023_v15 = vadd.f32 %v3022_v30, %v744_v4 }
 0xf20   :  { %6011 = vtanh.f32 %v3023_v15 }
 0xf2a   :  { %v6012_v62 = vpop.eup %6011 }
 0xf2b   :  { %v3026_v42 = vmul.f32 %v6012_v62, %v3025_v36 }
 0xf2d   :  { %v7299_v0 = vadd.f32 %v3027_v8, %v3026_v42 }
 0xf2f   :  { %3098 = vmatmul.mubr.f32.vlgmr.msra.gmra.mrb[28].mxu0 %v7299_v0  ;;  %4749 = vmatmul.mubr.f32.vlgmr.msra.gmra.mrb[68].mxu1 %v7299_v0 }
 0xf30   :  { %5638 = vmatpush1.bf16.msra.mxu0 %v6299_v55  ;;  %5669 = vmatpush3.bf16.msra.mxu1 %v6578_v51 }
 0xf31   :  { %5640 = vmatprep.subr.bf16.mxu0 %v6325_v61  ;;  %5670 = vmatprep.subr.bf16.mxu1 %v7716_v38 }
 0xf32   :  { %3263 = vmatprep.mubr.f32.mxu0 %v7717_v7  ;;  %4783 = vmatprep.mubr.msk.f32.mxu1 %vm6092_vm0, %v7717_v7 }
 0xf34   :  { %5642 = vmatpush1.bf16.msra.mxu0 %v6337_v1  ;;  %5672 = vmatpush3.bf16.msra.mxu1 %v6588_v56 }
 0xf35   :  { %5644 = vmatprep.subr.bf16.mxu0 %v6344_v3  ;;  %5673 = vmatprep.subr.bf16.mxu1 %v7716_v38 }
 0xf38   :  { %5646 = vmatpush1.bf16.msra.mxu0 %v6370_v11  ;;  %5675 = vmatpush3.bf16.msra.mxu1 %v6600_v59 }
 0xf39   :  { %5648 = vmatprep.subr.bf16.mxu0 %v6375_v12  ;;  %5676 = vmatprep.subr.bf16.mxu1 %v7716_v38 }
 0xf3c   :  { %5650 = vmatpush1.bf16.msra.mxu0 %v6399_v18  ;;  %5678 = vmatpush3.bf16.msra.mxu1 %v6610_v63 }
 0xf3d   :  { %5652 = vmatprep.subr.bf16.mxu0 %v6405_v19  ;;  %5679 = vmatprep.subr.bf16.mxu1 %v7716_v38 }
 0xf40   :  { %5654 = vmatpush1.bf16.msra.mxu0 %v6427_v25  ;;  %5681 = vmatpush3.bf16.msra.mxu1 %v6620_v6 }
 0xf41   :  { %5656 = vmatprep.subr.bf16.mxu0 %v6433_v26  ;;  %5682 = vmatprep.subr.bf16.mxu1 %v7716_v38 }
 0xf44   :  { %5658 = vmatpush1.bf16.msra.mxu0 %v6455_v32  ;;  %5684 = vmatpush3.bf16.msra.mxu1 %v6630_v9 }
 0xf45   :  { %5660 = vmatprep.subr.bf16.mxu0 %v6461_v33  ;;  %5685 = vmatprep.subr.bf16.mxu1 %v7716_v38 }
 0xf48   :  { %5662 = vmatpush1.bf16.msra.mxu0 %v6483_v39  ;;  %5687 = vmatpush3.bf16.msra.mxu1 %v6640_v14 }
 0xf49   :  { %5664 = vmatprep.subr.bf16.mxu0 %v6489_v40  ;;  %5688 = vmatprep.subr.bf16.mxu1 %v7716_v38 }
 0xf4c   :  { %5666 = vmatpush1.bf16.msra.mxu0 %v6505_v44  ;;  %5690 = vmatpush3.bf16.msra.mxu1 %v6650_v17 }
 0xf4d   :  { %5692 = vmatprep.subr.bf16.mxu0 %v6293_v53  ;;  %5723 = vmatprep.subr.bf16.mxu1 %v7716_v38 }
0x1002   :  { %v3099_v45 = vpop.f32.mrb[28].mxu0  ;;  %v3170_v49 = vpop.f32.mrb[68].mxu1 }
0x1003   :  { %v5837_v52 = vadd.f32 %v7719_v47, %v3099_v45  ;;  %v3101_v54 = vpop.f32.mrb[29].mxu0  ;;  %v4750_v28 = vpop.f32.mrb[69].mxu1  ;;  %v3171_v53 = vadd.f32 %v3170_v49, %v6751_v34  ;;  %v3546_v49 = vld [vmem:[%s7695_s10 + $0x10] sm:$0xff] }
0x1004   :  { %v5840_v60 = vadd.f32 %v7720_v29, %v3101_v54  ;;  %v3549_v29 = vld [vmem:[%s7695_s10 + $0x28] sm:$0xff] }
0x1005   :  { %v3875_v37 = vmul.f32 -1.442695, %v5837_v52 }
0x1006   :  { %v3876_v41 = vmul.f32 -1.442695, %v5840_v60 }
0x1007   :  { %6013 = vpow2.f32 %v3875_v37 }
0x1008   :  { %6015 = vpow2.f32 %v3876_v41 }
0x1011   :  { %v6014_v5 = vpop.eup %6013 }
0x1012   :  { %v3178_v50 = vadd.f32 1.0, %v6014_v5  ;;  %v6016_v4 = vpop.eup %6015 }
0x1013   :  { %v3185_v30 = vadd.f32 1.0, %v6016_v4  ;;  %v3548_v4 = vld [vmem:[%s7695_s10 + $0x20] sm:$0xff] }
0x1014   :  { %6017 = vrcp.f32 %v3178_v50 }
0x1015   :  { %6019 = vrcp.f32 %v3185_v30  ;;  %v3550_v30 = vld [vmem:[%s7695_s10 + $0x30] sm:$0xff] }
0x101e   :  { %v6018_v15 = vpop.eup %6017 }
0x101f   :  { %v3188_v36 = vmul.f32 %v6018_v15, %v3171_v53  ;;  %v6020_v42 = vpop.eup %6019  ;;  %v3553_v53 = vld [vmem:[%s7695_s10 + $0x48] sm:$0xff]  ;;  %v3555_v15 = vld [vmem:[%s7695_s10 + $0x58] sm:$0xff] }
0x1020   :  { %v3191_v8 = vsub.f32 1.0, %v6020_v42  ;;  %v3193_v52 = vmul.f32 %v6020_v42, %v7299_v0  ;;  %v3554_v42 = vld [vmem:[%s7695_s10 + $0x50] sm:$0xff] }
0x1021   :  { %v3189_v62 = vadd.f32 %v3188_v36, %v749_v22  ;;  %v5753_v22 = vpack.c.bf16 %v3550_v30, %v3548_v4  ;;  %v5755_v36 = vpack.c.bf16 %v3555_v15, %v3553_v53  ;;  %v7726_v4 = vld [vmem:[#allocation11_spill] sm:$0xff] }
0x1023   :  { %6021 = vtanh.f32 %v3189_v62  ;;  %v3552_v62 = vld [vmem:[%s7695_s10 + $0x40] sm:$0xff] }
0x102d   :  { %v6022_v45 = vpop.eup %6021 }
0x102e   :  { %v3192_v47 = vmul.f32 %v6022_v45, %v3191_v8  ;;  %v3557_v8 = vld [vmem:[%s7695_s10 + $0x68] sm:$0xff]  ;;  %v3559_v45 = vld [vmem:[%s7695_s10 + $0x78] sm:$0xff] }
0x1030   :  { %v7344_v54 = vadd.f32 %v3193_v52, %v3192_v47  ;;  %v5757_v47 = vpack.c.bf16 %v3554_v42, %v3552_v62  ;;  %v5759_v52 = vpack.c.bf16 %v3559_v45, %v3557_v8 }
0x1032   :  { %3264 = vmatmul.mubr.f32.vlgmr.msra.gmra.mrb[30].mxu0 %v7344_v54  ;;  %4784 = vmatmul.mubr.f32.vlgmr.msra.gmra.mrb[70].mxu1 %v7344_v54 }
0x1033   :  { %5694 = vmatpush1.bf16.msra.mxu0 %v6299_v55  ;;  %5725 = vmatpush3.bf16.msra.mxu1 %v6578_v51  ;;  %v3547_v55 = vld [vmem:[%s7695_s10 + $0x18] sm:$0xff] }
0x1034   :  { %5696 = vmatprep.subr.bf16.mxu0 %v6325_v61  ;;  %5726 = vmatprep.subr.bf16.mxu1 %v7716_v38  ;;  %v5747_v61 = vpack.c.bf16 %v3547_v55, %v3545_v2  ;;  %v3556_v2 = vld [vmem:[%s7695_s10 + $0x60] sm:$0xff]  ;;  %v3558_v55 = vld [vmem:[%s7695_s10 + $0x70] sm:$0xff] }
0x1035   :  { %3429 = vmatprep.mubr.f32.mxu0 %v7717_v7  ;;  %4818 = vmatprep.mubr.msk.f32.mxu1 %vm6092_vm0, %v7717_v7 }
0x1037   :  { %5698 = vmatpush1.bf16.msra.mxu0 %v6337_v1  ;;  %5728 = vmatpush3.bf16.msra.mxu1 %v6588_v56 }
0x1038   :  { %5700 = vmatprep.subr.bf16.mxu0 %v6344_v3  ;;  %5729 = vmatprep.subr.bf16.mxu1 %v7716_v38 }
0x103b   :  { %5702 = vmatpush1.bf16.msra.mxu0 %v6370_v11  ;;  %5731 = vmatpush3.bf16.msra.mxu1 %v6600_v59  ;;  %v7721_v11 = vld [vmem:[#allocation14_spill] sm:$0xff] }
0x103c   :  { %5704 = vmatprep.subr.bf16.mxu0 %v6375_v12  ;;  %5732 = vmatprep.subr.bf16.mxu1 %v7716_v38 }
0x103f   :  { %5706 = vmatpush1.bf16.msra.mxu0 %v6399_v18  ;;  %5734 = vmatpush3.bf16.msra.mxu1 %v6610_v63  ;;  %v754_v63 = vadd.f32 %v6745_v31, %v6754_v23  ;;  %v3551_v31 = vld [vmem:[%s7695_s10 + $0x38] sm:$0xff] }
0x1040   :  { %5708 = vmatprep.subr.bf16.mxu0 %v6405_v19  ;;  %5735 = vmatprep.subr.bf16.mxu1 %v7716_v38  ;;  %v5751_v50 = vpack.c.bf16 %v3551_v31, %v3549_v29 }
0x1043   :  { %5710 = vmatpush1.bf16.msra.mxu0 %v6427_v25  ;;  %5737 = vmatpush3.bf16.msra.mxu1 %v6620_v6  ;;  %v7722_v25 = vld [vmem:[#allocation15_spill] sm:$0xff] }
0x1044   :  { %5712 = vmatprep.subr.bf16.mxu0 %v6433_v26  ;;  %5738 = vmatprep.subr.bf16.mxu1 %v7716_v38 }
0x1047   :  { %5714 = vmatpush1.bf16.msra.mxu0 %v6455_v32  ;;  %5740 = vmatpush3.bf16.msra.mxu1 %v6630_v9 }
0x1048   :  { %5716 = vmatprep.subr.bf16.mxu0 %v6461_v33  ;;  %5741 = vmatprep.subr.bf16.mxu1 %v7716_v38 }
0x104b   :  { %5718 = vmatpush1.bf16.msra.mxu0 %v6483_v39  ;;  %5743 = vmatpush3.bf16.msra.mxu1 %v6640_v14 }
0x104c   :  { %5720 = vmatprep.subr.bf16.mxu0 %v6489_v40  ;;  %5744 = vmatprep.subr.bf16.mxu1 %v7716_v38  ;;  %v3544_v38 = vld [vmem:[%s7695_s10] sm:$0xff] }
0x104d   :  { %v5749_v41 = vpack.c.bf16 %v3546_v49, %v3544_v38  ;;  %v3572_v38 = vld [vmem:[%s7695_s10 + $0xe0] sm:$0xff]  ;;  %v3574_v49 = vld [vmem:[%s7695_s10 + $0xf0] sm:$0xff] }
0x104f   :  { %5722 = vmatpush1.bf16.msra.mxu0 %v6505_v44  ;;  %5746 = vmatpush3.bf16.msra.mxu1 %v6650_v17 }
0x1050   :  { %5748 = vmatprep.subr.bf16.mxu0 %v5747_v61  ;;  %v3561_v61 = vld [vmem:[%s7695_s10 + $0x88] sm:$0xff] }
0x1105   :  { %v3265_v1 = vpop.f32.mrb[30].mxu0  ;;  %v3336_v3 = vpop.f32.mrb[70].mxu1 }
0x1106   :  { %v5843_v12 = vadd.f32 %v7721_v11, %v3265_v1  ;;  %v3267_v18 = vpop.f32.mrb[31].mxu0  ;;  %v4785_v19 = vpop.f32.mrb[71].mxu1  ;;  %v3337_v56 = vadd.f32 %v3336_v3, %v6751_v34  ;;  %v3563_v1 = vld [vmem:[%s7695_s10 + $0x98] sm:$0xff]  ;;  %v5761_v3 = vpack.c.bf16 %v3558_v55, %v3556_v2 }
0x1107   :  { %v5846_v26 = vadd.f32 %v7722_v25, %v3267_v18  ;;  %v5763_v11 = vpack.c.bf16 %v3563_v1, %v3561_v61  ;;  %v3562_v18 = vld [vmem:[%s7695_s10 + $0x90] sm:$0xff]  ;;  %v3565_v19 = vld [vmem:[%s7695_s10 + $0xa8] sm:$0xff]  ;;  %v3567_v25 = vld [vmem:[%s7695_s10 + $0xb8] sm:$0xff] }
0x1108   :  { %v3877_v32 = vmul.f32 -1.442695, %v5843_v12  ;;  %v3560_v12 = vld [vmem:[%s7695_s10 + $0x80] sm:$0xff] }
0x1109   :  { %v3878_v33 = vmul.f32 -1.442695, %v5846_v26  ;;  %v5765_v26 = vpack.c.bf16 %v3562_v18, %v3560_v12 }
0x110a   :  { %6023 = vpow2.f32 %v3877_v32  ;;  %v5767_v32 = vpack.c.bf16 %v3567_v25, %v3565_v19 }
0x110b   :  { %6025 = vpow2.f32 %v3878_v33  ;;  %v3564_v33 = vld [vmem:[%s7695_s10 + $0xa0] sm:$0xff] }
0x1114   :  { %v6024_v39 = vpop.eup %6023 }
0x1115   :  { %v3344_v40 = vadd.f32 1.0, %v6024_v39  ;;  %v6026_v44 = vpop.eup %6025  ;;  %v3566_v39 = vld [vmem:[%s7695_s10 + $0xb0] sm:$0xff] }
0x1116   :  { %v3351_v51 = vadd.f32 1.0, %v6026_v44  ;;  %v3571_v44 = vld [vmem:[%s7695_s10 + $0xd8] sm:$0xff] }
0x1117   :  { %6027 = vrcp.f32 %v3344_v40  ;;  %v3569_v40 = vld [vmem:[%s7695_s10 + $0xc8] sm:$0xff] }
0x1118   :  { %6029 = vrcp.f32 %v3351_v51  ;;  %v5769_v51 = vpack.c.bf16 %v3566_v39, %v3564_v33 }
0x1121   :  { %v6028_v59 = vpop.eup %6027 }
0x1122   :  { %v3354_v6 = vmul.f32 %v6028_v59, %v3337_v56  ;;  %v6030_v14 = vpop.eup %6029  ;;  %v5771_v56 = vpack.c.bf16 %v3571_v44, %v3569_v40  ;;  %v3568_v59 = vld [vmem:[%s7695_s10 + $0xc0] sm:$0xff] }
0x1123   :  { %v3357_v17 = vsub.f32 1.0, %v6030_v14  ;;  %v3359_v37 = vmul.f32 %v6030_v14, %v7344_v54 }
0x1124   :  { %v3355_v9 = vadd.f32 %v3354_v6, %v754_v63  ;;  %v3570_v63 = vld [vmem:[%s7695_s10 + $0xd0] sm:$0xff]  ;;  %v3573_v6 = vld [vmem:[%s7695_s10 + $0xe8] sm:$0xff] }
0x1125   :  { %v5773_v14 = vpack.c.bf16 %v3570_v63, %v3568_v59 }
0x1126   :  { %6031 = vtanh.f32 %v3355_v9  ;;  %v3575_v9 = vld [vmem:[%s7695_s10 + $0xf8] sm:$0xff] }
0x1130   :  { %v6032_v28 = vpop.eup %6031 }
0x1131   :  { %v3358_v60 = vmul.f32 %v6032_v28, %v3357_v17  ;;  %v5775_v17 = vpack.c.bf16 %v3575_v9, %v3573_v6  ;;  %v5777_v28 = vpack.c.bf16 %v3574_v49, %v3572_v38 }
0x1133   :  { %v7405_v5 = vadd.f32 %v3359_v37, %v3358_v60  ;;  %v7725_v60 = vld [vmem:[#allocation10_spill] sm:$0xff] }
0x1135   :  { %3430 = vmatmul.mubr.f32.vlgmr.msra.gmra.mrb[32].mxu0 %v7405_v5  ;;  %4819 = vmatmul.mubr.f32.vlgmr.msra.gmra.mrb[72].mxu1 %v7405_v5 }
0x1136   :  { %5750 = vmatpush1.bf16.msra.mxu0 %v5749_v41  ;;  %3652 = vmatprep.mubr.f32.mxu0 %v7717_v7  ;;  %v759_v41 = vadd.f32 %v6747_v13, %v6754_v23 }
0x1137   :  { %5752 = vmatprep.subr.bf16.mxu0 %v5751_v50 }
0x113a   :  { %5754 = vmatpush1.bf16.msra.mxu0 %v5753_v22 }
0x113b   :  { %5756 = vmatprep.subr.bf16.mxu0 %v5755_v36 }
0x113e   :  { %5758 = vmatpush1.bf16.msra.mxu0 %v5757_v47 }
0x113f   :  { %5760 = vmatprep.subr.bf16.mxu0 %v5759_v52 }
0x1142   :  { %5762 = vmatpush1.bf16.msra.mxu0 %v5761_v3 }
0x1143   :  { %5764 = vmatprep.subr.bf16.mxu0 %v5763_v11 }
0x1146   :  { %5766 = vmatpush1.bf16.msra.mxu0 %v5765_v26 }
0x1147   :  { %5768 = vmatprep.subr.bf16.mxu0 %v5767_v32 }
0x114a   :  { %5770 = vmatpush1.bf16.msra.mxu0 %v5769_v51 }
0x114b   :  { %5772 = vmatprep.subr.bf16.mxu0 %v5771_v56 }
0x114e   :  { %5774 = vmatpush1.bf16.msra.mxu0 %v5773_v14 }
0x114f   :  { %5776 = vmatprep.subr.bf16.mxu0 %v5775_v17 }
0x1152   :  { %5778 = vmatpush1.bf16.msra.mxu0 %v5777_v28 }
0x1155   :  { %3653 = vmatmul.mubr.f32.vlgmr.msra.gmra.mrb[34].mxu0 %v6759_v24 }
0x1156   :  { %3658 = vmatprep.mubr.f32.mxu0 %v7717_v7 }
0x1159   :  { %3659 = vmatmul.mubr.f32.gmra.mrb[36].mxu0 %v6804_v57 }
0x115a   :  { %3664 = vmatprep.mubr.f32.mxu0 %v7717_v7 }
0x115d   :  { %3665 = vmatmul.mubr.f32.gmra.mrb[38].mxu0 %v6849_v35  ;;  %v7723_v35 = vld [vmem:[#allocation16_spill] sm:$0xff] }
0x115e   :  { %3670 = vmatprep.mubr.f32.mxu0 %v7717_v7 }
0x1161   :  { %3671 = vmatmul.mubr.f32.gmra.mrb[40].mxu0 %v6894_v48 }
0x1162   :  { %3676 = vmatprep.mubr.f32.mxu0 %v7717_v7 }
0x1165   :  { %3677 = vmatmul.mubr.f32.gmra.mrb[42].mxu0 %v6939_v58 }
0x1166   :  { %3682 = vmatprep.mubr.f32.mxu0 %v7717_v7 }
0x1169   :  { %3683 = vmatmul.mubr.f32.gmra.mrb[44].mxu0 %v6984_v27 }
0x116a   :  { %3688 = vmatprep.mubr.f32.mxu0 %v7717_v7 }
0x116d   :  { %3689 = vmatmul.mubr.f32.gmra.mrb[46].mxu0 %v7029_v20  ;;  %v7724_v20 = vld [vmem:[#allocation17_spill] sm:$0xff] }
0x116e   :  { %3694 = vmatprep.mubr.f32.mxu0 %v7717_v7 }
0x1171   :  { %3695 = vmatmul.mubr.f32.gmra.mrb[48].mxu0 %v7074_v10 }
0x1172   :  { %3700 = vmatprep.mubr.f32.mxu0 %v7717_v7 }
0x1175   :  { %3701 = vmatmul.mubr.f32.gmra.mrb[50].mxu0 %v7119_v16 }
0x1176   :  { %3706 = vmatprep.mubr.f32.mxu0 %v7717_v7 }
0x1179   :  { %3707 = vmatmul.mubr.f32.gmra.mrb[52].mxu0 %v7164_v21 }
0x117a   :  { %3712 = vmatprep.mubr.f32.mxu0 %v7717_v7 }
0x117d   :  { %3713 = vmatmul.mubr.f32.gmra.mrb[54].mxu0 %v7209_v43 }
0x117e   :  { %3718 = vmatprep.mubr.f32.mxu0 %v7717_v7 }
0x1181   :  { %3719 = vmatmul.mubr.f32.gmra.mrb[56].mxu0 %v7254_v46 }
0x1182   :  { %3724 = vmatprep.mubr.f32.mxu0 %v7717_v7 }
0x1185   :  { %3725 = vmatmul.mubr.f32.gmra.mrb[58].mxu0 %v7299_v0 }
0x1186   :  { %3730 = vmatprep.mubr.f32.mxu0 %v7717_v7 }
0x1189   :  { %3731 = vmatmul.mubr.f32.gmra.mrb[60].mxu0 %v7344_v54 }
0x118a   :  { %3736 = vmatprep.mubr.f32.mxu0 %v7717_v7 }
0x118d   :  { %3737 = vmatmul.mubr.f32.gmra.mrb[62].mxu0 %v7405_v5 }
0x118e   :  { %3742 = vmatprep.mubr.f32.mxu0 %v7717_v7  ;;  %v3576_v7 = vld [vmem:[%s7696_s11] sm:$0x3] }
0x118f   :  { %v7525_v37 = vrot.slane %v3576_v7, %v7725_v60  ;;  %v7530_v30 = vrot.slane %v3576_v7, %v7726_v4 }
0x1208   :  { %v3431_v24 = vpop.f32.mrb[32].mxu0  ;;  %v3502_v57 = vpop.f32.mrb[72].mxu1 }
0x1209   :  { %v5849_v48 = vadd.f32 %v7723_v35, %v3431_v24  ;;  %v3433_v58 = vpop.f32.mrb[33].mxu0  ;;  %v4820_v27 = vpop.f32.mrb[73].mxu1  ;;  %v3503_v29 = vadd.f32 %v3502_v57, %v6751_v34 }
0x120a   :  { %v5852_v10 = vadd.f32 %v7724_v20, %v3433_v58 }
0x120b   :  { %v3879_v16 = vmul.f32 -1.442695, %v5849_v48 }
0x120c   :  { %v3880_v21 = vmul.f32 -1.442695, %v5852_v10 }
0x120d   :  { %6033 = vpow2.f32 %v3879_v16 }
0x120e   :  { %6035 = vpow2.f32 %v3880_v21 }
0x1217   :  { %v6034_v43 = vpop.eup %6033 }
0x1218   :  { %v3510_v46 = vadd.f32 1.0, %v6034_v43  ;;  %v6036_v0 = vpop.eup %6035 }
0x1219   :  { %v3517_v54 = vadd.f32 1.0, %v6036_v0 }
0x121a   :  { %6037 = vrcp.f32 %v3510_v46 }
0x121b   :  { %6039 = vrcp.f32 %v3517_v54 }
0x1224   :  { %v6038_v31 = vpop.eup %6037 }
0x1225   :  { %v3520_v50 = vmul.f32 %v6038_v31, %v3503_v29  ;;  %v6040_v8 = vpop.eup %6039 }
0x1226   :  { %v3523_v55 = vsub.f32 1.0, %v6040_v8  ;;  %v3525_v11 = vmul.f32 %v6040_v8, %v7405_v5 }
0x1227   :  { %v3521_v53 = vadd.f32 %v3520_v50, %v759_v41 }
0x1228   :  { %v3654_v15 = vpop.f32.mrb[34].mxu0 }
0x1229   :  { %6041 = vtanh.f32 %v3521_v53  ;;  %v3655_v22 = vadd.f32 %v3654_v15, %v7525_v37  ;;  %v3656_v36 = vpop.f32.mrb[35].mxu0 }
0x122a   :  { %v3657_v34 = vadd.f32 %v3656_v36, %v7530_v30 }
0x122b   :  { %3749 = vst [vmem:[%s7700_s15] sm:$0xff] %v3655_v22 }
0x122c   :  { %3750 = vst [vmem:[%s7700_s15 + $0x8] sm:$0xff] %v3657_v34  ;;  %v3660_v13 = vpop.f32.mrb[36].mxu0 }
0x122d   :  { %v3661_v23 = vadd.f32 %v3660_v13, %v7525_v37  ;;  %v3662_v62 = vpop.f32.mrb[37].mxu0 }
0x122e   :  { %v3663_v42 = vadd.f32 %v3662_v62, %v7530_v30 }
0x122f   :  { %3751 = vst [vmem:[%s7700_s15 + $0x10] sm:$0xff] %v3661_v23 }
0x1230   :  { %3752 = vst [vmem:[%s7700_s15 + $0x18] sm:$0xff] %v3663_v42  ;;  %v3666_v45 = vpop.f32.mrb[38].mxu0 }
0x1231   :  { %v3667_v47 = vadd.f32 %v3666_v45, %v7525_v37  ;;  %v3668_v52 = vpop.f32.mrb[39].mxu0 }
0x1232   :  { %v3669_v2 = vadd.f32 %v3668_v52, %v7530_v30 }
0x1233   :  { %v6042_v61 = vpop.eup %6041  ;;  %3753 = vst [vmem:[%s7700_s15 + $0x20] sm:$0xff] %v3667_v47 }
0x1234   :  { %3754 = vst [vmem:[%s7700_s15 + $0x28] sm:$0xff] %v3669_v2  ;;  %v3672_v1 = vpop.f32.mrb[40].mxu0  ;;  %v3524_v3 = vmul.f32 %v6042_v61, %v3523_v55 }
0x1235   :  { %v3673_v12 = vadd.f32 %v3672_v1, %v7525_v37  ;;  %v3674_v18 = vpop.f32.mrb[41].mxu0 }
0x1236   :  { %v3675_v19 = vadd.f32 %v3674_v18, %v7530_v30  ;;  %v3526_v25 = vadd.f32 %v3525_v11, %v3524_v3 }
0x1237   :  { %3755 = vst [vmem:[%s7700_s15 + $0x30] sm:$0xff] %v3673_v12 }
0x1238   :  { %3756 = vst [vmem:[%s7700_s15 + $0x38] sm:$0xff] %v3675_v19  ;;  %v3678_v26 = vpop.f32.mrb[42].mxu0  ;;  %3743 = vmatmul.mubr.f32.gmra.mrb[64].mxu0 %v3526_v25 }
0x1239   :  { %v3679_v32 = vadd.f32 %v3678_v26, %v7525_v37  ;;  %v3680_v33 = vpop.f32.mrb[43].mxu0 }
0x123a   :  { %v3681_v5 = vadd.f32 %v3680_v33, %v7530_v30 }
0x123b   :  { %3757 = vst [vmem:[%s7700_s15 + $0x40] sm:$0xff] %v3679_v32 }
0x123c   :  { %3758 = vst [vmem:[%s7700_s15 + $0x48] sm:$0xff] %v3681_v5  ;;  %v3684_v39 = vpop.f32.mrb[44].mxu0 }
0x123d   :  { %v3685_v40 = vadd.f32 %v3684_v39, %v7525_v37  ;;  %v3686_v44 = vpop.f32.mrb[45].mxu0 }
0x123e   :  { %v3687_v51 = vadd.f32 %v3686_v44, %v7530_v30 }
0x123f   :  { %3759 = vst [vmem:[%s7700_s15 + $0x50] sm:$0xff] %v3685_v40 }
0x1240   :  { %3760 = vst [vmem:[%s7700_s15 + $0x58] sm:$0xff] %v3687_v51  ;;  %v3690_v56 = vpop.f32.mrb[46].mxu0 }
0x1241   :  { %v3691_v59 = vadd.f32 %v3690_v56, %v7525_v37  ;;  %v3692_v63 = vpop.f32.mrb[47].mxu0 }
0x1242   :  { %v3693_v6 = vadd.f32 %v3692_v63, %v7530_v30 }
0x1243   :  { %3761 = vst [vmem:[%s7700_s15 + $0x60] sm:$0xff] %v3691_v59 }
0x1244   :  { %3762 = vst [vmem:[%s7700_s15 + $0x68] sm:$0xff] %v3693_v6  ;;  %v3696_v9 = vpop.f32.mrb[48].mxu0 }
0x1245   :  { %v3697_v14 = vadd.f32 %v3696_v9, %v7525_v37  ;;  %v3698_v17 = vpop.f32.mrb[49].mxu0 }
0x1246   :  { %v3699_v38 = vadd.f32 %v3698_v17, %v7530_v30 }
0x1247   :  { %3763 = vst [vmem:[%s7700_s15 + $0x70] sm:$0xff] %v3697_v14 }
0x1248   :  { %3764 = vst [vmem:[%s7700_s15 + $0x78] sm:$0xff] %v3699_v38  ;;  %v3702_v49 = vpop.f32.mrb[50].mxu0 }
0x1249   :  { %v3703_v28 = vadd.f32 %v3702_v49, %v7525_v37  ;;  %v3704_v24 = vpop.f32.mrb[51].mxu0 }
0x124a   :  { %v3705_v57 = vadd.f32 %v3704_v24, %v7530_v30 }
0x124b   :  { %3765 = vst [vmem:[%s7700_s15 + $0x80] sm:$0xff] %v3703_v28 }
0x124c   :  { %3766 = vst [vmem:[%s7700_s15 + $0x88] sm:$0xff] %v3705_v57  ;;  %v3708_v35 = vpop.f32.mrb[52].mxu0 }
0x124d   :  { %v3709_v48 = vadd.f32 %v3708_v35, %v7525_v37  ;;  %v3710_v58 = vpop.f32.mrb[53].mxu0 }
0x124e   :  { %v3711_v27 = vadd.f32 %v3710_v58, %v7530_v30 }
0x124f   :  { %3767 = vst [vmem:[%s7700_s15 + $0x90] sm:$0xff] %v3709_v48 }
0x1250   :  { %3768 = vst [vmem:[%s7700_s15 + $0x98] sm:$0xff] %v3711_v27  ;;  %v3714_v20 = vpop.f32.mrb[54].mxu0 }
0x1251   :  { %v3715_v10 = vadd.f32 %v3714_v20, %v7525_v37  ;;  %v3716_v16 = vpop.f32.mrb[55].mxu0 }
0x1252   :  { %v3717_v21 = vadd.f32 %v3716_v16, %v7530_v30 }
0x1253   :  { %3769 = vst [vmem:[%s7700_s15 + $0xa0] sm:$0xff] %v3715_v10 }
0x1254   :  { %3770 = vst [vmem:[%s7700_s15 + $0xa8] sm:$0xff] %v3717_v21  ;;  %v3720_v43 = vpop.f32.mrb[56].mxu0 }
0x1255   :  { %v3721_v46 = vadd.f32 %v3720_v43, %v7525_v37  ;;  %v3722_v0 = vpop.f32.mrb[57].mxu0 }
0x1256   :  { %v3723_v54 = vadd.f32 %v3722_v0, %v7530_v30 }
0x1257   :  { %3771 = vst [vmem:[%s7700_s15 + $0xb0] sm:$0xff] %v3721_v46 }
0x1258   :  { %3772 = vst [vmem:[%s7700_s15 + $0xb8] sm:$0xff] %v3723_v54  ;;  %v3726_v7 = vpop.f32.mrb[58].mxu0 }
0x1259   :  { %v3727_v29 = vadd.f32 %v3726_v7, %v7525_v37  ;;  %v3728_v31 = vpop.f32.mrb[59].mxu0 }
0x125a   :  { %v3729_v60 = vadd.f32 %v3728_v31, %v7530_v30 }
0x125b   :  { %3773 = vst [vmem:[%s7700_s15 + $0xc0] sm:$0xff] %v3727_v29 }
0x125c   :  { %3774 = vst [vmem:[%s7700_s15 + $0xc8] sm:$0xff] %v3729_v60  ;;  %v3732_v41 = vpop.f32.mrb[60].mxu0 }
0x125d   :  { %v3733_v50 = vadd.f32 %v3732_v41, %v7525_v37  ;;  %v3734_v4 = vpop.f32.mrb[61].mxu0 }
0x125e   :  { %v3735_v53 = vadd.f32 %v3734_v4, %v7530_v30 }
0x125f   :  { %3775 = vst [vmem:[%s7700_s15 + $0xd0] sm:$0xff] %v3733_v50 }
0x1260   :  { %3776 = vst [vmem:[%s7700_s15 + $0xd8] sm:$0xff] %v3735_v53  ;;  %v3738_v15 = vpop.f32.mrb[62].mxu0 }
0x1261   :  { %v3739_v22 = vadd.f32 %v3738_v15, %v7525_v37  ;;  %v3740_v36 = vpop.f32.mrb[63].mxu0 }
0x1262   :  { %v3741_v34 = vadd.f32 %v3740_v36, %v7530_v30 }
0x1263   :  { %3777 = vst [vmem:[%s7700_s15 + $0xe0] sm:$0xff] %v3739_v22 }
0x1264   :  { %3778 = vst [vmem:[%s7700_s15 + $0xe8] sm:$0xff] %v3741_v34 }
0x1265   :  { %6054 = shalt.err (!%p6051_p4)
}
0x1266   :  { %s6055_s27 = scalar_lea.hbm %s7698_s13, 32 }
0x1267   :  { %p6056_p5 = scmp.ne.s32.totalorder %s7698_s13, %s6055_s27  ;;  %p6059_p6 = scmp.lt.u32.totalorder %s6055_s27, %s7698_s13 }
0x1269   :  { %p6061_p7 = pnand %p6059_p6, %p6056_p5 }
0x126b   :  { %6064 = shalt.err (!%p6061_p7)
}
0x126c   :  { %3790 = dma.vmem_to_hbm [thread:$0]  %s3788_s23, 32, %s7698_s13, [#allocation5]  }
0x126d   :  { %s6065_s0 = scalar_lea.vmem %s3798_s25, 32  ;;  %p6070_p9 = scmp.lt.s32.totalorder %s3798_s25, %s3798_s25 }
0x126e   :  { %p6066_p8 = scmp.ne.s32.totalorder %s3798_s25, %s6065_s0  ;;  %p6071_p10 = scmp.lt.s32.totalorder %s6065_s0, %s6065_s0 }
0x1270   :  { %p6072_p11 = por %p6071_p10, %p6070_p9 }
0x1272   :  { %p6073_p12 = pnand %p6072_p11, %p6066_p8 }
0x1274   :  { %6076 = shalt.err (!%p6073_p12)
}
0x1275   :  { %s6077_s17 = scalar_lea.hbm %s7699_s14, 32 }
0x1276   :  { %p6078_p13 = scmp.ne.s32.totalorder %s7699_s14, %s6077_s17  ;;  %p6081_p0 = scmp.lt.u32.totalorder %s6077_s17, %s7699_s14 }
0x1278   :  { %p6083_p1 = pnand %p6081_p0, %p6078_p13 }
0x127a   :  { %6086 = shalt.err (!%p6083_p1)
}
0x127b   :  { %3800 = dma.vmem_to_hbm [thread:$0]  %s3798_s25, 32, %s7699_s14, [#allocation7]  }
0x130b   :  { %v3744_v13 = vpop.f32.mrb[64].mxu0 }
0x130c   :  { %v3745_v23 = vadd.f32 %v3744_v13, %v7525_v37  ;;  %v3746_v62 = vpop.f32.mrb[65].mxu0 }
0x130d   :  { %v3747_v42 = vadd.f32 %v3746_v62, %v7530_v30 }
0x130e   :  { %3779 = vst [vmem:[%s7700_s15 + $0xf0] sm:$0xff] %v3745_v23 }
0x130f   :  { %3780 = vst [vmem:[%s7700_s15 + $0xf8] sm:$0xff] %v3747_v42 }
0x1310   :  { %6087 = dma.done.wait [#allocation5], 32  }
0x1311   :  { %6088 = vsyncadd [#allocation5], 4294967264 }
0x1312   :  { %6089 = dma.done.wait [#allocation7], 32  }
0x1313   :  { %6090 = vsyncadd [#allocation7], 4294967264 }
0x1314   :  { %3811 = vsyncpa [#allocation5], 1 }
0x1315   :  { %3812 = vsyncpa [#allocation7], 1 }

</bundles_post_ra>
